<compile_context>
chip_gen: v5e
topology: v5e:2x2
jax: 0.10.0
libtpu: 0.0.40
codegen_flags: <defaults>
</compile_context>

<pallas_src>
import math

import jax
import jax.numpy as jnp
from jax import lax
from jax.experimental import pallas as pl
from jax.experimental.pallas import tpu as pltpu

LN = 128                           # lane width
ROW_ALIGN = 16                     # sublane alignment (covers f32 and bf16)
VMEM_IN_BUDGET = 8 * 1024 * 1024   # double-buffered input bytes per pallas_call
SMALL_N = 1 << 16                  # below this, plain jnp beats a kernel launch


def _round_up(x, m):
    return -(-x // m) * m


def _round_down(x, m):
    return (x // m) * m


def _num_tensorcores():
    """Best-effort TensorCore count: 2 on v7x / megacore parts, 1 on v5e/v6e."""
    try:
        info = pltpu.get_tpu_info()
        for name in ("num_cores", "core_count", "num_tensorcores",
                     "tensorcore_count"):
            v = getattr(info, name, None)
            if isinstance(v, int) and not isinstance(v, bool) and 1 <= v <= 8:
                return v
    except Exception:
        pass
    try:
        kind = jax.devices()[0].device_kind.lower()
        if "lite" in kind or "v5e" in kind or "v6" in kind:
            return 1               # single-TensorCore chips
    except Exception:
        pass
    return 2                       # megacore / v7x default


def _as_rows128(x, neutral):
    """View x as a lane-dense (rows, 128) slab in its *native* dtype."""
    flat = jnp.asarray(x).reshape(-1)
    n = flat.shape[0]
    rem = (-n) % LN
    if rem:
        # TODO(synk): mask the (<128-elem) flat tail in-kernel instead of this
        # neutral pad (rare for NCHW tensors; the concat copies the array).
        flat = jnp.concatenate(
            [flat, jnp.full((rem,), neutral, dtype=flat.dtype)])
    return flat.reshape(-1, LN)


def _pallas_reduce(arrays2d, block_fn, *, flops_per_elem, transc_per_elem):
    """sum(block_fn(blocks)) over all elements of the (rows, 128) inputs.

    block_fn(list_of_blocks, mask_or_None) -> (tile, 128) f32 values to sum.
    """
    rows = arrays2d[0].shape[0]
    n_in = len(arrays2d)

    # Block sizing from an ~8 MiB double-buffered input working set.
    bytes_per_row = LN * sum(a.dtype.itemsize for a in arrays2d)
    budget_rows = max(VMEM_IN_BUDGET // (2 * bytes_per_row), ROW_ALIGN)
    tile = min(_round_down(rows, ROW_ALIGN), _round_down(budget_rows, ROW_ALIGN))
    tile = max(tile, ROW_ALIGN)
    nblocks = -(-rows // tile)
    ncores = _num_tensorcores()
    if nblocks < ncores:
        ncores = 1
    nbpc = -(-nblocks // ncores)               # blocks per core
    need_mask = (ncores * nbpc * tile) != rows

    def kernel(*refs):
        in_refs = refs[:n_in]
        o_ref = refs[n_in]
        acc_ref = refs[n_in + 1]
        j = pl.program_id(1)

        @pl.when(j == 0)
        def _():
            acc_ref[...] = jnp.zeros_like(acc_ref)

        def accumulate(mask):
            vals = block_fn([r[...] for r in in_refs], mask)   # (tile, LN) f32
            # Keep the running sum a full (8, 128) vreg: leading-axis adds are
            # pure VPU work; the 8->1 sublane and 128->1 lane reductions happen
            # once, in the wrapper.
            acc_ref[...] += jnp.sum(vals.reshape(tile // 8, 8, LN), axis=0)

        if need_mask:
            b = pl.program_id(0) * nbpc + j    # un-clamped global block index

            @pl.when(b < nblocks - 1)
            def _():
                accumulate(None)               # full block: no mask work

            @pl.when(b == nblocks - 1)         # single ragged tail block
            def _():
                rid = lax.broadcasted_iota(jnp.int32, (tile, LN), 0) + b * tile
                accumulate(rid < rows)
            # Blocks with b > nblocks - 1 (clamped duplicates) contribute 0.
        else:
            accumulate(None)

        @pl.when(j == nbpc - 1)
        def _():
            o_ref[0] = acc_ref[...]

    def in_map(i, j):
        # Clamp so overflow blocks (which skip accumulation) never DMA OOB.
        return (jnp.minimum(i * nbpc + j, nblocks - 1), 0)

    n = rows * LN
    out = pl.pallas_call(
        kernel,
        out_shape=jax.ShapeDtypeStruct((ncores, 8, LN), jnp.float32),
        grid=(ncores, nbpc),
        in_specs=[pl.BlockSpec((tile, LN), in_map) for _ in arrays2d],
        out_specs=pl.BlockSpec((1, 8, LN), lambda i, j: (i, 0, 0)),
        scratch_shapes=[pltpu.VMEM((8, LN), jnp.float32)],
        compiler_params=pltpu.CompilerParams(
            dimension_semantics=("parallel", "arbitrary")),
        cost_estimate=pl.CostEstimate(
            flops=flops_per_elem * n,
            transcendentals=transc_per_elem * n,
            bytes_accessed=sum(a.size * a.dtype.itemsize for a in arrays2d)
            + 4 * ncores * 8 * LN),
    )(*arrays2d)
    # Tiny cross-core + sublane + lane reduction in XLA.
    return jnp.sum(out)


# ---------------------------------------------------------------------------
# Loss-specific wrappers (small tensors fall back to plain jnp).
# ---------------------------------------------------------------------------
def pallas_sum_log(x):
    """sum(log(x)) over the whole array (bpp loss)."""
    x = jnp.asarray(x)
    if x.size < SMALL_N:
        return jnp.sum(jnp.log(x.astype(jnp.float32)))
    x2 = _as_rows128(x, neutral=1.0)   # log(1) == 0 for any padded element

    def block_fn(blocks, mask):
        v = blocks[0].astype(jnp.float32)
        if mask is not None:
            v = jnp.where(mask, v, 1.0)
        return jnp.log(v)

    return _pallas_reduce([x2], block_fn, flops_per_elem=1, transc_per_elem=1)


def pallas_sum_sq_diff(a, b):
    """sum((a - b)^2) over the whole array."""
    a = jnp.asarray(a)
    b = jnp.asarray(b)
    if a.size < SMALL_N:
        return jnp.sum((a.astype(jnp.float32) - b.astype(jnp.float32)) ** 2)
    a2 = _as_rows128(a, neutral=0.0)
    b2 = _as_rows128(b, neutral=0.0)

    def block_fn(blocks, mask):
        d = blocks[0].astype(jnp.float32) - blocks[1].astype(jnp.float32)
        if mask is not None:
            d = jnp.where(mask, d, 0.0)
        return d * d

    return _pallas_reduce([a2, b2], block_fn, flops_per_elem=3,
                          transc_per_elem=0)


def pallas_mse(a, b):
    return pallas_sum_sq_diff(a, b) / a.size


# ---------------------------------------------------------------------------
# Criterion_val forward (glue in plain JAX, hot-path reductions in Pallas).
# ---------------------------------------------------------------------------
class CriterionVal:
    def __init__(self, opt):
        self.opt = opt
        self.criterion_metric = opt['network']['criterions']['criterion_metric']
        self.criterion_fea = opt['network']['criterions']['criterion_fea']
        self.lambda_metric = opt['network']['lambdas']['lambda_metric']
        self.lambda_fea = opt['network']['lambdas']['lambda_fea']
        assert self.criterion_metric == 'mse'
        # TODO(synk): 'ms-ssim' metric branch (pytorch_msssim) not implemented.
        assert self.criterion_fea in (None, 'l2')
        # TODO(synk): 'l1' feature criterion not implemented (only 'l2').

    def _rate_distortion(self, out_net, target):
        N, _, H, W = target.shape
        num_pixels = N * H * W
        out = {}
        bpp = jnp.float32(0.0)
        for lh in out_net['likelihoods'].values():
            bpp = bpp + pallas_sum_log(lh) / (-math.log(2) * num_pixels)
        out['bpp_loss'] = bpp
        mse = pallas_mse(out_net['x_hat'], target)
        out['mse_loss'] = mse
        out['weighted_mse_loss'] = self.lambda_metric * (255.0 ** 2) * mse
        return out

    def _fea(self, fea, fea_gt, fea_inter=None, fea_inter_gt=None):
        loss = pallas_mse(fea, fea_gt)
        if fea_inter is not None and fea_inter_gt is not None:
            loss = loss + pallas_mse(fea_inter, fea_inter_gt)
        return {'fea_loss': loss, 'weighted_fea_loss': loss * self.lambda_fea}

    def __call__(self, out_net, gt):
        out = {'loss': jnp.float32(0.0), 'rd_loss': jnp.float32(0.0)}
        out_metric = self._rate_distortion(out_net, gt)
        out['loss'] = out['loss'] + out_metric['bpp_loss']
        out['rd_loss'] = out['rd_loss'] + out_metric['bpp_loss']
        for k, v in out_metric.items():
            out[k] = v
            if 'weighted' in k:
                out['loss'] = out['loss'] + v
                out['rd_loss'] = out['rd_loss'] + v
        if self.criterion_fea:
            if 'y_inter' in out_net:
                out_fea = self._fea(out_net['y'], out_net['y_gt'],
                                    out_net['y_inter'], out_net['y_inter_gt'])
            else:
                out_fea = self._fea(out_net['y'], out_net['y_gt'])
            for k, v in out_fea.items():
                out[k] = v
                if 'weighted' in k:
                    out['loss'] = out['loss'] + v
        return out


if __name__ == "__main__":
    opt = {
        'network': {
            'criterions': {'criterion_metric': 'mse', 'criterion_fea': 'l2'},
            'lambdas': {'lambda_metric': 0.01, 'lambda_fea': 1.0},
        }
    }
    crit = CriterionVal(opt)

    key = jax.random.PRNGKey(0)
    k = jax.random.split(key, 10)

    # NCHW inputs (small shapes -> criterion uses the jnp fallback path).
    gt = jax.random.uniform(k[0], (2, 3, 16, 16), jnp.float32)
    x_hat = jnp.clip(gt + 0.05 * jax.random.normal(k[1], gt.shape), 0.0, 1.0)

    # likelihoods must be in (0, 1]
    lh_y = jax.random.uniform(k[2], (2, 8, 4, 4), jnp.float32,
                              minval=0.1, maxval=1.0)
    lh_z = jax.random.uniform(k[3], (2, 8, 2, 2), jnp.float32,
                              minval=0.1, maxval=1.0)

    y = jax.random.normal(k[4], (2, 8, 4, 4), jnp.float32)
    y_gt = y + 0.1 * jax.random.normal(k[5], y.shape)
    y_inter = jax.random.normal(k[6], (2, 8, 4, 4), jnp.float32)
    y_inter_gt = y_inter + 0.1 * jax.random.normal(k[7], y_inter.shape)

    out_net = {
        'x_hat': x_hat,
        'likelihoods': {'y': lh_y, 'z': lh_z},
        'y': y, 'y_gt': y_gt,
        'y_inter': y_inter, 'y_inter_gt': y_inter_gt,
    }

    out = crit(out_net, gt)
    out = jax.tree_util.tree_map(jax.block_until_ready, out)

    # Reference check against plain jnp.
    N, _, H, W = gt.shape
    num_pixels = N * H * W
    bpp_ref = (jnp.sum(jnp.log(lh_y)) + jnp.sum(jnp.log(lh_z))) / (
        -math.log(2) * num_pixels)
    mse_ref = jnp.mean((x_hat - gt) ** 2)
    fea_ref = jnp.mean((y - y_gt) ** 2) + jnp.mean((y_inter - y_inter_gt) ** 2)
    assert jnp.allclose(out['bpp_loss'], bpp_ref, rtol=1e-5, atol=1e-5)
    assert jnp.allclose(out['mse_loss'], mse_ref, rtol=1e-5, atol=1e-6)
    assert jnp.allclose(out['fea_loss'], fea_ref, rtol=1e-5, atol=1e-6)
    expected_loss = (bpp_ref + 0.01 * 255.0 ** 2 * mse_ref + 1.0 * fea_ref)
    assert jnp.allclose(out['loss'], expected_loss, rtol=1e-5, atol=1e-4)

    # --- Pallas streaming-reduction path (tensors above the jnp threshold) ---
    big_a = jax.random.normal(k[8], (2, 4, 256, 320), jnp.float32)   # 655360
    big_b = big_a + 0.05 * jax.random.normal(k[9], big_a.shape)
    big_lh = jax.random.uniform(k[8], (2, 4, 256, 320), jnp.float32,
                                minval=0.1, maxval=1.0)
    mse_big = jax.block_until_ready(pallas_mse(big_a, big_b))
    sumlog_big = jax.block_until_ready(pallas_sum_log(big_lh))
    assert jnp.allclose(mse_big, jnp.mean((big_a - big_b) ** 2), rtol=1e-4)
    assert jnp.allclose(sumlog_big, jnp.sum(jnp.log(big_lh)), rtol=1e-4)

    # Multi-block + ragged-tail mask path (rows = 5000, not a tile multiple).
    rag_a = jax.random.normal(k[6], (2, 5, 250, 256), jnp.float32)   # 640000
    rag_b = rag_a + 0.1 * jax.random.normal(k[7], rag_a.shape)
    mse_rag = jax.block_until_ready(pallas_mse(rag_a, rag_b))
    assert jnp.allclose(mse_rag, jnp.mean((rag_a - rag_b) ** 2), rtol=1e-4)

    # Native-dtype (bf16) streaming path: the f32 cast happens in-kernel.
    bf_a = big_a.astype(jnp.bfloat16)
    bf_b = big_b.astype(jnp.bfloat16)
    mse_bf = jax.block_until_ready(pallas_mse(bf_a, bf_b))
    ref_bf = jnp.mean((bf_a.astype(jnp.float32) - bf_b.astype(jnp.float32)) ** 2)
    assert jnp.allclose(mse_bf, ref_bf, rtol=2e-3)

    print("KERNEL_OK")
</pallas_src>

<mosaic_0001>
module attributes {stable_mosaic.version = 11 : i64} {
  func.func @kernel(%arg0: i32, %arg1: i32, %arg2: memref<4096x128xf32, #tpu.memory_space<vmem>>, %arg3: memref<4096x128xf32, #tpu.memory_space<vmem>>, %arg4: memref<1x8x128xf32, #tpu.memory_space<vmem>>, %arg5: memref<8x128xf32, #tpu.memory_space<vmem>>) attributes {dimension_semantics = [#tpu.dimension_semantics<parallel>, #tpu.dimension_semantics<arbitrary>], iteration_bounds = array<i64: 2, 1>, scalar_prefetch = 0 : i64, scratch_operands = 1 : i64, tpu.core_type = #tpu.core_type<tc>, window_params = [{transform_indices = @transform_0, window_bounds = array<i64: 4096, 128>}, {transform_indices = @transform_1, window_bounds = array<i64: 4096, 128>}, {transform_indices = @transform_2, window_bounds = array<i64: 1, 8, 128>}]} {
    %c0_i32 = arith.constant 0 : i32
    %0 = arith.cmpi eq, %arg1, %c0_i32 : i32
    %1 = arith.extui %0 : i1 to i32
    %c0_i32_0 = arith.constant 0 : i32
    %2 = arith.cmpi ne, %1, %c0_i32_0 : i32
    scf.if %2 {
      %cst = arith.constant 0.000000e+00 : f32
      %14 = vector.broadcast %cst : f32 to vector<8x128xf32>
      %c0 = arith.constant 0 : index
      %c0_7 = arith.constant 0 : index
      %15 = vector.load %arg5[%c0, %c0_7] : memref<8x128xf32, #tpu.memory_space<vmem>>, vector<8x128xf32>
      tpu.vector_store %arg5[%c0, %c0_7], %14 {strides = array<i32>} : memref<8x128xf32, #tpu.memory_space<vmem>>, vector<8x128xf32>,
    } else {
    }
    %c1_i32 = arith.constant 1 : i32
    %3 = arith.muli %arg0, %c1_i32 : i32
    %4 = arith.addi %3, %arg1 : i32
    %c1_i32_1 = arith.constant 1 : i32
    %5 = arith.cmpi slt, %4, %c1_i32_1 : i32
    %6 = arith.extui %5 : i1 to i32
    %c0_i32_2 = arith.constant 0 : i32
    %7 = arith.cmpi ne, %6, %c0_i32_2 : i32
    scf.if %7 {
      %c0 = arith.constant 0 : index
      %c0_7 = arith.constant 0 : index
      %14 = vector.load %arg2[%c0, %c0_7] : memref<4096x128xf32, #tpu.memory_space<vmem>>, vector<4096x128xf32>
      %c0_8 = arith.constant 0 : index
      %c0_9 = arith.constant 0 : index
      %15 = vector.load %arg3[%c0_8, %c0_9] : memref<4096x128xf32, #tpu.memory_space<vmem>>, vector<4096x128xf32>
      %16 = arith.subf %14, %15 : vector<4096x128xf32>
      %17 = arith.mulf %16, %16 : vector<4096x128xf32>
      %c0_10 = arith.constant 0 : index
      %c0_11 = arith.constant 0 : index
      %18 = vector.load %arg5[%c0_10, %c0_11] : memref<8x128xf32, #tpu.memory_space<vmem>>, vector<8x128xf32>
      %19 = vector.shape_cast %17 : vector<4096x128xf32> to vector<512x8x128xf32>
      %cst = arith.constant dense<0.000000e+00> : vector<8x128xf32>
      %20 = vector.multi_reduction <add>, %19, %cst [0] : vector<512x8x128xf32> to vector<8x128xf32>
      %21 = arith.addf %18, %20 : vector<8x128xf32>
      %c0_12 = arith.constant 0 : index
      %c0_13 = arith.constant 0 : index
      %22 = vector.load %arg5[%c0_12, %c0_13] : memref<8x128xf32, #tpu.memory_space<vmem>>, vector<8x128xf32>
      tpu.vector_store %arg5[%c0_12, %c0_13], %21 {strides = array<i32>} : memref<8x128xf32, #tpu.memory_space<vmem>>, vector<8x128xf32>,
    } else {
    }
    %c1_i32_3 = arith.constant 1 : i32
    %8 = arith.cmpi eq, %4, %c1_i32_3 : i32
    %9 = arith.extui %8 : i1 to i32
    %c0_i32_4 = arith.constant 0 : i32
    %10 = arith.cmpi ne, %9, %c0_i32_4 : i32
    scf.if %10 {
      %14 = tpu.iota {dimensions = array<i32: 0>} : vector<4096x128xi32>
      %c4096_i32 = arith.constant 4096 : i32
      %15 = arith.muli %4, %c4096_i32 : i32
      %16 = vector.broadcast %15 : i32 to vector<4096x128xi32>
      %17 = arith.addi %14, %16 : vector<4096x128xi32>
      %c5120_i32 = arith.constant 5120 : i32
      %18 = vector.broadcast %c5120_i32 : i32 to vector<4096x128xi32>
      %19 = arith.cmpi slt, %17, %18 : vector<4096x128xi32>
      %c0 = arith.constant 0 : index
      %c0_7 = arith.constant 0 : index
      %20 = vector.load %arg2[%c0, %c0_7] : memref<4096x128xf32, #tpu.memory_space<vmem>>, vector<4096x128xf32>
      %c0_8 = arith.constant 0 : index
      %c0_9 = arith.constant 0 : index
      %21 = vector.load %arg3[%c0_8, %c0_9] : memref<4096x128xf32, #tpu.memory_space<vmem>>, vector<4096x128xf32>
      %22 = arith.subf %20, %21 : vector<4096x128xf32>
      %cst = arith.constant 0.000000e+00 : f32
      %23 = vector.broadcast %cst : f32 to vector<4096x128xf32>
      %24 = arith.select %19, %22, %23 : vector<4096x128xi1>, vector<4096x128xf32>
      %25 = arith.mulf %24, %24 : vector<4096x128xf32>
      %c0_10 = arith.constant 0 : index
      %c0_11 = arith.constant 0 : index
      %26 = vector.load %arg5[%c0_10, %c0_11] : memref<8x128xf32, #tpu.memory_space<vmem>>, vector<8x128xf32>
      %27 = vector.shape_cast %25 : vector<4096x128xf32> to vector<512x8x128xf32>
      %cst_12 = arith.constant dense<0.000000e+00> : vector<8x128xf32>
      %28 = vector.multi_reduction <add>, %27, %cst_12 [0] : vector<512x8x128xf32> to vector<8x128xf32>
      %29 = arith.addf %26, %28 : vector<8x128xf32>
      %c0_13 = arith.constant 0 : index
      %c0_14 = arith.constant 0 : index
      %30 = vector.load %arg5[%c0_13, %c0_14] : memref<8x128xf32, #tpu.memory_space<vmem>>, vector<8x128xf32>
      tpu.vector_store %arg5[%c0_13, %c0_14], %29 {strides = array<i32>} : memref<8x128xf32, #tpu.memory_space<vmem>>, vector<8x128xf32>,
    } else {
    }
    %c0_i32_5 = arith.constant 0 : i32
    %11 = arith.cmpi eq, %arg1, %c0_i32_5 : i32
    %12 = arith.extui %11 : i1 to i32
    %c0_i32_6 = arith.constant 0 : i32
    %13 = arith.cmpi ne, %12, %c0_i32_6 : i32
    scf.if %13 {
      %c0 = arith.constant 0 : index
      %c0_7 = arith.constant 0 : index
      %14 = vector.load %arg5[%c0, %c0_7] : memref<8x128xf32, #tpu.memory_space<vmem>>, vector<8x128xf32>
      %c0_8 = arith.constant 0 : index
      %c0_9 = arith.constant 0 : index
      %c0_10 = arith.constant 0 : index
      %15 = vector.load %arg4[%c0_8, %c0_9, %c0_10] : memref<1x8x128xf32, #tpu.memory_space<vmem>>, vector<1x8x128xf32>
      %16 = vector.shape_cast %15 : vector<1x8x128xf32> to vector<8x128xf32>
      %17 = vector.shape_cast %14 : vector<8x128xf32> to vector<1x8x128xf32>
      tpu.vector_store %arg4[%c0_8, %c0_9, %c0_10], %17 {strides = array<i32>} : memref<1x8x128xf32, #tpu.memory_space<vmem>>, vector<1x8x128xf32>,
    } else {
    }
    return
  }
  func.func @transform_0(%arg0: i32, %arg1: i32) -> (i32, i32) {
    %c1_i32 = arith.constant 1 : i32
    %0 = arith.muli %arg0, %c1_i32 : i32
    %1 = arith.addi %0, %arg1 : i32
    %c1_i32_0 = arith.constant 1 : i32
    %2 = arith.minsi %1, %c1_i32_0 : i32
    %c0_i32 = arith.constant 0 : i32
    %c0_i32_1 = arith.constant 0 : i32
    return %2, %c0_i32 : i32, i32
  }
  func.func @transform_1(%arg0: i32, %arg1: i32) -> (i32, i32) {
    %c1_i32 = arith.constant 1 : i32
    %0 = arith.muli %arg0, %c1_i32 : i32
    %1 = arith.addi %0, %arg1 : i32
    %c1_i32_0 = arith.constant 1 : i32
    %2 = arith.minsi %1, %c1_i32_0 : i32
    %c0_i32 = arith.constant 0 : i32
    %c0_i32_1 = arith.constant 0 : i32
    return %2, %c0_i32 : i32, i32
  }
  func.func @transform_2(%arg0: i32, %arg1: i32) -> (i32, i32, i32) {
    %c0_i32 = arith.constant 0 : i32
    %c0_i32_0 = arith.constant 0 : i32
    %c0_i32_1 = arith.constant 0 : i32
    return %arg0, %c0_i32, %c0_i32_0 : i32, i32, i32
  }
}

</mosaic_0001>

<bundles_post_ra>
// kernel: tpu_custom_call.1
= control target key start
LH: loop header
LB: loop body
LE: loop exit
PB: predicated region body
PF: predicated region fallthrough
CT: control target
= control target key end

     0   :  { %s11712_s0 = inlined_call_operand.hbm [shape: f32[5120,128], index: 0, kind: input, shape index: {}]   ;;  %s11713_s1 = inlined_call_operand.hbm [shape: f32[5120,128], index: 1, kind: input, shape index: {}]   ;;  %s11714_s2 = inlined_call_operand.hbm [shape: f32[2,8,128], index: 2, kind: output, shape index: {}]  }
   0x1   :  { %11718 = sst [smem:[#allocation14_spill]] %s11712_s0 }
   0x2   :  { %7 = vsyncpa [#allocation4], 0 }
   0x3   :  { %9 = vsyncpa [#allocation4 + $0x1], 0 }
   0x4   :  { %10 = vsyncpa [#allocation7], 0 }
   0x5   :  { %12 = vsyncpa [#allocation7 + $0x1], 0 }
   0x6   :  { %13 = vsyncpa [#allocation5], 0 }
   0x7   :  { %15 = vsyncpa [#allocation5 + $0x1], 0  ;;  %s7906_s9 = smov 0   ;;  %s7908_s10 = smov 0  }
   0x8   :  { %s7910_s11 = smov 0   ;;  %s7912_s12 = smov 0  }
   0x9   :  { %s7914_s13 = smov 0   ;;  %s7916_s14 = smov 0  }
   0xa   :  { %s7918_s15 = smov 0   ;;  %s7920_s16 = smov 0  }
   0xb   :  { %s7922_s17 = smov 0  }
   0xc LB: > { %11719 = sst [smem:[#allocation12_spill]] %s7878_s16  ;;  %s7577_s18 = sadd.s32 4294967295, %s7882_s17   ;;  %s7882_s17 = sphi %s7922_s17, %s21_s17   ;;  %s7878_s16 = sphi %s7920_s16, %s11730_s16   ;;  %s7874_s15 = sphi %s7918_s15, %s11729_s15   ;;  %s7870_s14 = sphi %s7916_s14, %s11736_s14   ;;  %s7866_s13 = sphi %s7914_s13, %s11735_s13   ;;  %s7862_s12 = sphi %s7912_s12, %s11734_s12   ;;  %s7858_s11 = sphi %s7910_s11, %s11733_s11   ;;  %s7854_s10 = sphi %s7908_s10, %s11732_s10   ;;  %s7850_s9 = sphi %s7906_s9, %s11731_s9  }
   0xd   : > { %s7578_s19 = sadd.s32 4294967294, %s7882_s17   ;;  %s33_s20 = sadd.s32 1, %s7878_s16 }
   0xe   : > { %p38_p0 = scmp.lt.s32.totalorder %s7878_s16, 1  ;;  %p35_p1 = scmp.ge.s32.totalorder %s33_s20, 2 }
   0xf   : > { %s46_s21 = sadd.s32 1, %s7870_s14  ;;  %p53_p2 = scmp.ne.s32.totalorder %s7870_s14, %s7866_s13 }
  0x10   : > { %s7955_s22 = scalar_select %p38_p0, %s7878_s16, 1 }
  0x11   : > { %s11738_s20 = smov (%p35_p1, %s33_s20), 0  ;;  %p54_p3 = scmp.eq.s32.totalorder %s7882_s17, 0 }
  0x12   : > { %11720 = sst [smem:[#allocation13_spill]] %s11738_s20  ;;  %p41_p4 = scmp.lt.s32.totalorder %s11738_s20, 1 }
  0x13   : > { %p59_p5 = scmp.ne.s32.totalorder %s7866_s13, %s7862_s12  ;;  %p7964_p6 = por %p54_p3, %p53_p2 }
  0x14   : > { %p60_p7 = scmp.eq.s32.totalorder %s7577_s18, 0  ;;  %s101_s26 = ssub.s32 %s7878_s16, %s11738_s20 }
  0x15   : > { %s42_s24 = scalar_select %p41_p4, %s11738_s20, 1 }
  0x16   : > { %p7969_p8 = por %p60_p7, %p59_p5  ;;  %p102_p9 = scmp.eq.s32.totalorder %s101_s26, 0 }
  0x17   : > { %s43_s27 = ssub.s32 %s7955_s22, %s42_s24  ;;  %s104_s28 = sadd.s32 1, %s7858_s11 }
  0x18   : > { %p44_p10 = scmp.eq.s32.totalorder %s43_s27, 0  ;;  %p114_p11 = scmp.ne.s32.totalorder %s7858_s11, %s7854_s10 }
  0x19   : > { %s7978_s29 = scalar_select %p102_p9, %s7858_s11, %s104_s28  }
  0x1a   : > { %s7981_s30 = scalar_select %p44_p10, %s7870_s14, %s46_s21  }
  0x1b   : > { %p115_p12 = scmp.eq.s32.totalorder %s7577_s18, 1  ;;  %p120_p13 = scmp.ne.s32.totalorder %s7854_s10, %s7850_s9 }
  0x1c   : > { %p121_p0 = scmp.eq.s32.totalorder %s7578_s19, 1  ;;  %p7580_p3 = scmp.ge.s32.totalorder %s7882_s17, 2 }
  0x1d   : > { %p7987_p1 = por %p115_p12, %p114_p11 }
  0x1e   : > { %p7991_p2 = por %p121_p0, %p120_p13  ;;  %137 = sbr.rel (%p7580_p3) target bundleno = 114 (0x72), region = 16 }
  0x23   : > { %140 = sbr.rel (!%p7964_p6) target bundleno = 78 (0x4e), region = 20  ;;  %s141_s5 = sand.u32 (%p7964_p6), 1, %s7870_s14  }
  0x24   : > { %s7582_s6 = sshll.u32 (%p7964_p6), %s7955_s22, 9  ;;  %s7581_s7 = sshll.u32 (%p7964_p6), %s141_s5, 12 }
  0x25   : > { %s150_s8 = ssub.s32 (%p7964_p6), 640, %s7582_s6  ;;  %s8005_s21 = scalar_lea.sflag (%p7964_p6), [#allocation4], %s141_s5 }
  0x26   : > { %p151_p4 = scmp.lt.s32.totalorder (%p7964_p6), %s150_s8, 512  ;;  %s145_s24 = scalar_lea.vmem (%p7964_p6), [#allocation3], %s7581_s7 }
  0x28   : > { %s11740_s8 = smov (!%p151_p4, %s150_s8), 512 }
  0x29   : > { %s7583_s12 = sshll.u32 %s11740_s8, 3 }
  0x2a   : > { %s154_s18 = ssub.s32 4096, %s7583_s12 }
  0x2b   : > { %s155_s19 = sshll.u32 %s154_s18, 4 }
  0x2c   : > { %156 = vsyncadd %s8005_s21, %s155_s19  ;;  %p8008_p5 = scmp.ne.s32.totalorder %s7583_s12, 0  ;;  %s7606_s27 = sshll.u32 %s7955_s22, 12 }
  0x2d   : > { %s11726_s0 = sld [smem:[#allocation14_spill]]  ;;  %s8016_s16 = sshll.u32 %s145_s24, 4  ;;  %s164_s16 = int_to_ptr.vmem [resolvable:$true] %s8016_s16 }
  0x2e   : > { %s11717_s7 = sshll.u32 %s11740_s8, 7 }
  0x2f   : > { %s7696_s12 = sshrl.u32 %s11717_s7, 4 }
  0x33   : > { %s159_s20 = scalar_lea.hbm %s11726_s0, %s7606_s27  ;;  %s7705_s24 = scalar_lea.hbm %s11726_s0, 5120 }
  0x34   : > { %s161_s5 = sshll.u32 %s159_s20, 4  ;;  %s8019_s5 = int_to_ptr.hbm [resolvable:$true] %s161_s5 }
  0x35   : > { %s7694_s18 = sshra.s32 %s8019_s5, 4  ;;  %s7695_s18 = int_to_ptr.hbm [resolvable:$true] %s7694_s18 }
  0x36   : > { %s7701_s19 = scalar_lea.hbm %s7695_s18, %s7696_s12 }
  0x37   : > { %p7702_p7 = scmp.ne.s32.totalorder %s7695_s18, %s7701_s19  ;;  %p7707_p11 = scmp.lt.s32.totalorder %s7705_s24, %s7701_s19 }
  0x39   : > { %p7703_p9 = pnand %p7702_p7, %p8008_p5 }
  0x3b   : > { %p7704_p10 = pneg %p7703_p9 }
  0x3d   : > { %p7709_p12 = pnand %p7707_p11, %p7704_p10 }
  0x3f   : > { %7712 = shalt.err (!%p7709_p12)
}
  0x40   : > { %s7713_s20 = sshra.s32 %s164_s16, 4  ;;  %s7884_s18 = smov [#allocation3]   ;;  %s7714_s20 = int_to_ptr.vmem [resolvable:$true] %s7713_s20 }
  0x41   : > { %s7720_s6 = scalar_lea.vmem %s7714_s20, %s7696_s12  ;;  %s7724_s7 = scalar_lea.vmem %s7884_s18, 8192 }
  0x42   : > { %p7721_p13 = scmp.ne.s32.totalorder %s7714_s20, %s7720_s6  ;;  %p7726_p7 = scmp.lt.s32.totalorder %s7724_s7, %s7720_s6 }
  0x44   : > { %p7722_p0 = pnand %p7721_p13, %p8008_p5 }
  0x46   : > { %p7723_p4 = pneg %p7722_p0 }
  0x48   : > { %p7728_p9 = pnand %p7726_p7, %p7723_p4 }
  0x4a   : > { %7731 = shalt.err (!%p7728_p9)
}
  0x4b   : > { %s7885_s28 = smov 128   ;;  %s7886_s19 = smov 8  }
  0x4c   : > { %s11727_s27 = sshll.u32 %s11740_s8, 7 }
  0x4d   : > { %169 = dma.hbm_to_vmem [thread:$0]  (%p8008_p5), %s8019_s5, %s11727_s27, %s164_s16, %s8005_s21, %s7885_s28, %s7885_s28, %s7886_s19  }
  0x4e PF: > { %172 = sbr.rel (!%p7964_p6) target bundleno = 114 (0x72), region = 24  ;;  %s173_s7 = sand.u32 (%p7964_p6), 1, %s7870_s14  }
  0x4f   : > { %s7589_s12 = sshll.u32 (%p7964_p6), %s7955_s22, 9  ;;  %s7588_s24 = sshll.u32 (%p7964_p6), %s173_s7, 12 }
  0x50   : > { %s182_s20 = ssub.s32 (%p7964_p6), 640, %s7589_s12  ;;  %s8049_s0 = scalar_lea.sflag (%p7964_p6), [#allocation7], %s173_s7 }
  0x51   : > { %p183_p10 = scmp.lt.s32.totalorder (%p7964_p6), %s182_s20, 512  ;;  %s177_s16 = scalar_lea.vmem (%p7964_p6), [#allocation6], %s7588_s24 }
  0x53   : > { %s11742_s20 = smov (!%p183_p10, %s182_s20), 512 }
  0x54   : > { %s7590_s6 = sshll.u32 %s11742_s20, 3 }
  0x55   : > { %s186_s18 = ssub.s32 4096, %s7590_s6 }
  0x56   : > { %s187_s26 = sshll.u32 %s186_s18, 4 }
  0x57   : > { %188 = vsyncadd %s8049_s0, %s187_s26  ;;  %p8052_p6 = scmp.ne.s32.totalorder %s7590_s6, 0  ;;  %s7607_s8 = sshll.u32 %s7955_s22, 12 }
  0x58   : > { %s191_s28 = scalar_lea.hbm %s11713_s1, %s7607_s8  ;;  %s8060_s19 = sshll.u32 %s177_s16, 4  ;;  %s196_s19 = int_to_ptr.vmem [resolvable:$true] %s8060_s19 }
  0x59   : > { %s193_s27 = sshll.u32 %s191_s28, 4  ;;  %s7594_s7 = sshll.u32 %s11742_s20, 7  ;;  %s8063_s27 = int_to_ptr.hbm [resolvable:$true] %s193_s27 }
  0x5a   : > { %s7733_s12 = sshra.s32 %s8063_s27, 4  ;;  %s7735_s24 = sshrl.u32 %s7594_s7, 4  ;;  %s7734_s12 = int_to_ptr.hbm [resolvable:$true] %s7733_s12 }
  0x5b   : > { %s7740_s6 = scalar_lea.hbm %s7734_s12, %s7735_s24  ;;  %s7744_s26 = scalar_lea.hbm %s11713_s1, 5120 }
  0x5c   : > { %p7741_p5 = scmp.ne.s32.totalorder %s7734_s12, %s7740_s6  ;;  %p7746_p13 = scmp.lt.s32.totalorder %s7744_s26, %s7740_s6 }
  0x5e   : > { %p7742_p11 = pnand %p7741_p5, %p8052_p6 }
  0x60   : > { %p7743_p12 = pneg %p7742_p11 }
  0x62   : > { %p7748_p0 = pnand %p7746_p13, %p7743_p12 }
  0x64   : > { %7751 = shalt.err (!%p7748_p0)
}
  0x65   : > { %s7752_s16 = sshra.s32 %s196_s19, 4  ;;  %s7887_s21 = smov [#allocation6]   ;;  %s7753_s16 = int_to_ptr.vmem [resolvable:$true] %s7752_s16 }
  0x66   : > { %s7759_s8 = scalar_lea.vmem %s7753_s16, %s7735_s24  ;;  %s7763_s5 = scalar_lea.vmem %s7887_s21, 8192 }
  0x67   : > { %p7760_p4 = scmp.ne.s32.totalorder %s7753_s16, %s7759_s8  ;;  %p7765_p10 = scmp.lt.s32.totalorder %s7763_s5, %s7759_s8 }
  0x69   : > { %p7761_p7 = pnand %p7760_p4, %p8052_p6 }
  0x6b   : > { %p7762_p9 = pneg %p7761_p7 }
  0x6d   : > { %p7767_p5 = pnand %p7765_p10, %p7762_p9 }
  0x6f   : > { %7770 = shalt.err (!%p7767_p5)
}
  0x70   : > { %s7888_s28 = smov 128   ;;  %s7889_s12 = smov 8  }
  0x71   : > { %201 = dma.hbm_to_vmem [thread:$0]  (%p8052_p6), %s8063_s27, %s7594_s7, %s196_s19, %s8049_s0, %s7888_s28, %s7888_s28, %s7889_s12  }
  0x72 PF: > { %p7595_p11 = scmp.ge.s32.totalorder %s7882_s17, 1  ;;  %p203_p12 = scmp.lt.s32.totalorder %s7882_s17, 3 }
  0x74   : > { %p204_p13 = pnand %p7595_p11, %p203_p12 }
  0x75   : > { %s209_s24 = sand.u32 (!%p204_p13), 1, %s7866_s13  }
  0x76   : > { %207 = sbr.rel (%p204_p13) target bundleno = 2223 (0x8af), region = 28  ;;  %s7596_s6 = sshll.u32 (!%p204_p13), %s209_s24, 12 }
  0x77   : > { %s210_s22 = scalar_lea.sflag (!%p204_p13), [#allocation4], %s209_s24  ;;  %s8089_s18 = scalar_lea.vmem (!%p204_p13), [#allocation3], %s7596_s6 }
  0x7b   : > { %7837 = dma.done.wait (%p7969_p8), %s210_s22, 65536  }
  0x7c   : > { %7839 = vsyncadd (%p7969_p8), %s210_s22, 4294901760  ;;  %s220_s0 = scalar_lea.sflag [#allocation7], %s209_s24  ;;  %s8095_s20 = scalar_lea.vmem [#allocation6], %s7596_s6 }
  0x7d   : > { %7841 = dma.done.wait (%p7969_p8), %s220_s0, 65536  }
  0x7e   : > { %7843 = vsyncadd (%p7969_p8), %s220_s0, 4294901760  ;;  %s247_s23 = sand.u32 1, %s7854_s10   ;;  %v7890_v0 = vmov 0.0   ;;  %p7599_p6 = scmp.ge.s32.totalorder %s7874_s15, 1 }
  0x7f   : > { %s8104_s19 = sshll.u32 %s247_s23, 3  ;;  %270 = vst [vmem:[#allocation2] sm:$0xff] %v7890_v0 }
  0x80   : > { %s249_s27 = scalar_lea.vmem [#allocation8], %s8104_s19  ;;  %275 = sbr.rel (%p7599_p6) target bundleno = 1164 (0x48c), region = 44 }
  0x85   : > { %v276_v1 = vld [vmem:[%s8089_s18] sm:$0xff]  ;;  %v277_v2 = vld [vmem:[%s8089_s18 + $0x8] sm:$0xff]  ;;  %v278_v7 = vld [vmem:[%s8089_s18 + $0x10] sm:$0xff] }
  0x86   : > { %v788_v3 = vld [vmem:[%s8095_s20] sm:$0xff]  ;;  %v789_v4 = vld [vmem:[%s8095_s20 + $0x8] sm:$0xff]  ;;  %v790_v8 = vld [vmem:[%s8095_s20 + $0x10] sm:$0xff] }
  0x87   : > { %v1300_v5 = vsub.f32 %v276_v1, %v788_v3  ;;  %v1301_v6 = vsub.f32 %v277_v2, %v789_v4  ;;  %v1302_v9 = vsub.f32 %v278_v7, %v790_v8  ;;  %v279_v12 = vld [vmem:[%s8089_s18 + $0x18] sm:$0xff]  ;;  %v280_v17 = vld [vmem:[%s8089_s18 + $0x20] sm:$0xff]  ;;  %v281_v22 = vld [vmem:[%s8089_s18 + $0x28] sm:$0xff] }
  0x88   : > { %v791_v13 = vld [vmem:[%s8095_s20 + $0x18] sm:$0xff]  ;;  %v792_v18 = vld [vmem:[%s8095_s20 + $0x20] sm:$0xff]  ;;  %v793_v23 = vld [vmem:[%s8095_s20 + $0x28] sm:$0xff] }
  0x89   : > { %v1812_v10 = vmul.f32 %v1300_v5, %v1300_v5  ;;  %v1813_v11 = vmul.f32 %v1301_v6, %v1301_v6  ;;  %v1303_v14 = vsub.f32 %v279_v12, %v791_v13  ;;  %v1814_v15 = vmul.f32 %v1302_v9, %v1302_v9  ;;  %v282_v27 = vld [vmem:[%s8089_s18 + $0x30] sm:$0xff]  ;;  %v283_v32 = vld [vmem:[%s8089_s18 + $0x38] sm:$0xff]  ;;  %v284_v37 = vld [vmem:[%s8089_s18 + $0x40] sm:$0xff] }
  0x8a   : > { %v1304_v19 = vsub.f32 %v280_v17, %v792_v18  ;;  %v1305_v24 = vsub.f32 %v281_v22, %v793_v23  ;;  %v794_v28 = vld [vmem:[%s8095_s20 + $0x30] sm:$0xff]  ;;  %v795_v33 = vld [vmem:[%s8095_s20 + $0x38] sm:$0xff]  ;;  %v796_v38 = vld [vmem:[%s8095_s20 + $0x40] sm:$0xff] }
  0x8b   : > { %v2325_v16 = vadd.f32 %v1813_v11, %v1812_v10  ;;  %v1815_v20 = vmul.f32 %v1303_v14, %v1303_v14  ;;  %v1306_v29 = vsub.f32 %v282_v27, %v794_v28  ;;  %v1307_v34 = vsub.f32 %v283_v32, %v795_v33  ;;  %v285_v42 = vld [vmem:[%s8089_s18 + $0x48] sm:$0xff]  ;;  %v286_v47 = vld [vmem:[%s8089_s18 + $0x50] sm:$0xff]  ;;  %v287_v52 = vld [vmem:[%s8089_s18 + $0x58] sm:$0xff] }
  0x8c   : > { %v1816_v25 = vmul.f32 %v1304_v19, %v1304_v19  ;;  %v1817_v30 = vmul.f32 %v1305_v24, %v1305_v24  ;;  %v1308_v39 = vsub.f32 %v284_v37, %v796_v38  ;;  %v797_v43 = vld [vmem:[%s8095_s20 + $0x48] sm:$0xff]  ;;  %v798_v48 = vld [vmem:[%s8095_s20 + $0x50] sm:$0xff]  ;;  %v799_v53 = vld [vmem:[%s8095_s20 + $0x58] sm:$0xff] }
  0x8d   : > { %v2326_v21 = vadd.f32 %v2325_v16, %v1814_v15  ;;  %v1818_v35 = vmul.f32 %v1306_v29, %v1306_v29  ;;  %v1819_v40 = vmul.f32 %v1307_v34, %v1307_v34  ;;  %v1309_v44 = vsub.f32 %v285_v42, %v797_v43  ;;  %v288_v57 = vld [vmem:[%s8089_s18 + $0x60] sm:$0xff]  ;;  %v289_v62 = vld [vmem:[%s8089_s18 + $0x68] sm:$0xff]  ;;  %v290_v3 = vld [vmem:[%s8089_s18 + $0x70] sm:$0xff] }
  0x8e   : > { %v1820_v45 = vmul.f32 %v1308_v39, %v1308_v39  ;;  %v1310_v49 = vsub.f32 %v286_v47, %v798_v48  ;;  %v1311_v54 = vsub.f32 %v287_v52, %v799_v53  ;;  %v800_v58 = vld [vmem:[%s8095_s20 + $0x60] sm:$0xff]  ;;  %v801_v63 = vld [vmem:[%s8095_s20 + $0x68] sm:$0xff]  ;;  %v802_v4 = vld [vmem:[%s8095_s20 + $0x70] sm:$0xff] }
  0x8f   : > { %v2327_v26 = vadd.f32 %v2326_v21, %v1815_v20  ;;  %v1821_v50 = vmul.f32 %v1309_v44, %v1309_v44  ;;  %v1312_v59 = vsub.f32 %v288_v57, %v800_v58  ;;  %v1313_v0 = vsub.f32 %v289_v62, %v801_v63  ;;  %v291_v8 = vld [vmem:[%s8089_s18 + $0x78] sm:$0xff]  ;;  %v292_v13 = vld [vmem:[%s8089_s18 + $0x80] sm:$0xff]  ;;  %v293_v18 = vld [vmem:[%s8089_s18 + $0x88] sm:$0xff] }
  0x90   : > { %v1822_v55 = vmul.f32 %v1310_v49, %v1310_v49  ;;  %v1823_v60 = vmul.f32 %v1311_v54, %v1311_v54  ;;  %v1314_v5 = vsub.f32 %v290_v3, %v802_v4  ;;  %v803_v9 = vld [vmem:[%s8095_s20 + $0x78] sm:$0xff]  ;;  %v804_v14 = vld [vmem:[%s8095_s20 + $0x80] sm:$0xff]  ;;  %v805_v19 = vld [vmem:[%s8095_s20 + $0x88] sm:$0xff] }
  0x91   : > { %v2328_v31 = vadd.f32 %v2327_v26, %v1816_v25  ;;  %v1824_v1 = vmul.f32 %v1312_v59, %v1312_v59  ;;  %v1825_v6 = vmul.f32 %v1313_v0, %v1313_v0  ;;  %v1315_v10 = vsub.f32 %v291_v8, %v803_v9  ;;  %v294_v23 = vld [vmem:[%s8089_s18 + $0x90] sm:$0xff]  ;;  %v295_v28 = vld [vmem:[%s8089_s18 + $0x98] sm:$0xff]  ;;  %v296_v33 = vld [vmem:[%s8089_s18 + $0xa0] sm:$0xff] }
  0x92   : > { %v1826_v11 = vmul.f32 %v1314_v5, %v1314_v5  ;;  %v1316_v15 = vsub.f32 %v292_v13, %v804_v14  ;;  %v1317_v20 = vsub.f32 %v293_v18, %v805_v19  ;;  %v806_v24 = vld [vmem:[%s8095_s20 + $0x90] sm:$0xff]  ;;  %v807_v29 = vld [vmem:[%s8095_s20 + $0x98] sm:$0xff]  ;;  %v808_v34 = vld [vmem:[%s8095_s20 + $0xa0] sm:$0xff] }
  0x93   : > { %v2329_v36 = vadd.f32 %v2328_v31, %v1817_v30  ;;  %v1827_v16 = vmul.f32 %v1315_v10, %v1315_v10  ;;  %v1318_v25 = vsub.f32 %v294_v23, %v806_v24  ;;  %v1319_v30 = vsub.f32 %v295_v28, %v807_v29  ;;  %v297_v38 = vld [vmem:[%s8089_s18 + $0xa8] sm:$0xff]  ;;  %v298_v43 = vld [vmem:[%s8089_s18 + $0xb0] sm:$0xff]  ;;  %v299_v48 = vld [vmem:[%s8089_s18 + $0xb8] sm:$0xff] }
  0x94   : > { %v1828_v21 = vmul.f32 %v1316_v15, %v1316_v15  ;;  %v1829_v26 = vmul.f32 %v1317_v20, %v1317_v20  ;;  %v809_v39 = vld [vmem:[%s8095_s20 + $0xa8] sm:$0xff]  ;;  %v810_v44 = vld [vmem:[%s8095_s20 + $0xb0] sm:$0xff]  ;;  %v811_v49 = vld [vmem:[%s8095_s20 + $0xb8] sm:$0xff] }
  0x95   : > { %v2330_v41 = vadd.f32 %v2329_v36, %v1818_v35  ;;  %v1830_v31 = vmul.f32 %v1318_v25, %v1318_v25  ;;  %v1320_v35 = vsub.f32 %v296_v33, %v808_v34  ;;  %v1831_v36 = vmul.f32 %v1319_v30, %v1319_v30  ;;  %v300_v53 = vld [vmem:[%s8089_s18 + $0xc0] sm:$0xff]  ;;  %v301_v58 = vld [vmem:[%s8089_s18 + $0xc8] sm:$0xff]  ;;  %v302_v63 = vld [vmem:[%s8089_s18 + $0xd0] sm:$0xff] }
  0x96   : > { %v812_v54 = vld [vmem:[%s8095_s20 + $0xc0] sm:$0xff]  ;;  %v813_v59 = vld [vmem:[%s8095_s20 + $0xc8] sm:$0xff]  ;;  %v814_v0 = vld [vmem:[%s8095_s20 + $0xd0] sm:$0xff] }
  0x97   : > { %v2331_v46 = vadd.f32 %v2330_v41, %v1819_v40  ;;  %v1321_v40 = vsub.f32 %v297_v38, %v809_v39  ;;  %v1832_v41 = vmul.f32 %v1320_v35, %v1320_v35  ;;  %v303_v4 = vld [vmem:[%s8089_s18 + $0xd8] sm:$0xff]  ;;  %v304_v9 = vld [vmem:[%s8089_s18 + $0xe0] sm:$0xff]  ;;  %v305_v14 = vld [vmem:[%s8089_s18 + $0xe8] sm:$0xff] }
  0x98   : > { %v815_v5 = vld [vmem:[%s8095_s20 + $0xd8] sm:$0xff]  ;;  %v816_v10 = vld [vmem:[%s8095_s20 + $0xe0] sm:$0xff]  ;;  %v817_v15 = vld [vmem:[%s8095_s20 + $0xe8] sm:$0xff] }
  0x99   : > { %v2332_v51 = vadd.f32 %v2331_v46, %v1820_v45  ;;  %v1322_v45 = vsub.f32 %v298_v43, %v810_v44  ;;  %v1833_v46 = vmul.f32 %v1321_v40, %v1321_v40  ;;  %v306_v19 = vld [vmem:[%s8089_s18 + $0xf0] sm:$0xff]  ;;  %v307_v24 = vld [vmem:[%s8089_s18 + $0xf8] sm:$0xff]  ;;  %v308_v29 = vld [vmem:[%s8089_s18 + $0x100] sm:$0xff] }
  0x9a   : > { %v818_v20 = vld [vmem:[%s8095_s20 + $0xf0] sm:$0xff]  ;;  %v819_v25 = vld [vmem:[%s8095_s20 + $0xf8] sm:$0xff]  ;;  %v820_v30 = vld [vmem:[%s8095_s20 + $0x100] sm:$0xff] }
  0x9b   : > { %v2333_v56 = vadd.f32 %v2332_v51, %v1821_v50  ;;  %v1323_v50 = vsub.f32 %v299_v48, %v811_v49  ;;  %v1834_v51 = vmul.f32 %v1322_v45, %v1322_v45  ;;  %v309_v34 = vld [vmem:[%s8089_s18 + $0x108] sm:$0xff]  ;;  %v310_v39 = vld [vmem:[%s8089_s18 + $0x110] sm:$0xff]  ;;  %v311_v44 = vld [vmem:[%s8089_s18 + $0x118] sm:$0xff] }
  0x9c   : > { %v821_v35 = vld [vmem:[%s8095_s20 + $0x108] sm:$0xff]  ;;  %v822_v40 = vld [vmem:[%s8095_s20 + $0x110] sm:$0xff]  ;;  %v823_v45 = vld [vmem:[%s8095_s20 + $0x118] sm:$0xff] }
  0x9d   : > { %v2334_v61 = vadd.f32 %v2333_v56, %v1822_v55  ;;  %v1324_v55 = vsub.f32 %v300_v53, %v812_v54  ;;  %v1835_v56 = vmul.f32 %v1323_v50, %v1323_v50  ;;  %v312_v49 = vld [vmem:[%s8089_s18 + $0x120] sm:$0xff]  ;;  %v313_v54 = vld [vmem:[%s8089_s18 + $0x128] sm:$0xff] }
  0x9e   : > { %v824_v50 = vld [vmem:[%s8095_s20 + $0x120] sm:$0xff] }
  0x9f   : > { %v2335_v2 = vadd.f32 %v2334_v61, %v1823_v60  ;;  %v1325_v60 = vsub.f32 %v301_v58, %v813_v59  ;;  %v1836_v61 = vmul.f32 %v1324_v55, %v1324_v55  ;;  %v825_v55 = vld [vmem:[%s8095_s20 + $0x128] sm:$0xff]  ;;  %v314_v59 = vld [vmem:[%s8089_s18 + $0x130] sm:$0xff] }
  0xa1   : > { %v2336_v7 = vadd.f32 %v2335_v2, %v1824_v1  ;;  %v1326_v1 = vsub.f32 %v302_v63, %v814_v0  ;;  %v1837_v2 = vmul.f32 %v1325_v60, %v1325_v60  ;;  %v826_v60 = vld [vmem:[%s8095_s20 + $0x130] sm:$0xff]  ;;  %v315_v0 = vld [vmem:[%s8089_s18 + $0x138] sm:$0xff] }
  0xa3   : > { %v2337_v12 = vadd.f32 %v2336_v7, %v1825_v6  ;;  %v1327_v6 = vsub.f32 %v303_v4, %v815_v5  ;;  %v1838_v7 = vmul.f32 %v1326_v1, %v1326_v1  ;;  %v827_v1 = vld [vmem:[%s8095_s20 + $0x138] sm:$0xff]  ;;  %v316_v5 = vld [vmem:[%s8089_s18 + $0x140] sm:$0xff] }
  0xa5   : > { %v2338_v17 = vadd.f32 %v2337_v12, %v1826_v11  ;;  %v1328_v11 = vsub.f32 %v304_v9, %v816_v10  ;;  %v1839_v12 = vmul.f32 %v1327_v6, %v1327_v6  ;;  %v828_v6 = vld [vmem:[%s8095_s20 + $0x140] sm:$0xff]  ;;  %v317_v10 = vld [vmem:[%s8089_s18 + $0x148] sm:$0xff] }
  0xa7   : > { %v2339_v22 = vadd.f32 %v2338_v17, %v1827_v16  ;;  %v1329_v16 = vsub.f32 %v305_v14, %v817_v15  ;;  %v1840_v17 = vmul.f32 %v1328_v11, %v1328_v11  ;;  %v829_v11 = vld [vmem:[%s8095_s20 + $0x148] sm:$0xff]  ;;  %v318_v15 = vld [vmem:[%s8089_s18 + $0x150] sm:$0xff] }
  0xa9   : > { %v2340_v27 = vadd.f32 %v2339_v22, %v1828_v21  ;;  %v1330_v21 = vsub.f32 %v306_v19, %v818_v20  ;;  %v1841_v22 = vmul.f32 %v1329_v16, %v1329_v16  ;;  %v830_v16 = vld [vmem:[%s8095_s20 + $0x150] sm:$0xff]  ;;  %v319_v20 = vld [vmem:[%s8089_s18 + $0x158] sm:$0xff] }
  0xab   : > { %v2341_v32 = vadd.f32 %v2340_v27, %v1829_v26  ;;  %v1331_v26 = vsub.f32 %v307_v24, %v819_v25  ;;  %v1842_v27 = vmul.f32 %v1330_v21, %v1330_v21  ;;  %v831_v21 = vld [vmem:[%s8095_s20 + $0x158] sm:$0xff]  ;;  %v320_v25 = vld [vmem:[%s8089_s18 + $0x160] sm:$0xff] }
  0xad   : > { %v2342_v37 = vadd.f32 %v2341_v32, %v1830_v31  ;;  %v1332_v31 = vsub.f32 %v308_v29, %v820_v30  ;;  %v1843_v32 = vmul.f32 %v1331_v26, %v1331_v26  ;;  %v832_v26 = vld [vmem:[%s8095_s20 + $0x160] sm:$0xff]  ;;  %v321_v30 = vld [vmem:[%s8089_s18 + $0x168] sm:$0xff] }
  0xaf   : > { %v2343_v42 = vadd.f32 %v2342_v37, %v1831_v36  ;;  %v1333_v36 = vsub.f32 %v309_v34, %v821_v35  ;;  %v1844_v37 = vmul.f32 %v1332_v31, %v1332_v31  ;;  %v833_v31 = vld [vmem:[%s8095_s20 + $0x168] sm:$0xff]  ;;  %v322_v35 = vld [vmem:[%s8089_s18 + $0x170] sm:$0xff] }
  0xb1   : > { %v2344_v47 = vadd.f32 %v2343_v42, %v1832_v41  ;;  %v1334_v41 = vsub.f32 %v310_v39, %v822_v40  ;;  %v1845_v42 = vmul.f32 %v1333_v36, %v1333_v36  ;;  %v834_v36 = vld [vmem:[%s8095_s20 + $0x170] sm:$0xff]  ;;  %v323_v40 = vld [vmem:[%s8089_s18 + $0x178] sm:$0xff] }
  0xb3   : > { %v2345_v52 = vadd.f32 %v2344_v47, %v1833_v46  ;;  %v1335_v46 = vsub.f32 %v311_v44, %v823_v45  ;;  %v1846_v47 = vmul.f32 %v1334_v41, %v1334_v41  ;;  %v835_v41 = vld [vmem:[%s8095_s20 + $0x178] sm:$0xff] }
  0xb4   : > { %v1347_v44 = vsub.f32 %v323_v40, %v835_v41  ;;  %v337_v40 = vld [vmem:[%s8089_s18 + $0x1e8] sm:$0xff] }
  0xb5   : > { %v2346_v57 = vadd.f32 %v2345_v52, %v1834_v51  ;;  %v1336_v51 = vsub.f32 %v312_v49, %v824_v50  ;;  %v1847_v52 = vmul.f32 %v1335_v46, %v1335_v46  ;;  %v326_v50 = vld [vmem:[%s8089_s18 + $0x190] sm:$0xff]  ;;  %v849_v41 = vld [vmem:[%s8095_s20 + $0x1e8] sm:$0xff] }
  0xb7   : > { %v2347_v62 = vadd.f32 %v2346_v57, %v1835_v56  ;;  %v1337_v56 = vsub.f32 %v313_v54, %v825_v55  ;;  %v1848_v57 = vmul.f32 %v1336_v51, %v1336_v51  ;;  %v838_v51 = vld [vmem:[%s8095_s20 + $0x190] sm:$0xff]  ;;  %v327_v55 = vld [vmem:[%s8089_s18 + $0x198] sm:$0xff] }
  0xb9   : > { %v2348_v3 = vadd.f32 %v2347_v62, %v1836_v61  ;;  %v1338_v61 = vsub.f32 %v314_v59, %v826_v60  ;;  %v1849_v62 = vmul.f32 %v1337_v56, %v1337_v56  ;;  %v839_v56 = vld [vmem:[%s8095_s20 + $0x198] sm:$0xff]  ;;  %v328_v59 = vld [vmem:[%s8089_s18 + $0x1a0] sm:$0xff] }
  0xba   : > { %v840_v60 = vld [vmem:[%s8095_s20 + $0x1a0] sm:$0xff] }
  0xbb   : > { %v2349_v8 = vadd.f32 %v2348_v3, %v1837_v2  ;;  %v1339_v2 = vsub.f32 %v315_v0, %v827_v1  ;;  %v1850_v3 = vmul.f32 %v1338_v61, %v1338_v61  ;;  %v1351_v61 = vsub.f32 %v327_v55, %v839_v56  ;;  %v329_v0 = vld [vmem:[%s8089_s18 + $0x1a8] sm:$0xff]  ;;  %v340_v55 = vld [vmem:[%s8089_s18 + $0x200] sm:$0xff] }
  0xbc   : > { %v841_v1 = vld [vmem:[%s8095_s20 + $0x1a8] sm:$0xff]  ;;  %v852_v56 = vld [vmem:[%s8095_s20 + $0x200] sm:$0xff] }
  0xbd   : > { %v2350_v13 = vadd.f32 %v2349_v8, %v1838_v7  ;;  %v1340_v7 = vsub.f32 %v316_v5, %v828_v6  ;;  %v1851_v8 = vmul.f32 %v1339_v2, %v1339_v2  ;;  %v1352_v2 = vsub.f32 %v328_v59, %v840_v60  ;;  %v330_v5 = vld [vmem:[%s8089_s18 + $0x1b0] sm:$0xff]  ;;  %v341_v60 = vld [vmem:[%s8089_s18 + $0x208] sm:$0xff] }
  0xbe   : > { %v842_v6 = vld [vmem:[%s8095_s20 + $0x1b0] sm:$0xff] }
  0xbf   : > { %v2351_v18 = vadd.f32 %v2350_v13, %v1839_v12  ;;  %v1341_v12 = vsub.f32 %v317_v10, %v829_v11  ;;  %v1852_v13 = vmul.f32 %v1340_v7, %v1340_v7  ;;  %v1353_v7 = vsub.f32 %v329_v0, %v841_v1  ;;  %v331_v10 = vld [vmem:[%s8089_s18 + $0x1b8] sm:$0xff]  ;;  %v342_v1 = vld [vmem:[%s8089_s18 + $0x210] sm:$0xff] }
  0xc0   : > { %v843_v11 = vld [vmem:[%s8095_s20 + $0x1b8] sm:$0xff] }
  0xc1   : > { %v2352_v23 = vadd.f32 %v2351_v18, %v1840_v17  ;;  %v1342_v17 = vsub.f32 %v318_v15, %v830_v16  ;;  %v1853_v18 = vmul.f32 %v1341_v12, %v1341_v12  ;;  %v1354_v12 = vsub.f32 %v330_v5, %v842_v6  ;;  %v332_v15 = vld [vmem:[%s8089_s18 + $0x1c0] sm:$0xff]  ;;  %v343_v6 = vld [vmem:[%s8089_s18 + $0x218] sm:$0xff] }
  0xc2   : > { %v844_v16 = vld [vmem:[%s8095_s20 + $0x1c0] sm:$0xff] }
  0xc3   : > { %v2353_v28 = vadd.f32 %v2352_v23, %v1841_v22  ;;  %v1343_v22 = vsub.f32 %v319_v20, %v831_v21  ;;  %v1854_v23 = vmul.f32 %v1342_v17, %v1342_v17  ;;  %v1355_v17 = vsub.f32 %v331_v10, %v843_v11  ;;  %v333_v20 = vld [vmem:[%s8089_s18 + $0x1c8] sm:$0xff]  ;;  %v344_v11 = vld [vmem:[%s8089_s18 + $0x220] sm:$0xff] }
  0xc4   : > { %v845_v21 = vld [vmem:[%s8095_s20 + $0x1c8] sm:$0xff] }
  0xc5   : > { %v2354_v33 = vadd.f32 %v2353_v28, %v1842_v27  ;;  %v1344_v27 = vsub.f32 %v320_v25, %v832_v26  ;;  %v1855_v28 = vmul.f32 %v1343_v22, %v1343_v22  ;;  %v1356_v22 = vsub.f32 %v332_v15, %v844_v16  ;;  %v334_v25 = vld [vmem:[%s8089_s18 + $0x1d0] sm:$0xff]  ;;  %v345_v16 = vld [vmem:[%s8089_s18 + $0x228] sm:$0xff] }
  0xc6   : > { %v846_v26 = vld [vmem:[%s8095_s20 + $0x1d0] sm:$0xff] }
  0xc7   : > { %v2355_v38 = vadd.f32 %v2354_v33, %v1843_v32  ;;  %v1345_v32 = vsub.f32 %v321_v30, %v833_v31  ;;  %v1856_v33 = vmul.f32 %v1344_v27, %v1344_v27  ;;  %v1357_v27 = vsub.f32 %v333_v20, %v845_v21  ;;  %v335_v30 = vld [vmem:[%s8089_s18 + $0x1d8] sm:$0xff]  ;;  %v346_v21 = vld [vmem:[%s8089_s18 + $0x230] sm:$0xff] }
  0xc8   : > { %v847_v31 = vld [vmem:[%s8095_s20 + $0x1d8] sm:$0xff] }
  0xc9   : > { %v2356_v43 = vadd.f32 %v2355_v38, %v1844_v37  ;;  %v1346_v37 = vsub.f32 %v322_v35, %v834_v36  ;;  %v1857_v38 = vmul.f32 %v1345_v32, %v1345_v32  ;;  %v1358_v32 = vsub.f32 %v334_v25, %v846_v26  ;;  %v336_v35 = vld [vmem:[%s8089_s18 + $0x1e0] sm:$0xff]  ;;  %v347_v26 = vld [vmem:[%s8089_s18 + $0x238] sm:$0xff] }
  0xca   : > { %v848_v36 = vld [vmem:[%s8095_s20 + $0x1e0] sm:$0xff] }
  0xcb   : > { %v2357_v48 = vadd.f32 %v2356_v43, %v1845_v42  ;;  %v324_v42 = vld [vmem:[%s8089_s18 + $0x180] sm:$0xff]  ;;  %v1858_v45 = vmul.f32 %v1346_v37, %v1346_v37  ;;  %v1359_v37 = vsub.f32 %v335_v30, %v847_v31 }
  0xcc   : > { %v836_v43 = vld [vmem:[%s8095_s20 + $0x180] sm:$0xff] }
  0xcd   : > { %v2358_v53 = vadd.f32 %v2357_v48, %v1846_v47  ;;  %v325_v47 = vld [vmem:[%s8089_s18 + $0x188] sm:$0xff]  ;;  %v1348_v49 = vsub.f32 %v324_v42, %v836_v43  ;;  %v1360_v42 = vsub.f32 %v336_v35, %v848_v36  ;;  %v1870_v43 = vmul.f32 %v1358_v32, %v1358_v32  ;;  %v348_v31 = vld [vmem:[%s8089_s18 + $0x240] sm:$0xff] }
  0xce   : > { %v837_v48 = vld [vmem:[%s8095_s20 + $0x188] sm:$0xff]  ;;  %v860_v32 = vld [vmem:[%s8095_s20 + $0x240] sm:$0xff] }
  0xcf   : > { %v2359_v58 = vadd.f32 %v2358_v53, %v1847_v52  ;;  %v1349_v52 = vsub.f32 %v325_v47, %v837_v48  ;;  %v1859_v53 = vmul.f32 %v1347_v44, %v1347_v44  ;;  %v1361_v47 = vsub.f32 %v337_v40, %v849_v41  ;;  %v349_v36 = vld [vmem:[%s8089_s18 + $0x248] sm:$0xff]  ;;  %v350_v41 = vld [vmem:[%s8089_s18 + $0x250] sm:$0xff] }
  0xd0   : > { %v1871_v48 = vmul.f32 %v1359_v37, %v1359_v37  ;;  %v861_v37 = vld [vmem:[%s8095_s20 + $0x248] sm:$0xff] }
  0xd1   : > { %v2360_v63 = vadd.f32 %v2359_v58, %v1848_v57  ;;  %v1350_v57 = vsub.f32 %v326_v50, %v838_v51  ;;  %v1860_v58 = vmul.f32 %v1348_v49, %v1348_v49  ;;  %v339_v50 = vld [vmem:[%s8089_s18 + $0x1f8] sm:$0xff] }
  0xd2   : > { %v851_v51 = vld [vmem:[%s8095_s20 + $0x1f8] sm:$0xff] }
  0xd3   : > { %v2361_v4 = vadd.f32 %v2360_v63, %v1849_v62  ;;  %v1861_v62 = vmul.f32 %v1349_v52, %v1349_v52 }
  0xd5   : > { %v2362_v9 = vadd.f32 %v2361_v4, %v1850_v3  ;;  %v1862_v3 = vmul.f32 %v1350_v57, %v1350_v57  ;;  %v1363_v57 = vsub.f32 %v339_v50, %v851_v51  ;;  %v352_v51 = vld [vmem:[%s8089_s18 + $0x260] sm:$0xff] }
  0xd7   : > { %v2363_v14 = vadd.f32 %v2362_v9, %v1851_v8  ;;  %v1863_v8 = vmul.f32 %v1351_v61, %v1351_v61  ;;  %v853_v61 = vld [vmem:[%s8095_s20 + $0x208] sm:$0xff] }
  0xd9   : > { %v2364_v19 = vadd.f32 %v2363_v14, %v1852_v13  ;;  %v1864_v13 = vmul.f32 %v1352_v2, %v1352_v2  ;;  %v854_v2 = vld [vmem:[%s8095_s20 + $0x210] sm:$0xff] }
  0xdb   : > { %v2365_v24 = vadd.f32 %v2364_v19, %v1853_v18  ;;  %v1865_v18 = vmul.f32 %v1353_v7, %v1353_v7  ;;  %v855_v7 = vld [vmem:[%s8095_s20 + $0x218] sm:$0xff] }
  0xdd   : > { %v2366_v29 = vadd.f32 %v2365_v24, %v1854_v23  ;;  %v1866_v23 = vmul.f32 %v1354_v12, %v1354_v12  ;;  %v856_v12 = vld [vmem:[%s8095_s20 + $0x220] sm:$0xff] }
  0xdf   : > { %v2367_v34 = vadd.f32 %v2366_v29, %v1855_v28  ;;  %v1867_v28 = vmul.f32 %v1355_v17, %v1355_v17  ;;  %v857_v17 = vld [vmem:[%s8095_s20 + $0x228] sm:$0xff] }
  0xe1   : > { %v2368_v39 = vadd.f32 %v2367_v34, %v1856_v33  ;;  %v1868_v33 = vmul.f32 %v1356_v22, %v1356_v22  ;;  %v858_v22 = vld [vmem:[%s8095_s20 + $0x230] sm:$0xff] }
  0xe3   : > { %v2369_v46 = vadd.f32 %v2368_v39, %v1857_v38  ;;  %v1869_v38 = vmul.f32 %v1357_v27, %v1357_v27  ;;  %v859_v27 = vld [vmem:[%s8095_s20 + $0x238] sm:$0xff] }
  0xe5   : > { %v2370_v54 = vadd.f32 %v2369_v46, %v1858_v45  ;;  %v338_v45 = vld [vmem:[%s8089_s18 + $0x1f0] sm:$0xff] }
  0xe6   : > { %v850_v46 = vld [vmem:[%s8095_s20 + $0x1f0] sm:$0xff] }
  0xe7   : > { %v2371_v63 = vadd.f32 %v2370_v54, %v1859_v53  ;;  %v1362_v52 = vsub.f32 %v338_v45, %v850_v46  ;;  %v1872_v53 = vmul.f32 %v1360_v42, %v1360_v42  ;;  %v862_v42 = vld [vmem:[%s8095_s20 + $0x250] sm:$0xff]  ;;  %v351_v46 = vld [vmem:[%s8089_s18 + $0x258] sm:$0xff] }
  0xe9   : > { %v2372_v4 = vadd.f32 %v2371_v63, %v1860_v58  ;;  %v1873_v58 = vmul.f32 %v1361_v47, %v1361_v47  ;;  %v1874_v63 = vmul.f32 %v1362_v52, %v1362_v52  ;;  %v863_v47 = vld [vmem:[%s8095_s20 + $0x258] sm:$0xff]  ;;  %v864_v52 = vld [vmem:[%s8095_s20 + $0x260] sm:$0xff] }
  0xeb   : > { %v2373_v9 = vadd.f32 %v2372_v4, %v1861_v62  ;;  %v1364_v62 = vsub.f32 %v340_v55, %v852_v56  ;;  %v1875_v4 = vmul.f32 %v1363_v57, %v1363_v57  ;;  %v353_v56 = vld [vmem:[%s8089_s18 + $0x268] sm:$0xff] }
  0xec   : > { %v865_v57 = vld [vmem:[%s8095_s20 + $0x268] sm:$0xff] }
  0xed   : > { %v2374_v14 = vadd.f32 %v2373_v9, %v1862_v3  ;;  %v1365_v3 = vsub.f32 %v341_v60, %v853_v61  ;;  %v1876_v9 = vmul.f32 %v1364_v62, %v1364_v62  ;;  %v354_v61 = vld [vmem:[%s8089_s18 + $0x270] sm:$0xff] }
  0xee   : > { %v866_v62 = vld [vmem:[%s8095_s20 + $0x270] sm:$0xff] }
  0xef   : > { %v2375_v19 = vadd.f32 %v2374_v14, %v1863_v8  ;;  %v1366_v8 = vsub.f32 %v342_v1, %v854_v2  ;;  %v1877_v14 = vmul.f32 %v1365_v3, %v1365_v3  ;;  %v355_v2 = vld [vmem:[%s8089_s18 + $0x278] sm:$0xff] }
  0xf0   : > { %v867_v3 = vld [vmem:[%s8095_s20 + $0x278] sm:$0xff] }
  0xf1   : > { %v2376_v24 = vadd.f32 %v2375_v19, %v1864_v13  ;;  %v1367_v13 = vsub.f32 %v343_v6, %v855_v7  ;;  %v1878_v19 = vmul.f32 %v1366_v8, %v1366_v8  ;;  %v356_v7 = vld [vmem:[%s8089_s18 + $0x280] sm:$0xff] }
  0xf2   : > { %v868_v8 = vld [vmem:[%s8095_s20 + $0x280] sm:$0xff] }
  0xf3   : > { %v2377_v29 = vadd.f32 %v2376_v24, %v1865_v18  ;;  %v1368_v18 = vsub.f32 %v344_v11, %v856_v12  ;;  %v1879_v24 = vmul.f32 %v1367_v13, %v1367_v13  ;;  %v357_v12 = vld [vmem:[%s8089_s18 + $0x288] sm:$0xff] }
  0xf4   : > { %v869_v13 = vld [vmem:[%s8095_s20 + $0x288] sm:$0xff] }
  0xf5   : > { %v2378_v34 = vadd.f32 %v2377_v29, %v1866_v23  ;;  %v1369_v23 = vsub.f32 %v345_v16, %v857_v17  ;;  %v1880_v29 = vmul.f32 %v1368_v18, %v1368_v18  ;;  %v358_v17 = vld [vmem:[%s8089_s18 + $0x290] sm:$0xff] }
  0xf6   : > { %v870_v18 = vld [vmem:[%s8095_s20 + $0x290] sm:$0xff] }
  0xf7   : > { %v2379_v39 = vadd.f32 %v2378_v34, %v1867_v28  ;;  %v1370_v28 = vsub.f32 %v346_v21, %v858_v22  ;;  %v1881_v34 = vmul.f32 %v1369_v23, %v1369_v23  ;;  %v359_v22 = vld [vmem:[%s8089_s18 + $0x298] sm:$0xff] }
  0xf8   : > { %v871_v23 = vld [vmem:[%s8095_s20 + $0x298] sm:$0xff] }
  0xf9   : > { %v2380_v44 = vadd.f32 %v2379_v39, %v1868_v33  ;;  %v1371_v33 = vsub.f32 %v347_v26, %v859_v27  ;;  %v1882_v39 = vmul.f32 %v1370_v28, %v1370_v28  ;;  %v360_v27 = vld [vmem:[%s8089_s18 + $0x2a0] sm:$0xff] }
  0xfa   : > { %v872_v28 = vld [vmem:[%s8095_s20 + $0x2a0] sm:$0xff] }
  0xfb   : > { %v2381_v49 = vadd.f32 %v2380_v44, %v1869_v38  ;;  %v1372_v38 = vsub.f32 %v348_v31, %v860_v32  ;;  %v1883_v44 = vmul.f32 %v1371_v33, %v1371_v33  ;;  %v361_v32 = vld [vmem:[%s8089_s18 + $0x2a8] sm:$0xff] }
  0xfc   : > { %v873_v33 = vld [vmem:[%s8095_s20 + $0x2a8] sm:$0xff] }
  0xfd   : > { %v2382_v54 = vadd.f32 %v2381_v49, %v1870_v43  ;;  %v1373_v43 = vsub.f32 %v349_v36, %v861_v37  ;;  %v1884_v49 = vmul.f32 %v1372_v38, %v1372_v38  ;;  %v362_v37 = vld [vmem:[%s8089_s18 + $0x2b0] sm:$0xff] }
  0xfe   : > { %v874_v38 = vld [vmem:[%s8095_s20 + $0x2b0] sm:$0xff] }
  0xff   : > { %v2383_v59 = vadd.f32 %v2382_v54, %v1871_v48  ;;  %v1374_v48 = vsub.f32 %v350_v41, %v862_v42  ;;  %v1885_v54 = vmul.f32 %v1373_v43, %v1373_v43  ;;  %v363_v42 = vld [vmem:[%s8089_s18 + $0x2b8] sm:$0xff] }
 0x100   : > { %v875_v43 = vld [vmem:[%s8095_s20 + $0x2b8] sm:$0xff] }
 0x101   : > { %v2384_v0 = vadd.f32 %v2383_v59, %v1872_v53  ;;  %v1375_v53 = vsub.f32 %v351_v46, %v863_v47  ;;  %v1886_v59 = vmul.f32 %v1374_v48, %v1374_v48  ;;  %v364_v47 = vld [vmem:[%s8089_s18 + $0x2c0] sm:$0xff] }
 0x102   : > { %v876_v48 = vld [vmem:[%s8095_s20 + $0x2c0] sm:$0xff] }
 0x103   : > { %v2385_v5 = vadd.f32 %v2384_v0, %v1873_v58  ;;  %v1376_v58 = vsub.f32 %v352_v51, %v864_v52  ;;  %v1887_v0 = vmul.f32 %v1375_v53, %v1375_v53  ;;  %v365_v52 = vld [vmem:[%s8089_s18 + $0x2c8] sm:$0xff] }
 0x104   : > { %v877_v53 = vld [vmem:[%s8095_s20 + $0x2c8] sm:$0xff] }
 0x105   : > { %v2386_v10 = vadd.f32 %v2385_v5, %v1874_v63  ;;  %v1377_v63 = vsub.f32 %v353_v56, %v865_v57  ;;  %v1888_v5 = vmul.f32 %v1376_v58, %v1376_v58  ;;  %v366_v57 = vld [vmem:[%s8089_s18 + $0x2d0] sm:$0xff] }
 0x106   : > { %v878_v58 = vld [vmem:[%s8095_s20 + $0x2d0] sm:$0xff] }
 0x107   : > { %v2387_v15 = vadd.f32 %v2386_v10, %v1875_v4  ;;  %v1378_v4 = vsub.f32 %v354_v61, %v866_v62  ;;  %v1889_v10 = vmul.f32 %v1377_v63, %v1377_v63  ;;  %v367_v62 = vld [vmem:[%s8089_s18 + $0x2d8] sm:$0xff] }
 0x108   : > { %v879_v63 = vld [vmem:[%s8095_s20 + $0x2d8] sm:$0xff] }
 0x109   : > { %v2388_v20 = vadd.f32 %v2387_v15, %v1876_v9  ;;  %v1379_v9 = vsub.f32 %v355_v2, %v867_v3  ;;  %v1890_v15 = vmul.f32 %v1378_v4, %v1378_v4  ;;  %v368_v3 = vld [vmem:[%s8089_s18 + $0x2e0] sm:$0xff] }
 0x10a   : > { %v880_v4 = vld [vmem:[%s8095_s20 + $0x2e0] sm:$0xff] }
 0x10b   : > { %v2389_v25 = vadd.f32 %v2388_v20, %v1877_v14  ;;  %v1380_v14 = vsub.f32 %v356_v7, %v868_v8  ;;  %v1891_v20 = vmul.f32 %v1379_v9, %v1379_v9  ;;  %v369_v8 = vld [vmem:[%s8089_s18 + $0x2e8] sm:$0xff] }
 0x10c   : > { %v881_v9 = vld [vmem:[%s8095_s20 + $0x2e8] sm:$0xff] }
 0x10d   : > { %v2390_v30 = vadd.f32 %v2389_v25, %v1878_v19  ;;  %v1381_v19 = vsub.f32 %v357_v12, %v869_v13  ;;  %v1892_v25 = vmul.f32 %v1380_v14, %v1380_v14  ;;  %v370_v13 = vld [vmem:[%s8089_s18 + $0x2f0] sm:$0xff] }
 0x10e   : > { %v882_v14 = vld [vmem:[%s8095_s20 + $0x2f0] sm:$0xff] }
 0x10f   : > { %v2391_v35 = vadd.f32 %v2390_v30, %v1879_v24  ;;  %v1382_v24 = vsub.f32 %v358_v17, %v870_v18  ;;  %v1893_v30 = vmul.f32 %v1381_v19, %v1381_v19  ;;  %v371_v18 = vld [vmem:[%s8089_s18 + $0x2f8] sm:$0xff] }
 0x110   : > { %v883_v19 = vld [vmem:[%s8095_s20 + $0x2f8] sm:$0xff] }
 0x111   : > { %v2392_v40 = vadd.f32 %v2391_v35, %v1880_v29  ;;  %v1383_v29 = vsub.f32 %v359_v22, %v871_v23  ;;  %v1894_v35 = vmul.f32 %v1382_v24, %v1382_v24  ;;  %v372_v23 = vld [vmem:[%s8089_s18 + $0x300] sm:$0xff] }
 0x112   : > { %v884_v24 = vld [vmem:[%s8095_s20 + $0x300] sm:$0xff] }
 0x113   : > { %v2393_v45 = vadd.f32 %v2392_v40, %v1881_v34  ;;  %v1384_v34 = vsub.f32 %v360_v27, %v872_v28  ;;  %v1895_v40 = vmul.f32 %v1383_v29, %v1383_v29  ;;  %v373_v28 = vld [vmem:[%s8089_s18 + $0x308] sm:$0xff] }
 0x114   : > { %v885_v29 = vld [vmem:[%s8095_s20 + $0x308] sm:$0xff] }
 0x115   : > { %v2394_v50 = vadd.f32 %v2393_v45, %v1882_v39  ;;  %v1385_v39 = vsub.f32 %v361_v32, %v873_v33  ;;  %v1896_v45 = vmul.f32 %v1384_v34, %v1384_v34  ;;  %v374_v33 = vld [vmem:[%s8089_s18 + $0x310] sm:$0xff] }
 0x116   : > { %v886_v34 = vld [vmem:[%s8095_s20 + $0x310] sm:$0xff] }
 0x117   : > { %v2395_v55 = vadd.f32 %v2394_v50, %v1883_v44  ;;  %v1386_v44 = vsub.f32 %v362_v37, %v874_v38  ;;  %v1897_v50 = vmul.f32 %v1385_v39, %v1385_v39  ;;  %v375_v38 = vld [vmem:[%s8089_s18 + $0x318] sm:$0xff] }
 0x118   : > { %v887_v39 = vld [vmem:[%s8095_s20 + $0x318] sm:$0xff] }
 0x119   : > { %v2396_v60 = vadd.f32 %v2395_v55, %v1884_v49  ;;  %v1387_v49 = vsub.f32 %v363_v42, %v875_v43  ;;  %v1898_v55 = vmul.f32 %v1386_v44, %v1386_v44  ;;  %v376_v43 = vld [vmem:[%s8089_s18 + $0x320] sm:$0xff] }
 0x11a   : > { %v888_v44 = vld [vmem:[%s8095_s20 + $0x320] sm:$0xff] }
 0x11b   : > { %v2397_v1 = vadd.f32 %v2396_v60, %v1885_v54  ;;  %v1388_v54 = vsub.f32 %v364_v47, %v876_v48  ;;  %v1899_v60 = vmul.f32 %v1387_v49, %v1387_v49  ;;  %v377_v48 = vld [vmem:[%s8089_s18 + $0x328] sm:$0xff] }
 0x11c   : > { %v889_v49 = vld [vmem:[%s8095_s20 + $0x328] sm:$0xff] }
 0x11d   : > { %v2398_v6 = vadd.f32 %v2397_v1, %v1886_v59  ;;  %v1389_v59 = vsub.f32 %v365_v52, %v877_v53  ;;  %v1900_v1 = vmul.f32 %v1388_v54, %v1388_v54  ;;  %v378_v53 = vld [vmem:[%s8089_s18 + $0x330] sm:$0xff] }
 0x11e   : > { %v890_v54 = vld [vmem:[%s8095_s20 + $0x330] sm:$0xff] }
 0x11f   : > { %v2399_v11 = vadd.f32 %v2398_v6, %v1887_v0  ;;  %v1390_v0 = vsub.f32 %v366_v57, %v878_v58  ;;  %v1901_v6 = vmul.f32 %v1389_v59, %v1389_v59  ;;  %v379_v58 = vld [vmem:[%s8089_s18 + $0x338] sm:$0xff] }
 0x120   : > { %v891_v59 = vld [vmem:[%s8095_s20 + $0x338] sm:$0xff] }
 0x121   : > { %v2400_v16 = vadd.f32 %v2399_v11, %v1888_v5  ;;  %v1391_v5 = vsub.f32 %v367_v62, %v879_v63  ;;  %v1902_v11 = vmul.f32 %v1390_v0, %v1390_v0  ;;  %v380_v63 = vld [vmem:[%s8089_s18 + $0x340] sm:$0xff] }
 0x122   : > { %v892_v0 = vld [vmem:[%s8095_s20 + $0x340] sm:$0xff] }
 0x123   : > { %v2401_v21 = vadd.f32 %v2400_v16, %v1889_v10  ;;  %v1392_v10 = vsub.f32 %v368_v3, %v880_v4  ;;  %v1903_v16 = vmul.f32 %v1391_v5, %v1391_v5  ;;  %v381_v4 = vld [vmem:[%s8089_s18 + $0x348] sm:$0xff] }
 0x124   : > { %v893_v5 = vld [vmem:[%s8095_s20 + $0x348] sm:$0xff] }
 0x125   : > { %v2402_v26 = vadd.f32 %v2401_v21, %v1890_v15  ;;  %v1393_v15 = vsub.f32 %v369_v8, %v881_v9  ;;  %v1904_v21 = vmul.f32 %v1392_v10, %v1392_v10  ;;  %v382_v9 = vld [vmem:[%s8089_s18 + $0x350] sm:$0xff] }
 0x126   : > { %v894_v10 = vld [vmem:[%s8095_s20 + $0x350] sm:$0xff] }
 0x127   : > { %v2403_v31 = vadd.f32 %v2402_v26, %v1891_v20  ;;  %v1394_v20 = vsub.f32 %v370_v13, %v882_v14  ;;  %v1905_v26 = vmul.f32 %v1393_v15, %v1393_v15  ;;  %v383_v14 = vld [vmem:[%s8089_s18 + $0x358] sm:$0xff] }
 0x128   : > { %v895_v15 = vld [vmem:[%s8095_s20 + $0x358] sm:$0xff] }
 0x129   : > { %v2404_v36 = vadd.f32 %v2403_v31, %v1892_v25  ;;  %v1395_v25 = vsub.f32 %v371_v18, %v883_v19  ;;  %v1906_v31 = vmul.f32 %v1394_v20, %v1394_v20  ;;  %v384_v19 = vld [vmem:[%s8089_s18 + $0x360] sm:$0xff] }
 0x12a   : > { %v896_v20 = vld [vmem:[%s8095_s20 + $0x360] sm:$0xff] }
 0x12b   : > { %v2405_v41 = vadd.f32 %v2404_v36, %v1893_v30  ;;  %v1396_v30 = vsub.f32 %v372_v23, %v884_v24  ;;  %v1907_v36 = vmul.f32 %v1395_v25, %v1395_v25  ;;  %v385_v24 = vld [vmem:[%s8089_s18 + $0x368] sm:$0xff] }
 0x12c   : > { %v897_v25 = vld [vmem:[%s8095_s20 + $0x368] sm:$0xff] }
 0x12d   : > { %v2406_v46 = vadd.f32 %v2405_v41, %v1894_v35  ;;  %v1397_v35 = vsub.f32 %v373_v28, %v885_v29  ;;  %v1908_v41 = vmul.f32 %v1396_v30, %v1396_v30  ;;  %v386_v29 = vld [vmem:[%s8089_s18 + $0x370] sm:$0xff] }
 0x12e   : > { %v898_v30 = vld [vmem:[%s8095_s20 + $0x370] sm:$0xff] }
 0x12f   : > { %v2407_v51 = vadd.f32 %v2406_v46, %v1895_v40  ;;  %v1398_v40 = vsub.f32 %v374_v33, %v886_v34  ;;  %v1909_v46 = vmul.f32 %v1397_v35, %v1397_v35  ;;  %v387_v34 = vld [vmem:[%s8089_s18 + $0x378] sm:$0xff] }
 0x130   : > { %v899_v35 = vld [vmem:[%s8095_s20 + $0x378] sm:$0xff] }
 0x131   : > { %v2408_v56 = vadd.f32 %v2407_v51, %v1896_v45  ;;  %v1399_v45 = vsub.f32 %v375_v38, %v887_v39  ;;  %v1910_v51 = vmul.f32 %v1398_v40, %v1398_v40  ;;  %v388_v39 = vld [vmem:[%s8089_s18 + $0x380] sm:$0xff] }
 0x132   : > { %v900_v40 = vld [vmem:[%s8095_s20 + $0x380] sm:$0xff] }
 0x133   : > { %v2409_v61 = vadd.f32 %v2408_v56, %v1897_v50  ;;  %v1400_v50 = vsub.f32 %v376_v43, %v888_v44  ;;  %v1911_v56 = vmul.f32 %v1399_v45, %v1399_v45  ;;  %v389_v44 = vld [vmem:[%s8089_s18 + $0x388] sm:$0xff] }
 0x134   : > { %v901_v45 = vld [vmem:[%s8095_s20 + $0x388] sm:$0xff] }
 0x135   : > { %v2410_v2 = vadd.f32 %v2409_v61, %v1898_v55  ;;  %v1401_v55 = vsub.f32 %v377_v48, %v889_v49  ;;  %v1912_v61 = vmul.f32 %v1400_v50, %v1400_v50  ;;  %v390_v49 = vld [vmem:[%s8089_s18 + $0x390] sm:$0xff] }
 0x136   : > { %v902_v50 = vld [vmem:[%s8095_s20 + $0x390] sm:$0xff] }
 0x137   : > { %v2411_v7 = vadd.f32 %v2410_v2, %v1899_v60  ;;  %v1402_v60 = vsub.f32 %v378_v53, %v890_v54  ;;  %v1913_v2 = vmul.f32 %v1401_v55, %v1401_v55  ;;  %v391_v54 = vld [vmem:[%s8089_s18 + $0x398] sm:$0xff] }
 0x138   : > { %v903_v55 = vld [vmem:[%s8095_s20 + $0x398] sm:$0xff] }
 0x139   : > { %v2412_v12 = vadd.f32 %v2411_v7, %v1900_v1  ;;  %v1403_v1 = vsub.f32 %v379_v58, %v891_v59  ;;  %v1914_v7 = vmul.f32 %v1402_v60, %v1402_v60  ;;  %v392_v59 = vld [vmem:[%s8089_s18 + $0x3a0] sm:$0xff] }
 0x13a   : > { %v904_v60 = vld [vmem:[%s8095_s20 + $0x3a0] sm:$0xff] }
 0x13b   : > { %v2413_v17 = vadd.f32 %v2412_v12, %v1901_v6  ;;  %v1404_v6 = vsub.f32 %v380_v63, %v892_v0  ;;  %v1915_v12 = vmul.f32 %v1403_v1, %v1403_v1  ;;  %v393_v0 = vld [vmem:[%s8089_s18 + $0x3a8] sm:$0xff] }
 0x13c   : > { %v905_v1 = vld [vmem:[%s8095_s20 + $0x3a8] sm:$0xff] }
 0x13d   : > { %v2414_v22 = vadd.f32 %v2413_v17, %v1902_v11  ;;  %v1405_v11 = vsub.f32 %v381_v4, %v893_v5  ;;  %v1916_v17 = vmul.f32 %v1404_v6, %v1404_v6  ;;  %v394_v5 = vld [vmem:[%s8089_s18 + $0x3b0] sm:$0xff] }
 0x13e   : > { %v906_v6 = vld [vmem:[%s8095_s20 + $0x3b0] sm:$0xff] }
 0x13f   : > { %v2415_v27 = vadd.f32 %v2414_v22, %v1903_v16  ;;  %v1406_v16 = vsub.f32 %v382_v9, %v894_v10  ;;  %v1917_v22 = vmul.f32 %v1405_v11, %v1405_v11  ;;  %v395_v10 = vld [vmem:[%s8089_s18 + $0x3b8] sm:$0xff] }
 0x140   : > { %v907_v11 = vld [vmem:[%s8095_s20 + $0x3b8] sm:$0xff] }
 0x141   : > { %v2416_v32 = vadd.f32 %v2415_v27, %v1904_v21  ;;  %v1407_v21 = vsub.f32 %v383_v14, %v895_v15  ;;  %v1918_v27 = vmul.f32 %v1406_v16, %v1406_v16  ;;  %v396_v15 = vld [vmem:[%s8089_s18 + $0x3c0] sm:$0xff] }
 0x142   : > { %v908_v16 = vld [vmem:[%s8095_s20 + $0x3c0] sm:$0xff] }
 0x143   : > { %v2417_v37 = vadd.f32 %v2416_v32, %v1905_v26  ;;  %v1408_v26 = vsub.f32 %v384_v19, %v896_v20  ;;  %v1919_v32 = vmul.f32 %v1407_v21, %v1407_v21  ;;  %v397_v20 = vld [vmem:[%s8089_s18 + $0x3c8] sm:$0xff] }
 0x144   : > { %v909_v21 = vld [vmem:[%s8095_s20 + $0x3c8] sm:$0xff] }
 0x145   : > { %v2418_v42 = vadd.f32 %v2417_v37, %v1906_v31  ;;  %v1409_v31 = vsub.f32 %v385_v24, %v897_v25  ;;  %v1920_v37 = vmul.f32 %v1408_v26, %v1408_v26  ;;  %v398_v25 = vld [vmem:[%s8089_s18 + $0x3d0] sm:$0xff] }
 0x146   : > { %v910_v26 = vld [vmem:[%s8095_s20 + $0x3d0] sm:$0xff] }
 0x147   : > { %v2419_v47 = vadd.f32 %v2418_v42, %v1907_v36  ;;  %v1410_v36 = vsub.f32 %v386_v29, %v898_v30  ;;  %v1921_v42 = vmul.f32 %v1409_v31, %v1409_v31  ;;  %v399_v30 = vld [vmem:[%s8089_s18 + $0x3d8] sm:$0xff] }
 0x148   : > { %v911_v31 = vld [vmem:[%s8095_s20 + $0x3d8] sm:$0xff] }
 0x149   : > { %v2420_v52 = vadd.f32 %v2419_v47, %v1908_v41  ;;  %v1411_v41 = vsub.f32 %v387_v34, %v899_v35  ;;  %v1922_v47 = vmul.f32 %v1410_v36, %v1410_v36  ;;  %v400_v35 = vld [vmem:[%s8089_s18 + $0x3e0] sm:$0xff] }
 0x14a   : > { %v912_v36 = vld [vmem:[%s8095_s20 + $0x3e0] sm:$0xff] }
 0x14b   : > { %v2421_v57 = vadd.f32 %v2420_v52, %v1909_v46  ;;  %v1412_v46 = vsub.f32 %v388_v39, %v900_v40  ;;  %v1923_v52 = vmul.f32 %v1411_v41, %v1411_v41  ;;  %v401_v40 = vld [vmem:[%s8089_s18 + $0x3e8] sm:$0xff] }
 0x14c   : > { %v913_v41 = vld [vmem:[%s8095_s20 + $0x3e8] sm:$0xff] }
 0x14d   : > { %v2422_v62 = vadd.f32 %v2421_v57, %v1910_v51  ;;  %v1413_v51 = vsub.f32 %v389_v44, %v901_v45  ;;  %v1924_v57 = vmul.f32 %v1412_v46, %v1412_v46  ;;  %v402_v45 = vld [vmem:[%s8089_s18 + $0x3f0] sm:$0xff] }
 0x14e   : > { %v914_v46 = vld [vmem:[%s8095_s20 + $0x3f0] sm:$0xff] }
 0x14f   : > { %v2423_v3 = vadd.f32 %v2422_v62, %v1911_v56  ;;  %v1414_v56 = vsub.f32 %v390_v49, %v902_v50  ;;  %v1925_v62 = vmul.f32 %v1413_v51, %v1413_v51  ;;  %v403_v50 = vld [vmem:[%s8089_s18 + $0x3f8] sm:$0xff] }
 0x150   : > { %v915_v51 = vld [vmem:[%s8095_s20 + $0x3f8] sm:$0xff] }
 0x151   : > { %v2424_v8 = vadd.f32 %v2423_v3, %v1912_v61  ;;  %v1415_v61 = vsub.f32 %v391_v54, %v903_v55  ;;  %v1926_v3 = vmul.f32 %v1414_v56, %v1414_v56  ;;  %v404_v55 = vld [vmem:[%s8089_s18 + $0x400] sm:$0xff] }
 0x152   : > { %v916_v56 = vld [vmem:[%s8095_s20 + $0x400] sm:$0xff] }
 0x153   : > { %v2425_v13 = vadd.f32 %v2424_v8, %v1913_v2  ;;  %v1416_v2 = vsub.f32 %v392_v59, %v904_v60  ;;  %v1927_v8 = vmul.f32 %v1415_v61, %v1415_v61  ;;  %v405_v60 = vld [vmem:[%s8089_s18 + $0x408] sm:$0xff] }
 0x154   : > { %v917_v61 = vld [vmem:[%s8095_s20 + $0x408] sm:$0xff] }
 0x155   : > { %v2426_v18 = vadd.f32 %v2425_v13, %v1914_v7  ;;  %v1417_v7 = vsub.f32 %v393_v0, %v905_v1  ;;  %v1928_v13 = vmul.f32 %v1416_v2, %v1416_v2  ;;  %v406_v1 = vld [vmem:[%s8089_s18 + $0x410] sm:$0xff] }
 0x156   : > { %v918_v2 = vld [vmem:[%s8095_s20 + $0x410] sm:$0xff] }
 0x157   : > { %v2427_v23 = vadd.f32 %v2426_v18, %v1915_v12  ;;  %v1418_v12 = vsub.f32 %v394_v5, %v906_v6  ;;  %v1929_v18 = vmul.f32 %v1417_v7, %v1417_v7  ;;  %v407_v6 = vld [vmem:[%s8089_s18 + $0x418] sm:$0xff] }
 0x158   : > { %v919_v7 = vld [vmem:[%s8095_s20 + $0x418] sm:$0xff] }
 0x159   : > { %v2428_v28 = vadd.f32 %v2427_v23, %v1916_v17  ;;  %v1419_v17 = vsub.f32 %v395_v10, %v907_v11  ;;  %v1930_v23 = vmul.f32 %v1418_v12, %v1418_v12  ;;  %v408_v11 = vld [vmem:[%s8089_s18 + $0x420] sm:$0xff] }
 0x15a   : > { %v920_v12 = vld [vmem:[%s8095_s20 + $0x420] sm:$0xff] }
 0x15b   : > { %v2429_v33 = vadd.f32 %v2428_v28, %v1917_v22  ;;  %v1420_v22 = vsub.f32 %v396_v15, %v908_v16  ;;  %v1931_v28 = vmul.f32 %v1419_v17, %v1419_v17  ;;  %v409_v16 = vld [vmem:[%s8089_s18 + $0x428] sm:$0xff] }
 0x15c   : > { %v921_v17 = vld [vmem:[%s8095_s20 + $0x428] sm:$0xff] }
 0x15d   : > { %v2430_v38 = vadd.f32 %v2429_v33, %v1918_v27  ;;  %v1421_v27 = vsub.f32 %v397_v20, %v909_v21  ;;  %v1932_v33 = vmul.f32 %v1420_v22, %v1420_v22  ;;  %v410_v21 = vld [vmem:[%s8089_s18 + $0x430] sm:$0xff] }
 0x15e   : > { %v922_v22 = vld [vmem:[%s8095_s20 + $0x430] sm:$0xff] }
 0x15f   : > { %v2431_v43 = vadd.f32 %v2430_v38, %v1919_v32  ;;  %v1422_v32 = vsub.f32 %v398_v25, %v910_v26  ;;  %v1933_v38 = vmul.f32 %v1421_v27, %v1421_v27  ;;  %v411_v26 = vld [vmem:[%s8089_s18 + $0x438] sm:$0xff] }
 0x160   : > { %v923_v27 = vld [vmem:[%s8095_s20 + $0x438] sm:$0xff] }
 0x161   : > { %v2432_v48 = vadd.f32 %v2431_v43, %v1920_v37  ;;  %v1423_v37 = vsub.f32 %v399_v30, %v911_v31  ;;  %v1934_v43 = vmul.f32 %v1422_v32, %v1422_v32  ;;  %v412_v31 = vld [vmem:[%s8089_s18 + $0x440] sm:$0xff] }
 0x162   : > { %v924_v32 = vld [vmem:[%s8095_s20 + $0x440] sm:$0xff] }
 0x163   : > { %v2433_v53 = vadd.f32 %v2432_v48, %v1921_v42  ;;  %v1424_v42 = vsub.f32 %v400_v35, %v912_v36  ;;  %v1935_v48 = vmul.f32 %v1423_v37, %v1423_v37  ;;  %v413_v36 = vld [vmem:[%s8089_s18 + $0x448] sm:$0xff] }
 0x164   : > { %v925_v37 = vld [vmem:[%s8095_s20 + $0x448] sm:$0xff] }
 0x165   : > { %v2434_v58 = vadd.f32 %v2433_v53, %v1922_v47  ;;  %v1425_v47 = vsub.f32 %v401_v40, %v913_v41  ;;  %v1936_v53 = vmul.f32 %v1424_v42, %v1424_v42  ;;  %v414_v41 = vld [vmem:[%s8089_s18 + $0x450] sm:$0xff] }
 0x166   : > { %v926_v42 = vld [vmem:[%s8095_s20 + $0x450] sm:$0xff] }
 0x167   : > { %v2435_v63 = vadd.f32 %v2434_v58, %v1923_v52  ;;  %v1426_v52 = vsub.f32 %v402_v45, %v914_v46  ;;  %v1937_v58 = vmul.f32 %v1425_v47, %v1425_v47  ;;  %v415_v46 = vld [vmem:[%s8089_s18 + $0x458] sm:$0xff] }
 0x168   : > { %v927_v47 = vld [vmem:[%s8095_s20 + $0x458] sm:$0xff] }
 0x169   : > { %v2436_v4 = vadd.f32 %v2435_v63, %v1924_v57  ;;  %v1427_v57 = vsub.f32 %v403_v50, %v915_v51  ;;  %v1938_v63 = vmul.f32 %v1426_v52, %v1426_v52  ;;  %v416_v51 = vld [vmem:[%s8089_s18 + $0x460] sm:$0xff] }
 0x16a   : > { %v928_v52 = vld [vmem:[%s8095_s20 + $0x460] sm:$0xff] }
 0x16b   : > { %v2437_v9 = vadd.f32 %v2436_v4, %v1925_v62  ;;  %v1428_v62 = vsub.f32 %v404_v55, %v916_v56  ;;  %v1939_v4 = vmul.f32 %v1427_v57, %v1427_v57  ;;  %v417_v56 = vld [vmem:[%s8089_s18 + $0x468] sm:$0xff] }
 0x16c   : > { %v929_v57 = vld [vmem:[%s8095_s20 + $0x468] sm:$0xff] }
 0x16d   : > { %v2438_v14 = vadd.f32 %v2437_v9, %v1926_v3  ;;  %v1429_v3 = vsub.f32 %v405_v60, %v917_v61  ;;  %v1940_v9 = vmul.f32 %v1428_v62, %v1428_v62  ;;  %v418_v61 = vld [vmem:[%s8089_s18 + $0x470] sm:$0xff] }
 0x16e   : > { %v930_v62 = vld [vmem:[%s8095_s20 + $0x470] sm:$0xff] }
 0x16f   : > { %v2439_v19 = vadd.f32 %v2438_v14, %v1927_v8  ;;  %v1430_v8 = vsub.f32 %v406_v1, %v918_v2  ;;  %v1941_v14 = vmul.f32 %v1429_v3, %v1429_v3  ;;  %v419_v2 = vld [vmem:[%s8089_s18 + $0x478] sm:$0xff] }
 0x170   : > { %v931_v3 = vld [vmem:[%s8095_s20 + $0x478] sm:$0xff] }
 0x171   : > { %v2440_v24 = vadd.f32 %v2439_v19, %v1928_v13  ;;  %v1431_v13 = vsub.f32 %v407_v6, %v919_v7  ;;  %v1942_v19 = vmul.f32 %v1430_v8, %v1430_v8  ;;  %v420_v7 = vld [vmem:[%s8089_s18 + $0x480] sm:$0xff] }
 0x172   : > { %v932_v8 = vld [vmem:[%s8095_s20 + $0x480] sm:$0xff] }
 0x173   : > { %v2441_v29 = vadd.f32 %v2440_v24, %v1929_v18  ;;  %v1432_v18 = vsub.f32 %v408_v11, %v920_v12  ;;  %v1943_v24 = vmul.f32 %v1431_v13, %v1431_v13  ;;  %v421_v12 = vld [vmem:[%s8089_s18 + $0x488] sm:$0xff] }
 0x174   : > { %v933_v13 = vld [vmem:[%s8095_s20 + $0x488] sm:$0xff] }
 0x175   : > { %v2442_v34 = vadd.f32 %v2441_v29, %v1930_v23  ;;  %v1433_v23 = vsub.f32 %v409_v16, %v921_v17  ;;  %v1944_v29 = vmul.f32 %v1432_v18, %v1432_v18  ;;  %v422_v17 = vld [vmem:[%s8089_s18 + $0x490] sm:$0xff] }
 0x176   : > { %v934_v18 = vld [vmem:[%s8095_s20 + $0x490] sm:$0xff] }
 0x177   : > { %v2443_v39 = vadd.f32 %v2442_v34, %v1931_v28  ;;  %v1434_v28 = vsub.f32 %v410_v21, %v922_v22  ;;  %v1945_v34 = vmul.f32 %v1433_v23, %v1433_v23  ;;  %v423_v22 = vld [vmem:[%s8089_s18 + $0x498] sm:$0xff] }
 0x178   : > { %v935_v23 = vld [vmem:[%s8095_s20 + $0x498] sm:$0xff] }
 0x179   : > { %v2444_v44 = vadd.f32 %v2443_v39, %v1932_v33  ;;  %v1435_v33 = vsub.f32 %v411_v26, %v923_v27  ;;  %v1946_v39 = vmul.f32 %v1434_v28, %v1434_v28  ;;  %v424_v27 = vld [vmem:[%s8089_s18 + $0x4a0] sm:$0xff] }
 0x17a   : > { %v936_v28 = vld [vmem:[%s8095_s20 + $0x4a0] sm:$0xff] }
 0x17b   : > { %v2445_v49 = vadd.f32 %v2444_v44, %v1933_v38  ;;  %v1436_v38 = vsub.f32 %v412_v31, %v924_v32  ;;  %v1947_v44 = vmul.f32 %v1435_v33, %v1435_v33  ;;  %v425_v32 = vld [vmem:[%s8089_s18 + $0x4a8] sm:$0xff] }
 0x17c   : > { %v937_v33 = vld [vmem:[%s8095_s20 + $0x4a8] sm:$0xff] }
 0x17d   : > { %v2446_v54 = vadd.f32 %v2445_v49, %v1934_v43  ;;  %v1437_v43 = vsub.f32 %v413_v36, %v925_v37  ;;  %v1948_v49 = vmul.f32 %v1436_v38, %v1436_v38  ;;  %v426_v37 = vld [vmem:[%s8089_s18 + $0x4b0] sm:$0xff] }
 0x17e   : > { %v938_v38 = vld [vmem:[%s8095_s20 + $0x4b0] sm:$0xff] }
 0x17f   : > { %v2447_v59 = vadd.f32 %v2446_v54, %v1935_v48  ;;  %v1438_v48 = vsub.f32 %v414_v41, %v926_v42  ;;  %v1949_v54 = vmul.f32 %v1437_v43, %v1437_v43  ;;  %v427_v42 = vld [vmem:[%s8089_s18 + $0x4b8] sm:$0xff] }
 0x180   : > { %v939_v43 = vld [vmem:[%s8095_s20 + $0x4b8] sm:$0xff] }
 0x181   : > { %v2448_v0 = vadd.f32 %v2447_v59, %v1936_v53  ;;  %v1439_v53 = vsub.f32 %v415_v46, %v927_v47  ;;  %v1950_v59 = vmul.f32 %v1438_v48, %v1438_v48  ;;  %v428_v47 = vld [vmem:[%s8089_s18 + $0x4c0] sm:$0xff] }
 0x182   : > { %v940_v48 = vld [vmem:[%s8095_s20 + $0x4c0] sm:$0xff] }
 0x183   : > { %v2449_v5 = vadd.f32 %v2448_v0, %v1937_v58  ;;  %v1440_v58 = vsub.f32 %v416_v51, %v928_v52  ;;  %v1951_v0 = vmul.f32 %v1439_v53, %v1439_v53  ;;  %v429_v52 = vld [vmem:[%s8089_s18 + $0x4c8] sm:$0xff] }
 0x184   : > { %v941_v53 = vld [vmem:[%s8095_s20 + $0x4c8] sm:$0xff] }
 0x185   : > { %v2450_v10 = vadd.f32 %v2449_v5, %v1938_v63  ;;  %v1441_v63 = vsub.f32 %v417_v56, %v929_v57  ;;  %v1952_v5 = vmul.f32 %v1440_v58, %v1440_v58  ;;  %v430_v57 = vld [vmem:[%s8089_s18 + $0x4d0] sm:$0xff] }
 0x186   : > { %v942_v58 = vld [vmem:[%s8095_s20 + $0x4d0] sm:$0xff] }
 0x187   : > { %v2451_v15 = vadd.f32 %v2450_v10, %v1939_v4  ;;  %v1442_v4 = vsub.f32 %v418_v61, %v930_v62  ;;  %v1953_v10 = vmul.f32 %v1441_v63, %v1441_v63  ;;  %v431_v62 = vld [vmem:[%s8089_s18 + $0x4d8] sm:$0xff] }
 0x188   : > { %v943_v63 = vld [vmem:[%s8095_s20 + $0x4d8] sm:$0xff] }
 0x189   : > { %v2452_v20 = vadd.f32 %v2451_v15, %v1940_v9  ;;  %v1443_v9 = vsub.f32 %v419_v2, %v931_v3  ;;  %v1954_v15 = vmul.f32 %v1442_v4, %v1442_v4  ;;  %v432_v3 = vld [vmem:[%s8089_s18 + $0x4e0] sm:$0xff] }
 0x18a   : > { %v944_v4 = vld [vmem:[%s8095_s20 + $0x4e0] sm:$0xff] }
 0x18b   : > { %v2453_v25 = vadd.f32 %v2452_v20, %v1941_v14  ;;  %v1444_v14 = vsub.f32 %v420_v7, %v932_v8  ;;  %v1955_v20 = vmul.f32 %v1443_v9, %v1443_v9  ;;  %v433_v8 = vld [vmem:[%s8089_s18 + $0x4e8] sm:$0xff] }
 0x18c   : > { %v945_v9 = vld [vmem:[%s8095_s20 + $0x4e8] sm:$0xff] }
 0x18d   : > { %v2454_v30 = vadd.f32 %v2453_v25, %v1942_v19  ;;  %v1445_v19 = vsub.f32 %v421_v12, %v933_v13  ;;  %v1956_v25 = vmul.f32 %v1444_v14, %v1444_v14  ;;  %v434_v13 = vld [vmem:[%s8089_s18 + $0x4f0] sm:$0xff] }
 0x18e   : > { %v946_v14 = vld [vmem:[%s8095_s20 + $0x4f0] sm:$0xff] }
 0x18f   : > { %v2455_v35 = vadd.f32 %v2454_v30, %v1943_v24  ;;  %v1446_v24 = vsub.f32 %v422_v17, %v934_v18  ;;  %v1957_v30 = vmul.f32 %v1445_v19, %v1445_v19  ;;  %v435_v18 = vld [vmem:[%s8089_s18 + $0x4f8] sm:$0xff] }
 0x190   : > { %v947_v19 = vld [vmem:[%s8095_s20 + $0x4f8] sm:$0xff] }
 0x191   : > { %v2456_v40 = vadd.f32 %v2455_v35, %v1944_v29  ;;  %v1447_v29 = vsub.f32 %v423_v22, %v935_v23  ;;  %v1958_v35 = vmul.f32 %v1446_v24, %v1446_v24  ;;  %v436_v23 = vld [vmem:[%s8089_s18 + $0x500] sm:$0xff] }
 0x192   : > { %v948_v24 = vld [vmem:[%s8095_s20 + $0x500] sm:$0xff] }
 0x193   : > { %v2457_v45 = vadd.f32 %v2456_v40, %v1945_v34  ;;  %v1448_v34 = vsub.f32 %v424_v27, %v936_v28  ;;  %v1959_v40 = vmul.f32 %v1447_v29, %v1447_v29  ;;  %v437_v28 = vld [vmem:[%s8089_s18 + $0x508] sm:$0xff] }
 0x194   : > { %v949_v29 = vld [vmem:[%s8095_s20 + $0x508] sm:$0xff] }
 0x195   : > { %v2458_v50 = vadd.f32 %v2457_v45, %v1946_v39  ;;  %v1449_v39 = vsub.f32 %v425_v32, %v937_v33  ;;  %v1960_v45 = vmul.f32 %v1448_v34, %v1448_v34  ;;  %v438_v33 = vld [vmem:[%s8089_s18 + $0x510] sm:$0xff] }
 0x196   : > { %v950_v34 = vld [vmem:[%s8095_s20 + $0x510] sm:$0xff] }
 0x197   : > { %v2459_v55 = vadd.f32 %v2458_v50, %v1947_v44  ;;  %v1450_v44 = vsub.f32 %v426_v37, %v938_v38  ;;  %v1961_v50 = vmul.f32 %v1449_v39, %v1449_v39  ;;  %v439_v38 = vld [vmem:[%s8089_s18 + $0x518] sm:$0xff] }
 0x198   : > { %v951_v39 = vld [vmem:[%s8095_s20 + $0x518] sm:$0xff] }
 0x199   : > { %v2460_v60 = vadd.f32 %v2459_v55, %v1948_v49  ;;  %v1451_v49 = vsub.f32 %v427_v42, %v939_v43  ;;  %v1962_v55 = vmul.f32 %v1450_v44, %v1450_v44  ;;  %v440_v43 = vld [vmem:[%s8089_s18 + $0x520] sm:$0xff] }
 0x19a   : > { %v952_v44 = vld [vmem:[%s8095_s20 + $0x520] sm:$0xff] }
 0x19b   : > { %v2461_v1 = vadd.f32 %v2460_v60, %v1949_v54  ;;  %v1452_v54 = vsub.f32 %v428_v47, %v940_v48  ;;  %v1963_v60 = vmul.f32 %v1451_v49, %v1451_v49  ;;  %v441_v48 = vld [vmem:[%s8089_s18 + $0x528] sm:$0xff] }
 0x19c   : > { %v953_v49 = vld [vmem:[%s8095_s20 + $0x528] sm:$0xff] }
 0x19d   : > { %v2462_v6 = vadd.f32 %v2461_v1, %v1950_v59  ;;  %v1453_v59 = vsub.f32 %v429_v52, %v941_v53  ;;  %v1964_v1 = vmul.f32 %v1452_v54, %v1452_v54  ;;  %v442_v53 = vld [vmem:[%s8089_s18 + $0x530] sm:$0xff] }
 0x19e   : > { %v954_v54 = vld [vmem:[%s8095_s20 + $0x530] sm:$0xff] }
 0x19f   : > { %v2463_v11 = vadd.f32 %v2462_v6, %v1951_v0  ;;  %v1454_v0 = vsub.f32 %v430_v57, %v942_v58  ;;  %v1965_v6 = vmul.f32 %v1453_v59, %v1453_v59  ;;  %v443_v58 = vld [vmem:[%s8089_s18 + $0x538] sm:$0xff] }
 0x1a0   : > { %v955_v59 = vld [vmem:[%s8095_s20 + $0x538] sm:$0xff] }
 0x1a1   : > { %v2464_v16 = vadd.f32 %v2463_v11, %v1952_v5  ;;  %v1455_v5 = vsub.f32 %v431_v62, %v943_v63  ;;  %v1966_v11 = vmul.f32 %v1454_v0, %v1454_v0  ;;  %v444_v63 = vld [vmem:[%s8089_s18 + $0x540] sm:$0xff] }
 0x1a2   : > { %v956_v0 = vld [vmem:[%s8095_s20 + $0x540] sm:$0xff] }
 0x1a3   : > { %v2465_v21 = vadd.f32 %v2464_v16, %v1953_v10  ;;  %v1456_v10 = vsub.f32 %v432_v3, %v944_v4  ;;  %v1967_v16 = vmul.f32 %v1455_v5, %v1455_v5  ;;  %v445_v4 = vld [vmem:[%s8089_s18 + $0x548] sm:$0xff] }
 0x1a4   : > { %v957_v5 = vld [vmem:[%s8095_s20 + $0x548] sm:$0xff] }
 0x1a5   : > { %v2466_v26 = vadd.f32 %v2465_v21, %v1954_v15  ;;  %v1457_v15 = vsub.f32 %v433_v8, %v945_v9  ;;  %v1968_v21 = vmul.f32 %v1456_v10, %v1456_v10  ;;  %v446_v9 = vld [vmem:[%s8089_s18 + $0x550] sm:$0xff] }
 0x1a6   : > { %v958_v10 = vld [vmem:[%s8095_s20 + $0x550] sm:$0xff] }
 0x1a7   : > { %v2467_v31 = vadd.f32 %v2466_v26, %v1955_v20  ;;  %v1458_v20 = vsub.f32 %v434_v13, %v946_v14  ;;  %v1969_v26 = vmul.f32 %v1457_v15, %v1457_v15  ;;  %v447_v14 = vld [vmem:[%s8089_s18 + $0x558] sm:$0xff] }
 0x1a8   : > { %v959_v15 = vld [vmem:[%s8095_s20 + $0x558] sm:$0xff] }
 0x1a9   : > { %v2468_v36 = vadd.f32 %v2467_v31, %v1956_v25  ;;  %v1459_v25 = vsub.f32 %v435_v18, %v947_v19  ;;  %v1970_v31 = vmul.f32 %v1458_v20, %v1458_v20  ;;  %v448_v19 = vld [vmem:[%s8089_s18 + $0x560] sm:$0xff] }
 0x1aa   : > { %v960_v20 = vld [vmem:[%s8095_s20 + $0x560] sm:$0xff] }
 0x1ab   : > { %v2469_v41 = vadd.f32 %v2468_v36, %v1957_v30  ;;  %v1460_v30 = vsub.f32 %v436_v23, %v948_v24  ;;  %v1971_v36 = vmul.f32 %v1459_v25, %v1459_v25  ;;  %v449_v24 = vld [vmem:[%s8089_s18 + $0x568] sm:$0xff] }
 0x1ac   : > { %v961_v25 = vld [vmem:[%s8095_s20 + $0x568] sm:$0xff] }
 0x1ad   : > { %v2470_v46 = vadd.f32 %v2469_v41, %v1958_v35  ;;  %v1461_v35 = vsub.f32 %v437_v28, %v949_v29  ;;  %v1972_v41 = vmul.f32 %v1460_v30, %v1460_v30  ;;  %v450_v29 = vld [vmem:[%s8089_s18 + $0x570] sm:$0xff] }
 0x1ae   : > { %v962_v30 = vld [vmem:[%s8095_s20 + $0x570] sm:$0xff] }
 0x1af   : > { %v2471_v51 = vadd.f32 %v2470_v46, %v1959_v40  ;;  %v1462_v40 = vsub.f32 %v438_v33, %v950_v34  ;;  %v1973_v46 = vmul.f32 %v1461_v35, %v1461_v35  ;;  %v451_v34 = vld [vmem:[%s8089_s18 + $0x578] sm:$0xff] }
 0x1b0   : > { %v963_v35 = vld [vmem:[%s8095_s20 + $0x578] sm:$0xff] }
 0x1b1   : > { %v2472_v56 = vadd.f32 %v2471_v51, %v1960_v45  ;;  %v1463_v45 = vsub.f32 %v439_v38, %v951_v39  ;;  %v1974_v51 = vmul.f32 %v1462_v40, %v1462_v40  ;;  %v452_v39 = vld [vmem:[%s8089_s18 + $0x580] sm:$0xff] }
 0x1b2   : > { %v964_v40 = vld [vmem:[%s8095_s20 + $0x580] sm:$0xff] }
 0x1b3   : > { %v2473_v61 = vadd.f32 %v2472_v56, %v1961_v50  ;;  %v1464_v50 = vsub.f32 %v440_v43, %v952_v44  ;;  %v1975_v56 = vmul.f32 %v1463_v45, %v1463_v45  ;;  %v453_v44 = vld [vmem:[%s8089_s18 + $0x588] sm:$0xff] }
 0x1b4   : > { %v965_v45 = vld [vmem:[%s8095_s20 + $0x588] sm:$0xff] }
 0x1b5   : > { %v2474_v2 = vadd.f32 %v2473_v61, %v1962_v55  ;;  %v1465_v55 = vsub.f32 %v441_v48, %v953_v49  ;;  %v1976_v61 = vmul.f32 %v1464_v50, %v1464_v50  ;;  %v454_v49 = vld [vmem:[%s8089_s18 + $0x590] sm:$0xff] }
 0x1b6   : > { %v966_v50 = vld [vmem:[%s8095_s20 + $0x590] sm:$0xff] }
 0x1b7   : > { %v2475_v7 = vadd.f32 %v2474_v2, %v1963_v60  ;;  %v1466_v60 = vsub.f32 %v442_v53, %v954_v54  ;;  %v1977_v2 = vmul.f32 %v1465_v55, %v1465_v55  ;;  %v455_v54 = vld [vmem:[%s8089_s18 + $0x598] sm:$0xff] }
 0x1b8   : > { %v967_v55 = vld [vmem:[%s8095_s20 + $0x598] sm:$0xff] }
 0x1b9   : > { %v2476_v12 = vadd.f32 %v2475_v7, %v1964_v1  ;;  %v1467_v1 = vsub.f32 %v443_v58, %v955_v59  ;;  %v1978_v7 = vmul.f32 %v1466_v60, %v1466_v60  ;;  %v456_v59 = vld [vmem:[%s8089_s18 + $0x5a0] sm:$0xff] }
 0x1ba   : > { %v968_v60 = vld [vmem:[%s8095_s20 + $0x5a0] sm:$0xff] }
 0x1bb   : > { %v2477_v17 = vadd.f32 %v2476_v12, %v1965_v6  ;;  %v1468_v6 = vsub.f32 %v444_v63, %v956_v0  ;;  %v1979_v12 = vmul.f32 %v1467_v1, %v1467_v1  ;;  %v457_v0 = vld [vmem:[%s8089_s18 + $0x5a8] sm:$0xff] }
 0x1bc   : > { %v969_v1 = vld [vmem:[%s8095_s20 + $0x5a8] sm:$0xff] }
 0x1bd   : > { %v2478_v22 = vadd.f32 %v2477_v17, %v1966_v11  ;;  %v1469_v11 = vsub.f32 %v445_v4, %v957_v5  ;;  %v1980_v17 = vmul.f32 %v1468_v6, %v1468_v6  ;;  %v458_v5 = vld [vmem:[%s8089_s18 + $0x5b0] sm:$0xff] }
 0x1be   : > { %v970_v6 = vld [vmem:[%s8095_s20 + $0x5b0] sm:$0xff] }
 0x1bf   : > { %v2479_v27 = vadd.f32 %v2478_v22, %v1967_v16  ;;  %v1470_v16 = vsub.f32 %v446_v9, %v958_v10  ;;  %v1981_v22 = vmul.f32 %v1469_v11, %v1469_v11  ;;  %v459_v10 = vld [vmem:[%s8089_s18 + $0x5b8] sm:$0xff] }
 0x1c0   : > { %v971_v11 = vld [vmem:[%s8095_s20 + $0x5b8] sm:$0xff] }
 0x1c1   : > { %v2480_v32 = vadd.f32 %v2479_v27, %v1968_v21  ;;  %v1471_v21 = vsub.f32 %v447_v14, %v959_v15  ;;  %v1982_v27 = vmul.f32 %v1470_v16, %v1470_v16  ;;  %v460_v15 = vld [vmem:[%s8089_s18 + $0x5c0] sm:$0xff] }
 0x1c2   : > { %v972_v16 = vld [vmem:[%s8095_s20 + $0x5c0] sm:$0xff] }
 0x1c3   : > { %v2481_v37 = vadd.f32 %v2480_v32, %v1969_v26  ;;  %v1472_v26 = vsub.f32 %v448_v19, %v960_v20  ;;  %v1983_v32 = vmul.f32 %v1471_v21, %v1471_v21  ;;  %v461_v20 = vld [vmem:[%s8089_s18 + $0x5c8] sm:$0xff] }
 0x1c4   : > { %v973_v21 = vld [vmem:[%s8095_s20 + $0x5c8] sm:$0xff] }
 0x1c5   : > { %v2482_v42 = vadd.f32 %v2481_v37, %v1970_v31  ;;  %v1473_v31 = vsub.f32 %v449_v24, %v961_v25  ;;  %v1984_v37 = vmul.f32 %v1472_v26, %v1472_v26  ;;  %v462_v25 = vld [vmem:[%s8089_s18 + $0x5d0] sm:$0xff] }
 0x1c6   : > { %v974_v26 = vld [vmem:[%s8095_s20 + $0x5d0] sm:$0xff] }
 0x1c7   : > { %v2483_v47 = vadd.f32 %v2482_v42, %v1971_v36  ;;  %v1474_v36 = vsub.f32 %v450_v29, %v962_v30  ;;  %v1985_v42 = vmul.f32 %v1473_v31, %v1473_v31  ;;  %v463_v30 = vld [vmem:[%s8089_s18 + $0x5d8] sm:$0xff] }
 0x1c8   : > { %v975_v31 = vld [vmem:[%s8095_s20 + $0x5d8] sm:$0xff] }
 0x1c9   : > { %v2484_v52 = vadd.f32 %v2483_v47, %v1972_v41  ;;  %v1475_v41 = vsub.f32 %v451_v34, %v963_v35  ;;  %v1986_v47 = vmul.f32 %v1474_v36, %v1474_v36  ;;  %v464_v35 = vld [vmem:[%s8089_s18 + $0x5e0] sm:$0xff] }
 0x1ca   : > { %v976_v36 = vld [vmem:[%s8095_s20 + $0x5e0] sm:$0xff] }
 0x1cb   : > { %v2485_v57 = vadd.f32 %v2484_v52, %v1973_v46  ;;  %v1476_v46 = vsub.f32 %v452_v39, %v964_v40  ;;  %v1987_v52 = vmul.f32 %v1475_v41, %v1475_v41  ;;  %v465_v40 = vld [vmem:[%s8089_s18 + $0x5e8] sm:$0xff] }
 0x1cc   : > { %v977_v41 = vld [vmem:[%s8095_s20 + $0x5e8] sm:$0xff] }
 0x1cd   : > { %v2486_v62 = vadd.f32 %v2485_v57, %v1974_v51  ;;  %v1477_v51 = vsub.f32 %v453_v44, %v965_v45  ;;  %v1988_v57 = vmul.f32 %v1476_v46, %v1476_v46  ;;  %v466_v45 = vld [vmem:[%s8089_s18 + $0x5f0] sm:$0xff] }
 0x1ce   : > { %v978_v46 = vld [vmem:[%s8095_s20 + $0x5f0] sm:$0xff] }
 0x1cf   : > { %v2487_v3 = vadd.f32 %v2486_v62, %v1975_v56  ;;  %v1478_v56 = vsub.f32 %v454_v49, %v966_v50  ;;  %v1989_v62 = vmul.f32 %v1477_v51, %v1477_v51  ;;  %v467_v50 = vld [vmem:[%s8089_s18 + $0x5f8] sm:$0xff] }
 0x1d0   : > { %v979_v51 = vld [vmem:[%s8095_s20 + $0x5f8] sm:$0xff] }
 0x1d1   : > { %v2488_v8 = vadd.f32 %v2487_v3, %v1976_v61  ;;  %v1479_v61 = vsub.f32 %v455_v54, %v967_v55  ;;  %v1990_v3 = vmul.f32 %v1478_v56, %v1478_v56  ;;  %v468_v55 = vld [vmem:[%s8089_s18 + $0x600] sm:$0xff] }
 0x1d2   : > { %v980_v56 = vld [vmem:[%s8095_s20 + $0x600] sm:$0xff] }
 0x1d3   : > { %v2489_v13 = vadd.f32 %v2488_v8, %v1977_v2  ;;  %v1480_v2 = vsub.f32 %v456_v59, %v968_v60  ;;  %v1991_v8 = vmul.f32 %v1479_v61, %v1479_v61  ;;  %v469_v60 = vld [vmem:[%s8089_s18 + $0x608] sm:$0xff] }
 0x1d4   : > { %v981_v61 = vld [vmem:[%s8095_s20 + $0x608] sm:$0xff] }
 0x1d5   : > { %v2490_v18 = vadd.f32 %v2489_v13, %v1978_v7  ;;  %v1481_v7 = vsub.f32 %v457_v0, %v969_v1  ;;  %v1992_v13 = vmul.f32 %v1480_v2, %v1480_v2  ;;  %v470_v1 = vld [vmem:[%s8089_s18 + $0x610] sm:$0xff] }
 0x1d6   : > { %v982_v2 = vld [vmem:[%s8095_s20 + $0x610] sm:$0xff] }
 0x1d7   : > { %v2491_v23 = vadd.f32 %v2490_v18, %v1979_v12  ;;  %v1482_v12 = vsub.f32 %v458_v5, %v970_v6  ;;  %v1993_v18 = vmul.f32 %v1481_v7, %v1481_v7  ;;  %v471_v6 = vld [vmem:[%s8089_s18 + $0x618] sm:$0xff] }
 0x1d8   : > { %v983_v7 = vld [vmem:[%s8095_s20 + $0x618] sm:$0xff] }
 0x1d9   : > { %v2492_v28 = vadd.f32 %v2491_v23, %v1980_v17  ;;  %v1483_v17 = vsub.f32 %v459_v10, %v971_v11  ;;  %v1994_v23 = vmul.f32 %v1482_v12, %v1482_v12  ;;  %v472_v11 = vld [vmem:[%s8089_s18 + $0x620] sm:$0xff] }
 0x1da   : > { %v984_v12 = vld [vmem:[%s8095_s20 + $0x620] sm:$0xff] }
 0x1db   : > { %v2493_v33 = vadd.f32 %v2492_v28, %v1981_v22  ;;  %v1484_v22 = vsub.f32 %v460_v15, %v972_v16  ;;  %v1995_v28 = vmul.f32 %v1483_v17, %v1483_v17  ;;  %v473_v16 = vld [vmem:[%s8089_s18 + $0x628] sm:$0xff] }
 0x1dc   : > { %v985_v17 = vld [vmem:[%s8095_s20 + $0x628] sm:$0xff] }
 0x1dd   : > { %v2494_v38 = vadd.f32 %v2493_v33, %v1982_v27  ;;  %v1485_v27 = vsub.f32 %v461_v20, %v973_v21  ;;  %v1996_v33 = vmul.f32 %v1484_v22, %v1484_v22  ;;  %v474_v21 = vld [vmem:[%s8089_s18 + $0x630] sm:$0xff] }
 0x1de   : > { %v986_v22 = vld [vmem:[%s8095_s20 + $0x630] sm:$0xff] }
 0x1df   : > { %v2495_v43 = vadd.f32 %v2494_v38, %v1983_v32  ;;  %v1486_v32 = vsub.f32 %v462_v25, %v974_v26  ;;  %v1997_v38 = vmul.f32 %v1485_v27, %v1485_v27  ;;  %v475_v26 = vld [vmem:[%s8089_s18 + $0x638] sm:$0xff] }
 0x1e0   : > { %v987_v27 = vld [vmem:[%s8095_s20 + $0x638] sm:$0xff] }
 0x1e1   : > { %v2496_v48 = vadd.f32 %v2495_v43, %v1984_v37  ;;  %v1487_v37 = vsub.f32 %v463_v30, %v975_v31  ;;  %v1998_v43 = vmul.f32 %v1486_v32, %v1486_v32  ;;  %v476_v31 = vld [vmem:[%s8089_s18 + $0x640] sm:$0xff] }
 0x1e2   : > { %v988_v32 = vld [vmem:[%s8095_s20 + $0x640] sm:$0xff] }
 0x1e3   : > { %v2497_v53 = vadd.f32 %v2496_v48, %v1985_v42  ;;  %v1488_v42 = vsub.f32 %v464_v35, %v976_v36  ;;  %v1999_v48 = vmul.f32 %v1487_v37, %v1487_v37  ;;  %v477_v36 = vld [vmem:[%s8089_s18 + $0x648] sm:$0xff] }
 0x1e4   : > { %v989_v37 = vld [vmem:[%s8095_s20 + $0x648] sm:$0xff] }
 0x1e5   : > { %v2498_v58 = vadd.f32 %v2497_v53, %v1986_v47  ;;  %v1489_v47 = vsub.f32 %v465_v40, %v977_v41  ;;  %v2000_v53 = vmul.f32 %v1488_v42, %v1488_v42  ;;  %v478_v41 = vld [vmem:[%s8089_s18 + $0x650] sm:$0xff] }
 0x1e6   : > { %v990_v42 = vld [vmem:[%s8095_s20 + $0x650] sm:$0xff] }
 0x1e7   : > { %v2499_v63 = vadd.f32 %v2498_v58, %v1987_v52  ;;  %v1490_v52 = vsub.f32 %v466_v45, %v978_v46  ;;  %v2001_v58 = vmul.f32 %v1489_v47, %v1489_v47  ;;  %v479_v46 = vld [vmem:[%s8089_s18 + $0x658] sm:$0xff] }
 0x1e8   : > { %v991_v47 = vld [vmem:[%s8095_s20 + $0x658] sm:$0xff] }
 0x1e9   : > { %v2500_v4 = vadd.f32 %v2499_v63, %v1988_v57  ;;  %v1491_v57 = vsub.f32 %v467_v50, %v979_v51  ;;  %v2002_v63 = vmul.f32 %v1490_v52, %v1490_v52  ;;  %v480_v51 = vld [vmem:[%s8089_s18 + $0x660] sm:$0xff] }
 0x1ea   : > { %v992_v52 = vld [vmem:[%s8095_s20 + $0x660] sm:$0xff] }
 0x1eb   : > { %v2501_v9 = vadd.f32 %v2500_v4, %v1989_v62  ;;  %v1492_v62 = vsub.f32 %v468_v55, %v980_v56  ;;  %v2003_v4 = vmul.f32 %v1491_v57, %v1491_v57  ;;  %v481_v56 = vld [vmem:[%s8089_s18 + $0x668] sm:$0xff] }
 0x1ec   : > { %v993_v57 = vld [vmem:[%s8095_s20 + $0x668] sm:$0xff] }
 0x1ed   : > { %v2502_v14 = vadd.f32 %v2501_v9, %v1990_v3  ;;  %v1493_v3 = vsub.f32 %v469_v60, %v981_v61  ;;  %v2004_v9 = vmul.f32 %v1492_v62, %v1492_v62  ;;  %v482_v61 = vld [vmem:[%s8089_s18 + $0x670] sm:$0xff] }
 0x1ee   : > { %v994_v62 = vld [vmem:[%s8095_s20 + $0x670] sm:$0xff] }
 0x1ef   : > { %v2503_v19 = vadd.f32 %v2502_v14, %v1991_v8  ;;  %v1494_v8 = vsub.f32 %v470_v1, %v982_v2  ;;  %v2005_v14 = vmul.f32 %v1493_v3, %v1493_v3  ;;  %v483_v2 = vld [vmem:[%s8089_s18 + $0x678] sm:$0xff] }
 0x1f0   : > { %v995_v3 = vld [vmem:[%s8095_s20 + $0x678] sm:$0xff] }
 0x1f1   : > { %v2504_v24 = vadd.f32 %v2503_v19, %v1992_v13  ;;  %v1495_v13 = vsub.f32 %v471_v6, %v983_v7  ;;  %v2006_v19 = vmul.f32 %v1494_v8, %v1494_v8  ;;  %v484_v7 = vld [vmem:[%s8089_s18 + $0x680] sm:$0xff] }
 0x1f2   : > { %v996_v8 = vld [vmem:[%s8095_s20 + $0x680] sm:$0xff] }
 0x1f3   : > { %v2505_v29 = vadd.f32 %v2504_v24, %v1993_v18  ;;  %v1496_v18 = vsub.f32 %v472_v11, %v984_v12  ;;  %v2007_v24 = vmul.f32 %v1495_v13, %v1495_v13  ;;  %v485_v12 = vld [vmem:[%s8089_s18 + $0x688] sm:$0xff] }
 0x1f4   : > { %v997_v13 = vld [vmem:[%s8095_s20 + $0x688] sm:$0xff] }
 0x1f5   : > { %v2506_v34 = vadd.f32 %v2505_v29, %v1994_v23  ;;  %v1497_v23 = vsub.f32 %v473_v16, %v985_v17  ;;  %v2008_v29 = vmul.f32 %v1496_v18, %v1496_v18  ;;  %v486_v17 = vld [vmem:[%s8089_s18 + $0x690] sm:$0xff] }
 0x1f6   : > { %v998_v18 = vld [vmem:[%s8095_s20 + $0x690] sm:$0xff] }
 0x1f7   : > { %v2507_v39 = vadd.f32 %v2506_v34, %v1995_v28  ;;  %v1498_v28 = vsub.f32 %v474_v21, %v986_v22  ;;  %v2009_v34 = vmul.f32 %v1497_v23, %v1497_v23  ;;  %v487_v22 = vld [vmem:[%s8089_s18 + $0x698] sm:$0xff] }
 0x1f8   : > { %v999_v23 = vld [vmem:[%s8095_s20 + $0x698] sm:$0xff] }
 0x1f9   : > { %v2508_v44 = vadd.f32 %v2507_v39, %v1996_v33  ;;  %v1499_v33 = vsub.f32 %v475_v26, %v987_v27  ;;  %v2010_v39 = vmul.f32 %v1498_v28, %v1498_v28  ;;  %v488_v27 = vld [vmem:[%s8089_s18 + $0x6a0] sm:$0xff] }
 0x1fa   : > { %v1000_v28 = vld [vmem:[%s8095_s20 + $0x6a0] sm:$0xff] }
 0x1fb   : > { %v2509_v49 = vadd.f32 %v2508_v44, %v1997_v38  ;;  %v1500_v38 = vsub.f32 %v476_v31, %v988_v32  ;;  %v2011_v44 = vmul.f32 %v1499_v33, %v1499_v33  ;;  %v489_v32 = vld [vmem:[%s8089_s18 + $0x6a8] sm:$0xff] }
 0x1fc   : > { %v1001_v33 = vld [vmem:[%s8095_s20 + $0x6a8] sm:$0xff] }
 0x1fd   : > { %v2510_v54 = vadd.f32 %v2509_v49, %v1998_v43  ;;  %v1501_v43 = vsub.f32 %v477_v36, %v989_v37  ;;  %v2012_v49 = vmul.f32 %v1500_v38, %v1500_v38  ;;  %v490_v37 = vld [vmem:[%s8089_s18 + $0x6b0] sm:$0xff] }
 0x1fe   : > { %v1002_v38 = vld [vmem:[%s8095_s20 + $0x6b0] sm:$0xff] }
 0x1ff   : > { %v2511_v59 = vadd.f32 %v2510_v54, %v1999_v48  ;;  %v1502_v48 = vsub.f32 %v478_v41, %v990_v42  ;;  %v2013_v54 = vmul.f32 %v1501_v43, %v1501_v43  ;;  %v491_v42 = vld [vmem:[%s8089_s18 + $0x6b8] sm:$0xff] }
 0x200   : > { %v1003_v43 = vld [vmem:[%s8095_s20 + $0x6b8] sm:$0xff] }
 0x201   : > { %v2512_v0 = vadd.f32 %v2511_v59, %v2000_v53  ;;  %v1503_v53 = vsub.f32 %v479_v46, %v991_v47  ;;  %v2014_v59 = vmul.f32 %v1502_v48, %v1502_v48  ;;  %v492_v47 = vld [vmem:[%s8089_s18 + $0x6c0] sm:$0xff] }
 0x202   : > { %v1004_v48 = vld [vmem:[%s8095_s20 + $0x6c0] sm:$0xff] }
 0x203   : > { %v2513_v5 = vadd.f32 %v2512_v0, %v2001_v58  ;;  %v1504_v58 = vsub.f32 %v480_v51, %v992_v52  ;;  %v2015_v0 = vmul.f32 %v1503_v53, %v1503_v53  ;;  %v493_v52 = vld [vmem:[%s8089_s18 + $0x6c8] sm:$0xff] }
 0x204   : > { %v1005_v53 = vld [vmem:[%s8095_s20 + $0x6c8] sm:$0xff] }
 0x205   : > { %v2514_v10 = vadd.f32 %v2513_v5, %v2002_v63  ;;  %v1505_v63 = vsub.f32 %v481_v56, %v993_v57  ;;  %v2016_v5 = vmul.f32 %v1504_v58, %v1504_v58  ;;  %v494_v57 = vld [vmem:[%s8089_s18 + $0x6d0] sm:$0xff] }
 0x206   : > { %v1006_v58 = vld [vmem:[%s8095_s20 + $0x6d0] sm:$0xff] }
 0x207   : > { %v2515_v15 = vadd.f32 %v2514_v10, %v2003_v4  ;;  %v1506_v4 = vsub.f32 %v482_v61, %v994_v62  ;;  %v2017_v10 = vmul.f32 %v1505_v63, %v1505_v63  ;;  %v495_v62 = vld [vmem:[%s8089_s18 + $0x6d8] sm:$0xff] }
 0x208   : > { %v1007_v63 = vld [vmem:[%s8095_s20 + $0x6d8] sm:$0xff] }
 0x209   : > { %v2516_v20 = vadd.f32 %v2515_v15, %v2004_v9  ;;  %v1507_v9 = vsub.f32 %v483_v2, %v995_v3  ;;  %v2018_v15 = vmul.f32 %v1506_v4, %v1506_v4  ;;  %v496_v3 = vld [vmem:[%s8089_s18 + $0x6e0] sm:$0xff] }
 0x20a   : > { %v1008_v4 = vld [vmem:[%s8095_s20 + $0x6e0] sm:$0xff] }
 0x20b   : > { %v2517_v25 = vadd.f32 %v2516_v20, %v2005_v14  ;;  %v1508_v14 = vsub.f32 %v484_v7, %v996_v8  ;;  %v2019_v20 = vmul.f32 %v1507_v9, %v1507_v9  ;;  %v497_v8 = vld [vmem:[%s8089_s18 + $0x6e8] sm:$0xff] }
 0x20c   : > { %v1009_v9 = vld [vmem:[%s8095_s20 + $0x6e8] sm:$0xff] }
 0x20d   : > { %v2518_v30 = vadd.f32 %v2517_v25, %v2006_v19  ;;  %v1509_v19 = vsub.f32 %v485_v12, %v997_v13  ;;  %v2020_v25 = vmul.f32 %v1508_v14, %v1508_v14  ;;  %v498_v13 = vld [vmem:[%s8089_s18 + $0x6f0] sm:$0xff] }
 0x20e   : > { %v1010_v14 = vld [vmem:[%s8095_s20 + $0x6f0] sm:$0xff] }
 0x20f   : > { %v2519_v35 = vadd.f32 %v2518_v30, %v2007_v24  ;;  %v1510_v24 = vsub.f32 %v486_v17, %v998_v18  ;;  %v2021_v30 = vmul.f32 %v1509_v19, %v1509_v19  ;;  %v499_v18 = vld [vmem:[%s8089_s18 + $0x6f8] sm:$0xff] }
 0x210   : > { %v1011_v19 = vld [vmem:[%s8095_s20 + $0x6f8] sm:$0xff] }
 0x211   : > { %v2520_v40 = vadd.f32 %v2519_v35, %v2008_v29  ;;  %v1511_v29 = vsub.f32 %v487_v22, %v999_v23  ;;  %v2022_v35 = vmul.f32 %v1510_v24, %v1510_v24  ;;  %v500_v23 = vld [vmem:[%s8089_s18 + $0x700] sm:$0xff] }
 0x212   : > { %v1012_v24 = vld [vmem:[%s8095_s20 + $0x700] sm:$0xff] }
 0x213   : > { %v2521_v45 = vadd.f32 %v2520_v40, %v2009_v34  ;;  %v1512_v34 = vsub.f32 %v488_v27, %v1000_v28  ;;  %v2023_v40 = vmul.f32 %v1511_v29, %v1511_v29  ;;  %v501_v28 = vld [vmem:[%s8089_s18 + $0x708] sm:$0xff] }
 0x214   : > { %v1013_v29 = vld [vmem:[%s8095_s20 + $0x708] sm:$0xff] }
 0x215   : > { %v2522_v50 = vadd.f32 %v2521_v45, %v2010_v39  ;;  %v1513_v39 = vsub.f32 %v489_v32, %v1001_v33  ;;  %v2024_v45 = vmul.f32 %v1512_v34, %v1512_v34  ;;  %v502_v33 = vld [vmem:[%s8089_s18 + $0x710] sm:$0xff] }
 0x216   : > { %v1014_v34 = vld [vmem:[%s8095_s20 + $0x710] sm:$0xff] }
 0x217   : > { %v2523_v55 = vadd.f32 %v2522_v50, %v2011_v44  ;;  %v1514_v44 = vsub.f32 %v490_v37, %v1002_v38  ;;  %v2025_v50 = vmul.f32 %v1513_v39, %v1513_v39  ;;  %v503_v38 = vld [vmem:[%s8089_s18 + $0x718] sm:$0xff] }
 0x218   : > { %v1015_v39 = vld [vmem:[%s8095_s20 + $0x718] sm:$0xff] }
 0x219   : > { %v2524_v60 = vadd.f32 %v2523_v55, %v2012_v49  ;;  %v1515_v49 = vsub.f32 %v491_v42, %v1003_v43  ;;  %v2026_v55 = vmul.f32 %v1514_v44, %v1514_v44  ;;  %v504_v43 = vld [vmem:[%s8089_s18 + $0x720] sm:$0xff] }
 0x21a   : > { %v1016_v44 = vld [vmem:[%s8095_s20 + $0x720] sm:$0xff] }
 0x21b   : > { %v2525_v1 = vadd.f32 %v2524_v60, %v2013_v54  ;;  %v1516_v54 = vsub.f32 %v492_v47, %v1004_v48  ;;  %v2027_v60 = vmul.f32 %v1515_v49, %v1515_v49  ;;  %v505_v48 = vld [vmem:[%s8089_s18 + $0x728] sm:$0xff] }
 0x21c   : > { %v1017_v49 = vld [vmem:[%s8095_s20 + $0x728] sm:$0xff] }
 0x21d   : > { %v2526_v6 = vadd.f32 %v2525_v1, %v2014_v59  ;;  %v1517_v59 = vsub.f32 %v493_v52, %v1005_v53  ;;  %v2028_v1 = vmul.f32 %v1516_v54, %v1516_v54  ;;  %v506_v53 = vld [vmem:[%s8089_s18 + $0x730] sm:$0xff] }
 0x21e   : > { %v1018_v54 = vld [vmem:[%s8095_s20 + $0x730] sm:$0xff] }
 0x21f   : > { %v2527_v11 = vadd.f32 %v2526_v6, %v2015_v0  ;;  %v1518_v0 = vsub.f32 %v494_v57, %v1006_v58  ;;  %v2029_v6 = vmul.f32 %v1517_v59, %v1517_v59  ;;  %v507_v58 = vld [vmem:[%s8089_s18 + $0x738] sm:$0xff] }
 0x220   : > { %v1019_v59 = vld [vmem:[%s8095_s20 + $0x738] sm:$0xff] }
 0x221   : > { %v2528_v16 = vadd.f32 %v2527_v11, %v2016_v5  ;;  %v1519_v5 = vsub.f32 %v495_v62, %v1007_v63  ;;  %v2030_v11 = vmul.f32 %v1518_v0, %v1518_v0  ;;  %v508_v63 = vld [vmem:[%s8089_s18 + $0x740] sm:$0xff] }
 0x222   : > { %v1020_v0 = vld [vmem:[%s8095_s20 + $0x740] sm:$0xff] }
 0x223   : > { %v2529_v21 = vadd.f32 %v2528_v16, %v2017_v10  ;;  %v1520_v10 = vsub.f32 %v496_v3, %v1008_v4  ;;  %v2031_v16 = vmul.f32 %v1519_v5, %v1519_v5  ;;  %v509_v4 = vld [vmem:[%s8089_s18 + $0x748] sm:$0xff] }
 0x224   : > { %v1021_v5 = vld [vmem:[%s8095_s20 + $0x748] sm:$0xff] }
 0x225   : > { %v2530_v26 = vadd.f32 %v2529_v21, %v2018_v15  ;;  %v1521_v15 = vsub.f32 %v497_v8, %v1009_v9  ;;  %v2032_v21 = vmul.f32 %v1520_v10, %v1520_v10  ;;  %v510_v9 = vld [vmem:[%s8089_s18 + $0x750] sm:$0xff] }
 0x226   : > { %v1022_v10 = vld [vmem:[%s8095_s20 + $0x750] sm:$0xff] }
 0x227   : > { %v2531_v31 = vadd.f32 %v2530_v26, %v2019_v20  ;;  %v1522_v20 = vsub.f32 %v498_v13, %v1010_v14  ;;  %v2033_v26 = vmul.f32 %v1521_v15, %v1521_v15  ;;  %v511_v14 = vld [vmem:[%s8089_s18 + $0x758] sm:$0xff] }
 0x228   : > { %v1023_v15 = vld [vmem:[%s8095_s20 + $0x758] sm:$0xff] }
 0x229   : > { %v2532_v36 = vadd.f32 %v2531_v31, %v2020_v25  ;;  %v1523_v25 = vsub.f32 %v499_v18, %v1011_v19  ;;  %v2034_v31 = vmul.f32 %v1522_v20, %v1522_v20  ;;  %v512_v19 = vld [vmem:[%s8089_s18 + $0x760] sm:$0xff] }
 0x22a   : > { %v1024_v20 = vld [vmem:[%s8095_s20 + $0x760] sm:$0xff] }
 0x22b   : > { %v2533_v41 = vadd.f32 %v2532_v36, %v2021_v30  ;;  %v1524_v30 = vsub.f32 %v500_v23, %v1012_v24  ;;  %v2035_v36 = vmul.f32 %v1523_v25, %v1523_v25  ;;  %v513_v24 = vld [vmem:[%s8089_s18 + $0x768] sm:$0xff] }
 0x22c   : > { %v1025_v25 = vld [vmem:[%s8095_s20 + $0x768] sm:$0xff] }
 0x22d   : > { %v2534_v46 = vadd.f32 %v2533_v41, %v2022_v35  ;;  %v1525_v35 = vsub.f32 %v501_v28, %v1013_v29  ;;  %v2036_v41 = vmul.f32 %v1524_v30, %v1524_v30  ;;  %v514_v29 = vld [vmem:[%s8089_s18 + $0x770] sm:$0xff] }
 0x22e   : > { %v1026_v30 = vld [vmem:[%s8095_s20 + $0x770] sm:$0xff] }
 0x22f   : > { %v2535_v51 = vadd.f32 %v2534_v46, %v2023_v40  ;;  %v1526_v40 = vsub.f32 %v502_v33, %v1014_v34  ;;  %v2037_v46 = vmul.f32 %v1525_v35, %v1525_v35  ;;  %v515_v34 = vld [vmem:[%s8089_s18 + $0x778] sm:$0xff] }
 0x230   : > { %v1027_v35 = vld [vmem:[%s8095_s20 + $0x778] sm:$0xff] }
 0x231   : > { %v2536_v56 = vadd.f32 %v2535_v51, %v2024_v45  ;;  %v1527_v45 = vsub.f32 %v503_v38, %v1015_v39  ;;  %v2038_v51 = vmul.f32 %v1526_v40, %v1526_v40  ;;  %v516_v39 = vld [vmem:[%s8089_s18 + $0x780] sm:$0xff] }
 0x232   : > { %v1028_v40 = vld [vmem:[%s8095_s20 + $0x780] sm:$0xff] }
 0x233   : > { %v2537_v61 = vadd.f32 %v2536_v56, %v2025_v50  ;;  %v1528_v50 = vsub.f32 %v504_v43, %v1016_v44  ;;  %v2039_v56 = vmul.f32 %v1527_v45, %v1527_v45  ;;  %v517_v44 = vld [vmem:[%s8089_s18 + $0x788] sm:$0xff] }
 0x234   : > { %v1029_v45 = vld [vmem:[%s8095_s20 + $0x788] sm:$0xff] }
 0x235   : > { %v2538_v2 = vadd.f32 %v2537_v61, %v2026_v55  ;;  %v1529_v55 = vsub.f32 %v505_v48, %v1017_v49  ;;  %v2040_v61 = vmul.f32 %v1528_v50, %v1528_v50  ;;  %v518_v49 = vld [vmem:[%s8089_s18 + $0x790] sm:$0xff] }
 0x236   : > { %v1030_v50 = vld [vmem:[%s8095_s20 + $0x790] sm:$0xff] }
 0x237   : > { %v2539_v7 = vadd.f32 %v2538_v2, %v2027_v60  ;;  %v1530_v60 = vsub.f32 %v506_v53, %v1018_v54  ;;  %v2041_v2 = vmul.f32 %v1529_v55, %v1529_v55  ;;  %v519_v54 = vld [vmem:[%s8089_s18 + $0x798] sm:$0xff] }
 0x238   : > { %v1031_v55 = vld [vmem:[%s8095_s20 + $0x798] sm:$0xff] }
 0x239   : > { %v2540_v12 = vadd.f32 %v2539_v7, %v2028_v1  ;;  %v1531_v1 = vsub.f32 %v507_v58, %v1019_v59  ;;  %v2042_v7 = vmul.f32 %v1530_v60, %v1530_v60  ;;  %v520_v59 = vld [vmem:[%s8089_s18 + $0x7a0] sm:$0xff] }
 0x23a   : > { %v1032_v60 = vld [vmem:[%s8095_s20 + $0x7a0] sm:$0xff] }
 0x23b   : > { %v2541_v17 = vadd.f32 %v2540_v12, %v2029_v6  ;;  %v1532_v6 = vsub.f32 %v508_v63, %v1020_v0  ;;  %v2043_v12 = vmul.f32 %v1531_v1, %v1531_v1  ;;  %v521_v0 = vld [vmem:[%s8089_s18 + $0x7a8] sm:$0xff] }
 0x23c   : > { %v1033_v1 = vld [vmem:[%s8095_s20 + $0x7a8] sm:$0xff] }
 0x23d   : > { %v2542_v22 = vadd.f32 %v2541_v17, %v2030_v11  ;;  %v1533_v11 = vsub.f32 %v509_v4, %v1021_v5  ;;  %v2044_v17 = vmul.f32 %v1532_v6, %v1532_v6  ;;  %v522_v5 = vld [vmem:[%s8089_s18 + $0x7b0] sm:$0xff] }
 0x23e   : > { %v1034_v6 = vld [vmem:[%s8095_s20 + $0x7b0] sm:$0xff] }
 0x23f   : > { %v2543_v27 = vadd.f32 %v2542_v22, %v2031_v16  ;;  %v1534_v16 = vsub.f32 %v510_v9, %v1022_v10  ;;  %v2045_v22 = vmul.f32 %v1533_v11, %v1533_v11  ;;  %v523_v10 = vld [vmem:[%s8089_s18 + $0x7b8] sm:$0xff] }
 0x240   : > { %v1035_v11 = vld [vmem:[%s8095_s20 + $0x7b8] sm:$0xff] }
 0x241   : > { %v2544_v32 = vadd.f32 %v2543_v27, %v2032_v21  ;;  %v1535_v21 = vsub.f32 %v511_v14, %v1023_v15  ;;  %v2046_v27 = vmul.f32 %v1534_v16, %v1534_v16  ;;  %v524_v15 = vld [vmem:[%s8089_s18 + $0x7c0] sm:$0xff] }
 0x242   : > { %v1036_v16 = vld [vmem:[%s8095_s20 + $0x7c0] sm:$0xff] }
 0x243   : > { %v2545_v37 = vadd.f32 %v2544_v32, %v2033_v26  ;;  %v1536_v26 = vsub.f32 %v512_v19, %v1024_v20  ;;  %v2047_v32 = vmul.f32 %v1535_v21, %v1535_v21  ;;  %v525_v20 = vld [vmem:[%s8089_s18 + $0x7c8] sm:$0xff] }
 0x244   : > { %v1037_v21 = vld [vmem:[%s8095_s20 + $0x7c8] sm:$0xff] }
 0x245   : > { %v2546_v42 = vadd.f32 %v2545_v37, %v2034_v31  ;;  %v1537_v31 = vsub.f32 %v513_v24, %v1025_v25  ;;  %v2048_v37 = vmul.f32 %v1536_v26, %v1536_v26  ;;  %v526_v25 = vld [vmem:[%s8089_s18 + $0x7d0] sm:$0xff] }
 0x246   : > { %v1038_v26 = vld [vmem:[%s8095_s20 + $0x7d0] sm:$0xff] }
 0x247   : > { %v2547_v47 = vadd.f32 %v2546_v42, %v2035_v36  ;;  %v1538_v36 = vsub.f32 %v514_v29, %v1026_v30  ;;  %v2049_v42 = vmul.f32 %v1537_v31, %v1537_v31  ;;  %v527_v30 = vld [vmem:[%s8089_s18 + $0x7d8] sm:$0xff] }
 0x248   : > { %v1039_v31 = vld [vmem:[%s8095_s20 + $0x7d8] sm:$0xff] }
 0x249   : > { %v2548_v52 = vadd.f32 %v2547_v47, %v2036_v41  ;;  %v1539_v41 = vsub.f32 %v515_v34, %v1027_v35  ;;  %v2050_v47 = vmul.f32 %v1538_v36, %v1538_v36  ;;  %v528_v35 = vld [vmem:[%s8089_s18 + $0x7e0] sm:$0xff] }
 0x24a   : > { %v1040_v36 = vld [vmem:[%s8095_s20 + $0x7e0] sm:$0xff] }
 0x24b   : > { %v2549_v57 = vadd.f32 %v2548_v52, %v2037_v46  ;;  %v1540_v46 = vsub.f32 %v516_v39, %v1028_v40  ;;  %v2051_v52 = vmul.f32 %v1539_v41, %v1539_v41  ;;  %v529_v40 = vld [vmem:[%s8089_s18 + $0x7e8] sm:$0xff] }
 0x24c   : > { %v1041_v41 = vld [vmem:[%s8095_s20 + $0x7e8] sm:$0xff] }
 0x24d   : > { %v2550_v62 = vadd.f32 %v2549_v57, %v2038_v51  ;;  %v1541_v51 = vsub.f32 %v517_v44, %v1029_v45  ;;  %v2052_v57 = vmul.f32 %v1540_v46, %v1540_v46  ;;  %v530_v45 = vld [vmem:[%s8089_s18 + $0x7f0] sm:$0xff] }
 0x24e   : > { %v1042_v46 = vld [vmem:[%s8095_s20 + $0x7f0] sm:$0xff] }
 0x24f   : > { %v2551_v3 = vadd.f32 %v2550_v62, %v2039_v56  ;;  %v1542_v56 = vsub.f32 %v518_v49, %v1030_v50  ;;  %v2053_v62 = vmul.f32 %v1541_v51, %v1541_v51  ;;  %v531_v50 = vld [vmem:[%s8089_s18 + $0x7f8] sm:$0xff] }
 0x250   : > { %v1043_v51 = vld [vmem:[%s8095_s20 + $0x7f8] sm:$0xff] }
 0x251   : > { %v2552_v8 = vadd.f32 %v2551_v3, %v2040_v61  ;;  %v1543_v61 = vsub.f32 %v519_v54, %v1031_v55  ;;  %v2054_v3 = vmul.f32 %v1542_v56, %v1542_v56  ;;  %v532_v55 = vld [vmem:[%s8089_s18 + $0x800] sm:$0xff] }
 0x252   : > { %v1044_v56 = vld [vmem:[%s8095_s20 + $0x800] sm:$0xff] }
 0x253   : > { %v2553_v13 = vadd.f32 %v2552_v8, %v2041_v2  ;;  %v1544_v2 = vsub.f32 %v520_v59, %v1032_v60  ;;  %v2055_v8 = vmul.f32 %v1543_v61, %v1543_v61  ;;  %v533_v60 = vld [vmem:[%s8089_s18 + $0x808] sm:$0xff] }
 0x254   : > { %v1045_v61 = vld [vmem:[%s8095_s20 + $0x808] sm:$0xff] }
 0x255   : > { %v2554_v18 = vadd.f32 %v2553_v13, %v2042_v7  ;;  %v1545_v7 = vsub.f32 %v521_v0, %v1033_v1  ;;  %v2056_v13 = vmul.f32 %v1544_v2, %v1544_v2  ;;  %v534_v1 = vld [vmem:[%s8089_s18 + $0x810] sm:$0xff] }
 0x256   : > { %v1046_v2 = vld [vmem:[%s8095_s20 + $0x810] sm:$0xff] }
 0x257   : > { %v2555_v23 = vadd.f32 %v2554_v18, %v2043_v12  ;;  %v1546_v12 = vsub.f32 %v522_v5, %v1034_v6  ;;  %v2057_v18 = vmul.f32 %v1545_v7, %v1545_v7  ;;  %v535_v6 = vld [vmem:[%s8089_s18 + $0x818] sm:$0xff] }
 0x258   : > { %v1047_v7 = vld [vmem:[%s8095_s20 + $0x818] sm:$0xff] }
 0x259   : > { %v2556_v28 = vadd.f32 %v2555_v23, %v2044_v17  ;;  %v1547_v17 = vsub.f32 %v523_v10, %v1035_v11  ;;  %v2058_v23 = vmul.f32 %v1546_v12, %v1546_v12  ;;  %v536_v11 = vld [vmem:[%s8089_s18 + $0x820] sm:$0xff] }
 0x25a   : > { %v1048_v12 = vld [vmem:[%s8095_s20 + $0x820] sm:$0xff] }
 0x25b   : > { %v2557_v33 = vadd.f32 %v2556_v28, %v2045_v22  ;;  %v1548_v22 = vsub.f32 %v524_v15, %v1036_v16  ;;  %v2059_v28 = vmul.f32 %v1547_v17, %v1547_v17  ;;  %v537_v16 = vld [vmem:[%s8089_s18 + $0x828] sm:$0xff] }
 0x25c   : > { %v1049_v17 = vld [vmem:[%s8095_s20 + $0x828] sm:$0xff] }
 0x25d   : > { %v2558_v38 = vadd.f32 %v2557_v33, %v2046_v27  ;;  %v1549_v27 = vsub.f32 %v525_v20, %v1037_v21  ;;  %v2060_v33 = vmul.f32 %v1548_v22, %v1548_v22  ;;  %v538_v21 = vld [vmem:[%s8089_s18 + $0x830] sm:$0xff] }
 0x25e   : > { %v1050_v22 = vld [vmem:[%s8095_s20 + $0x830] sm:$0xff] }
 0x25f   : > { %v2559_v43 = vadd.f32 %v2558_v38, %v2047_v32  ;;  %v1550_v32 = vsub.f32 %v526_v25, %v1038_v26  ;;  %v2061_v38 = vmul.f32 %v1549_v27, %v1549_v27  ;;  %v539_v26 = vld [vmem:[%s8089_s18 + $0x838] sm:$0xff] }
 0x260   : > { %v1051_v27 = vld [vmem:[%s8095_s20 + $0x838] sm:$0xff] }
 0x261   : > { %v2560_v48 = vadd.f32 %v2559_v43, %v2048_v37  ;;  %v1551_v37 = vsub.f32 %v527_v30, %v1039_v31  ;;  %v2062_v43 = vmul.f32 %v1550_v32, %v1550_v32  ;;  %v540_v31 = vld [vmem:[%s8089_s18 + $0x840] sm:$0xff] }
 0x262   : > { %v1052_v32 = vld [vmem:[%s8095_s20 + $0x840] sm:$0xff] }
 0x263   : > { %v2561_v53 = vadd.f32 %v2560_v48, %v2049_v42  ;;  %v1552_v42 = vsub.f32 %v528_v35, %v1040_v36  ;;  %v2063_v48 = vmul.f32 %v1551_v37, %v1551_v37  ;;  %v541_v36 = vld [vmem:[%s8089_s18 + $0x848] sm:$0xff] }
 0x264   : > { %v1053_v37 = vld [vmem:[%s8095_s20 + $0x848] sm:$0xff] }
 0x265   : > { %v2562_v58 = vadd.f32 %v2561_v53, %v2050_v47  ;;  %v1553_v47 = vsub.f32 %v529_v40, %v1041_v41  ;;  %v2064_v53 = vmul.f32 %v1552_v42, %v1552_v42  ;;  %v542_v41 = vld [vmem:[%s8089_s18 + $0x850] sm:$0xff] }
 0x266   : > { %v1054_v42 = vld [vmem:[%s8095_s20 + $0x850] sm:$0xff] }
 0x267   : > { %v2563_v63 = vadd.f32 %v2562_v58, %v2051_v52  ;;  %v1554_v52 = vsub.f32 %v530_v45, %v1042_v46  ;;  %v2065_v58 = vmul.f32 %v1553_v47, %v1553_v47  ;;  %v543_v46 = vld [vmem:[%s8089_s18 + $0x858] sm:$0xff] }
 0x268   : > { %v1055_v47 = vld [vmem:[%s8095_s20 + $0x858] sm:$0xff] }
 0x269   : > { %v2564_v4 = vadd.f32 %v2563_v63, %v2052_v57  ;;  %v1555_v57 = vsub.f32 %v531_v50, %v1043_v51  ;;  %v2066_v63 = vmul.f32 %v1554_v52, %v1554_v52  ;;  %v544_v51 = vld [vmem:[%s8089_s18 + $0x860] sm:$0xff] }
 0x26a   : > { %v1056_v52 = vld [vmem:[%s8095_s20 + $0x860] sm:$0xff] }
 0x26b   : > { %v2565_v9 = vadd.f32 %v2564_v4, %v2053_v62  ;;  %v1556_v62 = vsub.f32 %v532_v55, %v1044_v56  ;;  %v2067_v4 = vmul.f32 %v1555_v57, %v1555_v57  ;;  %v545_v56 = vld [vmem:[%s8089_s18 + $0x868] sm:$0xff] }
 0x26c   : > { %v1057_v57 = vld [vmem:[%s8095_s20 + $0x868] sm:$0xff] }
 0x26d   : > { %v2566_v14 = vadd.f32 %v2565_v9, %v2054_v3  ;;  %v1557_v3 = vsub.f32 %v533_v60, %v1045_v61  ;;  %v2068_v9 = vmul.f32 %v1556_v62, %v1556_v62  ;;  %v546_v61 = vld [vmem:[%s8089_s18 + $0x870] sm:$0xff] }
 0x26e   : > { %v1058_v62 = vld [vmem:[%s8095_s20 + $0x870] sm:$0xff] }
 0x26f   : > { %v2567_v19 = vadd.f32 %v2566_v14, %v2055_v8  ;;  %v1558_v8 = vsub.f32 %v534_v1, %v1046_v2  ;;  %v2069_v14 = vmul.f32 %v1557_v3, %v1557_v3  ;;  %v547_v2 = vld [vmem:[%s8089_s18 + $0x878] sm:$0xff] }
 0x270   : > { %v1059_v3 = vld [vmem:[%s8095_s20 + $0x878] sm:$0xff] }
 0x271   : > { %v2568_v24 = vadd.f32 %v2567_v19, %v2056_v13  ;;  %v1559_v13 = vsub.f32 %v535_v6, %v1047_v7  ;;  %v2070_v19 = vmul.f32 %v1558_v8, %v1558_v8  ;;  %v548_v7 = vld [vmem:[%s8089_s18 + $0x880] sm:$0xff] }
 0x272   : > { %v1060_v8 = vld [vmem:[%s8095_s20 + $0x880] sm:$0xff] }
 0x273   : > { %v2569_v29 = vadd.f32 %v2568_v24, %v2057_v18  ;;  %v1560_v18 = vsub.f32 %v536_v11, %v1048_v12  ;;  %v2071_v24 = vmul.f32 %v1559_v13, %v1559_v13  ;;  %v549_v12 = vld [vmem:[%s8089_s18 + $0x888] sm:$0xff] }
 0x274   : > { %v1061_v13 = vld [vmem:[%s8095_s20 + $0x888] sm:$0xff] }
 0x275   : > { %v2570_v34 = vadd.f32 %v2569_v29, %v2058_v23  ;;  %v1561_v23 = vsub.f32 %v537_v16, %v1049_v17  ;;  %v2072_v29 = vmul.f32 %v1560_v18, %v1560_v18  ;;  %v550_v17 = vld [vmem:[%s8089_s18 + $0x890] sm:$0xff] }
 0x276   : > { %v1062_v18 = vld [vmem:[%s8095_s20 + $0x890] sm:$0xff] }
 0x277   : > { %v2571_v39 = vadd.f32 %v2570_v34, %v2059_v28  ;;  %v1562_v28 = vsub.f32 %v538_v21, %v1050_v22  ;;  %v2073_v34 = vmul.f32 %v1561_v23, %v1561_v23  ;;  %v551_v22 = vld [vmem:[%s8089_s18 + $0x898] sm:$0xff] }
 0x278   : > { %v1063_v23 = vld [vmem:[%s8095_s20 + $0x898] sm:$0xff] }
 0x279   : > { %v2572_v44 = vadd.f32 %v2571_v39, %v2060_v33  ;;  %v1563_v33 = vsub.f32 %v539_v26, %v1051_v27  ;;  %v2074_v39 = vmul.f32 %v1562_v28, %v1562_v28  ;;  %v552_v27 = vld [vmem:[%s8089_s18 + $0x8a0] sm:$0xff] }
 0x27a   : > { %v1064_v28 = vld [vmem:[%s8095_s20 + $0x8a0] sm:$0xff] }
 0x27b   : > { %v2573_v49 = vadd.f32 %v2572_v44, %v2061_v38  ;;  %v1564_v38 = vsub.f32 %v540_v31, %v1052_v32  ;;  %v2075_v44 = vmul.f32 %v1563_v33, %v1563_v33  ;;  %v553_v32 = vld [vmem:[%s8089_s18 + $0x8a8] sm:$0xff] }
 0x27c   : > { %v1065_v33 = vld [vmem:[%s8095_s20 + $0x8a8] sm:$0xff] }
 0x27d   : > { %v2574_v54 = vadd.f32 %v2573_v49, %v2062_v43  ;;  %v1565_v43 = vsub.f32 %v541_v36, %v1053_v37  ;;  %v2076_v49 = vmul.f32 %v1564_v38, %v1564_v38  ;;  %v554_v37 = vld [vmem:[%s8089_s18 + $0x8b0] sm:$0xff] }
 0x27e   : > { %v1066_v38 = vld [vmem:[%s8095_s20 + $0x8b0] sm:$0xff] }
 0x27f   : > { %v2575_v59 = vadd.f32 %v2574_v54, %v2063_v48  ;;  %v1566_v48 = vsub.f32 %v542_v41, %v1054_v42  ;;  %v2077_v54 = vmul.f32 %v1565_v43, %v1565_v43  ;;  %v555_v42 = vld [vmem:[%s8089_s18 + $0x8b8] sm:$0xff] }
 0x280   : > { %v1067_v43 = vld [vmem:[%s8095_s20 + $0x8b8] sm:$0xff] }
 0x281   : > { %v2576_v0 = vadd.f32 %v2575_v59, %v2064_v53  ;;  %v1567_v53 = vsub.f32 %v543_v46, %v1055_v47  ;;  %v2078_v59 = vmul.f32 %v1566_v48, %v1566_v48  ;;  %v556_v47 = vld [vmem:[%s8089_s18 + $0x8c0] sm:$0xff] }
 0x282   : > { %v1068_v48 = vld [vmem:[%s8095_s20 + $0x8c0] sm:$0xff] }
 0x283   : > { %v2577_v5 = vadd.f32 %v2576_v0, %v2065_v58  ;;  %v1568_v58 = vsub.f32 %v544_v51, %v1056_v52  ;;  %v2079_v0 = vmul.f32 %v1567_v53, %v1567_v53  ;;  %v557_v52 = vld [vmem:[%s8089_s18 + $0x8c8] sm:$0xff] }
 0x284   : > { %v1069_v53 = vld [vmem:[%s8095_s20 + $0x8c8] sm:$0xff] }
 0x285   : > { %v2578_v10 = vadd.f32 %v2577_v5, %v2066_v63  ;;  %v1569_v63 = vsub.f32 %v545_v56, %v1057_v57  ;;  %v2080_v5 = vmul.f32 %v1568_v58, %v1568_v58  ;;  %v558_v57 = vld [vmem:[%s8089_s18 + $0x8d0] sm:$0xff] }
 0x286   : > { %v1070_v58 = vld [vmem:[%s8095_s20 + $0x8d0] sm:$0xff] }
 0x287   : > { %v2579_v15 = vadd.f32 %v2578_v10, %v2067_v4  ;;  %v1570_v4 = vsub.f32 %v546_v61, %v1058_v62  ;;  %v2081_v10 = vmul.f32 %v1569_v63, %v1569_v63  ;;  %v559_v62 = vld [vmem:[%s8089_s18 + $0x8d8] sm:$0xff] }
 0x288   : > { %v1071_v63 = vld [vmem:[%s8095_s20 + $0x8d8] sm:$0xff] }
 0x289   : > { %v2580_v20 = vadd.f32 %v2579_v15, %v2068_v9  ;;  %v1571_v9 = vsub.f32 %v547_v2, %v1059_v3  ;;  %v2082_v15 = vmul.f32 %v1570_v4, %v1570_v4  ;;  %v560_v3 = vld [vmem:[%s8089_s18 + $0x8e0] sm:$0xff] }
 0x28a   : > { %v1072_v4 = vld [vmem:[%s8095_s20 + $0x8e0] sm:$0xff] }
 0x28b   : > { %v2581_v25 = vadd.f32 %v2580_v20, %v2069_v14  ;;  %v1572_v14 = vsub.f32 %v548_v7, %v1060_v8  ;;  %v2083_v20 = vmul.f32 %v1571_v9, %v1571_v9  ;;  %v561_v8 = vld [vmem:[%s8089_s18 + $0x8e8] sm:$0xff] }
 0x28c   : > { %v1073_v9 = vld [vmem:[%s8095_s20 + $0x8e8] sm:$0xff] }
 0x28d   : > { %v2582_v30 = vadd.f32 %v2581_v25, %v2070_v19  ;;  %v1573_v19 = vsub.f32 %v549_v12, %v1061_v13  ;;  %v2084_v25 = vmul.f32 %v1572_v14, %v1572_v14  ;;  %v562_v13 = vld [vmem:[%s8089_s18 + $0x8f0] sm:$0xff] }
 0x28e   : > { %v1074_v14 = vld [vmem:[%s8095_s20 + $0x8f0] sm:$0xff] }
 0x28f   : > { %v2583_v35 = vadd.f32 %v2582_v30, %v2071_v24  ;;  %v1574_v24 = vsub.f32 %v550_v17, %v1062_v18  ;;  %v2085_v30 = vmul.f32 %v1573_v19, %v1573_v19  ;;  %v563_v18 = vld [vmem:[%s8089_s18 + $0x8f8] sm:$0xff] }
 0x290   : > { %v1075_v19 = vld [vmem:[%s8095_s20 + $0x8f8] sm:$0xff] }
 0x291   : > { %v2584_v40 = vadd.f32 %v2583_v35, %v2072_v29  ;;  %v1575_v29 = vsub.f32 %v551_v22, %v1063_v23  ;;  %v2086_v35 = vmul.f32 %v1574_v24, %v1574_v24  ;;  %v564_v23 = vld [vmem:[%s8089_s18 + $0x900] sm:$0xff] }
 0x292   : > { %v1076_v24 = vld [vmem:[%s8095_s20 + $0x900] sm:$0xff] }
 0x293   : > { %v2585_v45 = vadd.f32 %v2584_v40, %v2073_v34  ;;  %v1576_v34 = vsub.f32 %v552_v27, %v1064_v28  ;;  %v2087_v40 = vmul.f32 %v1575_v29, %v1575_v29  ;;  %v565_v28 = vld [vmem:[%s8089_s18 + $0x908] sm:$0xff] }
 0x294   : > { %v1077_v29 = vld [vmem:[%s8095_s20 + $0x908] sm:$0xff] }
 0x295   : > { %v2586_v50 = vadd.f32 %v2585_v45, %v2074_v39  ;;  %v1577_v39 = vsub.f32 %v553_v32, %v1065_v33  ;;  %v2088_v45 = vmul.f32 %v1576_v34, %v1576_v34  ;;  %v566_v33 = vld [vmem:[%s8089_s18 + $0x910] sm:$0xff] }
 0x296   : > { %v1078_v34 = vld [vmem:[%s8095_s20 + $0x910] sm:$0xff] }
 0x297   : > { %v2587_v55 = vadd.f32 %v2586_v50, %v2075_v44  ;;  %v1578_v44 = vsub.f32 %v554_v37, %v1066_v38  ;;  %v2089_v50 = vmul.f32 %v1577_v39, %v1577_v39  ;;  %v567_v38 = vld [vmem:[%s8089_s18 + $0x918] sm:$0xff] }
 0x298   : > { %v1079_v39 = vld [vmem:[%s8095_s20 + $0x918] sm:$0xff] }
 0x299   : > { %v2588_v60 = vadd.f32 %v2587_v55, %v2076_v49  ;;  %v1579_v49 = vsub.f32 %v555_v42, %v1067_v43  ;;  %v2090_v55 = vmul.f32 %v1578_v44, %v1578_v44  ;;  %v568_v43 = vld [vmem:[%s8089_s18 + $0x920] sm:$0xff] }
 0x29a   : > { %v1080_v44 = vld [vmem:[%s8095_s20 + $0x920] sm:$0xff] }
 0x29b   : > { %v2589_v1 = vadd.f32 %v2588_v60, %v2077_v54  ;;  %v1580_v54 = vsub.f32 %v556_v47, %v1068_v48  ;;  %v2091_v60 = vmul.f32 %v1579_v49, %v1579_v49  ;;  %v569_v48 = vld [vmem:[%s8089_s18 + $0x928] sm:$0xff] }
 0x29c   : > { %v1081_v49 = vld [vmem:[%s8095_s20 + $0x928] sm:$0xff] }
 0x29d   : > { %v2590_v6 = vadd.f32 %v2589_v1, %v2078_v59  ;;  %v1581_v59 = vsub.f32 %v557_v52, %v1069_v53  ;;  %v2092_v1 = vmul.f32 %v1580_v54, %v1580_v54  ;;  %v570_v53 = vld [vmem:[%s8089_s18 + $0x930] sm:$0xff] }
 0x29e   : > { %v1082_v54 = vld [vmem:[%s8095_s20 + $0x930] sm:$0xff] }
 0x29f   : > { %v2591_v11 = vadd.f32 %v2590_v6, %v2079_v0  ;;  %v1582_v0 = vsub.f32 %v558_v57, %v1070_v58  ;;  %v2093_v6 = vmul.f32 %v1581_v59, %v1581_v59  ;;  %v571_v58 = vld [vmem:[%s8089_s18 + $0x938] sm:$0xff] }
 0x2a0   : > { %v1083_v59 = vld [vmem:[%s8095_s20 + $0x938] sm:$0xff] }
 0x2a1   : > { %v2592_v16 = vadd.f32 %v2591_v11, %v2080_v5  ;;  %v1583_v5 = vsub.f32 %v559_v62, %v1071_v63  ;;  %v2094_v11 = vmul.f32 %v1582_v0, %v1582_v0  ;;  %v572_v63 = vld [vmem:[%s8089_s18 + $0x940] sm:$0xff] }
 0x2a2   : > { %v1084_v0 = vld [vmem:[%s8095_s20 + $0x940] sm:$0xff] }
 0x2a3   : > { %v2593_v21 = vadd.f32 %v2592_v16, %v2081_v10  ;;  %v1584_v10 = vsub.f32 %v560_v3, %v1072_v4  ;;  %v2095_v16 = vmul.f32 %v1583_v5, %v1583_v5  ;;  %v573_v4 = vld [vmem:[%s8089_s18 + $0x948] sm:$0xff] }
 0x2a4   : > { %v1085_v5 = vld [vmem:[%s8095_s20 + $0x948] sm:$0xff] }
 0x2a5   : > { %v2594_v26 = vadd.f32 %v2593_v21, %v2082_v15  ;;  %v1585_v15 = vsub.f32 %v561_v8, %v1073_v9  ;;  %v2096_v21 = vmul.f32 %v1584_v10, %v1584_v10  ;;  %v574_v9 = vld [vmem:[%s8089_s18 + $0x950] sm:$0xff] }
 0x2a6   : > { %v1086_v10 = vld [vmem:[%s8095_s20 + $0x950] sm:$0xff] }
 0x2a7   : > { %v2595_v31 = vadd.f32 %v2594_v26, %v2083_v20  ;;  %v1586_v20 = vsub.f32 %v562_v13, %v1074_v14  ;;  %v2097_v26 = vmul.f32 %v1585_v15, %v1585_v15  ;;  %v575_v14 = vld [vmem:[%s8089_s18 + $0x958] sm:$0xff] }
 0x2a8   : > { %v1087_v15 = vld [vmem:[%s8095_s20 + $0x958] sm:$0xff] }
 0x2a9   : > { %v2596_v36 = vadd.f32 %v2595_v31, %v2084_v25  ;;  %v1587_v25 = vsub.f32 %v563_v18, %v1075_v19  ;;  %v2098_v31 = vmul.f32 %v1586_v20, %v1586_v20  ;;  %v576_v19 = vld [vmem:[%s8089_s18 + $0x960] sm:$0xff] }
 0x2aa   : > { %v1088_v20 = vld [vmem:[%s8095_s20 + $0x960] sm:$0xff] }
 0x2ab   : > { %v2597_v41 = vadd.f32 %v2596_v36, %v2085_v30  ;;  %v1588_v30 = vsub.f32 %v564_v23, %v1076_v24  ;;  %v2099_v36 = vmul.f32 %v1587_v25, %v1587_v25  ;;  %v577_v24 = vld [vmem:[%s8089_s18 + $0x968] sm:$0xff] }
 0x2ac   : > { %v1089_v25 = vld [vmem:[%s8095_s20 + $0x968] sm:$0xff] }
 0x2ad   : > { %v2598_v46 = vadd.f32 %v2597_v41, %v2086_v35  ;;  %v1589_v35 = vsub.f32 %v565_v28, %v1077_v29  ;;  %v2100_v41 = vmul.f32 %v1588_v30, %v1588_v30  ;;  %v578_v29 = vld [vmem:[%s8089_s18 + $0x970] sm:$0xff] }
 0x2ae   : > { %v1090_v30 = vld [vmem:[%s8095_s20 + $0x970] sm:$0xff] }
 0x2af   : > { %v2599_v51 = vadd.f32 %v2598_v46, %v2087_v40  ;;  %v1590_v40 = vsub.f32 %v566_v33, %v1078_v34  ;;  %v2101_v46 = vmul.f32 %v1589_v35, %v1589_v35  ;;  %v579_v34 = vld [vmem:[%s8089_s18 + $0x978] sm:$0xff] }
 0x2b0   : > { %v1091_v35 = vld [vmem:[%s8095_s20 + $0x978] sm:$0xff] }
 0x2b1   : > { %v2600_v56 = vadd.f32 %v2599_v51, %v2088_v45  ;;  %v1591_v45 = vsub.f32 %v567_v38, %v1079_v39  ;;  %v2102_v51 = vmul.f32 %v1590_v40, %v1590_v40  ;;  %v580_v39 = vld [vmem:[%s8089_s18 + $0x980] sm:$0xff] }
 0x2b2   : > { %v1092_v40 = vld [vmem:[%s8095_s20 + $0x980] sm:$0xff] }
 0x2b3   : > { %v2601_v61 = vadd.f32 %v2600_v56, %v2089_v50  ;;  %v1592_v50 = vsub.f32 %v568_v43, %v1080_v44  ;;  %v2103_v56 = vmul.f32 %v1591_v45, %v1591_v45  ;;  %v581_v44 = vld [vmem:[%s8089_s18 + $0x988] sm:$0xff] }
 0x2b4   : > { %v1093_v45 = vld [vmem:[%s8095_s20 + $0x988] sm:$0xff] }
 0x2b5   : > { %v2602_v2 = vadd.f32 %v2601_v61, %v2090_v55  ;;  %v1593_v55 = vsub.f32 %v569_v48, %v1081_v49  ;;  %v2104_v61 = vmul.f32 %v1592_v50, %v1592_v50  ;;  %v582_v49 = vld [vmem:[%s8089_s18 + $0x990] sm:$0xff] }
 0x2b6   : > { %v1094_v50 = vld [vmem:[%s8095_s20 + $0x990] sm:$0xff] }
 0x2b7   : > { %v2603_v7 = vadd.f32 %v2602_v2, %v2091_v60  ;;  %v1594_v60 = vsub.f32 %v570_v53, %v1082_v54  ;;  %v2105_v2 = vmul.f32 %v1593_v55, %v1593_v55  ;;  %v583_v54 = vld [vmem:[%s8089_s18 + $0x998] sm:$0xff] }
 0x2b8   : > { %v1095_v55 = vld [vmem:[%s8095_s20 + $0x998] sm:$0xff] }
 0x2b9   : > { %v2604_v12 = vadd.f32 %v2603_v7, %v2092_v1  ;;  %v1595_v1 = vsub.f32 %v571_v58, %v1083_v59  ;;  %v2106_v7 = vmul.f32 %v1594_v60, %v1594_v60  ;;  %v584_v59 = vld [vmem:[%s8089_s18 + $0x9a0] sm:$0xff] }
 0x2ba   : > { %v1096_v60 = vld [vmem:[%s8095_s20 + $0x9a0] sm:$0xff] }
 0x2bb   : > { %v2605_v17 = vadd.f32 %v2604_v12, %v2093_v6  ;;  %v1596_v6 = vsub.f32 %v572_v63, %v1084_v0  ;;  %v2107_v12 = vmul.f32 %v1595_v1, %v1595_v1  ;;  %v585_v0 = vld [vmem:[%s8089_s18 + $0x9a8] sm:$0xff] }
 0x2bc   : > { %v1097_v1 = vld [vmem:[%s8095_s20 + $0x9a8] sm:$0xff] }
 0x2bd   : > { %v2606_v22 = vadd.f32 %v2605_v17, %v2094_v11  ;;  %v1597_v11 = vsub.f32 %v573_v4, %v1085_v5  ;;  %v2108_v17 = vmul.f32 %v1596_v6, %v1596_v6  ;;  %v586_v5 = vld [vmem:[%s8089_s18 + $0x9b0] sm:$0xff] }
 0x2be   : > { %v1098_v6 = vld [vmem:[%s8095_s20 + $0x9b0] sm:$0xff] }
 0x2bf   : > { %v2607_v27 = vadd.f32 %v2606_v22, %v2095_v16  ;;  %v1598_v16 = vsub.f32 %v574_v9, %v1086_v10  ;;  %v2109_v22 = vmul.f32 %v1597_v11, %v1597_v11  ;;  %v587_v10 = vld [vmem:[%s8089_s18 + $0x9b8] sm:$0xff] }
 0x2c0   : > { %v1099_v11 = vld [vmem:[%s8095_s20 + $0x9b8] sm:$0xff] }
 0x2c1   : > { %v2608_v32 = vadd.f32 %v2607_v27, %v2096_v21  ;;  %v1599_v21 = vsub.f32 %v575_v14, %v1087_v15  ;;  %v2110_v27 = vmul.f32 %v1598_v16, %v1598_v16  ;;  %v588_v15 = vld [vmem:[%s8089_s18 + $0x9c0] sm:$0xff] }
 0x2c2   : > { %v1100_v16 = vld [vmem:[%s8095_s20 + $0x9c0] sm:$0xff] }
 0x2c3   : > { %v2609_v37 = vadd.f32 %v2608_v32, %v2097_v26  ;;  %v1600_v26 = vsub.f32 %v576_v19, %v1088_v20  ;;  %v2111_v32 = vmul.f32 %v1599_v21, %v1599_v21  ;;  %v589_v20 = vld [vmem:[%s8089_s18 + $0x9c8] sm:$0xff] }
 0x2c4   : > { %v1101_v21 = vld [vmem:[%s8095_s20 + $0x9c8] sm:$0xff] }
 0x2c5   : > { %v2610_v42 = vadd.f32 %v2609_v37, %v2098_v31  ;;  %v1601_v31 = vsub.f32 %v577_v24, %v1089_v25  ;;  %v2112_v37 = vmul.f32 %v1600_v26, %v1600_v26  ;;  %v590_v25 = vld [vmem:[%s8089_s18 + $0x9d0] sm:$0xff] }
 0x2c6   : > { %v1102_v26 = vld [vmem:[%s8095_s20 + $0x9d0] sm:$0xff] }
 0x2c7   : > { %v2611_v47 = vadd.f32 %v2610_v42, %v2099_v36  ;;  %v1602_v36 = vsub.f32 %v578_v29, %v1090_v30  ;;  %v2113_v42 = vmul.f32 %v1601_v31, %v1601_v31  ;;  %v591_v30 = vld [vmem:[%s8089_s18 + $0x9d8] sm:$0xff] }
 0x2c8   : > { %v1103_v31 = vld [vmem:[%s8095_s20 + $0x9d8] sm:$0xff] }
 0x2c9   : > { %v2612_v52 = vadd.f32 %v2611_v47, %v2100_v41  ;;  %v1603_v41 = vsub.f32 %v579_v34, %v1091_v35  ;;  %v2114_v47 = vmul.f32 %v1602_v36, %v1602_v36  ;;  %v592_v35 = vld [vmem:[%s8089_s18 + $0x9e0] sm:$0xff] }
 0x2ca   : > { %v1104_v36 = vld [vmem:[%s8095_s20 + $0x9e0] sm:$0xff] }
 0x2cb   : > { %v2613_v57 = vadd.f32 %v2612_v52, %v2101_v46  ;;  %v1604_v46 = vsub.f32 %v580_v39, %v1092_v40  ;;  %v2115_v52 = vmul.f32 %v1603_v41, %v1603_v41  ;;  %v593_v40 = vld [vmem:[%s8089_s18 + $0x9e8] sm:$0xff] }
 0x2cc   : > { %v1105_v41 = vld [vmem:[%s8095_s20 + $0x9e8] sm:$0xff] }
 0x2cd   : > { %v2614_v62 = vadd.f32 %v2613_v57, %v2102_v51  ;;  %v1605_v51 = vsub.f32 %v581_v44, %v1093_v45  ;;  %v2116_v57 = vmul.f32 %v1604_v46, %v1604_v46  ;;  %v594_v45 = vld [vmem:[%s8089_s18 + $0x9f0] sm:$0xff] }
 0x2ce   : > { %v1106_v46 = vld [vmem:[%s8095_s20 + $0x9f0] sm:$0xff] }
 0x2cf   : > { %v2615_v3 = vadd.f32 %v2614_v62, %v2103_v56  ;;  %v1606_v56 = vsub.f32 %v582_v49, %v1094_v50  ;;  %v2117_v62 = vmul.f32 %v1605_v51, %v1605_v51  ;;  %v595_v50 = vld [vmem:[%s8089_s18 + $0x9f8] sm:$0xff] }
 0x2d0   : > { %v1107_v51 = vld [vmem:[%s8095_s20 + $0x9f8] sm:$0xff] }
 0x2d1   : > { %v2616_v8 = vadd.f32 %v2615_v3, %v2104_v61  ;;  %v1607_v61 = vsub.f32 %v583_v54, %v1095_v55  ;;  %v2118_v3 = vmul.f32 %v1606_v56, %v1606_v56  ;;  %v596_v55 = vld [vmem:[%s8089_s18 + $0xa00] sm:$0xff] }
 0x2d2   : > { %v1108_v56 = vld [vmem:[%s8095_s20 + $0xa00] sm:$0xff] }
 0x2d3   : > { %v2617_v13 = vadd.f32 %v2616_v8, %v2105_v2  ;;  %v1608_v2 = vsub.f32 %v584_v59, %v1096_v60  ;;  %v2119_v8 = vmul.f32 %v1607_v61, %v1607_v61  ;;  %v597_v60 = vld [vmem:[%s8089_s18 + $0xa08] sm:$0xff] }
 0x2d4   : > { %v1109_v61 = vld [vmem:[%s8095_s20 + $0xa08] sm:$0xff] }
 0x2d5   : > { %v2618_v18 = vadd.f32 %v2617_v13, %v2106_v7  ;;  %v1609_v7 = vsub.f32 %v585_v0, %v1097_v1  ;;  %v2120_v13 = vmul.f32 %v1608_v2, %v1608_v2  ;;  %v598_v1 = vld [vmem:[%s8089_s18 + $0xa10] sm:$0xff] }
 0x2d6   : > { %v1110_v2 = vld [vmem:[%s8095_s20 + $0xa10] sm:$0xff] }
 0x2d7   : > { %v2619_v23 = vadd.f32 %v2618_v18, %v2107_v12  ;;  %v1610_v12 = vsub.f32 %v586_v5, %v1098_v6  ;;  %v2121_v18 = vmul.f32 %v1609_v7, %v1609_v7  ;;  %v599_v6 = vld [vmem:[%s8089_s18 + $0xa18] sm:$0xff] }
 0x2d8   : > { %v1111_v7 = vld [vmem:[%s8095_s20 + $0xa18] sm:$0xff] }
 0x2d9   : > { %v2620_v28 = vadd.f32 %v2619_v23, %v2108_v17  ;;  %v1611_v17 = vsub.f32 %v587_v10, %v1099_v11  ;;  %v2122_v23 = vmul.f32 %v1610_v12, %v1610_v12  ;;  %v600_v11 = vld [vmem:[%s8089_s18 + $0xa20] sm:$0xff] }
 0x2da   : > { %v1112_v12 = vld [vmem:[%s8095_s20 + $0xa20] sm:$0xff] }
 0x2db   : > { %v2621_v33 = vadd.f32 %v2620_v28, %v2109_v22  ;;  %v1612_v22 = vsub.f32 %v588_v15, %v1100_v16  ;;  %v2123_v28 = vmul.f32 %v1611_v17, %v1611_v17  ;;  %v601_v16 = vld [vmem:[%s8089_s18 + $0xa28] sm:$0xff] }
 0x2dc   : > { %v1113_v17 = vld [vmem:[%s8095_s20 + $0xa28] sm:$0xff] }
 0x2dd   : > { %v2622_v38 = vadd.f32 %v2621_v33, %v2110_v27  ;;  %v1613_v27 = vsub.f32 %v589_v20, %v1101_v21  ;;  %v2124_v33 = vmul.f32 %v1612_v22, %v1612_v22  ;;  %v602_v21 = vld [vmem:[%s8089_s18 + $0xa30] sm:$0xff] }
 0x2de   : > { %v1114_v22 = vld [vmem:[%s8095_s20 + $0xa30] sm:$0xff] }
 0x2df   : > { %v2623_v43 = vadd.f32 %v2622_v38, %v2111_v32  ;;  %v1614_v32 = vsub.f32 %v590_v25, %v1102_v26  ;;  %v2125_v38 = vmul.f32 %v1613_v27, %v1613_v27  ;;  %v603_v26 = vld [vmem:[%s8089_s18 + $0xa38] sm:$0xff] }
 0x2e0   : > { %v1115_v27 = vld [vmem:[%s8095_s20 + $0xa38] sm:$0xff] }
 0x2e1   : > { %v2624_v48 = vadd.f32 %v2623_v43, %v2112_v37  ;;  %v1615_v37 = vsub.f32 %v591_v30, %v1103_v31  ;;  %v2126_v43 = vmul.f32 %v1614_v32, %v1614_v32  ;;  %v604_v31 = vld [vmem:[%s8089_s18 + $0xa40] sm:$0xff] }
 0x2e2   : > { %v1116_v32 = vld [vmem:[%s8095_s20 + $0xa40] sm:$0xff] }
 0x2e3   : > { %v2625_v53 = vadd.f32 %v2624_v48, %v2113_v42  ;;  %v1616_v42 = vsub.f32 %v592_v35, %v1104_v36  ;;  %v2127_v48 = vmul.f32 %v1615_v37, %v1615_v37  ;;  %v605_v36 = vld [vmem:[%s8089_s18 + $0xa48] sm:$0xff] }
 0x2e4   : > { %v1117_v37 = vld [vmem:[%s8095_s20 + $0xa48] sm:$0xff] }
 0x2e5   : > { %v2626_v58 = vadd.f32 %v2625_v53, %v2114_v47  ;;  %v1617_v47 = vsub.f32 %v593_v40, %v1105_v41  ;;  %v2128_v53 = vmul.f32 %v1616_v42, %v1616_v42  ;;  %v606_v41 = vld [vmem:[%s8089_s18 + $0xa50] sm:$0xff] }
 0x2e6   : > { %v1118_v42 = vld [vmem:[%s8095_s20 + $0xa50] sm:$0xff] }
 0x2e7   : > { %v2627_v63 = vadd.f32 %v2626_v58, %v2115_v52  ;;  %v1618_v52 = vsub.f32 %v594_v45, %v1106_v46  ;;  %v2129_v58 = vmul.f32 %v1617_v47, %v1617_v47  ;;  %v607_v46 = vld [vmem:[%s8089_s18 + $0xa58] sm:$0xff] }
 0x2e8   : > { %v1119_v47 = vld [vmem:[%s8095_s20 + $0xa58] sm:$0xff] }
 0x2e9   : > { %v2628_v4 = vadd.f32 %v2627_v63, %v2116_v57  ;;  %v1619_v57 = vsub.f32 %v595_v50, %v1107_v51  ;;  %v2130_v63 = vmul.f32 %v1618_v52, %v1618_v52  ;;  %v608_v51 = vld [vmem:[%s8089_s18 + $0xa60] sm:$0xff] }
 0x2ea   : > { %v1120_v52 = vld [vmem:[%s8095_s20 + $0xa60] sm:$0xff] }
 0x2eb   : > { %v2629_v9 = vadd.f32 %v2628_v4, %v2117_v62  ;;  %v1620_v62 = vsub.f32 %v596_v55, %v1108_v56  ;;  %v2131_v4 = vmul.f32 %v1619_v57, %v1619_v57  ;;  %v609_v56 = vld [vmem:[%s8089_s18 + $0xa68] sm:$0xff] }
 0x2ec   : > { %v1121_v57 = vld [vmem:[%s8095_s20 + $0xa68] sm:$0xff] }
 0x2ed   : > { %v2630_v14 = vadd.f32 %v2629_v9, %v2118_v3  ;;  %v1621_v3 = vsub.f32 %v597_v60, %v1109_v61  ;;  %v2132_v9 = vmul.f32 %v1620_v62, %v1620_v62  ;;  %v610_v61 = vld [vmem:[%s8089_s18 + $0xa70] sm:$0xff] }
 0x2ee   : > { %v1122_v62 = vld [vmem:[%s8095_s20 + $0xa70] sm:$0xff] }
 0x2ef   : > { %v2631_v19 = vadd.f32 %v2630_v14, %v2119_v8  ;;  %v1622_v8 = vsub.f32 %v598_v1, %v1110_v2  ;;  %v2133_v14 = vmul.f32 %v1621_v3, %v1621_v3  ;;  %v611_v2 = vld [vmem:[%s8089_s18 + $0xa78] sm:$0xff] }
 0x2f0   : > { %v1123_v3 = vld [vmem:[%s8095_s20 + $0xa78] sm:$0xff] }
 0x2f1   : > { %v2632_v24 = vadd.f32 %v2631_v19, %v2120_v13  ;;  %v1623_v13 = vsub.f32 %v599_v6, %v1111_v7  ;;  %v2134_v19 = vmul.f32 %v1622_v8, %v1622_v8  ;;  %v612_v7 = vld [vmem:[%s8089_s18 + $0xa80] sm:$0xff] }
 0x2f2   : > { %v1124_v8 = vld [vmem:[%s8095_s20 + $0xa80] sm:$0xff] }
 0x2f3   : > { %v2633_v29 = vadd.f32 %v2632_v24, %v2121_v18  ;;  %v1624_v18 = vsub.f32 %v600_v11, %v1112_v12  ;;  %v2135_v24 = vmul.f32 %v1623_v13, %v1623_v13  ;;  %v613_v12 = vld [vmem:[%s8089_s18 + $0xa88] sm:$0xff] }
 0x2f4   : > { %v1125_v13 = vld [vmem:[%s8095_s20 + $0xa88] sm:$0xff] }
 0x2f5   : > { %v2634_v34 = vadd.f32 %v2633_v29, %v2122_v23  ;;  %v1625_v23 = vsub.f32 %v601_v16, %v1113_v17  ;;  %v2136_v29 = vmul.f32 %v1624_v18, %v1624_v18  ;;  %v614_v17 = vld [vmem:[%s8089_s18 + $0xa90] sm:$0xff] }
 0x2f6   : > { %v1126_v18 = vld [vmem:[%s8095_s20 + $0xa90] sm:$0xff] }
 0x2f7   : > { %v2635_v39 = vadd.f32 %v2634_v34, %v2123_v28  ;;  %v1626_v28 = vsub.f32 %v602_v21, %v1114_v22  ;;  %v2137_v34 = vmul.f32 %v1625_v23, %v1625_v23  ;;  %v615_v22 = vld [vmem:[%s8089_s18 + $0xa98] sm:$0xff] }
 0x2f8   : > { %v1127_v23 = vld [vmem:[%s8095_s20 + $0xa98] sm:$0xff] }
 0x2f9   : > { %v2636_v44 = vadd.f32 %v2635_v39, %v2124_v33  ;;  %v1627_v33 = vsub.f32 %v603_v26, %v1115_v27  ;;  %v2138_v39 = vmul.f32 %v1626_v28, %v1626_v28  ;;  %v616_v27 = vld [vmem:[%s8089_s18 + $0xaa0] sm:$0xff] }
 0x2fa   : > { %v1128_v28 = vld [vmem:[%s8095_s20 + $0xaa0] sm:$0xff] }
 0x2fb   : > { %v2637_v49 = vadd.f32 %v2636_v44, %v2125_v38  ;;  %v1628_v38 = vsub.f32 %v604_v31, %v1116_v32  ;;  %v2139_v44 = vmul.f32 %v1627_v33, %v1627_v33  ;;  %v617_v32 = vld [vmem:[%s8089_s18 + $0xaa8] sm:$0xff] }
 0x2fc   : > { %v1129_v33 = vld [vmem:[%s8095_s20 + $0xaa8] sm:$0xff] }
 0x2fd   : > { %v2638_v54 = vadd.f32 %v2637_v49, %v2126_v43  ;;  %v1629_v43 = vsub.f32 %v605_v36, %v1117_v37  ;;  %v2140_v49 = vmul.f32 %v1628_v38, %v1628_v38  ;;  %v618_v37 = vld [vmem:[%s8089_s18 + $0xab0] sm:$0xff] }
 0x2fe   : > { %v1130_v38 = vld [vmem:[%s8095_s20 + $0xab0] sm:$0xff] }
 0x2ff   : > { %v2639_v59 = vadd.f32 %v2638_v54, %v2127_v48  ;;  %v1630_v48 = vsub.f32 %v606_v41, %v1118_v42  ;;  %v2141_v54 = vmul.f32 %v1629_v43, %v1629_v43  ;;  %v619_v42 = vld [vmem:[%s8089_s18 + $0xab8] sm:$0xff] }
 0x300   : > { %v1131_v43 = vld [vmem:[%s8095_s20 + $0xab8] sm:$0xff] }
 0x301   : > { %v2640_v0 = vadd.f32 %v2639_v59, %v2128_v53  ;;  %v1631_v53 = vsub.f32 %v607_v46, %v1119_v47  ;;  %v2142_v59 = vmul.f32 %v1630_v48, %v1630_v48  ;;  %v620_v47 = vld [vmem:[%s8089_s18 + $0xac0] sm:$0xff] }
 0x302   : > { %v1132_v48 = vld [vmem:[%s8095_s20 + $0xac0] sm:$0xff] }
 0x303   : > { %v2641_v5 = vadd.f32 %v2640_v0, %v2129_v58  ;;  %v1632_v58 = vsub.f32 %v608_v51, %v1120_v52  ;;  %v2143_v0 = vmul.f32 %v1631_v53, %v1631_v53  ;;  %v621_v52 = vld [vmem:[%s8089_s18 + $0xac8] sm:$0xff] }
 0x304   : > { %v1133_v53 = vld [vmem:[%s8095_s20 + $0xac8] sm:$0xff] }
 0x305   : > { %v2642_v10 = vadd.f32 %v2641_v5, %v2130_v63  ;;  %v1633_v63 = vsub.f32 %v609_v56, %v1121_v57  ;;  %v2144_v5 = vmul.f32 %v1632_v58, %v1632_v58  ;;  %v622_v57 = vld [vmem:[%s8089_s18 + $0xad0] sm:$0xff] }
 0x306   : > { %v1134_v58 = vld [vmem:[%s8095_s20 + $0xad0] sm:$0xff] }
 0x307   : > { %v2643_v15 = vadd.f32 %v2642_v10, %v2131_v4  ;;  %v1634_v4 = vsub.f32 %v610_v61, %v1122_v62  ;;  %v2145_v10 = vmul.f32 %v1633_v63, %v1633_v63  ;;  %v623_v62 = vld [vmem:[%s8089_s18 + $0xad8] sm:$0xff] }
 0x308   : > { %v1135_v63 = vld [vmem:[%s8095_s20 + $0xad8] sm:$0xff] }
 0x309   : > { %v2644_v20 = vadd.f32 %v2643_v15, %v2132_v9  ;;  %v1635_v9 = vsub.f32 %v611_v2, %v1123_v3  ;;  %v2146_v15 = vmul.f32 %v1634_v4, %v1634_v4  ;;  %v624_v3 = vld [vmem:[%s8089_s18 + $0xae0] sm:$0xff] }
 0x30a   : > { %v1136_v4 = vld [vmem:[%s8095_s20 + $0xae0] sm:$0xff] }
 0x30b   : > { %v2645_v25 = vadd.f32 %v2644_v20, %v2133_v14  ;;  %v1636_v14 = vsub.f32 %v612_v7, %v1124_v8  ;;  %v2147_v20 = vmul.f32 %v1635_v9, %v1635_v9  ;;  %v625_v8 = vld [vmem:[%s8089_s18 + $0xae8] sm:$0xff] }
 0x30c   : > { %v1137_v9 = vld [vmem:[%s8095_s20 + $0xae8] sm:$0xff] }
 0x30d   : > { %v2646_v30 = vadd.f32 %v2645_v25, %v2134_v19  ;;  %v1637_v19 = vsub.f32 %v613_v12, %v1125_v13  ;;  %v2148_v25 = vmul.f32 %v1636_v14, %v1636_v14  ;;  %v626_v13 = vld [vmem:[%s8089_s18 + $0xaf0] sm:$0xff] }
 0x30e   : > { %v1138_v14 = vld [vmem:[%s8095_s20 + $0xaf0] sm:$0xff] }
 0x30f   : > { %v2647_v35 = vadd.f32 %v2646_v30, %v2135_v24  ;;  %v1638_v24 = vsub.f32 %v614_v17, %v1126_v18  ;;  %v2149_v30 = vmul.f32 %v1637_v19, %v1637_v19  ;;  %v627_v18 = vld [vmem:[%s8089_s18 + $0xaf8] sm:$0xff] }
 0x310   : > { %v1139_v19 = vld [vmem:[%s8095_s20 + $0xaf8] sm:$0xff] }
 0x311   : > { %v2648_v40 = vadd.f32 %v2647_v35, %v2136_v29  ;;  %v1639_v29 = vsub.f32 %v615_v22, %v1127_v23  ;;  %v2150_v35 = vmul.f32 %v1638_v24, %v1638_v24  ;;  %v628_v23 = vld [vmem:[%s8089_s18 + $0xb00] sm:$0xff] }
 0x312   : > { %v1140_v24 = vld [vmem:[%s8095_s20 + $0xb00] sm:$0xff] }
 0x313   : > { %v2649_v45 = vadd.f32 %v2648_v40, %v2137_v34  ;;  %v1640_v34 = vsub.f32 %v616_v27, %v1128_v28  ;;  %v2151_v40 = vmul.f32 %v1639_v29, %v1639_v29  ;;  %v629_v28 = vld [vmem:[%s8089_s18 + $0xb08] sm:$0xff] }
 0x314   : > { %v1141_v29 = vld [vmem:[%s8095_s20 + $0xb08] sm:$0xff] }
 0x315   : > { %v2650_v50 = vadd.f32 %v2649_v45, %v2138_v39  ;;  %v1641_v39 = vsub.f32 %v617_v32, %v1129_v33  ;;  %v2152_v45 = vmul.f32 %v1640_v34, %v1640_v34  ;;  %v630_v33 = vld [vmem:[%s8089_s18 + $0xb10] sm:$0xff] }
 0x316   : > { %v1142_v34 = vld [vmem:[%s8095_s20 + $0xb10] sm:$0xff] }
 0x317   : > { %v2651_v55 = vadd.f32 %v2650_v50, %v2139_v44  ;;  %v1642_v44 = vsub.f32 %v618_v37, %v1130_v38  ;;  %v2153_v50 = vmul.f32 %v1641_v39, %v1641_v39  ;;  %v631_v38 = vld [vmem:[%s8089_s18 + $0xb18] sm:$0xff] }
 0x318   : > { %v1143_v39 = vld [vmem:[%s8095_s20 + $0xb18] sm:$0xff] }
 0x319   : > { %v2652_v60 = vadd.f32 %v2651_v55, %v2140_v49  ;;  %v1643_v49 = vsub.f32 %v619_v42, %v1131_v43  ;;  %v2154_v55 = vmul.f32 %v1642_v44, %v1642_v44  ;;  %v632_v43 = vld [vmem:[%s8089_s18 + $0xb20] sm:$0xff] }
 0x31a   : > { %v1144_v44 = vld [vmem:[%s8095_s20 + $0xb20] sm:$0xff] }
 0x31b   : > { %v2653_v1 = vadd.f32 %v2652_v60, %v2141_v54  ;;  %v1644_v54 = vsub.f32 %v620_v47, %v1132_v48  ;;  %v2155_v60 = vmul.f32 %v1643_v49, %v1643_v49  ;;  %v633_v48 = vld [vmem:[%s8089_s18 + $0xb28] sm:$0xff] }
 0x31c   : > { %v1145_v49 = vld [vmem:[%s8095_s20 + $0xb28] sm:$0xff] }
 0x31d   : > { %v2654_v6 = vadd.f32 %v2653_v1, %v2142_v59  ;;  %v1645_v59 = vsub.f32 %v621_v52, %v1133_v53  ;;  %v2156_v1 = vmul.f32 %v1644_v54, %v1644_v54  ;;  %v634_v53 = vld [vmem:[%s8089_s18 + $0xb30] sm:$0xff] }
 0x31e   : > { %v1146_v54 = vld [vmem:[%s8095_s20 + $0xb30] sm:$0xff] }
 0x31f   : > { %v2655_v11 = vadd.f32 %v2654_v6, %v2143_v0  ;;  %v1646_v0 = vsub.f32 %v622_v57, %v1134_v58  ;;  %v2157_v6 = vmul.f32 %v1645_v59, %v1645_v59  ;;  %v635_v58 = vld [vmem:[%s8089_s18 + $0xb38] sm:$0xff] }
 0x320   : > { %v1147_v59 = vld [vmem:[%s8095_s20 + $0xb38] sm:$0xff] }
 0x321   : > { %v2656_v16 = vadd.f32 %v2655_v11, %v2144_v5  ;;  %v1647_v5 = vsub.f32 %v623_v62, %v1135_v63  ;;  %v2158_v11 = vmul.f32 %v1646_v0, %v1646_v0  ;;  %v636_v63 = vld [vmem:[%s8089_s18 + $0xb40] sm:$0xff] }
 0x322   : > { %v1148_v0 = vld [vmem:[%s8095_s20 + $0xb40] sm:$0xff] }
 0x323   : > { %v2657_v21 = vadd.f32 %v2656_v16, %v2145_v10  ;;  %v1648_v10 = vsub.f32 %v624_v3, %v1136_v4  ;;  %v2159_v16 = vmul.f32 %v1647_v5, %v1647_v5  ;;  %v637_v4 = vld [vmem:[%s8089_s18 + $0xb48] sm:$0xff] }
 0x324   : > { %v1149_v5 = vld [vmem:[%s8095_s20 + $0xb48] sm:$0xff] }
 0x325   : > { %v2658_v26 = vadd.f32 %v2657_v21, %v2146_v15  ;;  %v1649_v15 = vsub.f32 %v625_v8, %v1137_v9  ;;  %v2160_v21 = vmul.f32 %v1648_v10, %v1648_v10  ;;  %v638_v9 = vld [vmem:[%s8089_s18 + $0xb50] sm:$0xff] }
 0x326   : > { %v1150_v10 = vld [vmem:[%s8095_s20 + $0xb50] sm:$0xff] }
 0x327   : > { %v2659_v31 = vadd.f32 %v2658_v26, %v2147_v20  ;;  %v1650_v20 = vsub.f32 %v626_v13, %v1138_v14  ;;  %v2161_v26 = vmul.f32 %v1649_v15, %v1649_v15  ;;  %v639_v14 = vld [vmem:[%s8089_s18 + $0xb58] sm:$0xff] }
 0x328   : > { %v1151_v15 = vld [vmem:[%s8095_s20 + $0xb58] sm:$0xff] }
 0x329   : > { %v2660_v36 = vadd.f32 %v2659_v31, %v2148_v25  ;;  %v1651_v25 = vsub.f32 %v627_v18, %v1139_v19  ;;  %v2162_v31 = vmul.f32 %v1650_v20, %v1650_v20  ;;  %v640_v19 = vld [vmem:[%s8089_s18 + $0xb60] sm:$0xff] }
 0x32a   : > { %v1152_v20 = vld [vmem:[%s8095_s20 + $0xb60] sm:$0xff] }
 0x32b   : > { %v2661_v41 = vadd.f32 %v2660_v36, %v2149_v30  ;;  %v1652_v30 = vsub.f32 %v628_v23, %v1140_v24  ;;  %v2163_v36 = vmul.f32 %v1651_v25, %v1651_v25  ;;  %v641_v24 = vld [vmem:[%s8089_s18 + $0xb68] sm:$0xff] }
 0x32c   : > { %v1153_v25 = vld [vmem:[%s8095_s20 + $0xb68] sm:$0xff] }
 0x32d   : > { %v2662_v46 = vadd.f32 %v2661_v41, %v2150_v35  ;;  %v1653_v35 = vsub.f32 %v629_v28, %v1141_v29  ;;  %v2164_v41 = vmul.f32 %v1652_v30, %v1652_v30  ;;  %v642_v29 = vld [vmem:[%s8089_s18 + $0xb70] sm:$0xff] }
 0x32e   : > { %v1154_v30 = vld [vmem:[%s8095_s20 + $0xb70] sm:$0xff] }
 0x32f   : > { %v2663_v51 = vadd.f32 %v2662_v46, %v2151_v40  ;;  %v1654_v40 = vsub.f32 %v630_v33, %v1142_v34  ;;  %v2165_v46 = vmul.f32 %v1653_v35, %v1653_v35  ;;  %v643_v34 = vld [vmem:[%s8089_s18 + $0xb78] sm:$0xff] }
 0x330   : > { %v1155_v35 = vld [vmem:[%s8095_s20 + $0xb78] sm:$0xff] }
 0x331   : > { %v2664_v56 = vadd.f32 %v2663_v51, %v2152_v45  ;;  %v1655_v45 = vsub.f32 %v631_v38, %v1143_v39  ;;  %v2166_v51 = vmul.f32 %v1654_v40, %v1654_v40  ;;  %v644_v39 = vld [vmem:[%s8089_s18 + $0xb80] sm:$0xff] }
 0x332   : > { %v1156_v40 = vld [vmem:[%s8095_s20 + $0xb80] sm:$0xff] }
 0x333   : > { %v2665_v61 = vadd.f32 %v2664_v56, %v2153_v50  ;;  %v1656_v50 = vsub.f32 %v632_v43, %v1144_v44  ;;  %v2167_v56 = vmul.f32 %v1655_v45, %v1655_v45  ;;  %v645_v44 = vld [vmem:[%s8089_s18 + $0xb88] sm:$0xff] }
 0x334   : > { %v1157_v45 = vld [vmem:[%s8095_s20 + $0xb88] sm:$0xff] }
 0x335   : > { %v2666_v2 = vadd.f32 %v2665_v61, %v2154_v55  ;;  %v1657_v55 = vsub.f32 %v633_v48, %v1145_v49  ;;  %v2168_v61 = vmul.f32 %v1656_v50, %v1656_v50  ;;  %v646_v49 = vld [vmem:[%s8089_s18 + $0xb90] sm:$0xff] }
 0x336   : > { %v1158_v50 = vld [vmem:[%s8095_s20 + $0xb90] sm:$0xff] }
 0x337   : > { %v2667_v7 = vadd.f32 %v2666_v2, %v2155_v60  ;;  %v1658_v60 = vsub.f32 %v634_v53, %v1146_v54  ;;  %v2169_v2 = vmul.f32 %v1657_v55, %v1657_v55  ;;  %v647_v54 = vld [vmem:[%s8089_s18 + $0xb98] sm:$0xff] }
 0x338   : > { %v1159_v55 = vld [vmem:[%s8095_s20 + $0xb98] sm:$0xff] }
 0x339   : > { %v2668_v12 = vadd.f32 %v2667_v7, %v2156_v1  ;;  %v1659_v1 = vsub.f32 %v635_v58, %v1147_v59  ;;  %v2170_v7 = vmul.f32 %v1658_v60, %v1658_v60  ;;  %v648_v59 = vld [vmem:[%s8089_s18 + $0xba0] sm:$0xff] }
 0x33a   : > { %v1160_v60 = vld [vmem:[%s8095_s20 + $0xba0] sm:$0xff] }
 0x33b   : > { %v2669_v17 = vadd.f32 %v2668_v12, %v2157_v6  ;;  %v1660_v6 = vsub.f32 %v636_v63, %v1148_v0  ;;  %v2171_v12 = vmul.f32 %v1659_v1, %v1659_v1  ;;  %v649_v0 = vld [vmem:[%s8089_s18 + $0xba8] sm:$0xff] }
 0x33c   : > { %v1161_v1 = vld [vmem:[%s8095_s20 + $0xba8] sm:$0xff] }
 0x33d   : > { %v2670_v22 = vadd.f32 %v2669_v17, %v2158_v11  ;;  %v1661_v11 = vsub.f32 %v637_v4, %v1149_v5  ;;  %v2172_v17 = vmul.f32 %v1660_v6, %v1660_v6  ;;  %v650_v5 = vld [vmem:[%s8089_s18 + $0xbb0] sm:$0xff] }
 0x33e   : > { %v1162_v6 = vld [vmem:[%s8095_s20 + $0xbb0] sm:$0xff] }
 0x33f   : > { %v2671_v27 = vadd.f32 %v2670_v22, %v2159_v16  ;;  %v1662_v16 = vsub.f32 %v638_v9, %v1150_v10  ;;  %v2173_v22 = vmul.f32 %v1661_v11, %v1661_v11  ;;  %v651_v10 = vld [vmem:[%s8089_s18 + $0xbb8] sm:$0xff] }
 0x340   : > { %v1163_v11 = vld [vmem:[%s8095_s20 + $0xbb8] sm:$0xff] }
 0x341   : > { %v2672_v32 = vadd.f32 %v2671_v27, %v2160_v21  ;;  %v1663_v21 = vsub.f32 %v639_v14, %v1151_v15  ;;  %v2174_v27 = vmul.f32 %v1662_v16, %v1662_v16  ;;  %v652_v15 = vld [vmem:[%s8089_s18 + $0xbc0] sm:$0xff] }
 0x342   : > { %v1164_v16 = vld [vmem:[%s8095_s20 + $0xbc0] sm:$0xff] }
 0x343   : > { %v2673_v37 = vadd.f32 %v2672_v32, %v2161_v26  ;;  %v1664_v26 = vsub.f32 %v640_v19, %v1152_v20  ;;  %v2175_v32 = vmul.f32 %v1663_v21, %v1663_v21  ;;  %v653_v20 = vld [vmem:[%s8089_s18 + $0xbc8] sm:$0xff] }
 0x344   : > { %v1165_v21 = vld [vmem:[%s8095_s20 + $0xbc8] sm:$0xff] }
 0x345   : > { %v2674_v42 = vadd.f32 %v2673_v37, %v2162_v31  ;;  %v1665_v31 = vsub.f32 %v641_v24, %v1153_v25  ;;  %v2176_v37 = vmul.f32 %v1664_v26, %v1664_v26  ;;  %v654_v25 = vld [vmem:[%s8089_s18 + $0xbd0] sm:$0xff] }
 0x346   : > { %v1166_v26 = vld [vmem:[%s8095_s20 + $0xbd0] sm:$0xff] }
 0x347   : > { %v2675_v47 = vadd.f32 %v2674_v42, %v2163_v36  ;;  %v1666_v36 = vsub.f32 %v642_v29, %v1154_v30  ;;  %v2177_v42 = vmul.f32 %v1665_v31, %v1665_v31  ;;  %v655_v30 = vld [vmem:[%s8089_s18 + $0xbd8] sm:$0xff] }
 0x348   : > { %v1167_v31 = vld [vmem:[%s8095_s20 + $0xbd8] sm:$0xff] }
 0x349   : > { %v2676_v52 = vadd.f32 %v2675_v47, %v2164_v41  ;;  %v1667_v41 = vsub.f32 %v643_v34, %v1155_v35  ;;  %v2178_v47 = vmul.f32 %v1666_v36, %v1666_v36  ;;  %v656_v35 = vld [vmem:[%s8089_s18 + $0xbe0] sm:$0xff] }
 0x34a   : > { %v1168_v36 = vld [vmem:[%s8095_s20 + $0xbe0] sm:$0xff] }
 0x34b   : > { %v2677_v57 = vadd.f32 %v2676_v52, %v2165_v46  ;;  %v1668_v46 = vsub.f32 %v644_v39, %v1156_v40  ;;  %v2179_v52 = vmul.f32 %v1667_v41, %v1667_v41  ;;  %v657_v40 = vld [vmem:[%s8089_s18 + $0xbe8] sm:$0xff] }
 0x34c   : > { %v1169_v41 = vld [vmem:[%s8095_s20 + $0xbe8] sm:$0xff] }
 0x34d   : > { %v2678_v62 = vadd.f32 %v2677_v57, %v2166_v51  ;;  %v1669_v51 = vsub.f32 %v645_v44, %v1157_v45  ;;  %v2180_v57 = vmul.f32 %v1668_v46, %v1668_v46  ;;  %v658_v45 = vld [vmem:[%s8089_s18 + $0xbf0] sm:$0xff] }
 0x34e   : > { %v1170_v46 = vld [vmem:[%s8095_s20 + $0xbf0] sm:$0xff] }
 0x34f   : > { %v2679_v3 = vadd.f32 %v2678_v62, %v2167_v56  ;;  %v1670_v56 = vsub.f32 %v646_v49, %v1158_v50  ;;  %v2181_v62 = vmul.f32 %v1669_v51, %v1669_v51  ;;  %v659_v50 = vld [vmem:[%s8089_s18 + $0xbf8] sm:$0xff] }
 0x350   : > { %v1171_v51 = vld [vmem:[%s8095_s20 + $0xbf8] sm:$0xff] }
 0x351   : > { %v2680_v8 = vadd.f32 %v2679_v3, %v2168_v61  ;;  %v1671_v61 = vsub.f32 %v647_v54, %v1159_v55  ;;  %v2182_v3 = vmul.f32 %v1670_v56, %v1670_v56  ;;  %v660_v55 = vld [vmem:[%s8089_s18 + $0xc00] sm:$0xff] }
 0x352   : > { %v1172_v56 = vld [vmem:[%s8095_s20 + $0xc00] sm:$0xff] }
 0x353   : > { %v2681_v13 = vadd.f32 %v2680_v8, %v2169_v2  ;;  %v1672_v2 = vsub.f32 %v648_v59, %v1160_v60  ;;  %v2183_v8 = vmul.f32 %v1671_v61, %v1671_v61  ;;  %v661_v60 = vld [vmem:[%s8089_s18 + $0xc08] sm:$0xff] }
 0x354   : > { %v1173_v61 = vld [vmem:[%s8095_s20 + $0xc08] sm:$0xff] }
 0x355   : > { %v2682_v18 = vadd.f32 %v2681_v13, %v2170_v7  ;;  %v1673_v7 = vsub.f32 %v649_v0, %v1161_v1  ;;  %v2184_v13 = vmul.f32 %v1672_v2, %v1672_v2  ;;  %v662_v1 = vld [vmem:[%s8089_s18 + $0xc10] sm:$0xff] }
 0x356   : > { %v1174_v2 = vld [vmem:[%s8095_s20 + $0xc10] sm:$0xff] }
 0x357   : > { %v2683_v23 = vadd.f32 %v2682_v18, %v2171_v12  ;;  %v1674_v12 = vsub.f32 %v650_v5, %v1162_v6  ;;  %v2185_v18 = vmul.f32 %v1673_v7, %v1673_v7  ;;  %v663_v6 = vld [vmem:[%s8089_s18 + $0xc18] sm:$0xff] }
 0x358   : > { %v1175_v7 = vld [vmem:[%s8095_s20 + $0xc18] sm:$0xff] }
 0x359   : > { %v2684_v28 = vadd.f32 %v2683_v23, %v2172_v17  ;;  %v1675_v17 = vsub.f32 %v651_v10, %v1163_v11  ;;  %v2186_v23 = vmul.f32 %v1674_v12, %v1674_v12  ;;  %v664_v11 = vld [vmem:[%s8089_s18 + $0xc20] sm:$0xff] }
 0x35a   : > { %v1176_v12 = vld [vmem:[%s8095_s20 + $0xc20] sm:$0xff] }
 0x35b   : > { %v2685_v33 = vadd.f32 %v2684_v28, %v2173_v22  ;;  %v1676_v22 = vsub.f32 %v652_v15, %v1164_v16  ;;  %v2187_v28 = vmul.f32 %v1675_v17, %v1675_v17  ;;  %v665_v16 = vld [vmem:[%s8089_s18 + $0xc28] sm:$0xff] }
 0x35c   : > { %v1177_v17 = vld [vmem:[%s8095_s20 + $0xc28] sm:$0xff] }
 0x35d   : > { %v2686_v38 = vadd.f32 %v2685_v33, %v2174_v27  ;;  %v1677_v27 = vsub.f32 %v653_v20, %v1165_v21  ;;  %v2188_v33 = vmul.f32 %v1676_v22, %v1676_v22  ;;  %v666_v21 = vld [vmem:[%s8089_s18 + $0xc30] sm:$0xff] }
 0x35e   : > { %v1178_v22 = vld [vmem:[%s8095_s20 + $0xc30] sm:$0xff] }
 0x35f   : > { %v2687_v43 = vadd.f32 %v2686_v38, %v2175_v32  ;;  %v1678_v32 = vsub.f32 %v654_v25, %v1166_v26  ;;  %v2189_v38 = vmul.f32 %v1677_v27, %v1677_v27  ;;  %v667_v26 = vld [vmem:[%s8089_s18 + $0xc38] sm:$0xff] }
 0x360   : > { %v1179_v27 = vld [vmem:[%s8095_s20 + $0xc38] sm:$0xff] }
 0x361   : > { %v2688_v48 = vadd.f32 %v2687_v43, %v2176_v37  ;;  %v1679_v37 = vsub.f32 %v655_v30, %v1167_v31  ;;  %v2190_v43 = vmul.f32 %v1678_v32, %v1678_v32  ;;  %v668_v31 = vld [vmem:[%s8089_s18 + $0xc40] sm:$0xff] }
 0x362   : > { %v1180_v32 = vld [vmem:[%s8095_s20 + $0xc40] sm:$0xff] }
 0x363   : > { %v2689_v53 = vadd.f32 %v2688_v48, %v2177_v42  ;;  %v1680_v42 = vsub.f32 %v656_v35, %v1168_v36  ;;  %v2191_v48 = vmul.f32 %v1679_v37, %v1679_v37  ;;  %v669_v36 = vld [vmem:[%s8089_s18 + $0xc48] sm:$0xff] }
 0x364   : > { %v1181_v37 = vld [vmem:[%s8095_s20 + $0xc48] sm:$0xff] }
 0x365   : > { %v2690_v58 = vadd.f32 %v2689_v53, %v2178_v47  ;;  %v1681_v47 = vsub.f32 %v657_v40, %v1169_v41  ;;  %v2192_v53 = vmul.f32 %v1680_v42, %v1680_v42  ;;  %v670_v41 = vld [vmem:[%s8089_s18 + $0xc50] sm:$0xff] }
 0x366   : > { %v1182_v42 = vld [vmem:[%s8095_s20 + $0xc50] sm:$0xff] }
 0x367   : > { %v2691_v63 = vadd.f32 %v2690_v58, %v2179_v52  ;;  %v1682_v52 = vsub.f32 %v658_v45, %v1170_v46  ;;  %v2193_v58 = vmul.f32 %v1681_v47, %v1681_v47  ;;  %v671_v46 = vld [vmem:[%s8089_s18 + $0xc58] sm:$0xff] }
 0x368   : > { %v1183_v47 = vld [vmem:[%s8095_s20 + $0xc58] sm:$0xff] }
 0x369   : > { %v2692_v4 = vadd.f32 %v2691_v63, %v2180_v57  ;;  %v1683_v57 = vsub.f32 %v659_v50, %v1171_v51  ;;  %v2194_v63 = vmul.f32 %v1682_v52, %v1682_v52  ;;  %v672_v51 = vld [vmem:[%s8089_s18 + $0xc60] sm:$0xff] }
 0x36a   : > { %v1184_v52 = vld [vmem:[%s8095_s20 + $0xc60] sm:$0xff] }
 0x36b   : > { %v2693_v9 = vadd.f32 %v2692_v4, %v2181_v62  ;;  %v1684_v62 = vsub.f32 %v660_v55, %v1172_v56  ;;  %v2195_v4 = vmul.f32 %v1683_v57, %v1683_v57  ;;  %v673_v56 = vld [vmem:[%s8089_s18 + $0xc68] sm:$0xff] }
 0x36c   : > { %v1185_v57 = vld [vmem:[%s8095_s20 + $0xc68] sm:$0xff] }
 0x36d   : > { %v2694_v14 = vadd.f32 %v2693_v9, %v2182_v3  ;;  %v1685_v3 = vsub.f32 %v661_v60, %v1173_v61  ;;  %v2196_v9 = vmul.f32 %v1684_v62, %v1684_v62  ;;  %v674_v61 = vld [vmem:[%s8089_s18 + $0xc70] sm:$0xff] }
 0x36e   : > { %v1186_v62 = vld [vmem:[%s8095_s20 + $0xc70] sm:$0xff] }
 0x36f   : > { %v2695_v19 = vadd.f32 %v2694_v14, %v2183_v8  ;;  %v1686_v8 = vsub.f32 %v662_v1, %v1174_v2  ;;  %v2197_v14 = vmul.f32 %v1685_v3, %v1685_v3  ;;  %v675_v2 = vld [vmem:[%s8089_s18 + $0xc78] sm:$0xff] }
 0x370   : > { %v1187_v3 = vld [vmem:[%s8095_s20 + $0xc78] sm:$0xff] }
 0x371   : > { %v2696_v24 = vadd.f32 %v2695_v19, %v2184_v13  ;;  %v1687_v13 = vsub.f32 %v663_v6, %v1175_v7  ;;  %v2198_v19 = vmul.f32 %v1686_v8, %v1686_v8  ;;  %v676_v7 = vld [vmem:[%s8089_s18 + $0xc80] sm:$0xff] }
 0x372   : > { %v1188_v8 = vld [vmem:[%s8095_s20 + $0xc80] sm:$0xff] }
 0x373   : > { %v2697_v29 = vadd.f32 %v2696_v24, %v2185_v18  ;;  %v1688_v18 = vsub.f32 %v664_v11, %v1176_v12  ;;  %v2199_v24 = vmul.f32 %v1687_v13, %v1687_v13  ;;  %v677_v12 = vld [vmem:[%s8089_s18 + $0xc88] sm:$0xff] }
 0x374   : > { %v1189_v13 = vld [vmem:[%s8095_s20 + $0xc88] sm:$0xff] }
 0x375   : > { %v2698_v34 = vadd.f32 %v2697_v29, %v2186_v23  ;;  %v1689_v23 = vsub.f32 %v665_v16, %v1177_v17  ;;  %v2200_v29 = vmul.f32 %v1688_v18, %v1688_v18  ;;  %v678_v17 = vld [vmem:[%s8089_s18 + $0xc90] sm:$0xff] }
 0x376   : > { %v1190_v18 = vld [vmem:[%s8095_s20 + $0xc90] sm:$0xff] }
 0x377   : > { %v2699_v39 = vadd.f32 %v2698_v34, %v2187_v28  ;;  %v1690_v28 = vsub.f32 %v666_v21, %v1178_v22  ;;  %v2201_v34 = vmul.f32 %v1689_v23, %v1689_v23  ;;  %v679_v22 = vld [vmem:[%s8089_s18 + $0xc98] sm:$0xff] }
 0x378   : > { %v1191_v23 = vld [vmem:[%s8095_s20 + $0xc98] sm:$0xff] }
 0x379   : > { %v2700_v44 = vadd.f32 %v2699_v39, %v2188_v33  ;;  %v1691_v33 = vsub.f32 %v667_v26, %v1179_v27  ;;  %v2202_v39 = vmul.f32 %v1690_v28, %v1690_v28  ;;  %v680_v27 = vld [vmem:[%s8089_s18 + $0xca0] sm:$0xff] }
 0x37a   : > { %v1192_v28 = vld [vmem:[%s8095_s20 + $0xca0] sm:$0xff] }
 0x37b   : > { %v2701_v49 = vadd.f32 %v2700_v44, %v2189_v38  ;;  %v1692_v38 = vsub.f32 %v668_v31, %v1180_v32  ;;  %v2203_v44 = vmul.f32 %v1691_v33, %v1691_v33  ;;  %v681_v32 = vld [vmem:[%s8089_s18 + $0xca8] sm:$0xff] }
 0x37c   : > { %v1193_v33 = vld [vmem:[%s8095_s20 + $0xca8] sm:$0xff] }
 0x37d   : > { %v2702_v54 = vadd.f32 %v2701_v49, %v2190_v43  ;;  %v1693_v43 = vsub.f32 %v669_v36, %v1181_v37  ;;  %v2204_v49 = vmul.f32 %v1692_v38, %v1692_v38  ;;  %v682_v37 = vld [vmem:[%s8089_s18 + $0xcb0] sm:$0xff] }
 0x37e   : > { %v1194_v38 = vld [vmem:[%s8095_s20 + $0xcb0] sm:$0xff] }
 0x37f   : > { %v2703_v59 = vadd.f32 %v2702_v54, %v2191_v48  ;;  %v1694_v48 = vsub.f32 %v670_v41, %v1182_v42  ;;  %v2205_v54 = vmul.f32 %v1693_v43, %v1693_v43  ;;  %v683_v42 = vld [vmem:[%s8089_s18 + $0xcb8] sm:$0xff] }
 0x380   : > { %v1195_v43 = vld [vmem:[%s8095_s20 + $0xcb8] sm:$0xff] }
 0x381   : > { %v2704_v0 = vadd.f32 %v2703_v59, %v2192_v53  ;;  %v1695_v53 = vsub.f32 %v671_v46, %v1183_v47  ;;  %v2206_v59 = vmul.f32 %v1694_v48, %v1694_v48  ;;  %v684_v47 = vld [vmem:[%s8089_s18 + $0xcc0] sm:$0xff] }
 0x382   : > { %v1196_v48 = vld [vmem:[%s8095_s20 + $0xcc0] sm:$0xff] }
 0x383   : > { %v2705_v5 = vadd.f32 %v2704_v0, %v2193_v58  ;;  %v1696_v58 = vsub.f32 %v672_v51, %v1184_v52  ;;  %v2207_v0 = vmul.f32 %v1695_v53, %v1695_v53  ;;  %v685_v52 = vld [vmem:[%s8089_s18 + $0xcc8] sm:$0xff] }
 0x384   : > { %v1197_v53 = vld [vmem:[%s8095_s20 + $0xcc8] sm:$0xff] }
 0x385   : > { %v2706_v10 = vadd.f32 %v2705_v5, %v2194_v63  ;;  %v1697_v63 = vsub.f32 %v673_v56, %v1185_v57  ;;  %v2208_v5 = vmul.f32 %v1696_v58, %v1696_v58  ;;  %v686_v57 = vld [vmem:[%s8089_s18 + $0xcd0] sm:$0xff] }
 0x386   : > { %v1198_v58 = vld [vmem:[%s8095_s20 + $0xcd0] sm:$0xff] }
 0x387   : > { %v2707_v15 = vadd.f32 %v2706_v10, %v2195_v4  ;;  %v1698_v4 = vsub.f32 %v674_v61, %v1186_v62  ;;  %v2209_v10 = vmul.f32 %v1697_v63, %v1697_v63  ;;  %v687_v62 = vld [vmem:[%s8089_s18 + $0xcd8] sm:$0xff] }
 0x388   : > { %v1199_v63 = vld [vmem:[%s8095_s20 + $0xcd8] sm:$0xff] }
 0x389   : > { %v2708_v20 = vadd.f32 %v2707_v15, %v2196_v9  ;;  %v1699_v9 = vsub.f32 %v675_v2, %v1187_v3  ;;  %v2210_v15 = vmul.f32 %v1698_v4, %v1698_v4  ;;  %v688_v3 = vld [vmem:[%s8089_s18 + $0xce0] sm:$0xff] }
 0x38a   : > { %v1200_v4 = vld [vmem:[%s8095_s20 + $0xce0] sm:$0xff] }
 0x38b   : > { %v2709_v25 = vadd.f32 %v2708_v20, %v2197_v14  ;;  %v1700_v14 = vsub.f32 %v676_v7, %v1188_v8  ;;  %v2211_v20 = vmul.f32 %v1699_v9, %v1699_v9  ;;  %v689_v8 = vld [vmem:[%s8089_s18 + $0xce8] sm:$0xff] }
 0x38c   : > { %v1201_v9 = vld [vmem:[%s8095_s20 + $0xce8] sm:$0xff] }
 0x38d   : > { %v2710_v30 = vadd.f32 %v2709_v25, %v2198_v19  ;;  %v1701_v19 = vsub.f32 %v677_v12, %v1189_v13  ;;  %v2212_v25 = vmul.f32 %v1700_v14, %v1700_v14  ;;  %v690_v13 = vld [vmem:[%s8089_s18 + $0xcf0] sm:$0xff] }
 0x38e   : > { %v1202_v14 = vld [vmem:[%s8095_s20 + $0xcf0] sm:$0xff] }
 0x38f   : > { %v2711_v35 = vadd.f32 %v2710_v30, %v2199_v24  ;;  %v1702_v24 = vsub.f32 %v678_v17, %v1190_v18  ;;  %v2213_v30 = vmul.f32 %v1701_v19, %v1701_v19  ;;  %v691_v18 = vld [vmem:[%s8089_s18 + $0xcf8] sm:$0xff] }
 0x390   : > { %v1203_v19 = vld [vmem:[%s8095_s20 + $0xcf8] sm:$0xff] }
 0x391   : > { %v2712_v40 = vadd.f32 %v2711_v35, %v2200_v29  ;;  %v1703_v29 = vsub.f32 %v679_v22, %v1191_v23  ;;  %v2214_v35 = vmul.f32 %v1702_v24, %v1702_v24  ;;  %v692_v23 = vld [vmem:[%s8089_s18 + $0xd00] sm:$0xff] }
 0x392   : > { %v1204_v24 = vld [vmem:[%s8095_s20 + $0xd00] sm:$0xff] }
 0x393   : > { %v2713_v45 = vadd.f32 %v2712_v40, %v2201_v34  ;;  %v1704_v34 = vsub.f32 %v680_v27, %v1192_v28  ;;  %v2215_v40 = vmul.f32 %v1703_v29, %v1703_v29  ;;  %v693_v28 = vld [vmem:[%s8089_s18 + $0xd08] sm:$0xff] }
 0x394   : > { %v1205_v29 = vld [vmem:[%s8095_s20 + $0xd08] sm:$0xff] }
 0x395   : > { %v2714_v50 = vadd.f32 %v2713_v45, %v2202_v39  ;;  %v1705_v39 = vsub.f32 %v681_v32, %v1193_v33  ;;  %v2216_v45 = vmul.f32 %v1704_v34, %v1704_v34  ;;  %v694_v33 = vld [vmem:[%s8089_s18 + $0xd10] sm:$0xff] }
 0x396   : > { %v1206_v34 = vld [vmem:[%s8095_s20 + $0xd10] sm:$0xff] }
 0x397   : > { %v2715_v55 = vadd.f32 %v2714_v50, %v2203_v44  ;;  %v1706_v44 = vsub.f32 %v682_v37, %v1194_v38  ;;  %v2217_v50 = vmul.f32 %v1705_v39, %v1705_v39  ;;  %v695_v38 = vld [vmem:[%s8089_s18 + $0xd18] sm:$0xff] }
 0x398   : > { %v1207_v39 = vld [vmem:[%s8095_s20 + $0xd18] sm:$0xff] }
 0x399   : > { %v2716_v60 = vadd.f32 %v2715_v55, %v2204_v49  ;;  %v1707_v49 = vsub.f32 %v683_v42, %v1195_v43  ;;  %v2218_v55 = vmul.f32 %v1706_v44, %v1706_v44  ;;  %v696_v43 = vld [vmem:[%s8089_s18 + $0xd20] sm:$0xff] }
 0x39a   : > { %v1208_v44 = vld [vmem:[%s8095_s20 + $0xd20] sm:$0xff] }
 0x39b   : > { %v2717_v1 = vadd.f32 %v2716_v60, %v2205_v54  ;;  %v1708_v54 = vsub.f32 %v684_v47, %v1196_v48  ;;  %v2219_v60 = vmul.f32 %v1707_v49, %v1707_v49  ;;  %v697_v48 = vld [vmem:[%s8089_s18 + $0xd28] sm:$0xff] }
 0x39c   : > { %v1209_v49 = vld [vmem:[%s8095_s20 + $0xd28] sm:$0xff] }
 0x39d   : > { %v2718_v6 = vadd.f32 %v2717_v1, %v2206_v59  ;;  %v1709_v59 = vsub.f32 %v685_v52, %v1197_v53  ;;  %v2220_v1 = vmul.f32 %v1708_v54, %v1708_v54  ;;  %v698_v53 = vld [vmem:[%s8089_s18 + $0xd30] sm:$0xff] }
 0x39e   : > { %v1210_v54 = vld [vmem:[%s8095_s20 + $0xd30] sm:$0xff] }
 0x39f   : > { %v2719_v11 = vadd.f32 %v2718_v6, %v2207_v0  ;;  %v1710_v0 = vsub.f32 %v686_v57, %v1198_v58  ;;  %v2221_v6 = vmul.f32 %v1709_v59, %v1709_v59  ;;  %v699_v58 = vld [vmem:[%s8089_s18 + $0xd38] sm:$0xff] }
 0x3a0   : > { %v1211_v59 = vld [vmem:[%s8095_s20 + $0xd38] sm:$0xff] }
 0x3a1   : > { %v2720_v16 = vadd.f32 %v2719_v11, %v2208_v5  ;;  %v1711_v5 = vsub.f32 %v687_v62, %v1199_v63  ;;  %v2222_v11 = vmul.f32 %v1710_v0, %v1710_v0  ;;  %v700_v63 = vld [vmem:[%s8089_s18 + $0xd40] sm:$0xff] }
 0x3a2   : > { %v1212_v0 = vld [vmem:[%s8095_s20 + $0xd40] sm:$0xff] }
 0x3a3   : > { %v2721_v21 = vadd.f32 %v2720_v16, %v2209_v10  ;;  %v1712_v10 = vsub.f32 %v688_v3, %v1200_v4  ;;  %v2223_v16 = vmul.f32 %v1711_v5, %v1711_v5  ;;  %v701_v4 = vld [vmem:[%s8089_s18 + $0xd48] sm:$0xff] }
 0x3a4   : > { %v1213_v5 = vld [vmem:[%s8095_s20 + $0xd48] sm:$0xff] }
 0x3a5   : > { %v2722_v26 = vadd.f32 %v2721_v21, %v2210_v15  ;;  %v1713_v15 = vsub.f32 %v689_v8, %v1201_v9  ;;  %v2224_v21 = vmul.f32 %v1712_v10, %v1712_v10  ;;  %v702_v9 = vld [vmem:[%s8089_s18 + $0xd50] sm:$0xff] }
 0x3a6   : > { %v1214_v10 = vld [vmem:[%s8095_s20 + $0xd50] sm:$0xff] }
 0x3a7   : > { %v2723_v31 = vadd.f32 %v2722_v26, %v2211_v20  ;;  %v1714_v20 = vsub.f32 %v690_v13, %v1202_v14  ;;  %v2225_v26 = vmul.f32 %v1713_v15, %v1713_v15  ;;  %v703_v14 = vld [vmem:[%s8089_s18 + $0xd58] sm:$0xff] }
 0x3a8   : > { %v1215_v15 = vld [vmem:[%s8095_s20 + $0xd58] sm:$0xff] }
 0x3a9   : > { %v2724_v36 = vadd.f32 %v2723_v31, %v2212_v25  ;;  %v1715_v25 = vsub.f32 %v691_v18, %v1203_v19  ;;  %v2226_v31 = vmul.f32 %v1714_v20, %v1714_v20  ;;  %v704_v19 = vld [vmem:[%s8089_s18 + $0xd60] sm:$0xff] }
 0x3aa   : > { %v1216_v20 = vld [vmem:[%s8095_s20 + $0xd60] sm:$0xff] }
 0x3ab   : > { %v2725_v41 = vadd.f32 %v2724_v36, %v2213_v30  ;;  %v1716_v30 = vsub.f32 %v692_v23, %v1204_v24  ;;  %v2227_v36 = vmul.f32 %v1715_v25, %v1715_v25  ;;  %v705_v24 = vld [vmem:[%s8089_s18 + $0xd68] sm:$0xff] }
 0x3ac   : > { %v1217_v25 = vld [vmem:[%s8095_s20 + $0xd68] sm:$0xff] }
 0x3ad   : > { %v2726_v46 = vadd.f32 %v2725_v41, %v2214_v35  ;;  %v1717_v35 = vsub.f32 %v693_v28, %v1205_v29  ;;  %v2228_v41 = vmul.f32 %v1716_v30, %v1716_v30  ;;  %v706_v29 = vld [vmem:[%s8089_s18 + $0xd70] sm:$0xff] }
 0x3ae   : > { %v1218_v30 = vld [vmem:[%s8095_s20 + $0xd70] sm:$0xff] }
 0x3af   : > { %v2727_v51 = vadd.f32 %v2726_v46, %v2215_v40  ;;  %v1718_v40 = vsub.f32 %v694_v33, %v1206_v34  ;;  %v2229_v46 = vmul.f32 %v1717_v35, %v1717_v35  ;;  %v707_v34 = vld [vmem:[%s8089_s18 + $0xd78] sm:$0xff] }
 0x3b0   : > { %v1219_v35 = vld [vmem:[%s8095_s20 + $0xd78] sm:$0xff] }
 0x3b1   : > { %v2728_v56 = vadd.f32 %v2727_v51, %v2216_v45  ;;  %v1719_v45 = vsub.f32 %v695_v38, %v1207_v39  ;;  %v2230_v51 = vmul.f32 %v1718_v40, %v1718_v40  ;;  %v708_v39 = vld [vmem:[%s8089_s18 + $0xd80] sm:$0xff] }
 0x3b2   : > { %v1220_v40 = vld [vmem:[%s8095_s20 + $0xd80] sm:$0xff] }
 0x3b3   : > { %v2729_v61 = vadd.f32 %v2728_v56, %v2217_v50  ;;  %v1720_v50 = vsub.f32 %v696_v43, %v1208_v44  ;;  %v2231_v56 = vmul.f32 %v1719_v45, %v1719_v45  ;;  %v709_v44 = vld [vmem:[%s8089_s18 + $0xd88] sm:$0xff] }
 0x3b4   : > { %v1221_v45 = vld [vmem:[%s8095_s20 + $0xd88] sm:$0xff] }
 0x3b5   : > { %v2730_v2 = vadd.f32 %v2729_v61, %v2218_v55  ;;  %v1721_v55 = vsub.f32 %v697_v48, %v1209_v49  ;;  %v2232_v61 = vmul.f32 %v1720_v50, %v1720_v50  ;;  %v710_v49 = vld [vmem:[%s8089_s18 + $0xd90] sm:$0xff] }
 0x3b6   : > { %v1222_v50 = vld [vmem:[%s8095_s20 + $0xd90] sm:$0xff] }
 0x3b7   : > { %v2731_v7 = vadd.f32 %v2730_v2, %v2219_v60  ;;  %v1722_v60 = vsub.f32 %v698_v53, %v1210_v54  ;;  %v2233_v2 = vmul.f32 %v1721_v55, %v1721_v55  ;;  %v711_v54 = vld [vmem:[%s8089_s18 + $0xd98] sm:$0xff] }
 0x3b8   : > { %v1223_v55 = vld [vmem:[%s8095_s20 + $0xd98] sm:$0xff] }
 0x3b9   : > { %v2732_v12 = vadd.f32 %v2731_v7, %v2220_v1  ;;  %v1723_v1 = vsub.f32 %v699_v58, %v1211_v59  ;;  %v2234_v7 = vmul.f32 %v1722_v60, %v1722_v60  ;;  %v712_v59 = vld [vmem:[%s8089_s18 + $0xda0] sm:$0xff] }
 0x3ba   : > { %v1224_v60 = vld [vmem:[%s8095_s20 + $0xda0] sm:$0xff] }
 0x3bb   : > { %v2733_v17 = vadd.f32 %v2732_v12, %v2221_v6  ;;  %v1724_v6 = vsub.f32 %v700_v63, %v1212_v0  ;;  %v2235_v12 = vmul.f32 %v1723_v1, %v1723_v1  ;;  %v713_v0 = vld [vmem:[%s8089_s18 + $0xda8] sm:$0xff] }
 0x3bc   : > { %v1225_v1 = vld [vmem:[%s8095_s20 + $0xda8] sm:$0xff] }
 0x3bd   : > { %v2734_v22 = vadd.f32 %v2733_v17, %v2222_v11  ;;  %v1725_v11 = vsub.f32 %v701_v4, %v1213_v5  ;;  %v2236_v17 = vmul.f32 %v1724_v6, %v1724_v6  ;;  %v714_v5 = vld [vmem:[%s8089_s18 + $0xdb0] sm:$0xff] }
 0x3be   : > { %v1226_v6 = vld [vmem:[%s8095_s20 + $0xdb0] sm:$0xff] }
 0x3bf   : > { %v2735_v27 = vadd.f32 %v2734_v22, %v2223_v16  ;;  %v1726_v16 = vsub.f32 %v702_v9, %v1214_v10  ;;  %v2237_v22 = vmul.f32 %v1725_v11, %v1725_v11  ;;  %v715_v10 = vld [vmem:[%s8089_s18 + $0xdb8] sm:$0xff] }
 0x3c0   : > { %v1227_v11 = vld [vmem:[%s8095_s20 + $0xdb8] sm:$0xff] }
 0x3c1   : > { %v2736_v32 = vadd.f32 %v2735_v27, %v2224_v21  ;;  %v1727_v21 = vsub.f32 %v703_v14, %v1215_v15  ;;  %v2238_v27 = vmul.f32 %v1726_v16, %v1726_v16  ;;  %v716_v15 = vld [vmem:[%s8089_s18 + $0xdc0] sm:$0xff] }
 0x3c2   : > { %v1228_v16 = vld [vmem:[%s8095_s20 + $0xdc0] sm:$0xff] }
 0x3c3   : > { %v2737_v37 = vadd.f32 %v2736_v32, %v2225_v26  ;;  %v1728_v26 = vsub.f32 %v704_v19, %v1216_v20  ;;  %v2239_v32 = vmul.f32 %v1727_v21, %v1727_v21  ;;  %v717_v20 = vld [vmem:[%s8089_s18 + $0xdc8] sm:$0xff] }
 0x3c4   : > { %v1229_v21 = vld [vmem:[%s8095_s20 + $0xdc8] sm:$0xff] }
 0x3c5   : > { %v2738_v42 = vadd.f32 %v2737_v37, %v2226_v31  ;;  %v1729_v31 = vsub.f32 %v705_v24, %v1217_v25  ;;  %v2240_v37 = vmul.f32 %v1728_v26, %v1728_v26  ;;  %v718_v25 = vld [vmem:[%s8089_s18 + $0xdd0] sm:$0xff] }
 0x3c6   : > { %v1230_v26 = vld [vmem:[%s8095_s20 + $0xdd0] sm:$0xff] }
 0x3c7   : > { %v2739_v47 = vadd.f32 %v2738_v42, %v2227_v36  ;;  %v1730_v36 = vsub.f32 %v706_v29, %v1218_v30  ;;  %v2241_v42 = vmul.f32 %v1729_v31, %v1729_v31  ;;  %v719_v30 = vld [vmem:[%s8089_s18 + $0xdd8] sm:$0xff] }
 0x3c8   : > { %v1231_v31 = vld [vmem:[%s8095_s20 + $0xdd8] sm:$0xff] }
 0x3c9   : > { %v2740_v52 = vadd.f32 %v2739_v47, %v2228_v41  ;;  %v1731_v41 = vsub.f32 %v707_v34, %v1219_v35  ;;  %v2242_v47 = vmul.f32 %v1730_v36, %v1730_v36  ;;  %v720_v35 = vld [vmem:[%s8089_s18 + $0xde0] sm:$0xff] }
 0x3ca   : > { %v1232_v36 = vld [vmem:[%s8095_s20 + $0xde0] sm:$0xff] }
 0x3cb   : > { %v2741_v57 = vadd.f32 %v2740_v52, %v2229_v46  ;;  %v1732_v46 = vsub.f32 %v708_v39, %v1220_v40  ;;  %v2243_v52 = vmul.f32 %v1731_v41, %v1731_v41  ;;  %v721_v40 = vld [vmem:[%s8089_s18 + $0xde8] sm:$0xff] }
 0x3cc   : > { %v1233_v41 = vld [vmem:[%s8095_s20 + $0xde8] sm:$0xff] }
 0x3cd   : > { %v2742_v62 = vadd.f32 %v2741_v57, %v2230_v51  ;;  %v1733_v51 = vsub.f32 %v709_v44, %v1221_v45  ;;  %v2244_v57 = vmul.f32 %v1732_v46, %v1732_v46  ;;  %v722_v45 = vld [vmem:[%s8089_s18 + $0xdf0] sm:$0xff] }
 0x3ce   : > { %v1234_v46 = vld [vmem:[%s8095_s20 + $0xdf0] sm:$0xff] }
 0x3cf   : > { %v2743_v3 = vadd.f32 %v2742_v62, %v2231_v56  ;;  %v1734_v56 = vsub.f32 %v710_v49, %v1222_v50  ;;  %v2245_v62 = vmul.f32 %v1733_v51, %v1733_v51  ;;  %v723_v50 = vld [vmem:[%s8089_s18 + $0xdf8] sm:$0xff] }
 0x3d0   : > { %v1235_v51 = vld [vmem:[%s8095_s20 + $0xdf8] sm:$0xff] }
 0x3d1   : > { %v2744_v8 = vadd.f32 %v2743_v3, %v2232_v61  ;;  %v1735_v61 = vsub.f32 %v711_v54, %v1223_v55  ;;  %v2246_v3 = vmul.f32 %v1734_v56, %v1734_v56  ;;  %v724_v55 = vld [vmem:[%s8089_s18 + $0xe00] sm:$0xff] }
 0x3d2   : > { %v1236_v56 = vld [vmem:[%s8095_s20 + $0xe00] sm:$0xff] }
 0x3d3   : > { %v2745_v13 = vadd.f32 %v2744_v8, %v2233_v2  ;;  %v1736_v2 = vsub.f32 %v712_v59, %v1224_v60  ;;  %v2247_v8 = vmul.f32 %v1735_v61, %v1735_v61  ;;  %v725_v60 = vld [vmem:[%s8089_s18 + $0xe08] sm:$0xff] }
 0x3d4   : > { %v1237_v61 = vld [vmem:[%s8095_s20 + $0xe08] sm:$0xff] }
 0x3d5   : > { %v2746_v18 = vadd.f32 %v2745_v13, %v2234_v7  ;;  %v1737_v7 = vsub.f32 %v713_v0, %v1225_v1  ;;  %v2248_v13 = vmul.f32 %v1736_v2, %v1736_v2  ;;  %v726_v1 = vld [vmem:[%s8089_s18 + $0xe10] sm:$0xff] }
 0x3d6   : > { %v1238_v2 = vld [vmem:[%s8095_s20 + $0xe10] sm:$0xff] }
 0x3d7   : > { %v2747_v23 = vadd.f32 %v2746_v18, %v2235_v12  ;;  %v1738_v12 = vsub.f32 %v714_v5, %v1226_v6  ;;  %v2249_v18 = vmul.f32 %v1737_v7, %v1737_v7  ;;  %v727_v6 = vld [vmem:[%s8089_s18 + $0xe18] sm:$0xff] }
 0x3d8   : > { %v1239_v7 = vld [vmem:[%s8095_s20 + $0xe18] sm:$0xff] }
 0x3d9   : > { %v2748_v28 = vadd.f32 %v2747_v23, %v2236_v17  ;;  %v1739_v17 = vsub.f32 %v715_v10, %v1227_v11  ;;  %v2250_v23 = vmul.f32 %v1738_v12, %v1738_v12  ;;  %v728_v11 = vld [vmem:[%s8089_s18 + $0xe20] sm:$0xff] }
 0x3da   : > { %v1240_v12 = vld [vmem:[%s8095_s20 + $0xe20] sm:$0xff] }
 0x3db   : > { %v2749_v33 = vadd.f32 %v2748_v28, %v2237_v22  ;;  %v1740_v22 = vsub.f32 %v716_v15, %v1228_v16  ;;  %v2251_v28 = vmul.f32 %v1739_v17, %v1739_v17  ;;  %v729_v16 = vld [vmem:[%s8089_s18 + $0xe28] sm:$0xff] }
 0x3dc   : > { %v1241_v17 = vld [vmem:[%s8095_s20 + $0xe28] sm:$0xff] }
 0x3dd   : > { %v2750_v38 = vadd.f32 %v2749_v33, %v2238_v27  ;;  %v1741_v27 = vsub.f32 %v717_v20, %v1229_v21  ;;  %v2252_v33 = vmul.f32 %v1740_v22, %v1740_v22  ;;  %v730_v21 = vld [vmem:[%s8089_s18 + $0xe30] sm:$0xff] }
 0x3de   : > { %v1242_v22 = vld [vmem:[%s8095_s20 + $0xe30] sm:$0xff] }
 0x3df   : > { %v2751_v43 = vadd.f32 %v2750_v38, %v2239_v32  ;;  %v1742_v32 = vsub.f32 %v718_v25, %v1230_v26  ;;  %v2253_v38 = vmul.f32 %v1741_v27, %v1741_v27  ;;  %v731_v26 = vld [vmem:[%s8089_s18 + $0xe38] sm:$0xff] }
 0x3e0   : > { %v1243_v27 = vld [vmem:[%s8095_s20 + $0xe38] sm:$0xff] }
 0x3e1   : > { %v2752_v48 = vadd.f32 %v2751_v43, %v2240_v37  ;;  %v1743_v37 = vsub.f32 %v719_v30, %v1231_v31  ;;  %v2254_v43 = vmul.f32 %v1742_v32, %v1742_v32  ;;  %v732_v31 = vld [vmem:[%s8089_s18 + $0xe40] sm:$0xff] }
 0x3e2   : > { %v1244_v32 = vld [vmem:[%s8095_s20 + $0xe40] sm:$0xff] }
 0x3e3   : > { %v2753_v53 = vadd.f32 %v2752_v48, %v2241_v42  ;;  %v1744_v42 = vsub.f32 %v720_v35, %v1232_v36  ;;  %v2255_v48 = vmul.f32 %v1743_v37, %v1743_v37  ;;  %v733_v36 = vld [vmem:[%s8089_s18 + $0xe48] sm:$0xff] }
 0x3e4   : > { %v1245_v37 = vld [vmem:[%s8095_s20 + $0xe48] sm:$0xff] }
 0x3e5   : > { %v2754_v58 = vadd.f32 %v2753_v53, %v2242_v47  ;;  %v1745_v47 = vsub.f32 %v721_v40, %v1233_v41  ;;  %v2256_v53 = vmul.f32 %v1744_v42, %v1744_v42  ;;  %v734_v41 = vld [vmem:[%s8089_s18 + $0xe50] sm:$0xff] }
 0x3e6   : > { %v1246_v42 = vld [vmem:[%s8095_s20 + $0xe50] sm:$0xff] }
 0x3e7   : > { %v2755_v63 = vadd.f32 %v2754_v58, %v2243_v52  ;;  %v1746_v52 = vsub.f32 %v722_v45, %v1234_v46  ;;  %v2257_v58 = vmul.f32 %v1745_v47, %v1745_v47  ;;  %v735_v46 = vld [vmem:[%s8089_s18 + $0xe58] sm:$0xff] }
 0x3e8   : > { %v1247_v47 = vld [vmem:[%s8095_s20 + $0xe58] sm:$0xff] }
 0x3e9   : > { %v2756_v4 = vadd.f32 %v2755_v63, %v2244_v57  ;;  %v1747_v57 = vsub.f32 %v723_v50, %v1235_v51  ;;  %v2258_v63 = vmul.f32 %v1746_v52, %v1746_v52  ;;  %v736_v51 = vld [vmem:[%s8089_s18 + $0xe60] sm:$0xff] }
 0x3ea   : > { %v1248_v52 = vld [vmem:[%s8095_s20 + $0xe60] sm:$0xff] }
 0x3eb   : > { %v2757_v9 = vadd.f32 %v2756_v4, %v2245_v62  ;;  %v1748_v62 = vsub.f32 %v724_v55, %v1236_v56  ;;  %v2259_v4 = vmul.f32 %v1747_v57, %v1747_v57  ;;  %v737_v56 = vld [vmem:[%s8089_s18 + $0xe68] sm:$0xff] }
 0x3ec   : > { %v1249_v57 = vld [vmem:[%s8095_s20 + $0xe68] sm:$0xff] }
 0x3ed   : > { %v2758_v14 = vadd.f32 %v2757_v9, %v2246_v3  ;;  %v1749_v3 = vsub.f32 %v725_v60, %v1237_v61  ;;  %v2260_v9 = vmul.f32 %v1748_v62, %v1748_v62  ;;  %v738_v61 = vld [vmem:[%s8089_s18 + $0xe70] sm:$0xff] }
 0x3ee   : > { %v1250_v62 = vld [vmem:[%s8095_s20 + $0xe70] sm:$0xff] }
 0x3ef   : > { %v2759_v19 = vadd.f32 %v2758_v14, %v2247_v8  ;;  %v1750_v8 = vsub.f32 %v726_v1, %v1238_v2  ;;  %v2261_v14 = vmul.f32 %v1749_v3, %v1749_v3  ;;  %v739_v2 = vld [vmem:[%s8089_s18 + $0xe78] sm:$0xff] }
 0x3f0   : > { %v1251_v3 = vld [vmem:[%s8095_s20 + $0xe78] sm:$0xff] }
 0x3f1   : > { %v2760_v24 = vadd.f32 %v2759_v19, %v2248_v13  ;;  %v1751_v13 = vsub.f32 %v727_v6, %v1239_v7  ;;  %v2262_v19 = vmul.f32 %v1750_v8, %v1750_v8  ;;  %v740_v7 = vld [vmem:[%s8089_s18 + $0xe80] sm:$0xff] }
 0x3f2   : > { %v1252_v8 = vld [vmem:[%s8095_s20 + $0xe80] sm:$0xff] }
 0x3f3   : > { %v2761_v29 = vadd.f32 %v2760_v24, %v2249_v18  ;;  %v1752_v18 = vsub.f32 %v728_v11, %v1240_v12  ;;  %v2263_v24 = vmul.f32 %v1751_v13, %v1751_v13  ;;  %v741_v12 = vld [vmem:[%s8089_s18 + $0xe88] sm:$0xff] }
 0x3f4   : > { %v1253_v13 = vld [vmem:[%s8095_s20 + $0xe88] sm:$0xff] }
 0x3f5   : > { %v2762_v34 = vadd.f32 %v2761_v29, %v2250_v23  ;;  %v1753_v23 = vsub.f32 %v729_v16, %v1241_v17  ;;  %v2264_v29 = vmul.f32 %v1752_v18, %v1752_v18  ;;  %v742_v17 = vld [vmem:[%s8089_s18 + $0xe90] sm:$0xff] }
 0x3f6   : > { %v1254_v18 = vld [vmem:[%s8095_s20 + $0xe90] sm:$0xff] }
 0x3f7   : > { %v2763_v39 = vadd.f32 %v2762_v34, %v2251_v28  ;;  %v1754_v28 = vsub.f32 %v730_v21, %v1242_v22  ;;  %v2265_v34 = vmul.f32 %v1753_v23, %v1753_v23  ;;  %v743_v22 = vld [vmem:[%s8089_s18 + $0xe98] sm:$0xff] }
 0x3f8   : > { %v1255_v23 = vld [vmem:[%s8095_s20 + $0xe98] sm:$0xff] }
 0x3f9   : > { %v2764_v44 = vadd.f32 %v2763_v39, %v2252_v33  ;;  %v1755_v33 = vsub.f32 %v731_v26, %v1243_v27  ;;  %v2266_v39 = vmul.f32 %v1754_v28, %v1754_v28  ;;  %v744_v27 = vld [vmem:[%s8089_s18 + $0xea0] sm:$0xff] }
 0x3fa   : > { %v1256_v28 = vld [vmem:[%s8095_s20 + $0xea0] sm:$0xff] }
 0x3fb   : > { %v2765_v49 = vadd.f32 %v2764_v44, %v2253_v38  ;;  %v1756_v38 = vsub.f32 %v732_v31, %v1244_v32  ;;  %v2267_v44 = vmul.f32 %v1755_v33, %v1755_v33  ;;  %v745_v32 = vld [vmem:[%s8089_s18 + $0xea8] sm:$0xff] }
 0x3fc   : > { %v1257_v33 = vld [vmem:[%s8095_s20 + $0xea8] sm:$0xff] }
 0x3fd   : > { %v2766_v54 = vadd.f32 %v2765_v49, %v2254_v43  ;;  %v1757_v43 = vsub.f32 %v733_v36, %v1245_v37  ;;  %v2268_v49 = vmul.f32 %v1756_v38, %v1756_v38  ;;  %v746_v37 = vld [vmem:[%s8089_s18 + $0xeb0] sm:$0xff] }
 0x3fe   : > { %v1258_v38 = vld [vmem:[%s8095_s20 + $0xeb0] sm:$0xff] }
 0x3ff   : > { %v2767_v59 = vadd.f32 %v2766_v54, %v2255_v48  ;;  %v1758_v48 = vsub.f32 %v734_v41, %v1246_v42  ;;  %v2269_v54 = vmul.f32 %v1757_v43, %v1757_v43  ;;  %v747_v42 = vld [vmem:[%s8089_s18 + $0xeb8] sm:$0xff] }
 0x400   : > { %v1259_v43 = vld [vmem:[%s8095_s20 + $0xeb8] sm:$0xff] }
 0x401   : > { %v2768_v0 = vadd.f32 %v2767_v59, %v2256_v53  ;;  %v1759_v53 = vsub.f32 %v735_v46, %v1247_v47  ;;  %v2270_v59 = vmul.f32 %v1758_v48, %v1758_v48  ;;  %v748_v47 = vld [vmem:[%s8089_s18 + $0xec0] sm:$0xff] }
 0x402   : > { %v1260_v48 = vld [vmem:[%s8095_s20 + $0xec0] sm:$0xff] }
 0x403   : > { %v2769_v5 = vadd.f32 %v2768_v0, %v2257_v58  ;;  %v1760_v58 = vsub.f32 %v736_v51, %v1248_v52  ;;  %v2271_v0 = vmul.f32 %v1759_v53, %v1759_v53  ;;  %v749_v52 = vld [vmem:[%s8089_s18 + $0xec8] sm:$0xff] }
 0x404   : > { %v1261_v53 = vld [vmem:[%s8095_s20 + $0xec8] sm:$0xff] }
 0x405   : > { %v2770_v10 = vadd.f32 %v2769_v5, %v2258_v63  ;;  %v1761_v63 = vsub.f32 %v737_v56, %v1249_v57  ;;  %v2272_v5 = vmul.f32 %v1760_v58, %v1760_v58  ;;  %v750_v57 = vld [vmem:[%s8089_s18 + $0xed0] sm:$0xff] }
 0x406   : > { %v1262_v58 = vld [vmem:[%s8095_s20 + $0xed0] sm:$0xff] }
 0x407   : > { %v2771_v15 = vadd.f32 %v2770_v10, %v2259_v4  ;;  %v1762_v4 = vsub.f32 %v738_v61, %v1250_v62  ;;  %v2273_v10 = vmul.f32 %v1761_v63, %v1761_v63  ;;  %v751_v62 = vld [vmem:[%s8089_s18 + $0xed8] sm:$0xff] }
 0x408   : > { %v1263_v63 = vld [vmem:[%s8095_s20 + $0xed8] sm:$0xff] }
 0x409   : > { %v2772_v20 = vadd.f32 %v2771_v15, %v2260_v9  ;;  %v1763_v9 = vsub.f32 %v739_v2, %v1251_v3  ;;  %v2274_v15 = vmul.f32 %v1762_v4, %v1762_v4  ;;  %v752_v3 = vld [vmem:[%s8089_s18 + $0xee0] sm:$0xff] }
 0x40a   : > { %v1264_v4 = vld [vmem:[%s8095_s20 + $0xee0] sm:$0xff] }
 0x40b   : > { %v2773_v25 = vadd.f32 %v2772_v20, %v2261_v14  ;;  %v1764_v14 = vsub.f32 %v740_v7, %v1252_v8  ;;  %v2275_v20 = vmul.f32 %v1763_v9, %v1763_v9  ;;  %v753_v8 = vld [vmem:[%s8089_s18 + $0xee8] sm:$0xff] }
 0x40c   : > { %v1265_v9 = vld [vmem:[%s8095_s20 + $0xee8] sm:$0xff] }
 0x40d   : > { %v2774_v30 = vadd.f32 %v2773_v25, %v2262_v19  ;;  %v1765_v19 = vsub.f32 %v741_v12, %v1253_v13  ;;  %v2276_v25 = vmul.f32 %v1764_v14, %v1764_v14  ;;  %v754_v13 = vld [vmem:[%s8089_s18 + $0xef0] sm:$0xff] }
 0x40e   : > { %v1266_v14 = vld [vmem:[%s8095_s20 + $0xef0] sm:$0xff] }
 0x40f   : > { %v2775_v35 = vadd.f32 %v2774_v30, %v2263_v24  ;;  %v1766_v24 = vsub.f32 %v742_v17, %v1254_v18  ;;  %v2277_v30 = vmul.f32 %v1765_v19, %v1765_v19  ;;  %v755_v18 = vld [vmem:[%s8089_s18 + $0xef8] sm:$0xff] }
 0x410   : > { %v1267_v19 = vld [vmem:[%s8095_s20 + $0xef8] sm:$0xff] }
 0x411   : > { %v2776_v40 = vadd.f32 %v2775_v35, %v2264_v29  ;;  %v1767_v29 = vsub.f32 %v743_v22, %v1255_v23  ;;  %v2278_v35 = vmul.f32 %v1766_v24, %v1766_v24  ;;  %v756_v23 = vld [vmem:[%s8089_s18 + $0xf00] sm:$0xff] }
 0x412   : > { %v1268_v24 = vld [vmem:[%s8095_s20 + $0xf00] sm:$0xff] }
 0x413   : > { %v2777_v45 = vadd.f32 %v2776_v40, %v2265_v34  ;;  %v1768_v34 = vsub.f32 %v744_v27, %v1256_v28  ;;  %v2279_v40 = vmul.f32 %v1767_v29, %v1767_v29  ;;  %v757_v28 = vld [vmem:[%s8089_s18 + $0xf08] sm:$0xff] }
 0x414   : > { %v1269_v29 = vld [vmem:[%s8095_s20 + $0xf08] sm:$0xff] }
 0x415   : > { %v2778_v50 = vadd.f32 %v2777_v45, %v2266_v39  ;;  %v1769_v39 = vsub.f32 %v745_v32, %v1257_v33  ;;  %v2280_v45 = vmul.f32 %v1768_v34, %v1768_v34  ;;  %v758_v33 = vld [vmem:[%s8089_s18 + $0xf10] sm:$0xff] }
 0x416   : > { %v1270_v34 = vld [vmem:[%s8095_s20 + $0xf10] sm:$0xff] }
 0x417   : > { %v2779_v55 = vadd.f32 %v2778_v50, %v2267_v44  ;;  %v1770_v44 = vsub.f32 %v746_v37, %v1258_v38  ;;  %v2281_v50 = vmul.f32 %v1769_v39, %v1769_v39  ;;  %v759_v38 = vld [vmem:[%s8089_s18 + $0xf18] sm:$0xff] }
 0x418   : > { %v1271_v39 = vld [vmem:[%s8095_s20 + $0xf18] sm:$0xff] }
 0x419   : > { %v2780_v60 = vadd.f32 %v2779_v55, %v2268_v49  ;;  %v1771_v49 = vsub.f32 %v747_v42, %v1259_v43  ;;  %v2282_v55 = vmul.f32 %v1770_v44, %v1770_v44  ;;  %v760_v43 = vld [vmem:[%s8089_s18 + $0xf20] sm:$0xff] }
 0x41a   : > { %v1272_v44 = vld [vmem:[%s8095_s20 + $0xf20] sm:$0xff] }
 0x41b   : > { %v2781_v1 = vadd.f32 %v2780_v60, %v2269_v54  ;;  %v1772_v54 = vsub.f32 %v748_v47, %v1260_v48  ;;  %v2283_v60 = vmul.f32 %v1771_v49, %v1771_v49  ;;  %v761_v48 = vld [vmem:[%s8089_s18 + $0xf28] sm:$0xff] }
 0x41c   : > { %v1273_v49 = vld [vmem:[%s8095_s20 + $0xf28] sm:$0xff] }
 0x41d   : > { %v2782_v6 = vadd.f32 %v2781_v1, %v2270_v59  ;;  %v1773_v59 = vsub.f32 %v749_v52, %v1261_v53  ;;  %v2284_v1 = vmul.f32 %v1772_v54, %v1772_v54  ;;  %v762_v53 = vld [vmem:[%s8089_s18 + $0xf30] sm:$0xff] }
 0x41e   : > { %v1274_v54 = vld [vmem:[%s8095_s20 + $0xf30] sm:$0xff] }
 0x41f   : > { %v2783_v11 = vadd.f32 %v2782_v6, %v2271_v0  ;;  %v1774_v0 = vsub.f32 %v750_v57, %v1262_v58  ;;  %v2285_v6 = vmul.f32 %v1773_v59, %v1773_v59  ;;  %v763_v58 = vld [vmem:[%s8089_s18 + $0xf38] sm:$0xff] }
 0x420   : > { %v1275_v59 = vld [vmem:[%s8095_s20 + $0xf38] sm:$0xff] }
 0x421   : > { %v2784_v16 = vadd.f32 %v2783_v11, %v2272_v5  ;;  %v1775_v5 = vsub.f32 %v751_v62, %v1263_v63  ;;  %v2286_v11 = vmul.f32 %v1774_v0, %v1774_v0  ;;  %v764_v63 = vld [vmem:[%s8089_s18 + $0xf40] sm:$0xff] }
 0x422   : > { %v1276_v0 = vld [vmem:[%s8095_s20 + $0xf40] sm:$0xff] }
 0x423   : > { %v2785_v21 = vadd.f32 %v2784_v16, %v2273_v10  ;;  %v1776_v10 = vsub.f32 %v752_v3, %v1264_v4  ;;  %v2287_v16 = vmul.f32 %v1775_v5, %v1775_v5  ;;  %v765_v4 = vld [vmem:[%s8089_s18 + $0xf48] sm:$0xff] }
 0x424   : > { %v1277_v5 = vld [vmem:[%s8095_s20 + $0xf48] sm:$0xff] }
 0x425   : > { %v2786_v26 = vadd.f32 %v2785_v21, %v2274_v15  ;;  %v1777_v15 = vsub.f32 %v753_v8, %v1265_v9  ;;  %v2288_v21 = vmul.f32 %v1776_v10, %v1776_v10  ;;  %v766_v9 = vld [vmem:[%s8089_s18 + $0xf50] sm:$0xff] }
 0x426   : > { %v1278_v10 = vld [vmem:[%s8095_s20 + $0xf50] sm:$0xff] }
 0x427   : > { %v2787_v31 = vadd.f32 %v2786_v26, %v2275_v20  ;;  %v1778_v20 = vsub.f32 %v754_v13, %v1266_v14  ;;  %v2289_v26 = vmul.f32 %v1777_v15, %v1777_v15  ;;  %v767_v14 = vld [vmem:[%s8089_s18 + $0xf58] sm:$0xff] }
 0x428   : > { %v1279_v15 = vld [vmem:[%s8095_s20 + $0xf58] sm:$0xff] }
 0x429   : > { %v2788_v36 = vadd.f32 %v2787_v31, %v2276_v25  ;;  %v1779_v25 = vsub.f32 %v755_v18, %v1267_v19  ;;  %v2290_v31 = vmul.f32 %v1778_v20, %v1778_v20  ;;  %v768_v19 = vld [vmem:[%s8089_s18 + $0xf60] sm:$0xff] }
 0x42a   : > { %v1280_v20 = vld [vmem:[%s8095_s20 + $0xf60] sm:$0xff] }
 0x42b   : > { %v2789_v41 = vadd.f32 %v2788_v36, %v2277_v30  ;;  %v1780_v30 = vsub.f32 %v756_v23, %v1268_v24  ;;  %v2291_v36 = vmul.f32 %v1779_v25, %v1779_v25  ;;  %v769_v24 = vld [vmem:[%s8089_s18 + $0xf68] sm:$0xff] }
 0x42c   : > { %v1281_v25 = vld [vmem:[%s8095_s20 + $0xf68] sm:$0xff] }
 0x42d   : > { %v2790_v46 = vadd.f32 %v2789_v41, %v2278_v35  ;;  %v1781_v35 = vsub.f32 %v757_v28, %v1269_v29  ;;  %v2292_v41 = vmul.f32 %v1780_v30, %v1780_v30  ;;  %v770_v29 = vld [vmem:[%s8089_s18 + $0xf70] sm:$0xff] }
 0x42e   : > { %v1282_v30 = vld [vmem:[%s8095_s20 + $0xf70] sm:$0xff] }
 0x42f   : > { %v2791_v51 = vadd.f32 %v2790_v46, %v2279_v40  ;;  %v1782_v40 = vsub.f32 %v758_v33, %v1270_v34  ;;  %v2293_v46 = vmul.f32 %v1781_v35, %v1781_v35  ;;  %v771_v34 = vld [vmem:[%s8089_s18 + $0xf78] sm:$0xff] }
 0x430   : > { %v1283_v35 = vld [vmem:[%s8095_s20 + $0xf78] sm:$0xff] }
 0x431   : > { %v2792_v56 = vadd.f32 %v2791_v51, %v2280_v45  ;;  %v1783_v45 = vsub.f32 %v759_v38, %v1271_v39  ;;  %v2294_v51 = vmul.f32 %v1782_v40, %v1782_v40  ;;  %v772_v39 = vld [vmem:[%s8089_s18 + $0xf80] sm:$0xff] }
 0x432   : > { %v1284_v40 = vld [vmem:[%s8095_s20 + $0xf80] sm:$0xff] }
 0x433   : > { %v2793_v61 = vadd.f32 %v2792_v56, %v2281_v50  ;;  %v1784_v50 = vsub.f32 %v760_v43, %v1272_v44  ;;  %v2295_v56 = vmul.f32 %v1783_v45, %v1783_v45  ;;  %v773_v44 = vld [vmem:[%s8089_s18 + $0xf88] sm:$0xff] }
 0x434   : > { %v1285_v45 = vld [vmem:[%s8095_s20 + $0xf88] sm:$0xff] }
 0x435   : > { %v2794_v2 = vadd.f32 %v2793_v61, %v2282_v55  ;;  %v1785_v55 = vsub.f32 %v761_v48, %v1273_v49  ;;  %v2296_v61 = vmul.f32 %v1784_v50, %v1784_v50  ;;  %v774_v49 = vld [vmem:[%s8089_s18 + $0xf90] sm:$0xff] }
 0x436   : > { %v1286_v50 = vld [vmem:[%s8095_s20 + $0xf90] sm:$0xff] }
 0x437   : > { %v2795_v7 = vadd.f32 %v2794_v2, %v2283_v60  ;;  %v1786_v60 = vsub.f32 %v762_v53, %v1274_v54  ;;  %v2297_v2 = vmul.f32 %v1785_v55, %v1785_v55  ;;  %v775_v54 = vld [vmem:[%s8089_s18 + $0xf98] sm:$0xff] }
 0x438   : > { %v1287_v55 = vld [vmem:[%s8095_s20 + $0xf98] sm:$0xff] }
 0x439   : > { %v2796_v12 = vadd.f32 %v2795_v7, %v2284_v1  ;;  %v1787_v1 = vsub.f32 %v763_v58, %v1275_v59  ;;  %v2298_v7 = vmul.f32 %v1786_v60, %v1786_v60  ;;  %v776_v59 = vld [vmem:[%s8089_s18 + $0xfa0] sm:$0xff] }
 0x43a   : > { %v1288_v60 = vld [vmem:[%s8095_s20 + $0xfa0] sm:$0xff] }
 0x43b   : > { %v2797_v17 = vadd.f32 %v2796_v12, %v2285_v6  ;;  %v1788_v6 = vsub.f32 %v764_v63, %v1276_v0  ;;  %v2299_v12 = vmul.f32 %v1787_v1, %v1787_v1  ;;  %v777_v0 = vld [vmem:[%s8089_s18 + $0xfa8] sm:$0xff] }
 0x43c   : > { %v1289_v1 = vld [vmem:[%s8095_s20 + $0xfa8] sm:$0xff] }
 0x43d   : > { %v2798_v22 = vadd.f32 %v2797_v17, %v2286_v11  ;;  %v1789_v11 = vsub.f32 %v765_v4, %v1277_v5  ;;  %v2300_v17 = vmul.f32 %v1788_v6, %v1788_v6  ;;  %v778_v5 = vld [vmem:[%s8089_s18 + $0xfb0] sm:$0xff] }
 0x43e   : > { %v1290_v6 = vld [vmem:[%s8095_s20 + $0xfb0] sm:$0xff] }
 0x43f   : > { %v2799_v27 = vadd.f32 %v2798_v22, %v2287_v16  ;;  %v1790_v16 = vsub.f32 %v766_v9, %v1278_v10  ;;  %v2301_v22 = vmul.f32 %v1789_v11, %v1789_v11  ;;  %v779_v10 = vld [vmem:[%s8089_s18 + $0xfb8] sm:$0xff] }
 0x440   : > { %v1291_v11 = vld [vmem:[%s8095_s20 + $0xfb8] sm:$0xff] }
 0x441   : > { %v2800_v32 = vadd.f32 %v2799_v27, %v2288_v21  ;;  %v1791_v21 = vsub.f32 %v767_v14, %v1279_v15  ;;  %v2302_v27 = vmul.f32 %v1790_v16, %v1790_v16  ;;  %v780_v15 = vld [vmem:[%s8089_s18 + $0xfc0] sm:$0xff] }
 0x442   : > { %v1292_v16 = vld [vmem:[%s8095_s20 + $0xfc0] sm:$0xff] }
 0x443   : > { %v2801_v37 = vadd.f32 %v2800_v32, %v2289_v26  ;;  %v1792_v26 = vsub.f32 %v768_v19, %v1280_v20  ;;  %v2303_v32 = vmul.f32 %v1791_v21, %v1791_v21  ;;  %v781_v20 = vld [vmem:[%s8089_s18 + $0xfc8] sm:$0xff] }
 0x444   : > { %v1293_v21 = vld [vmem:[%s8095_s20 + $0xfc8] sm:$0xff] }
 0x445   : > { %v2802_v42 = vadd.f32 %v2801_v37, %v2290_v31  ;;  %v1793_v31 = vsub.f32 %v769_v24, %v1281_v25  ;;  %v2304_v37 = vmul.f32 %v1792_v26, %v1792_v26  ;;  %v782_v25 = vld [vmem:[%s8089_s18 + $0xfd0] sm:$0xff] }
 0x446   : > { %v1294_v26 = vld [vmem:[%s8095_s20 + $0xfd0] sm:$0xff] }
 0x447   : > { %v2803_v47 = vadd.f32 %v2802_v42, %v2291_v36  ;;  %v1794_v36 = vsub.f32 %v770_v29, %v1282_v30  ;;  %v2305_v42 = vmul.f32 %v1793_v31, %v1793_v31  ;;  %v783_v30 = vld [vmem:[%s8089_s18 + $0xfd8] sm:$0xff] }
 0x448   : > { %v1295_v31 = vld [vmem:[%s8095_s20 + $0xfd8] sm:$0xff] }
 0x449   : > { %v2804_v52 = vadd.f32 %v2803_v47, %v2292_v41  ;;  %v1795_v41 = vsub.f32 %v771_v34, %v1283_v35  ;;  %v2306_v47 = vmul.f32 %v1794_v36, %v1794_v36  ;;  %v784_v35 = vld [vmem:[%s8089_s18 + $0xfe0] sm:$0xff] }
 0x44a   : > { %v1296_v36 = vld [vmem:[%s8095_s20 + $0xfe0] sm:$0xff] }
 0x44b   : > { %v2805_v57 = vadd.f32 %v2804_v52, %v2293_v46  ;;  %v1796_v46 = vsub.f32 %v772_v39, %v1284_v40  ;;  %v2307_v52 = vmul.f32 %v1795_v41, %v1795_v41  ;;  %v785_v40 = vld [vmem:[%s8089_s18 + $0xfe8] sm:$0xff] }
 0x44c   : > { %v1297_v41 = vld [vmem:[%s8095_s20 + $0xfe8] sm:$0xff] }
 0x44d   : > { %v2806_v62 = vadd.f32 %v2805_v57, %v2294_v51  ;;  %v1797_v51 = vsub.f32 %v773_v44, %v1285_v45  ;;  %v2308_v57 = vmul.f32 %v1796_v46, %v1796_v46  ;;  %v786_v45 = vld [vmem:[%s8089_s18 + $0xff0] sm:$0xff] }
 0x44e   : > { %v1298_v46 = vld [vmem:[%s8095_s20 + $0xff0] sm:$0xff] }
 0x44f   : > { %v2807_v3 = vadd.f32 %v2806_v62, %v2295_v56  ;;  %v1798_v56 = vsub.f32 %v774_v49, %v1286_v50  ;;  %v2309_v62 = vmul.f32 %v1797_v51, %v1797_v51  ;;  %v787_v50 = vld [vmem:[%s8089_s18 + $0xff8] sm:$0xff] }
 0x450   : > { %v1299_v51 = vld [vmem:[%s8095_s20 + $0xff8] sm:$0xff] }
 0x451   : > { %v2808_v8 = vadd.f32 %v2807_v3, %v2296_v61  ;;  %v1799_v61 = vsub.f32 %v775_v54, %v1287_v55  ;;  %v2310_v3 = vmul.f32 %v1798_v56, %v1798_v56  ;;  %v1811_v55 = vsub.f32 %v787_v50, %v1299_v51 }
 0x453   : > { %v2809_v13 = vadd.f32 %v2808_v8, %v2297_v2  ;;  %v1800_v2 = vsub.f32 %v776_v59, %v1288_v60  ;;  %v2311_v8 = vmul.f32 %v1799_v61, %v1799_v61  ;;  %v2323_v60 = vmul.f32 %v1811_v55, %v1811_v55 }
 0x455   : > { %v2810_v18 = vadd.f32 %v2809_v13, %v2298_v7  ;;  %v1801_v7 = vsub.f32 %v777_v0, %v1289_v1  ;;  %v2312_v13 = vmul.f32 %v1800_v2, %v1800_v2 }
 0x457   : > { %v2811_v23 = vadd.f32 %v2810_v18, %v2299_v12  ;;  %v1802_v12 = vsub.f32 %v778_v5, %v1290_v6  ;;  %v2313_v18 = vmul.f32 %v1801_v7, %v1801_v7 }
 0x459   : > { %v2812_v28 = vadd.f32 %v2811_v23, %v2300_v17  ;;  %v1803_v17 = vsub.f32 %v779_v10, %v1291_v11  ;;  %v2314_v23 = vmul.f32 %v1802_v12, %v1802_v12 }
 0x45b   : > { %v2813_v33 = vadd.f32 %v2812_v28, %v2301_v22  ;;  %v1804_v22 = vsub.f32 %v780_v15, %v1292_v16  ;;  %v2315_v28 = vmul.f32 %v1803_v17, %v1803_v17 }
 0x45d   : > { %v2814_v38 = vadd.f32 %v2813_v33, %v2302_v27  ;;  %v1805_v27 = vsub.f32 %v781_v20, %v1293_v21  ;;  %v2316_v33 = vmul.f32 %v1804_v22, %v1804_v22 }
 0x45f   : > { %v2815_v43 = vadd.f32 %v2814_v38, %v2303_v32  ;;  %v1806_v32 = vsub.f32 %v782_v25, %v1294_v26  ;;  %v2317_v38 = vmul.f32 %v1805_v27, %v1805_v27 }
 0x461   : > { %v2816_v48 = vadd.f32 %v2815_v43, %v2304_v37  ;;  %v1807_v37 = vsub.f32 %v783_v30, %v1295_v31  ;;  %v2318_v43 = vmul.f32 %v1806_v32, %v1806_v32 }
 0x463   : > { %v2817_v53 = vadd.f32 %v2816_v48, %v2305_v42  ;;  %v1808_v42 = vsub.f32 %v784_v35, %v1296_v36  ;;  %v2319_v48 = vmul.f32 %v1807_v37, %v1807_v37 }
 0x465   : > { %v2818_v58 = vadd.f32 %v2817_v53, %v2306_v47  ;;  %v1809_v47 = vsub.f32 %v785_v40, %v1297_v41  ;;  %v2320_v53 = vmul.f32 %v1808_v42, %v1808_v42 }
 0x467   : > { %v2819_v63 = vadd.f32 %v2818_v58, %v2307_v52  ;;  %v1810_v52 = vsub.f32 %v786_v45, %v1298_v46  ;;  %v2321_v56 = vmul.f32 %v1809_v47, %v1809_v47 }
 0x469   : > { %v2820_v4 = vadd.f32 %v2819_v63, %v2308_v57  ;;  %v2322_v58 = vmul.f32 %v1810_v52, %v1810_v52  ;;  %v2324_v63 = vld [vmem:[#allocation2] sm:$0xff] }
 0x46b   : > { %v2821_v9 = vadd.f32 %v2820_v4, %v2309_v62 }
 0x46d   : > { %v2822_v14 = vadd.f32 %v2821_v9, %v2310_v3 }
 0x46f   : > { %v2823_v19 = vadd.f32 %v2822_v14, %v2311_v8 }
 0x471   : > { %v2824_v24 = vadd.f32 %v2823_v19, %v2312_v13 }
 0x473   : > { %v2825_v29 = vadd.f32 %v2824_v24, %v2313_v18 }
 0x475   : > { %v2826_v34 = vadd.f32 %v2825_v29, %v2314_v23 }
 0x477   : > { %v2827_v39 = vadd.f32 %v2826_v34, %v2315_v28 }
 0x479   : > { %v2828_v44 = vadd.f32 %v2827_v39, %v2316_v33 }
 0x47b   : > { %v2829_v49 = vadd.f32 %v2828_v44, %v2317_v38 }
 0x47d   : > { %v2830_v54 = vadd.f32 %v2829_v49, %v2318_v43 }
 0x47f   : > { %v2831_v57 = vadd.f32 %v2830_v54, %v2319_v48 }
 0x481   : > { %v2832_v59 = vadd.f32 %v2831_v57, %v2320_v53 }
 0x483   : > { %v2833_v61 = vadd.f32 %v2832_v59, %v2321_v56 }
 0x485   : > { %v2834_v62 = vadd.f32 %v2833_v61, %v2322_v58 }
 0x487   : > { %v2835_v0 = vadd.f32 %v2834_v62, %v2323_v60 }
 0x489   : > { %v2836_v1 = vadd.f32 %v2835_v0, %v2324_v63 }
 0x48b   : > { %2837 = vst [vmem:[#allocation2] sm:$0xff] %v2836_v1 }
 0x48c PF: > { %p7600_p8 = scmp.ne.s32.totalorder %s7874_s15, 1 }
 0x48d   : > { %s7601_s25 = sshll.u32 (!%p7600_p8), %s7874_s15, 12 }
 0x48e   : > { %2841 = sbr.rel (%p7600_p8) target bundleno = 2208 (0x8a0), region = 48 }
 0x493   : > { %v2842_v2 = vlaneseq  ;;  %v9137_v5 = vstv %s7601_s25  ;;  %v4381_v6 = vld [vmem:[%s8089_s18] sm:$0xff]  ;;  %v4382_v10 = vld [vmem:[%s8089_s18 + $0x8] sm:$0xff]  ;;  %v4383_v17 = vld [vmem:[%s8089_s18 + $0x10] sm:$0xff] }
 0x494   : > { %v4893_v11 = vld [vmem:[%s8095_s20] sm:$0xff]  ;;  %v4894_v12 = vld [vmem:[%s8095_s20 + $0x8] sm:$0xff]  ;;  %v4895_v18 = vld [vmem:[%s8095_s20 + $0x10] sm:$0xff] }
 0x495   : > { %v9133_v3 = vshrl.u32 %v2842_v2, 7  ;;  %v5405_v13 = vsub.f32 %v4381_v6, %v4893_v11  ;;  %v5406_v14 = vsub.f32 %v4382_v10, %v4894_v12  ;;  %v5407_v19 = vsub.f32 %v4383_v17, %v4895_v18  ;;  %v4384_v24 = vld [vmem:[%s8089_s18 + $0x18] sm:$0xff]  ;;  %v4385_v32 = vld [vmem:[%s8089_s18 + $0x20] sm:$0xff]  ;;  %v4386_v40 = vld [vmem:[%s8089_s18 + $0x28] sm:$0xff] }
 0x496   : > { %v4896_v25 = vld [vmem:[%s8095_s20 + $0x18] sm:$0xff]  ;;  %v4897_v33 = vld [vmem:[%s8095_s20 + $0x20] sm:$0xff]  ;;  %v4898_v41 = vld [vmem:[%s8095_s20 + $0x28] sm:$0xff] }
 0x497   : > { %v2844_v4 = vadd.s32 8, %v9133_v3  ;;  %v2845_v7 = vadd.s32 16, %v9133_v3  ;;  %v3357_v8 = vadd.s32 %v9137_v5, %v9133_v3  ;;  %v2846_v15 = vadd.s32 24, %v9133_v3  ;;  %v4387_v48 = vld [vmem:[%s8089_s18 + $0x30] sm:$0xff]  ;;  %v4388_v56 = vld [vmem:[%s8089_s18 + $0x38] sm:$0xff]  ;;  %v4389_v0 = vld [vmem:[%s8089_s18 + $0x40] sm:$0xff] }
 0x498   : > { %v2847_v22 = vadd.s32 32, %v9133_v3  ;;  %v5408_v28 = vsub.f32 %v4384_v24, %v4896_v25  ;;  %v2848_v30 = vadd.s32 40, %v9133_v3  ;;  %v5409_v36 = vsub.f32 %v4385_v32, %v4897_v33  ;;  %v4899_v49 = vld [vmem:[%s8095_s20 + $0x30] sm:$0xff]  ;;  %v4900_v57 = vld [vmem:[%s8095_s20 + $0x38] sm:$0xff]  ;;  %v4901_v1 = vld [vmem:[%s8095_s20 + $0x40] sm:$0xff] }
 0x499   : > { %v3358_v9 = vadd.s32 %v9137_v5, %v2844_v4  ;;  %v3359_v16 = vadd.s32 %v9137_v5, %v2845_v7  ;;  %vm3869_vm0 = vcmp.lt.s32.totalorder %v3357_v8, 5120  ;;  %v3360_v23 = vadd.s32 %v9137_v5, %v2846_v15  ;;  %v4390_v10 = vld [vmem:[%s8089_s18 + $0x48] sm:$0xff]  ;;  %v4391_v18 = vld [vmem:[%s8089_s18 + $0x50] sm:$0xff] }
 0x49a   : > { %v5917_v20 = vsel %vm3869_vm0, %v5405_v13, 0.0  ;;  %v3361_v31 = vadd.s32 %v9137_v5, %v2847_v22  ;;  %v2849_v38 = vadd.s32 48, %v9133_v3  ;;  %v3362_v39 = vadd.s32 %v9137_v5, %v2848_v30  ;;  %v4902_v11 = vld [vmem:[%s8095_s20 + $0x48] sm:$0xff] }
 0x49b   : > { %vm3870_vm1 = vcmp.lt.s32.totalorder %v3358_v9, 5120  ;;  %vm3871_vm2 = vcmp.lt.s32.totalorder %v3359_v16, 5120  ;;  %v6429_v26 = vmul.f32 %v5917_v20, %v5917_v20  ;;  %vm3872_vm3 = vcmp.lt.s32.totalorder %v3360_v23, 5120 }
 0x49c   : > { %v5918_v21 = vsel %vm3870_vm1, %v5406_v14, 0.0  ;;  %v5919_v29 = vsel %vm3871_vm2, %v5407_v19, 0.0  ;;  %v5920_v37 = vsel %vm3872_vm3, %v5408_v28, 0.0  ;;  %vm3873_vm4 = vcmp.lt.s32.totalorder %v3361_v31, 5120  ;;  %v4903_v19 = vld [vmem:[%s8095_s20 + $0x50] sm:$0xff] }
 0x49d   : > { %v6430_v27 = vmul.f32 %v5918_v21, %v5918_v21  ;;  %v6431_v34 = vmul.f32 %v5919_v29, %v5919_v29  ;;  %v6432_v42 = vmul.f32 %v5920_v37, %v5920_v37  ;;  %v5410_v44 = vsub.f32 %v4386_v40, %v4898_v41 }
 0x49e   : > { %v5921_v45 = vsel %vm3873_vm4, %v5409_v36, 0.0  ;;  %v2850_v46 = vadd.s32 56, %v9133_v3  ;;  %v3363_v47 = vadd.s32 %v9137_v5, %v2849_v38  ;;  %vm3874_vm5 = vcmp.lt.s32.totalorder %v3362_v39, 5120 }
 0x49f   : > { %v6942_v35 = vadd.f32 %v6430_v27, %v6429_v26  ;;  %v6433_v50 = vmul.f32 %v5921_v45, %v5921_v45  ;;  %v5411_v52 = vsub.f32 %v4387_v48, %v4899_v49  ;;  %v5922_v53 = vsel %vm3874_vm5, %v5410_v44, 0.0  ;;  %v4392_v26 = vld [vmem:[%s8089_s18 + $0x58] sm:$0xff] }
 0x4a0   : > { %v2851_v54 = vadd.s32 64, %v9133_v3  ;;  %v3364_v55 = vadd.s32 %v9137_v5, %v2850_v46  ;;  %vm3875_vm6 = vcmp.lt.s32.totalorder %v3363_v47, 5120  ;;  %v6434_v58 = vmul.f32 %v5922_v53, %v5922_v53  ;;  %v4904_v27 = vld [vmem:[%s8095_s20 + $0x58] sm:$0xff] }
 0x4a1   : > { %v6943_v43 = vadd.f32 %v6942_v35, %v6431_v34  ;;  %v5412_v60 = vsub.f32 %v4388_v56, %v4900_v57  ;;  %v5923_v61 = vsel %vm3875_vm6, %v5411_v52, 0.0  ;;  %v2852_v62 = vadd.s32 72, %v9133_v3  ;;  %v4393_v34 = vld [vmem:[%s8089_s18 + $0x60] sm:$0xff] }
 0x4a2   : > { %v3365_v63 = vadd.s32 %v9137_v5, %v2851_v54  ;;  %vm3876_vm7 = vcmp.lt.s32.totalorder %v3364_v55, 5120  ;;  %v6435_v2 = vmul.f32 %v5923_v61, %v5923_v61  ;;  %v5413_v6 = vsub.f32 %v4389_v0, %v4901_v1  ;;  %v4905_v35 = vld [vmem:[%s8095_s20 + $0x60] sm:$0xff] }
 0x4a3   : > { %v6944_v51 = vadd.f32 %v6943_v43, %v6432_v42  ;;  %v5924_v7 = vsel %vm3876_vm7, %v5412_v60, 0.0  ;;  %v2853_v8 = vadd.s32 80, %v9133_v3  ;;  %v3366_v9 = vadd.s32 %v9137_v5, %v2852_v62  ;;  %v4394_v42 = vld [vmem:[%s8089_s18 + $0x68] sm:$0xff] }
 0x4a4   : > { %vm3877_vm8 = vcmp.lt.s32.totalorder %v3365_v63, 5120  ;;  %v6436_v12 = vmul.f32 %v5924_v7, %v5924_v7  ;;  %v5414_v14 = vsub.f32 %v4390_v10, %v4902_v11  ;;  %v2854_v16 = vadd.s32 88, %v9133_v3  ;;  %v4906_v43 = vld [vmem:[%s8095_s20 + $0x68] sm:$0xff] }
 0x4a5   : > { %v6945_v59 = vadd.f32 %v6944_v51, %v6433_v50  ;;  %v5925_v15 = vsel %vm3877_vm8, %v5413_v6, 0.0  ;;  %v3367_v17 = vadd.s32 %v9137_v5, %v2853_v8  ;;  %vm3878_vm9 = vcmp.lt.s32.totalorder %v3366_v9, 5120  ;;  %v4395_v50 = vld [vmem:[%s8089_s18 + $0x70] sm:$0xff] }
 0x4a6   : > { %v6437_v20 = vmul.f32 %v5925_v15, %v5925_v15  ;;  %v5415_v22 = vsub.f32 %v4391_v18, %v4903_v19  ;;  %v5926_v23 = vsel %vm3878_vm9, %v5414_v14, 0.0  ;;  %v2855_v24 = vadd.s32 96, %v9133_v3  ;;  %v4907_v51 = vld [vmem:[%s8095_s20 + $0x70] sm:$0xff] }
 0x4a7   : > { %v6946_v4 = vadd.f32 %v6945_v59, %v6434_v58  ;;  %v3368_v25 = vadd.s32 %v9137_v5, %v2854_v16  ;;  %vm3879_vm10 = vcmp.lt.s32.totalorder %v3367_v17, 5120  ;;  %v6438_v28 = vmul.f32 %v5926_v23, %v5926_v23  ;;  %v4396_v58 = vld [vmem:[%s8089_s18 + $0x78] sm:$0xff] }
 0x4a8   : > { %v5416_v30 = vsub.f32 %v4392_v26, %v4904_v27  ;;  %v5927_v31 = vsel %vm3879_vm10, %v5415_v22, 0.0  ;;  %v2856_v32 = vadd.s32 104, %v9133_v3  ;;  %v3369_v33 = vadd.s32 %v9137_v5, %v2855_v24  ;;  %v4908_v59 = vld [vmem:[%s8095_s20 + $0x78] sm:$0xff] }
 0x4a9   : > { %v6947_v13 = vadd.f32 %v6946_v4, %v6435_v2  ;;  %vm3880_vm11 = vcmp.lt.s32.totalorder %v3368_v25, 5120  ;;  %v6439_v36 = vmul.f32 %v5927_v31, %v5927_v31  ;;  %v5417_v38 = vsub.f32 %v4393_v34, %v4905_v35  ;;  %v4397_v2 = vld [vmem:[%s8089_s18 + $0x80] sm:$0xff] }
 0x4aa   : > { %v5928_v39 = vsel %vm3880_vm11, %v5416_v30, 0.0  ;;  %v2857_v40 = vadd.s32 112, %v9133_v3  ;;  %v3370_v41 = vadd.s32 %v9137_v5, %v2856_v32  ;;  %vm3881_vm12 = vcmp.lt.s32.totalorder %v3369_v33, 5120  ;;  %v4909_v4 = vld [vmem:[%s8095_s20 + $0x80] sm:$0xff] }
 0x4ab   : > { %v6948_v21 = vadd.f32 %v6947_v13, %v6436_v12  ;;  %v6440_v44 = vmul.f32 %v5928_v39, %v5928_v39  ;;  %v5418_v46 = vsub.f32 %v4394_v42, %v4906_v43  ;;  %v5929_v47 = vsel %vm3881_vm12, %v5417_v38, 0.0  ;;  %v4398_v12 = vld [vmem:[%s8089_s18 + $0x88] sm:$0xff] }
 0x4ac   : > { %v2858_v48 = vadd.s32 120, %v9133_v3  ;;  %v3371_v49 = vadd.s32 %v9137_v5, %v2857_v40  ;;  %vm3882_vm13 = vcmp.lt.s32.totalorder %v3370_v41, 5120  ;;  %v6441_v52 = vmul.f32 %v5929_v47, %v5929_v47  ;;  %v4910_v13 = vld [vmem:[%s8095_s20 + $0x88] sm:$0xff] }
 0x4ad   : > { %v6949_v29 = vadd.f32 %v6948_v21, %v6437_v20  ;;  %v5419_v54 = vsub.f32 %v4395_v50, %v4907_v51  ;;  %v5930_v55 = vsel %vm3882_vm13, %v5418_v46, 0.0  ;;  %v2859_v56 = vadd.s32 128, %v9133_v3  ;;  %v4399_v20 = vld [vmem:[%s8089_s18 + $0x90] sm:$0xff] }
 0x4ae   : > { %v3372_v57 = vadd.s32 %v9137_v5, %v2858_v48  ;;  %vm3883_vm14 = vcmp.lt.s32.totalorder %v3371_v49, 5120  ;;  %v6442_v60 = vmul.f32 %v5930_v55, %v5930_v55  ;;  %v5420_v62 = vsub.f32 %v4396_v58, %v4908_v59  ;;  %v4911_v21 = vld [vmem:[%s8095_s20 + $0x90] sm:$0xff] }
 0x4af   : > { %v6950_v37 = vadd.f32 %v6949_v29, %v6438_v28  ;;  %v5931_v63 = vsel %vm3883_vm14, %v5419_v54, 0.0  ;;  %v2860_v0 = vadd.s32 136, %v9133_v3  ;;  %v3373_v1 = vadd.s32 %v9137_v5, %v2859_v56  ;;  %v4400_v28 = vld [vmem:[%s8089_s18 + $0x98] sm:$0xff] }
 0x4b0   : > { %vm3884_vm15 = vcmp.lt.s32.totalorder %v3372_v57, 5120  ;;  %v6443_v6 = vmul.f32 %v5931_v63, %v5931_v63  ;;  %v5421_v8 = vsub.f32 %v4397_v2, %v4909_v4  ;;  %v2861_v10 = vadd.s32 144, %v9133_v3  ;;  %v4912_v29 = vld [vmem:[%s8095_s20 + $0x98] sm:$0xff] }
 0x4b1   : > { %v6951_v45 = vadd.f32 %v6950_v37, %v6439_v36  ;;  %v5932_v9 = vsel %vm3884_vm15, %v5420_v62, 0.0  ;;  %v3374_v11 = vadd.s32 %v9137_v5, %v2860_v0  ;;  %vm3885_vm0 = vcmp.lt.s32.totalorder %v3373_v1, 5120  ;;  %v4401_v36 = vld [vmem:[%s8089_s18 + $0xa0] sm:$0xff] }
 0x4b2   : > { %v6444_v14 = vmul.f32 %v5932_v9, %v5932_v9  ;;  %v5422_v16 = vsub.f32 %v4398_v12, %v4910_v13  ;;  %v5933_v17 = vsel %vm3885_vm0, %v5421_v8, 0.0  ;;  %v2862_v18 = vadd.s32 152, %v9133_v3  ;;  %v4913_v37 = vld [vmem:[%s8095_s20 + $0xa0] sm:$0xff] }
 0x4b3   : > { %v6952_v53 = vadd.f32 %v6951_v45, %v6440_v44  ;;  %v3375_v19 = vadd.s32 %v9137_v5, %v2861_v10  ;;  %vm3886_vm1 = vcmp.lt.s32.totalorder %v3374_v11, 5120  ;;  %v6445_v22 = vmul.f32 %v5933_v17, %v5933_v17  ;;  %v4402_v44 = vld [vmem:[%s8089_s18 + $0xa8] sm:$0xff] }
 0x4b4   : > { %v5423_v24 = vsub.f32 %v4399_v20, %v4911_v21  ;;  %v5934_v25 = vsel %vm3886_vm1, %v5422_v16, 0.0  ;;  %v2863_v26 = vadd.s32 160, %v9133_v3  ;;  %v3376_v27 = vadd.s32 %v9137_v5, %v2862_v18  ;;  %v4914_v45 = vld [vmem:[%s8095_s20 + $0xa8] sm:$0xff] }
 0x4b5   : > { %v6953_v61 = vadd.f32 %v6952_v53, %v6441_v52  ;;  %vm3887_vm2 = vcmp.lt.s32.totalorder %v3375_v19, 5120  ;;  %v6446_v30 = vmul.f32 %v5934_v25, %v5934_v25  ;;  %v5424_v32 = vsub.f32 %v4400_v28, %v4912_v29  ;;  %v4403_v52 = vld [vmem:[%s8089_s18 + $0xb0] sm:$0xff] }
 0x4b6   : > { %v5935_v33 = vsel %vm3887_vm2, %v5423_v24, 0.0  ;;  %v2864_v34 = vadd.s32 168, %v9133_v3  ;;  %v3377_v35 = vadd.s32 %v9137_v5, %v2863_v26  ;;  %vm3888_vm3 = vcmp.lt.s32.totalorder %v3376_v27, 5120  ;;  %v4915_v53 = vld [vmem:[%s8095_s20 + $0xb0] sm:$0xff] }
 0x4b7   : > { %v6954_v7 = vadd.f32 %v6953_v61, %v6442_v60  ;;  %v6447_v38 = vmul.f32 %v5935_v33, %v5935_v33  ;;  %v5425_v40 = vsub.f32 %v4401_v36, %v4913_v37  ;;  %v5936_v41 = vsel %vm3888_vm3, %v5424_v32, 0.0  ;;  %v4404_v60 = vld [vmem:[%s8089_s18 + $0xb8] sm:$0xff]  ;;  %v4921_v36 = vld [vmem:[%s8095_s20 + $0xe0] sm:$0xff] }
 0x4b8   : > { %v2865_v42 = vadd.s32 176, %v9133_v3  ;;  %v3378_v43 = vadd.s32 %v9137_v5, %v2864_v34  ;;  %vm3889_vm4 = vcmp.lt.s32.totalorder %v3377_v35, 5120  ;;  %v6448_v46 = vmul.f32 %v5936_v41, %v5936_v41  ;;  %v4916_v61 = vld [vmem:[%s8095_s20 + $0xb8] sm:$0xff]  ;;  %v4409_v35 = vld [vmem:[%s8089_s18 + $0xe0] sm:$0xff] }
 0x4b9   : > { %v6955_v15 = vadd.f32 %v6954_v7, %v6443_v6  ;;  %v5426_v48 = vsub.f32 %v4402_v44, %v4914_v45  ;;  %v5937_v49 = vsel %vm3889_vm4, %v5425_v40, 0.0  ;;  %v2866_v50 = vadd.s32 184, %v9133_v3  ;;  %v4405_v6 = vld [vmem:[%s8089_s18 + $0xc0] sm:$0xff]  ;;  %v4920_v32 = vld [vmem:[%s8095_s20 + $0xd8] sm:$0xff]  ;;  %v4922_v44 = vld [vmem:[%s8095_s20 + $0xe8] sm:$0xff] }
 0x4ba   : > { %v3379_v51 = vadd.s32 %v9137_v5, %v2865_v42  ;;  %vm3890_vm5 = vcmp.lt.s32.totalorder %v3378_v43, 5120  ;;  %v6449_v54 = vmul.f32 %v5937_v49, %v5937_v49  ;;  %v5427_v56 = vsub.f32 %v4403_v52, %v4915_v53  ;;  %v4917_v7 = vld [vmem:[%s8095_s20 + $0xc0] sm:$0xff]  ;;  %v4410_v43 = vld [vmem:[%s8089_s18 + $0xe8] sm:$0xff]  ;;  %v4923_v49 = vld [vmem:[%s8095_s20 + $0xf0] sm:$0xff] }
 0x4bb   : > { %v6956_v23 = vadd.f32 %v6955_v15, %v6444_v14  ;;  %v5938_v57 = vsel %vm3890_vm5, %v5426_v48, 0.0  ;;  %v2867_v58 = vadd.s32 192, %v9133_v3  ;;  %v3380_v59 = vadd.s32 %v9137_v5, %v2866_v50  ;;  %v4406_v14 = vld [vmem:[%s8089_s18 + $0xc8] sm:$0xff]  ;;  %v4411_v48 = vld [vmem:[%s8089_s18 + $0xf0] sm:$0xff] }
 0x4bc   : > { %vm3891_vm6 = vcmp.lt.s32.totalorder %v3379_v51, 5120  ;;  %v6450_v62 = vmul.f32 %v5938_v57, %v5938_v57  ;;  %v5428_v0 = vsub.f32 %v4404_v60, %v4916_v61  ;;  %v2868_v2 = vadd.s32 200, %v9133_v3  ;;  %v4918_v15 = vld [vmem:[%s8095_s20 + $0xc8] sm:$0xff]  ;;  %v4924_v57 = vld [vmem:[%s8095_s20 + $0xf8] sm:$0xff] }
 0x4bd   : > { %v6957_v31 = vadd.f32 %v6956_v23, %v6445_v22  ;;  %v5939_v1 = vsel %vm3891_vm6, %v5427_v56, 0.0  ;;  %v3381_v4 = vadd.s32 %v9137_v5, %v2867_v58  ;;  %vm3892_vm7 = vcmp.lt.s32.totalorder %v3380_v59, 5120  ;;  %v4407_v22 = vld [vmem:[%s8089_s18 + $0xd0] sm:$0xff]  ;;  %v4412_v56 = vld [vmem:[%s8089_s18 + $0xf8] sm:$0xff] }
 0x4be   : > { %v6451_v8 = vmul.f32 %v5939_v1, %v5939_v1  ;;  %v5429_v10 = vsub.f32 %v4405_v6, %v4917_v7  ;;  %v5940_v11 = vsel %vm3892_vm7, %v5428_v0, 0.0  ;;  %v2869_v12 = vadd.s32 208, %v9133_v3  ;;  %v4919_v23 = vld [vmem:[%s8095_s20 + $0xd0] sm:$0xff] }
 0x4bf   : > { %v6958_v39 = vadd.f32 %v6957_v31, %v6446_v30  ;;  %v3382_v13 = vadd.s32 %v9137_v5, %v2868_v2  ;;  %vm3893_vm8 = vcmp.lt.s32.totalorder %v3381_v4, 5120  ;;  %v6452_v16 = vmul.f32 %v5940_v11, %v5940_v11  ;;  %v4408_v31 = vld [vmem:[%s8089_s18 + $0xd8] sm:$0xff] }
 0x4c0   : > { %v5430_v18 = vsub.f32 %v4406_v14, %v4918_v15  ;;  %v5941_v19 = vsel %vm3893_vm8, %v5429_v10, 0.0  ;;  %v2870_v20 = vadd.s32 216, %v9133_v3  ;;  %v3383_v21 = vadd.s32 %v9137_v5, %v2869_v12  ;;  %v4415_v15 = vld [vmem:[%s8089_s18 + $0x110] sm:$0xff] }
 0x4c1   : > { %v6959_v47 = vadd.f32 %v6958_v39, %v6447_v38  ;;  %vm3894_vm9 = vcmp.lt.s32.totalorder %v3382_v13, 5120  ;;  %v2871_v24 = vadd.s32 224, %v9133_v3  ;;  %v6453_v25 = vmul.f32 %v5941_v19, %v5941_v19 }
 0x4c2   : > { %v5431_v27 = vsub.f32 %v4407_v22, %v4919_v23  ;;  %v5942_v28 = vsel %vm3894_vm9, %v5430_v18, 0.0  ;;  %v2872_v29 = vadd.s32 232, %v9133_v3  ;;  %v3384_v30 = vadd.s32 %v9137_v5, %v2870_v20  ;;  %v4416_v23 = vld [vmem:[%s8089_s18 + $0x118] sm:$0xff] }
 0x4c3   : > { %v6960_v55 = vadd.f32 %v6959_v47, %v6448_v46  ;;  %vm3895_vm10 = vcmp.lt.s32.totalorder %v3383_v21, 5120  ;;  %v2873_v33 = vadd.s32 240, %v9133_v3  ;;  %v3385_v34 = vadd.s32 %v9137_v5, %v2871_v24  ;;  %v4928_v24 = vld [vmem:[%s8095_s20 + $0x118] sm:$0xff] }
 0x4c4   : > { %v6454_v37 = vmul.f32 %v5942_v28, %v5942_v28  ;;  %v5432_v39 = vsub.f32 %v4408_v31, %v4920_v32  ;;  %v5943_v40 = vsel %vm3895_vm10, %v5431_v27, 0.0  ;;  %v2874_v41 = vadd.s32 248, %v9133_v3  ;;  %v4417_v31 = vld [vmem:[%s8089_s18 + $0x120] sm:$0xff] }
 0x4c5   : > { %v6961_v63 = vadd.f32 %v6960_v55, %v6449_v54  ;;  %v3386_v42 = vadd.s32 %v9137_v5, %v2872_v29  ;;  %vm3896_vm11 = vcmp.lt.s32.totalorder %v3384_v30, 5120  ;;  %v2875_v45 = vadd.s32 256, %v9133_v3  ;;  %v4929_v32 = vld [vmem:[%s8095_s20 + $0x120] sm:$0xff] }
 0x4c6   : > { %v5433_v46 = vsub.f32 %v4409_v35, %v4921_v36  ;;  %v3387_v47 = vadd.s32 %v9137_v5, %v2873_v33  ;;  %vm3897_vm12 = vcmp.lt.s32.totalorder %v3385_v34, 5120  ;;  %v6455_v50 = vmul.f32 %v5943_v40, %v5943_v40  ;;  %v4930_v40 = vld [vmem:[%s8095_s20 + $0x128] sm:$0xff] }
 0x4c7   : > { %v6962_v9 = vadd.f32 %v6961_v63, %v6450_v62  ;;  %v5434_v52 = vsub.f32 %v4410_v43, %v4922_v44  ;;  %v5944_v53 = vsel %vm3896_vm11, %v5432_v39, 0.0  ;;  %v2876_v54 = vadd.s32 264, %v9133_v3  ;;  %v4413_v62 = vld [vmem:[%s8089_s18 + $0x100] sm:$0xff]  ;;  %v4418_v39 = vld [vmem:[%s8089_s18 + $0x128] sm:$0xff] }
 0x4c8   : > { %v3388_v55 = vadd.s32 %v9137_v5, %v2874_v41  ;;  %vm3898_vm13 = vcmp.lt.s32.totalorder %v3386_v42, 5120  ;;  %v2877_v58 = vadd.s32 272, %v9133_v3  ;;  %v5435_v59 = vsub.f32 %v4411_v48, %v4923_v49  ;;  %v4925_v63 = vld [vmem:[%s8095_s20 + $0x100] sm:$0xff]  ;;  %v4931_v48 = vld [vmem:[%s8095_s20 + $0x130] sm:$0xff] }
 0x4c9   : > { %v6963_v17 = vadd.f32 %v6962_v9, %v6451_v8  ;;  %v5945_v60 = vsel %vm3897_vm12, %v5433_v46, 0.0  ;;  %v3389_v61 = vadd.s32 %v9137_v5, %v2875_v45  ;;  %vm3899_vm14 = vcmp.lt.s32.totalorder %v3387_v47, 5120  ;;  %v4414_v8 = vld [vmem:[%s8089_s18 + $0x108] sm:$0xff]  ;;  %v4419_v47 = vld [vmem:[%s8089_s18 + $0x130] sm:$0xff] }
 0x4ca   : > { %v6456_v0 = vmul.f32 %v5944_v53, %v5944_v53  ;;  %v5436_v2 = vsub.f32 %v4412_v56, %v4924_v57  ;;  %v5946_v4 = vsel %vm3898_vm13, %v5434_v52, 0.0  ;;  %v2878_v6 = vadd.s32 280, %v9133_v3  ;;  %v4926_v9 = vld [vmem:[%s8095_s20 + $0x108] sm:$0xff]  ;;  %v4932_v56 = vld [vmem:[%s8095_s20 + $0x138] sm:$0xff] }
 0x4cb   : > { %v6964_v26 = vadd.f32 %v6963_v17, %v6452_v16  ;;  %v3390_v7 = vadd.s32 %v9137_v5, %v2876_v54  ;;  %vm3900_vm15 = vcmp.lt.s32.totalorder %v3388_v55, 5120  ;;  %v6457_v10 = vmul.f32 %v5945_v60, %v5945_v60  ;;  %v4927_v16 = vld [vmem:[%s8095_s20 + $0x110] sm:$0xff]  ;;  %v4420_v55 = vld [vmem:[%s8089_s18 + $0x138] sm:$0xff] }
 0x4cc   : > { %v2879_v11 = vadd.s32 288, %v9133_v3  ;;  %v5437_v12 = vsub.f32 %v4413_v62, %v4925_v63  ;;  %v5947_v13 = vsel %vm3899_vm14, %v5435_v59, 0.0  ;;  %v3391_v14 = vadd.s32 %v9137_v5, %v2877_v58  ;;  %v4421_v63 = vld [vmem:[%s8089_s18 + $0x140] sm:$0xff] }
 0x4cd   : > { %v6965_v38 = vadd.f32 %v6964_v26, %v6453_v25  ;;  %vm3901_vm0 = vcmp.lt.s32.totalorder %v3389_v61, 5120  ;;  %v6458_v17 = vmul.f32 %v5946_v4, %v5946_v4  ;;  %v2880_v19 = vadd.s32 296, %v9133_v3 }
 0x4ce   : > { %v5438_v20 = vsub.f32 %v4414_v8, %v4926_v9  ;;  %v5948_v21 = vsel %vm3900_vm15, %v5436_v2, 0.0  ;;  %v3392_v22 = vadd.s32 %v9137_v5, %v2878_v6  ;;  %vm3902_vm1 = vcmp.lt.s32.totalorder %v3390_v7, 5120  ;;  %v4422_v9 = vld [vmem:[%s8089_s18 + $0x148] sm:$0xff] }
 0x4cf   : > { %v6966_v51 = vadd.f32 %v6965_v38, %v6454_v37  ;;  %v6459_v25 = vmul.f32 %v5947_v13, %v5947_v13  ;;  %v2881_v27 = vadd.s32 304, %v9133_v3  ;;  %v5439_v28 = vsub.f32 %v4415_v15, %v4927_v16 }
 0x4d0   : > { %v5949_v29 = vsel %vm3901_vm0, %v5437_v12, 0.0  ;;  %v3393_v30 = vadd.s32 %v9137_v5, %v2879_v11  ;;  %vm3903_vm2 = vcmp.lt.s32.totalorder %v3391_v14, 5120  ;;  %v6460_v33 = vmul.f32 %v5948_v21, %v5948_v21 }
 0x4d1   : > { %v6967_v1 = vadd.f32 %v6966_v51, %v6455_v50  ;;  %v2882_v35 = vadd.s32 312, %v9133_v3  ;;  %v5440_v36 = vsub.f32 %v4416_v23, %v4928_v24  ;;  %v5950_v37 = vsel %vm3902_vm1, %v5438_v20, 0.0 }
 0x4d2   : > { %v3394_v38 = vadd.s32 %v9137_v5, %v2880_v19  ;;  %vm3904_vm3 = vcmp.lt.s32.totalorder %v3392_v22, 5120  ;;  %v6461_v41 = vmul.f32 %v5949_v29, %v5949_v29  ;;  %v2883_v43 = vadd.s32 320, %v9133_v3 }
 0x4d3   : > { %v6968_v18 = vadd.f32 %v6967_v1, %v6456_v0  ;;  %v5441_v44 = vsub.f32 %v4417_v31, %v4929_v32  ;;  %v5951_v45 = vsel %vm3903_vm2, %v5439_v28, 0.0  ;;  %v3395_v46 = vadd.s32 %v9137_v5, %v2881_v27  ;;  %v4933_v0 = vld [vmem:[%s8095_s20 + $0x140] sm:$0xff] }
 0x4d4   : > { %vm3905_vm4 = vcmp.lt.s32.totalorder %v3393_v30, 5120  ;;  %v6462_v49 = vmul.f32 %v5950_v37, %v5950_v37  ;;  %v2884_v51 = vadd.s32 328, %v9133_v3  ;;  %v5442_v52 = vsub.f32 %v4418_v39, %v4930_v40 }
 0x4d5   : > { %v6969_v26 = vadd.f32 %v6968_v18, %v6457_v10  ;;  %v5952_v53 = vsel %vm3904_vm3, %v5440_v36, 0.0  ;;  %v3396_v54 = vadd.s32 %v9137_v5, %v2882_v35  ;;  %vm3906_vm5 = vcmp.lt.s32.totalorder %v3394_v38, 5120  ;;  %v4934_v10 = vld [vmem:[%s8095_s20 + $0x148] sm:$0xff]  ;;  %v4935_v18 = vld [vmem:[%s8095_s20 + $0x150] sm:$0xff] }
 0x4d6   : > { %v6463_v57 = vmul.f32 %v5951_v45, %v5951_v45  ;;  %v2885_v59 = vadd.s32 336, %v9133_v3  ;;  %v5443_v60 = vsub.f32 %v4419_v47, %v4931_v48  ;;  %v5953_v61 = vsel %vm3905_vm4, %v5441_v44, 0.0 }
 0x4d7   : > { %v6970_v34 = vadd.f32 %v6969_v26, %v6458_v17  ;;  %v3397_v62 = vadd.s32 %v9137_v5, %v2883_v43  ;;  %vm3907_vm6 = vcmp.lt.s32.totalorder %v3395_v46, 5120  ;;  %v6464_v1 = vmul.f32 %v5952_v53, %v5952_v53  ;;  %v4423_v17 = vld [vmem:[%s8089_s18 + $0x150] sm:$0xff]  ;;  %v4936_v26 = vld [vmem:[%s8095_s20 + $0x158] sm:$0xff] }
 0x4d8   : > { %v2886_v4 = vadd.s32 344, %v9133_v3  ;;  %v5444_v6 = vsub.f32 %v4420_v55, %v4932_v56  ;;  %v5954_v7 = vsel %vm3906_vm5, %v5442_v52, 0.0  ;;  %v3398_v8 = vadd.s32 %v9137_v5, %v2884_v51 }
 0x4d9   : > { %v6971_v42 = vadd.f32 %v6970_v34, %v6459_v25  ;;  %vm3908_vm7 = vcmp.lt.s32.totalorder %v3396_v54, 5120  ;;  %v6465_v11 = vmul.f32 %v5953_v61, %v5953_v61  ;;  %v2887_v13 = vadd.s32 352, %v9133_v3  ;;  %v4424_v25 = vld [vmem:[%s8089_s18 + $0x158] sm:$0xff]  ;;  %v4937_v34 = vld [vmem:[%s8095_s20 + $0x160] sm:$0xff] }
 0x4da   : > { %v5445_v14 = vsub.f32 %v4421_v63, %v4933_v0  ;;  %v5955_v15 = vsel %vm3907_vm6, %v5443_v60, 0.0  ;;  %v3399_v16 = vadd.s32 %v9137_v5, %v2885_v59  ;;  %vm3909_vm8 = vcmp.lt.s32.totalorder %v3397_v62, 5120 }
 0x4db   : > { %v6972_v50 = vadd.f32 %v6971_v42, %v6460_v33  ;;  %v6466_v19 = vmul.f32 %v5954_v7, %v5954_v7  ;;  %v2888_v21 = vadd.s32 360, %v9133_v3  ;;  %v5446_v22 = vsub.f32 %v4422_v9, %v4934_v10  ;;  %v4425_v33 = vld [vmem:[%s8089_s18 + $0x160] sm:$0xff]  ;;  %v4938_v42 = vld [vmem:[%s8095_s20 + $0x168] sm:$0xff] }
 0x4dc   : > { %v5956_v23 = vsel %vm3908_vm7, %v5444_v6, 0.0  ;;  %v3400_v24 = vadd.s32 %v9137_v5, %v2886_v4  ;;  %vm3910_vm9 = vcmp.lt.s32.totalorder %v3398_v8, 5120  ;;  %v6467_v27 = vmul.f32 %v5955_v15, %v5955_v15 }
 0x4dd   : > { %v6973_v58 = vadd.f32 %v6972_v50, %v6461_v41  ;;  %v2889_v29 = vadd.s32 368, %v9133_v3  ;;  %v5447_v30 = vsub.f32 %v4423_v17, %v4935_v18  ;;  %v5957_v31 = vsel %vm3909_vm8, %v5445_v14, 0.0  ;;  %v4426_v41 = vld [vmem:[%s8089_s18 + $0x168] sm:$0xff]  ;;  %v4939_v50 = vld [vmem:[%s8095_s20 + $0x170] sm:$0xff] }
 0x4de   : > { %v3401_v32 = vadd.s32 %v9137_v5, %v2887_v13  ;;  %vm3911_vm10 = vcmp.lt.s32.totalorder %v3399_v16, 5120  ;;  %v6468_v35 = vmul.f32 %v5956_v23, %v5956_v23  ;;  %v2890_v37 = vadd.s32 376, %v9133_v3 }
 0x4df   : > { %v6974_v2 = vadd.f32 %v6973_v58, %v6462_v49  ;;  %v5448_v38 = vsub.f32 %v4424_v25, %v4936_v26  ;;  %v5958_v39 = vsel %vm3910_vm9, %v5446_v22, 0.0  ;;  %v3402_v40 = vadd.s32 %v9137_v5, %v2888_v21  ;;  %v4427_v49 = vld [vmem:[%s8089_s18 + $0x170] sm:$0xff]  ;;  %v4940_v58 = vld [vmem:[%s8095_s20 + $0x178] sm:$0xff] }
 0x4e0   : > { %vm3912_vm11 = vcmp.lt.s32.totalorder %v3400_v24, 5120  ;;  %v6469_v43 = vmul.f32 %v5957_v31, %v5957_v31  ;;  %v2891_v45 = vadd.s32 384, %v9133_v3  ;;  %v5449_v46 = vsub.f32 %v4425_v33, %v4937_v34 }
 0x4e1   : > { %v6975_v12 = vadd.f32 %v6974_v2, %v6463_v57  ;;  %v5959_v47 = vsel %vm3911_vm10, %v5447_v30, 0.0  ;;  %v3403_v48 = vadd.s32 %v9137_v5, %v2889_v29  ;;  %vm3913_vm12 = vcmp.lt.s32.totalorder %v3401_v32, 5120  ;;  %v4428_v57 = vld [vmem:[%s8089_s18 + $0x178] sm:$0xff]  ;;  %v4941_v2 = vld [vmem:[%s8095_s20 + $0x180] sm:$0xff] }
 0x4e2   : > { %v6470_v51 = vmul.f32 %v5958_v39, %v5958_v39  ;;  %v2892_v53 = vadd.s32 392, %v9133_v3  ;;  %v5450_v54 = vsub.f32 %v4426_v41, %v4938_v42  ;;  %v5960_v55 = vsel %vm3912_vm11, %v5448_v38, 0.0 }
 0x4e3   : > { %v6976_v20 = vadd.f32 %v6975_v12, %v6464_v1  ;;  %v3404_v56 = vadd.s32 %v9137_v5, %v2890_v37  ;;  %vm3914_vm13 = vcmp.lt.s32.totalorder %v3402_v40, 5120  ;;  %v6471_v59 = vmul.f32 %v5959_v47, %v5959_v47  ;;  %v4429_v1 = vld [vmem:[%s8089_s18 + $0x180] sm:$0xff]  ;;  %v4942_v12 = vld [vmem:[%s8095_s20 + $0x188] sm:$0xff] }
 0x4e4   : > { %v2893_v61 = vadd.s32 400, %v9133_v3  ;;  %v5451_v62 = vsub.f32 %v4427_v49, %v4939_v50  ;;  %v5961_v63 = vsel %vm3913_vm12, %v5449_v46, 0.0  ;;  %v3405_v0 = vadd.s32 %v9137_v5, %v2891_v45 }
 0x4e5   : > { %v6977_v28 = vadd.f32 %v6976_v20, %v6465_v11  ;;  %vm3915_vm14 = vcmp.lt.s32.totalorder %v3403_v48, 5120  ;;  %v6472_v4 = vmul.f32 %v5960_v55, %v5960_v55  ;;  %v2894_v7 = vadd.s32 408, %v9133_v3  ;;  %v4430_v11 = vld [vmem:[%s8089_s18 + $0x188] sm:$0xff]  ;;  %v4943_v20 = vld [vmem:[%s8095_s20 + $0x190] sm:$0xff] }
 0x4e6   : > { %v5452_v8 = vsub.f32 %v4428_v57, %v4940_v58  ;;  %v5962_v9 = vsel %vm3914_vm13, %v5450_v54, 0.0  ;;  %v3406_v10 = vadd.s32 %v9137_v5, %v2892_v53  ;;  %vm3916_vm15 = vcmp.lt.s32.totalorder %v3404_v56, 5120 }
 0x4e7   : > { %v6978_v36 = vadd.f32 %v6977_v28, %v6466_v19  ;;  %v6473_v13 = vmul.f32 %v5961_v63, %v5961_v63  ;;  %v2895_v15 = vadd.s32 416, %v9133_v3  ;;  %v5453_v16 = vsub.f32 %v4429_v1, %v4941_v2  ;;  %v4431_v19 = vld [vmem:[%s8089_s18 + $0x190] sm:$0xff]  ;;  %v4944_v28 = vld [vmem:[%s8095_s20 + $0x198] sm:$0xff] }
 0x4e8   : > { %v5963_v17 = vsel %vm3915_vm14, %v5451_v62, 0.0  ;;  %v3407_v18 = vadd.s32 %v9137_v5, %v2893_v61  ;;  %vm3917_vm0 = vcmp.lt.s32.totalorder %v3405_v0, 5120  ;;  %v6474_v21 = vmul.f32 %v5962_v9, %v5962_v9 }
 0x4e9   : > { %v6979_v44 = vadd.f32 %v6978_v36, %v6467_v27  ;;  %v2896_v23 = vadd.s32 424, %v9133_v3  ;;  %v5454_v24 = vsub.f32 %v4430_v11, %v4942_v12  ;;  %v5964_v25 = vsel %vm3916_vm15, %v5452_v8, 0.0  ;;  %v4432_v27 = vld [vmem:[%s8089_s18 + $0x198] sm:$0xff]  ;;  %v4945_v36 = vld [vmem:[%s8095_s20 + $0x1a0] sm:$0xff] }
 0x4ea   : > { %v3408_v26 = vadd.s32 %v9137_v5, %v2894_v7  ;;  %vm3918_vm1 = vcmp.lt.s32.totalorder %v3406_v10, 5120  ;;  %v6475_v29 = vmul.f32 %v5963_v17, %v5963_v17  ;;  %v2897_v31 = vadd.s32 432, %v9133_v3 }
 0x4eb   : > { %v6980_v52 = vadd.f32 %v6979_v44, %v6468_v35  ;;  %v5455_v32 = vsub.f32 %v4431_v19, %v4943_v20  ;;  %v5965_v33 = vsel %vm3917_vm0, %v5453_v16, 0.0  ;;  %v3409_v34 = vadd.s32 %v9137_v5, %v2895_v15  ;;  %v4433_v35 = vld [vmem:[%s8089_s18 + $0x1a0] sm:$0xff]  ;;  %v4946_v44 = vld [vmem:[%s8095_s20 + $0x1a8] sm:$0xff] }
 0x4ec   : > { %vm3919_vm2 = vcmp.lt.s32.totalorder %v3407_v18, 5120  ;;  %v6476_v37 = vmul.f32 %v5964_v25, %v5964_v25  ;;  %v2898_v39 = vadd.s32 440, %v9133_v3  ;;  %v5456_v40 = vsub.f32 %v4432_v27, %v4944_v28 }
 0x4ed   : > { %v6981_v60 = vadd.f32 %v6980_v52, %v6469_v43  ;;  %v5966_v41 = vsel %vm3918_vm1, %v5454_v24, 0.0  ;;  %v3410_v42 = vadd.s32 %v9137_v5, %v2896_v23  ;;  %vm3920_vm3 = vcmp.lt.s32.totalorder %v3408_v26, 5120  ;;  %v4434_v43 = vld [vmem:[%s8089_s18 + $0x1a8] sm:$0xff]  ;;  %v4947_v52 = vld [vmem:[%s8095_s20 + $0x1b0] sm:$0xff] }
 0x4ee   : > { %v6477_v45 = vmul.f32 %v5965_v33, %v5965_v33  ;;  %v2899_v47 = vadd.s32 448, %v9133_v3  ;;  %v5457_v48 = vsub.f32 %v4433_v35, %v4945_v36  ;;  %v5967_v49 = vsel %vm3919_vm2, %v5455_v32, 0.0 }
 0x4ef   : > { %v6982_v6 = vadd.f32 %v6981_v60, %v6470_v51  ;;  %v3411_v50 = vadd.s32 %v9137_v5, %v2897_v31  ;;  %vm3921_vm4 = vcmp.lt.s32.totalorder %v3409_v34, 5120  ;;  %v4435_v51 = vld [vmem:[%s8089_s18 + $0x1b0] sm:$0xff]  ;;  %v6478_v53 = vmul.f32 %v5966_v41, %v5966_v41  ;;  %v4948_v60 = vld [vmem:[%s8095_s20 + $0x1b8] sm:$0xff] }
 0x4f0   : > { %v2900_v55 = vadd.s32 456, %v9133_v3  ;;  %v5458_v56 = vsub.f32 %v4434_v43, %v4946_v44  ;;  %v5968_v57 = vsel %vm3920_vm3, %v5456_v40, 0.0  ;;  %v3412_v58 = vadd.s32 %v9137_v5, %v2898_v39 }
 0x4f1   : > { %v6983_v14 = vadd.f32 %v6982_v6, %v6471_v59  ;;  %vm3922_vm5 = vcmp.lt.s32.totalorder %v3410_v42, 5120  ;;  %v4436_v59 = vld [vmem:[%s8089_s18 + $0x1b8] sm:$0xff]  ;;  %v6479_v61 = vmul.f32 %v5967_v49, %v5967_v49  ;;  %v2901_v63 = vadd.s32 464, %v9133_v3  ;;  %v4949_v6 = vld [vmem:[%s8095_s20 + $0x1c0] sm:$0xff] }
 0x4f2   : > { %v5459_v0 = vsub.f32 %v4435_v51, %v4947_v52  ;;  %v5969_v1 = vsel %vm3921_vm4, %v5457_v48, 0.0  ;;  %v3413_v2 = vadd.s32 %v9137_v5, %v2899_v47  ;;  %vm3923_vm6 = vcmp.lt.s32.totalorder %v3411_v50, 5120 }
 0x4f3   : > { %v6984_v22 = vadd.f32 %v6983_v14, %v6472_v4  ;;  %v4437_v4 = vld [vmem:[%s8089_s18 + $0x1c0] sm:$0xff]  ;;  %v6480_v7 = vmul.f32 %v5968_v57, %v5968_v57  ;;  %v2902_v9 = vadd.s32 472, %v9133_v3  ;;  %v5460_v10 = vsub.f32 %v4436_v59, %v4948_v60  ;;  %v4950_v14 = vld [vmem:[%s8095_s20 + $0x1c8] sm:$0xff] }
 0x4f4   : > { %v5970_v11 = vsel %vm3922_vm5, %v5458_v56, 0.0  ;;  %v3414_v12 = vadd.s32 %v9137_v5, %v2900_v55  ;;  %vm3924_vm7 = vcmp.lt.s32.totalorder %v3412_v58, 5120  ;;  %v6481_v15 = vmul.f32 %v5969_v1, %v5969_v1 }
 0x4f5   : > { %v6985_v30 = vadd.f32 %v6984_v22, %v6473_v13  ;;  %v4438_v13 = vld [vmem:[%s8089_s18 + $0x1c8] sm:$0xff]  ;;  %v2903_v17 = vadd.s32 480, %v9133_v3  ;;  %v5461_v18 = vsub.f32 %v4437_v4, %v4949_v6  ;;  %v5971_v19 = vsel %vm3923_vm6, %v5459_v0, 0.0  ;;  %v4951_v22 = vld [vmem:[%s8095_s20 + $0x1d0] sm:$0xff] }
 0x4f6   : > { %v3415_v20 = vadd.s32 %v9137_v5, %v2901_v63  ;;  %vm3925_vm8 = vcmp.lt.s32.totalorder %v3413_v2, 5120  ;;  %v6482_v23 = vmul.f32 %v5970_v11, %v5970_v11  ;;  %v2904_v25 = vadd.s32 488, %v9133_v3 }
 0x4f7   : > { %v6986_v38 = vadd.f32 %v6985_v30, %v6474_v21  ;;  %v4439_v21 = vld [vmem:[%s8089_s18 + $0x1d0] sm:$0xff]  ;;  %v5462_v26 = vsub.f32 %v4438_v13, %v4950_v14  ;;  %v5972_v27 = vsel %vm3924_vm7, %v5460_v10, 0.0  ;;  %v3416_v28 = vadd.s32 %v9137_v5, %v2902_v9  ;;  %v4952_v30 = vld [vmem:[%s8095_s20 + $0x1d8] sm:$0xff] }
 0x4f8   : > { %vm3926_vm9 = vcmp.lt.s32.totalorder %v3414_v12, 5120  ;;  %v6483_v31 = vmul.f32 %v5971_v19, %v5971_v19  ;;  %v2905_v33 = vadd.s32 496, %v9133_v3  ;;  %v5463_v34 = vsub.f32 %v4439_v21, %v4951_v22 }
 0x4f9   : > { %v6987_v46 = vadd.f32 %v6986_v38, %v6475_v29  ;;  %v4440_v29 = vld [vmem:[%s8089_s18 + $0x1d8] sm:$0xff]  ;;  %v5973_v35 = vsel %vm3925_vm8, %v5461_v18, 0.0  ;;  %v3417_v36 = vadd.s32 %v9137_v5, %v2903_v17  ;;  %vm3927_vm10 = vcmp.lt.s32.totalorder %v3415_v20, 5120  ;;  %v4953_v38 = vld [vmem:[%s8095_s20 + $0x1e0] sm:$0xff] }
 0x4fa   : > { %v6484_v39 = vmul.f32 %v5972_v27, %v5972_v27  ;;  %v2906_v41 = vadd.s32 504, %v9133_v3  ;;  %v5464_v42 = vsub.f32 %v4440_v29, %v4952_v30  ;;  %v5974_v43 = vsel %vm3926_vm9, %v5462_v26, 0.0 }
 0x4fb   : > { %v6988_v54 = vadd.f32 %v6987_v46, %v6476_v37  ;;  %v4441_v37 = vld [vmem:[%s8089_s18 + $0x1e0] sm:$0xff]  ;;  %v3418_v44 = vadd.s32 %v9137_v5, %v2904_v25  ;;  %vm3928_vm11 = vcmp.lt.s32.totalorder %v3416_v28, 5120  ;;  %v4954_v46 = vld [vmem:[%s8095_s20 + $0x1e8] sm:$0xff]  ;;  %v6485_v47 = vmul.f32 %v5973_v35, %v5973_v35 }
 0x4fc   : > { %v2907_v49 = vadd.s32 512, %v9133_v3  ;;  %v5465_v50 = vsub.f32 %v4441_v37, %v4953_v38  ;;  %v5975_v51 = vsel %vm3927_vm10, %v5463_v34, 0.0  ;;  %v3419_v52 = vadd.s32 %v9137_v5, %v2905_v33 }
 0x4fd   : > { %v6989_v62 = vadd.f32 %v6988_v54, %v6477_v45  ;;  %v4442_v45 = vld [vmem:[%s8089_s18 + $0x1e8] sm:$0xff]  ;;  %vm3929_vm12 = vcmp.lt.s32.totalorder %v3417_v36, 5120  ;;  %v4955_v54 = vld [vmem:[%s8095_s20 + $0x1f0] sm:$0xff]  ;;  %v6486_v55 = vmul.f32 %v5974_v43, %v5974_v43  ;;  %v2908_v57 = vadd.s32 520, %v9133_v3 }
 0x4fe   : > { %v5466_v58 = vsub.f32 %v4442_v45, %v4954_v46  ;;  %v5976_v59 = vsel %vm3928_vm11, %v5464_v42, 0.0  ;;  %v3420_v60 = vadd.s32 %v9137_v5, %v2906_v41  ;;  %vm3930_vm13 = vcmp.lt.s32.totalorder %v3418_v44, 5120 }
 0x4ff   : > { %v6990_v8 = vadd.f32 %v6989_v62, %v6478_v53  ;;  %v4443_v53 = vld [vmem:[%s8089_s18 + $0x1f0] sm:$0xff]  ;;  %v4956_v62 = vld [vmem:[%s8095_s20 + $0x1f8] sm:$0xff]  ;;  %v6487_v63 = vmul.f32 %v5975_v51, %v5975_v51  ;;  %v2909_v1 = vadd.s32 528, %v9133_v3  ;;  %v5977_v4 = vsel %vm3929_vm12, %v5465_v50, 0.0 }
 0x500   : > { %v5467_v2 = vsub.f32 %v4443_v53, %v4955_v54  ;;  %v3421_v6 = vadd.s32 %v9137_v5, %v2907_v49  ;;  %vm3931_vm14 = vcmp.lt.s32.totalorder %v3419_v52, 5120  ;;  %v6488_v9 = vmul.f32 %v5976_v59, %v5976_v59 }
 0x501   : > { %v6991_v16 = vadd.f32 %v6990_v8, %v6479_v61  ;;  %v4444_v61 = vld [vmem:[%s8089_s18 + $0x1f8] sm:$0xff]  ;;  %v4957_v8 = vld [vmem:[%s8095_s20 + $0x200] sm:$0xff]  ;;  %v2910_v11 = vadd.s32 536, %v9133_v3  ;;  %v5978_v13 = vsel %vm3930_vm13, %v5466_v58, 0.0  ;;  %v3422_v14 = vadd.s32 %v9137_v5, %v2908_v57 }
 0x502   : > { %v5468_v12 = vsub.f32 %v4444_v61, %v4956_v62  ;;  %vm3932_vm15 = vcmp.lt.s32.totalorder %v3420_v60, 5120  ;;  %v6489_v17 = vmul.f32 %v5977_v4, %v5977_v4  ;;  %v2911_v19 = vadd.s32 544, %v9133_v3 }
 0x503   : > { %v6992_v24 = vadd.f32 %v6991_v16, %v6480_v7  ;;  %v4445_v7 = vld [vmem:[%s8089_s18 + $0x200] sm:$0xff]  ;;  %v4958_v16 = vld [vmem:[%s8095_s20 + $0x208] sm:$0xff]  ;;  %v5979_v21 = vsel %vm3931_vm14, %v5467_v2, 0.0  ;;  %v3423_v22 = vadd.s32 %v9137_v5, %v2909_v1  ;;  %vm3933_vm0 = vcmp.lt.s32.totalorder %v3421_v6, 5120 }
 0x504   : > { %v5469_v20 = vsub.f32 %v4445_v7, %v4957_v8  ;;  %v6490_v25 = vmul.f32 %v5978_v13, %v5978_v13  ;;  %v2912_v27 = vadd.s32 552, %v9133_v3  ;;  %v5980_v29 = vsel %vm3932_vm15, %v5468_v12, 0.0 }
 0x505   : > { %v6993_v32 = vadd.f32 %v6992_v24, %v6481_v15  ;;  %v4446_v15 = vld [vmem:[%s8089_s18 + $0x208] sm:$0xff]  ;;  %v4959_v24 = vld [vmem:[%s8095_s20 + $0x210] sm:$0xff]  ;;  %v3424_v30 = vadd.s32 %v9137_v5, %v2910_v11  ;;  %vm3934_vm1 = vcmp.lt.s32.totalorder %v3422_v14, 5120  ;;  %v6491_v33 = vmul.f32 %v5979_v21, %v5979_v21 }
 0x506   : > { %v5470_v28 = vsub.f32 %v4446_v15, %v4958_v16  ;;  %v2913_v35 = vadd.s32 560, %v9133_v3  ;;  %v5981_v37 = vsel %vm3933_vm0, %v5469_v20, 0.0  ;;  %v3425_v38 = vadd.s32 %v9137_v5, %v2911_v19 }
 0x507   : > { %v6994_v40 = vadd.f32 %v6993_v32, %v6482_v23  ;;  %v4447_v23 = vld [vmem:[%s8089_s18 + $0x210] sm:$0xff]  ;;  %v4960_v32 = vld [vmem:[%s8095_s20 + $0x218] sm:$0xff]  ;;  %vm3935_vm2 = vcmp.lt.s32.totalorder %v3423_v22, 5120  ;;  %v6492_v41 = vmul.f32 %v5980_v29, %v5980_v29  ;;  %v2914_v43 = vadd.s32 568, %v9133_v3 }
 0x508   : > { %v5471_v36 = vsub.f32 %v4447_v23, %v4959_v24  ;;  %v5982_v45 = vsel %vm3934_vm1, %v5470_v28, 0.0  ;;  %v3426_v46 = vadd.s32 %v9137_v5, %v2912_v27  ;;  %vm3936_vm3 = vcmp.lt.s32.totalorder %v3424_v30, 5120 }
 0x509   : > { %v6995_v48 = vadd.f32 %v6994_v40, %v6483_v31  ;;  %v4448_v31 = vld [vmem:[%s8089_s18 + $0x218] sm:$0xff]  ;;  %v4961_v40 = vld [vmem:[%s8095_s20 + $0x220] sm:$0xff]  ;;  %v6493_v49 = vmul.f32 %v5981_v37, %v5981_v37  ;;  %v2915_v51 = vadd.s32 576, %v9133_v3  ;;  %v3427_v54 = vadd.s32 %v9137_v5, %v2913_v35 }
 0x50a   : > { %v5472_v44 = vsub.f32 %v4448_v31, %v4960_v32  ;;  %v5983_v53 = vsel %vm3935_vm2, %v5471_v36, 0.0  ;;  %vm3937_vm4 = vcmp.lt.s32.totalorder %v3425_v38, 5120  ;;  %v6494_v57 = vmul.f32 %v5982_v45, %v5982_v45 }
 0x50b   : > { %v6996_v56 = vadd.f32 %v6995_v48, %v6484_v39  ;;  %v4449_v39 = vld [vmem:[%s8089_s18 + $0x220] sm:$0xff]  ;;  %v4962_v48 = vld [vmem:[%s8095_s20 + $0x228] sm:$0xff]  ;;  %v2916_v59 = vadd.s32 584, %v9133_v3  ;;  %v3428_v62 = vadd.s32 %v9137_v5, %v2914_v43  ;;  %vm3938_vm5 = vcmp.lt.s32.totalorder %v3426_v46, 5120 }
 0x50c   : > { %v5473_v52 = vsub.f32 %v4449_v39, %v4961_v40  ;;  %v5984_v61 = vsel %vm3936_vm3, %v5472_v44, 0.0  ;;  %v6495_v1 = vmul.f32 %v5983_v53, %v5983_v53  ;;  %v2917_v4 = vadd.s32 592, %v9133_v3 }
 0x50d   : > { %v6997_v0 = vadd.f32 %v6996_v56, %v6485_v47  ;;  %v4450_v47 = vld [vmem:[%s8089_s18 + $0x228] sm:$0xff]  ;;  %v4963_v56 = vld [vmem:[%s8095_s20 + $0x230] sm:$0xff]  ;;  %v3429_v8 = vadd.s32 %v9137_v5, %v2915_v51  ;;  %vm3939_vm6 = vcmp.lt.s32.totalorder %v3427_v54, 5120  ;;  %v6496_v11 = vmul.f32 %v5984_v61, %v5984_v61 }
 0x50e   : > { %v5474_v60 = vsub.f32 %v4450_v47, %v4962_v48  ;;  %v5985_v7 = vsel %vm3937_vm4, %v5473_v52, 0.0  ;;  %v2918_v13 = vadd.s32 600, %v9133_v3  ;;  %v3430_v16 = vadd.s32 %v9137_v5, %v2916_v59 }
 0x50f   : > { %v6998_v10 = vadd.f32 %v6997_v0, %v6486_v55  ;;  %v4451_v55 = vld [vmem:[%s8089_s18 + $0x230] sm:$0xff]  ;;  %v4964_v0 = vld [vmem:[%s8095_s20 + $0x238] sm:$0xff]  ;;  %vm3940_vm7 = vcmp.lt.s32.totalorder %v3428_v62, 5120  ;;  %v6497_v19 = vmul.f32 %v5985_v7, %v5985_v7  ;;  %v2919_v21 = vadd.s32 608, %v9133_v3 }
 0x510   : > { %v5475_v6 = vsub.f32 %v4451_v55, %v4963_v56  ;;  %v5986_v15 = vsel %vm3938_vm5, %v5474_v60, 0.0  ;;  %v3431_v24 = vadd.s32 %v9137_v5, %v2917_v4  ;;  %vm3941_vm8 = vcmp.lt.s32.totalorder %v3429_v8, 5120 }
 0x511   : > { %v6999_v18 = vadd.f32 %v6998_v10, %v6487_v63  ;;  %v4452_v63 = vld [vmem:[%s8089_s18 + $0x238] sm:$0xff]  ;;  %v4965_v10 = vld [vmem:[%s8095_s20 + $0x240] sm:$0xff]  ;;  %v6498_v27 = vmul.f32 %v5986_v15, %v5986_v15  ;;  %v2920_v29 = vadd.s32 616, %v9133_v3  ;;  %v3432_v32 = vadd.s32 %v9137_v5, %v2918_v13 }
 0x512   : > { %v5476_v14 = vsub.f32 %v4452_v63, %v4964_v0  ;;  %v5987_v23 = vsel %vm3939_vm6, %v5475_v6, 0.0  ;;  %vm3942_vm9 = vcmp.lt.s32.totalorder %v3430_v16, 5120  ;;  %v2921_v37 = vadd.s32 624, %v9133_v3 }
 0x513   : > { %v7000_v26 = vadd.f32 %v6999_v18, %v6488_v9  ;;  %v4453_v9 = vld [vmem:[%s8089_s18 + $0x240] sm:$0xff]  ;;  %v4966_v18 = vld [vmem:[%s8095_s20 + $0x248] sm:$0xff]  ;;  %v6499_v35 = vmul.f32 %v5987_v23, %v5987_v23  ;;  %v3433_v40 = vadd.s32 %v9137_v5, %v2919_v21  ;;  %vm3943_vm10 = vcmp.lt.s32.totalorder %v3431_v24, 5120 }
 0x514   : > { %v5477_v22 = vsub.f32 %v4453_v9, %v4965_v10  ;;  %v5988_v31 = vsel %vm3940_vm7, %v5476_v14, 0.0  ;;  %v2922_v45 = vadd.s32 632, %v9133_v3  ;;  %v3434_v48 = vadd.s32 %v9137_v5, %v2920_v29 }
 0x515   : > { %v7001_v34 = vadd.f32 %v7000_v26, %v6489_v17  ;;  %v4454_v17 = vld [vmem:[%s8089_s18 + $0x248] sm:$0xff]  ;;  %v4967_v26 = vld [vmem:[%s8095_s20 + $0x250] sm:$0xff]  ;;  %v6500_v43 = vmul.f32 %v5988_v31, %v5988_v31  ;;  %vm3944_vm11 = vcmp.lt.s32.totalorder %v3432_v32, 5120  ;;  %v2923_v53 = vadd.s32 640, %v9133_v3 }
 0x516   : > { %v5478_v30 = vsub.f32 %v4454_v17, %v4966_v18  ;;  %v5989_v39 = vsel %vm3941_vm8, %v5477_v22, 0.0  ;;  %v3435_v56 = vadd.s32 %v9137_v5, %v2921_v37  ;;  %vm3945_vm12 = vcmp.lt.s32.totalorder %v3433_v40, 5120 }
 0x517   : > { %v7002_v42 = vadd.f32 %v7001_v34, %v6490_v25  ;;  %v4455_v25 = vld [vmem:[%s8089_s18 + $0x250] sm:$0xff]  ;;  %v4968_v34 = vld [vmem:[%s8095_s20 + $0x258] sm:$0xff]  ;;  %v6501_v51 = vmul.f32 %v5989_v39, %v5989_v39  ;;  %v2924_v61 = vadd.s32 648, %v9133_v3  ;;  %v3436_v0 = vadd.s32 %v9137_v5, %v2922_v45 }
 0x518   : > { %v5479_v38 = vsub.f32 %v4455_v25, %v4967_v26  ;;  %v5990_v47 = vsel %vm3942_vm9, %v5478_v30, 0.0  ;;  %vm3946_vm13 = vcmp.lt.s32.totalorder %v3434_v48, 5120  ;;  %v2925_v7 = vadd.s32 656, %v9133_v3 }
 0x519   : > { %v7003_v50 = vadd.f32 %v7002_v42, %v6491_v33  ;;  %v4456_v33 = vld [vmem:[%s8089_s18 + $0x258] sm:$0xff]  ;;  %v4969_v42 = vld [vmem:[%s8095_s20 + $0x260] sm:$0xff]  ;;  %v6502_v59 = vmul.f32 %v5990_v47, %v5990_v47  ;;  %v3437_v10 = vadd.s32 %v9137_v5, %v2923_v53  ;;  %vm3947_vm14 = vcmp.lt.s32.totalorder %v3435_v56, 5120 }
 0x51a   : > { %v5480_v46 = vsub.f32 %v4456_v33, %v4968_v34  ;;  %v5991_v55 = vsel %vm3943_vm10, %v5479_v38, 0.0  ;;  %v2926_v15 = vadd.s32 664, %v9133_v3  ;;  %v3438_v18 = vadd.s32 %v9137_v5, %v2924_v61 }
 0x51b   : > { %v7004_v58 = vadd.f32 %v7003_v50, %v6492_v41  ;;  %v4457_v41 = vld [vmem:[%s8089_s18 + $0x260] sm:$0xff]  ;;  %v4970_v50 = vld [vmem:[%s8095_s20 + $0x268] sm:$0xff]  ;;  %v6503_v4 = vmul.f32 %v5991_v55, %v5991_v55  ;;  %vm3948_vm15 = vcmp.lt.s32.totalorder %v3436_v0, 5120  ;;  %v2927_v23 = vadd.s32 672, %v9133_v3 }
 0x51c   : > { %v5481_v54 = vsub.f32 %v4457_v41, %v4969_v42  ;;  %v5992_v63 = vsel %vm3944_vm11, %v5480_v46, 0.0  ;;  %v3439_v26 = vadd.s32 %v9137_v5, %v2925_v7  ;;  %vm3949_vm0 = vcmp.lt.s32.totalorder %v3437_v10, 5120 }
 0x51d   : > { %v7005_v2 = vadd.f32 %v7004_v58, %v6493_v49  ;;  %v4458_v49 = vld [vmem:[%s8089_s18 + $0x268] sm:$0xff]  ;;  %v4971_v58 = vld [vmem:[%s8095_s20 + $0x270] sm:$0xff]  ;;  %v6504_v13 = vmul.f32 %v5992_v63, %v5992_v63  ;;  %v2928_v31 = vadd.s32 680, %v9133_v3  ;;  %v3440_v34 = vadd.s32 %v9137_v5, %v2926_v15 }
 0x51e   : > { %v5482_v62 = vsub.f32 %v4458_v49, %v4970_v50  ;;  %v5993_v9 = vsel %vm3945_vm12, %v5481_v54, 0.0  ;;  %vm3950_vm1 = vcmp.lt.s32.totalorder %v3438_v18, 5120  ;;  %v2929_v39 = vadd.s32 688, %v9133_v3 }
 0x51f   : > { %v7006_v12 = vadd.f32 %v7005_v2, %v6494_v57  ;;  %v4459_v57 = vld [vmem:[%s8089_s18 + $0x270] sm:$0xff]  ;;  %v4972_v2 = vld [vmem:[%s8095_s20 + $0x278] sm:$0xff]  ;;  %v6505_v21 = vmul.f32 %v5993_v9, %v5993_v9  ;;  %v3441_v42 = vadd.s32 %v9137_v5, %v2927_v23  ;;  %vm3951_vm2 = vcmp.lt.s32.totalorder %v3439_v26, 5120 }
 0x520   : > { %v5483_v8 = vsub.f32 %v4459_v57, %v4971_v58  ;;  %v5994_v17 = vsel %vm3946_vm13, %v5482_v62, 0.0  ;;  %v2930_v47 = vadd.s32 696, %v9133_v3  ;;  %v3442_v50 = vadd.s32 %v9137_v5, %v2928_v31 }
 0x521   : > { %v7007_v20 = vadd.f32 %v7006_v12, %v6495_v1  ;;  %v4460_v1 = vld [vmem:[%s8089_s18 + $0x278] sm:$0xff]  ;;  %v4973_v12 = vld [vmem:[%s8095_s20 + $0x280] sm:$0xff]  ;;  %v6506_v29 = vmul.f32 %v5994_v17, %v5994_v17  ;;  %vm3952_vm3 = vcmp.lt.s32.totalorder %v3440_v34, 5120  ;;  %v2931_v55 = vadd.s32 704, %v9133_v3 }
 0x522   : > { %v5484_v16 = vsub.f32 %v4460_v1, %v4972_v2  ;;  %v5995_v25 = vsel %vm3947_vm14, %v5483_v8, 0.0  ;;  %v3443_v58 = vadd.s32 %v9137_v5, %v2929_v39  ;;  %vm3953_vm4 = vcmp.lt.s32.totalorder %v3441_v42, 5120 }
 0x523   : > { %v7008_v28 = vadd.f32 %v7007_v20, %v6496_v11  ;;  %v4461_v11 = vld [vmem:[%s8089_s18 + $0x280] sm:$0xff]  ;;  %v4974_v20 = vld [vmem:[%s8095_s20 + $0x288] sm:$0xff]  ;;  %v6507_v37 = vmul.f32 %v5995_v25, %v5995_v25  ;;  %v2932_v63 = vadd.s32 712, %v9133_v3  ;;  %v3444_v2 = vadd.s32 %v9137_v5, %v2930_v47 }
 0x524   : > { %v5485_v24 = vsub.f32 %v4461_v11, %v4973_v12  ;;  %v5996_v33 = vsel %vm3948_vm15, %v5484_v16, 0.0  ;;  %vm3954_vm5 = vcmp.lt.s32.totalorder %v3442_v50, 5120  ;;  %v2933_v9 = vadd.s32 720, %v9133_v3 }
 0x525   : > { %v7009_v36 = vadd.f32 %v7008_v28, %v6497_v19  ;;  %v4462_v19 = vld [vmem:[%s8089_s18 + $0x288] sm:$0xff]  ;;  %v4975_v28 = vld [vmem:[%s8095_s20 + $0x290] sm:$0xff]  ;;  %v6508_v45 = vmul.f32 %v5996_v33, %v5996_v33  ;;  %v3445_v12 = vadd.s32 %v9137_v5, %v2931_v55  ;;  %vm3955_vm6 = vcmp.lt.s32.totalorder %v3443_v58, 5120 }
 0x526   : > { %v5486_v32 = vsub.f32 %v4462_v19, %v4974_v20  ;;  %v5997_v41 = vsel %vm3949_vm0, %v5485_v24, 0.0  ;;  %v2934_v17 = vadd.s32 728, %v9133_v3  ;;  %v3446_v20 = vadd.s32 %v9137_v5, %v2932_v63 }
 0x527   : > { %v7010_v44 = vadd.f32 %v7009_v36, %v6498_v27  ;;  %v4463_v27 = vld [vmem:[%s8089_s18 + $0x290] sm:$0xff]  ;;  %v4976_v36 = vld [vmem:[%s8095_s20 + $0x298] sm:$0xff]  ;;  %v6509_v53 = vmul.f32 %v5997_v41, %v5997_v41  ;;  %vm3956_vm7 = vcmp.lt.s32.totalorder %v3444_v2, 5120  ;;  %v2935_v25 = vadd.s32 736, %v9133_v3 }
 0x528   : > { %v5487_v40 = vsub.f32 %v4463_v27, %v4975_v28  ;;  %v5998_v49 = vsel %vm3950_vm1, %v5486_v32, 0.0  ;;  %v3447_v28 = vadd.s32 %v9137_v5, %v2933_v9  ;;  %vm3957_vm8 = vcmp.lt.s32.totalorder %v3445_v12, 5120 }
 0x529   : > { %v7011_v52 = vadd.f32 %v7010_v44, %v6499_v35  ;;  %v4464_v35 = vld [vmem:[%s8089_s18 + $0x298] sm:$0xff]  ;;  %v4977_v44 = vld [vmem:[%s8095_s20 + $0x2a0] sm:$0xff]  ;;  %v6510_v61 = vmul.f32 %v5998_v49, %v5998_v49  ;;  %v2936_v33 = vadd.s32 744, %v9133_v3  ;;  %vm3958_vm9 = vcmp.lt.s32.totalorder %v3446_v20, 5120 }
 0x52a   : > { %v5488_v48 = vsub.f32 %v4464_v35, %v4976_v36  ;;  %v5999_v57 = vsel %vm3951_vm2, %v5487_v40, 0.0  ;;  %v3448_v36 = vadd.s32 %v9137_v5, %v2934_v17  ;;  %v2937_v41 = vadd.s32 752, %v9133_v3 }
 0x52b   : > { %v7012_v60 = vadd.f32 %v7011_v52, %v6500_v43  ;;  %v4465_v43 = vld [vmem:[%s8089_s18 + $0x2a0] sm:$0xff]  ;;  %v4978_v52 = vld [vmem:[%s8095_s20 + $0x2a8] sm:$0xff]  ;;  %v6511_v7 = vmul.f32 %v5999_v57, %v5999_v57  ;;  %vm3959_vm10 = vcmp.lt.s32.totalorder %v3447_v28, 5120  ;;  %v2938_v49 = vadd.s32 760, %v9133_v3 }
 0x52c   : > { %v5489_v56 = vsub.f32 %v4465_v43, %v4977_v44  ;;  %v6000_v1 = vsel %vm3952_vm3, %v5488_v48, 0.0  ;;  %v3449_v44 = vadd.s32 %v9137_v5, %v2935_v25  ;;  %vm3960_vm11 = vcmp.lt.s32.totalorder %v3448_v36, 5120 }
 0x52d   : > { %v7013_v6 = vadd.f32 %v7012_v60, %v6501_v51  ;;  %v4466_v51 = vld [vmem:[%s8089_s18 + $0x2a8] sm:$0xff]  ;;  %v4979_v60 = vld [vmem:[%s8095_s20 + $0x2b0] sm:$0xff]  ;;  %v6512_v15 = vmul.f32 %v6000_v1, %v6000_v1  ;;  %v2939_v57 = vadd.s32 768, %v9133_v3  ;;  %v2940_v1 = vadd.s32 776, %v9133_v3 }
 0x52e   : > { %v5490_v0 = vsub.f32 %v4466_v51, %v4978_v52  ;;  %v6001_v11 = vsel %vm3953_vm4, %v5489_v56, 0.0  ;;  %v3450_v52 = vadd.s32 %v9137_v5, %v2936_v33  ;;  %vm3961_vm12 = vcmp.lt.s32.totalorder %v3449_v44, 5120 }
 0x52f   : > { %v7014_v14 = vadd.f32 %v7013_v6, %v6502_v59  ;;  %v4467_v59 = vld [vmem:[%s8089_s18 + $0x2b0] sm:$0xff]  ;;  %v4980_v6 = vld [vmem:[%s8095_s20 + $0x2b8] sm:$0xff]  ;;  %v6513_v23 = vmul.f32 %v6001_v11, %v6001_v11  ;;  %v2941_v11 = vadd.s32 784, %v9133_v3 }
 0x530   : > { %v5491_v10 = vsub.f32 %v4467_v59, %v4979_v60  ;;  %v6002_v19 = vsel %vm3954_vm5, %v5490_v0, 0.0  ;;  %v3451_v60 = vadd.s32 %v9137_v5, %v2937_v41  ;;  %vm3962_vm13 = vcmp.lt.s32.totalorder %v3450_v52, 5120 }
 0x531   : > { %v7015_v22 = vadd.f32 %v7014_v14, %v6503_v4  ;;  %v4468_v4 = vld [vmem:[%s8089_s18 + $0x2b8] sm:$0xff]  ;;  %v4981_v14 = vld [vmem:[%s8095_s20 + $0x2c0] sm:$0xff]  ;;  %v6514_v31 = vmul.f32 %v6002_v19, %v6002_v19  ;;  %v2942_v19 = vadd.s32 792, %v9133_v3 }
 0x532   : > { %v5492_v18 = vsub.f32 %v4468_v4, %v4980_v6  ;;  %v6003_v27 = vsel %vm3955_vm6, %v5491_v10, 0.0  ;;  %v3452_v6 = vadd.s32 %v9137_v5, %v2938_v49  ;;  %vm3963_vm14 = vcmp.lt.s32.totalorder %v3451_v60, 5120 }
 0x533   : > { %v7016_v30 = vadd.f32 %v7015_v22, %v6504_v13  ;;  %v4469_v13 = vld [vmem:[%s8089_s18 + $0x2c0] sm:$0xff]  ;;  %v4982_v22 = vld [vmem:[%s8095_s20 + $0x2c8] sm:$0xff]  ;;  %v6515_v39 = vmul.f32 %v6003_v27, %v6003_v27  ;;  %v2943_v27 = vadd.s32 800, %v9133_v3 }
 0x534   : > { %v5493_v26 = vsub.f32 %v4469_v13, %v4981_v14  ;;  %v6004_v35 = vsel %vm3956_vm7, %v5492_v18, 0.0  ;;  %v3453_v14 = vadd.s32 %v9137_v5, %v2939_v57  ;;  %vm3964_vm15 = vcmp.lt.s32.totalorder %v3452_v6, 5120 }
 0x535   : > { %v7017_v38 = vadd.f32 %v7016_v30, %v6505_v21  ;;  %v4470_v21 = vld [vmem:[%s8089_s18 + $0x2c8] sm:$0xff]  ;;  %v4983_v30 = vld [vmem:[%s8095_s20 + $0x2d0] sm:$0xff]  ;;  %v6516_v47 = vmul.f32 %v6004_v35, %v6004_v35  ;;  %v2944_v35 = vadd.s32 808, %v9133_v3 }
 0x536   : > { %v5494_v34 = vsub.f32 %v4470_v21, %v4982_v22  ;;  %v6005_v43 = vsel %vm3957_vm8, %v5493_v26, 0.0  ;;  %v3454_v22 = vadd.s32 %v9137_v5, %v2940_v1  ;;  %vm3965_vm0 = vcmp.lt.s32.totalorder %v3453_v14, 5120 }
 0x537   : > { %v7018_v46 = vadd.f32 %v7017_v38, %v6506_v29  ;;  %v4471_v29 = vld [vmem:[%s8089_s18 + $0x2d0] sm:$0xff]  ;;  %v4984_v38 = vld [vmem:[%s8095_s20 + $0x2d8] sm:$0xff]  ;;  %v6517_v55 = vmul.f32 %v6005_v43, %v6005_v43  ;;  %v2945_v43 = vadd.s32 816, %v9133_v3 }
 0x538   : > { %v5495_v42 = vsub.f32 %v4471_v29, %v4983_v30  ;;  %v6006_v51 = vsel %vm3958_vm9, %v5494_v34, 0.0  ;;  %v3455_v30 = vadd.s32 %v9137_v5, %v2941_v11  ;;  %vm3966_vm1 = vcmp.lt.s32.totalorder %v3454_v22, 5120 }
 0x539   : > { %v7019_v54 = vadd.f32 %v7018_v46, %v6507_v37  ;;  %v4472_v37 = vld [vmem:[%s8089_s18 + $0x2d8] sm:$0xff]  ;;  %v4985_v46 = vld [vmem:[%s8095_s20 + $0x2e0] sm:$0xff]  ;;  %v6518_v63 = vmul.f32 %v6006_v51, %v6006_v51  ;;  %v2946_v51 = vadd.s32 824, %v9133_v3 }
 0x53a   : > { %v5496_v50 = vsub.f32 %v4472_v37, %v4984_v38  ;;  %v6007_v59 = vsel %vm3959_vm10, %v5495_v42, 0.0  ;;  %v3456_v38 = vadd.s32 %v9137_v5, %v2942_v19  ;;  %vm3967_vm2 = vcmp.lt.s32.totalorder %v3455_v30, 5120 }
 0x53b   : > { %v7020_v62 = vadd.f32 %v7019_v54, %v6508_v45  ;;  %v4473_v45 = vld [vmem:[%s8089_s18 + $0x2e0] sm:$0xff]  ;;  %v4986_v54 = vld [vmem:[%s8095_s20 + $0x2e8] sm:$0xff]  ;;  %v6519_v9 = vmul.f32 %v6007_v59, %v6007_v59  ;;  %v2947_v59 = vadd.s32 832, %v9133_v3 }
 0x53c   : > { %v5497_v58 = vsub.f32 %v4473_v45, %v4985_v46  ;;  %v6008_v4 = vsel %vm3960_vm11, %v5496_v50, 0.0  ;;  %v3457_v46 = vadd.s32 %v9137_v5, %v2943_v27  ;;  %vm3968_vm3 = vcmp.lt.s32.totalorder %v3456_v38, 5120 }
 0x53d   : > { %v7021_v8 = vadd.f32 %v7020_v62, %v6509_v53  ;;  %v4474_v53 = vld [vmem:[%s8089_s18 + $0x2e8] sm:$0xff]  ;;  %v4987_v62 = vld [vmem:[%s8095_s20 + $0x2f0] sm:$0xff]  ;;  %v6520_v17 = vmul.f32 %v6008_v4, %v6008_v4  ;;  %v2948_v4 = vadd.s32 840, %v9133_v3 }
 0x53e   : > { %v5498_v2 = vsub.f32 %v4474_v53, %v4986_v54  ;;  %v6009_v13 = vsel %vm3961_vm12, %v5497_v58, 0.0  ;;  %v3458_v54 = vadd.s32 %v9137_v5, %v2944_v35  ;;  %vm3969_vm4 = vcmp.lt.s32.totalorder %v3457_v46, 5120 }
 0x53f   : > { %v7022_v16 = vadd.f32 %v7021_v8, %v6510_v61  ;;  %v4475_v61 = vld [vmem:[%s8089_s18 + $0x2f0] sm:$0xff]  ;;  %v4988_v8 = vld [vmem:[%s8095_s20 + $0x2f8] sm:$0xff]  ;;  %v6521_v25 = vmul.f32 %v6009_v13, %v6009_v13  ;;  %v2949_v13 = vadd.s32 848, %v9133_v3 }
 0x540   : > { %v5499_v12 = vsub.f32 %v4475_v61, %v4987_v62  ;;  %v6010_v21 = vsel %vm3962_vm13, %v5498_v2, 0.0  ;;  %v3459_v62 = vadd.s32 %v9137_v5, %v2945_v43  ;;  %vm3970_vm5 = vcmp.lt.s32.totalorder %v3458_v54, 5120 }
 0x541   : > { %v7023_v24 = vadd.f32 %v7022_v16, %v6511_v7  ;;  %v4476_v7 = vld [vmem:[%s8089_s18 + $0x2f8] sm:$0xff]  ;;  %v4989_v16 = vld [vmem:[%s8095_s20 + $0x300] sm:$0xff]  ;;  %v6522_v33 = vmul.f32 %v6010_v21, %v6010_v21  ;;  %v2950_v21 = vadd.s32 856, %v9133_v3 }
 0x542   : > { %v5500_v20 = vsub.f32 %v4476_v7, %v4988_v8  ;;  %v6011_v29 = vsel %vm3963_vm14, %v5499_v12, 0.0  ;;  %v3460_v8 = vadd.s32 %v9137_v5, %v2946_v51  ;;  %vm3971_vm6 = vcmp.lt.s32.totalorder %v3459_v62, 5120 }
 0x543   : > { %v7024_v32 = vadd.f32 %v7023_v24, %v6512_v15  ;;  %v4477_v15 = vld [vmem:[%s8089_s18 + $0x300] sm:$0xff]  ;;  %v4990_v24 = vld [vmem:[%s8095_s20 + $0x308] sm:$0xff]  ;;  %v6523_v41 = vmul.f32 %v6011_v29, %v6011_v29  ;;  %v2951_v29 = vadd.s32 864, %v9133_v3 }
 0x544   : > { %v5501_v28 = vsub.f32 %v4477_v15, %v4989_v16  ;;  %v6012_v37 = vsel %vm3964_vm15, %v5500_v20, 0.0  ;;  %v3461_v16 = vadd.s32 %v9137_v5, %v2947_v59  ;;  %vm3972_vm7 = vcmp.lt.s32.totalorder %v3460_v8, 5120 }
 0x545   : > { %v7025_v40 = vadd.f32 %v7024_v32, %v6513_v23  ;;  %v4478_v23 = vld [vmem:[%s8089_s18 + $0x308] sm:$0xff]  ;;  %v4991_v32 = vld [vmem:[%s8095_s20 + $0x310] sm:$0xff]  ;;  %v6524_v49 = vmul.f32 %v6012_v37, %v6012_v37  ;;  %v2952_v37 = vadd.s32 872, %v9133_v3 }
 0x546   : > { %v5502_v36 = vsub.f32 %v4478_v23, %v4990_v24  ;;  %v6013_v45 = vsel %vm3965_vm0, %v5501_v28, 0.0  ;;  %v3462_v24 = vadd.s32 %v9137_v5, %v2948_v4  ;;  %vm3973_vm8 = vcmp.lt.s32.totalorder %v3461_v16, 5120 }
 0x547   : > { %v7026_v48 = vadd.f32 %v7025_v40, %v6514_v31  ;;  %v4479_v31 = vld [vmem:[%s8089_s18 + $0x310] sm:$0xff]  ;;  %v4992_v40 = vld [vmem:[%s8095_s20 + $0x318] sm:$0xff]  ;;  %v6525_v57 = vmul.f32 %v6013_v45, %v6013_v45  ;;  %v2953_v45 = vadd.s32 880, %v9133_v3 }
 0x548   : > { %v5503_v44 = vsub.f32 %v4479_v31, %v4991_v32  ;;  %v6014_v53 = vsel %vm3966_vm1, %v5502_v36, 0.0  ;;  %v3463_v32 = vadd.s32 %v9137_v5, %v2949_v13  ;;  %vm3974_vm9 = vcmp.lt.s32.totalorder %v3462_v24, 5120 }
 0x549   : > { %v7027_v56 = vadd.f32 %v7026_v48, %v6515_v39  ;;  %v4480_v39 = vld [vmem:[%s8089_s18 + $0x318] sm:$0xff]  ;;  %v4993_v48 = vld [vmem:[%s8095_s20 + $0x320] sm:$0xff]  ;;  %v6526_v1 = vmul.f32 %v6014_v53, %v6014_v53  ;;  %v2954_v53 = vadd.s32 888, %v9133_v3 }
 0x54a   : > { %v5504_v52 = vsub.f32 %v4480_v39, %v4992_v40  ;;  %v6015_v61 = vsel %vm3967_vm2, %v5503_v44, 0.0  ;;  %v3464_v40 = vadd.s32 %v9137_v5, %v2950_v21  ;;  %vm3975_vm10 = vcmp.lt.s32.totalorder %v3463_v32, 5120 }
 0x54b   : > { %v7028_v0 = vadd.f32 %v7027_v56, %v6516_v47  ;;  %v4481_v47 = vld [vmem:[%s8089_s18 + $0x320] sm:$0xff]  ;;  %v4994_v56 = vld [vmem:[%s8095_s20 + $0x328] sm:$0xff]  ;;  %v6527_v11 = vmul.f32 %v6015_v61, %v6015_v61  ;;  %v2955_v61 = vadd.s32 896, %v9133_v3 }
 0x54c   : > { %v5505_v60 = vsub.f32 %v4481_v47, %v4993_v48  ;;  %v6016_v7 = vsel %vm3968_vm3, %v5504_v52, 0.0  ;;  %v3465_v48 = vadd.s32 %v9137_v5, %v2951_v29  ;;  %vm3976_vm11 = vcmp.lt.s32.totalorder %v3464_v40, 5120 }
 0x54d   : > { %v7029_v10 = vadd.f32 %v7028_v0, %v6517_v55  ;;  %v4482_v55 = vld [vmem:[%s8089_s18 + $0x328] sm:$0xff]  ;;  %v4995_v0 = vld [vmem:[%s8095_s20 + $0x330] sm:$0xff]  ;;  %v6528_v19 = vmul.f32 %v6016_v7, %v6016_v7  ;;  %v2956_v7 = vadd.s32 904, %v9133_v3 }
 0x54e   : > { %v5506_v6 = vsub.f32 %v4482_v55, %v4994_v56  ;;  %v6017_v15 = vsel %vm3969_vm4, %v5505_v60, 0.0  ;;  %v3466_v56 = vadd.s32 %v9137_v5, %v2952_v37  ;;  %vm3977_vm12 = vcmp.lt.s32.totalorder %v3465_v48, 5120 }
 0x54f   : > { %v7030_v18 = vadd.f32 %v7029_v10, %v6518_v63  ;;  %v4483_v63 = vld [vmem:[%s8089_s18 + $0x330] sm:$0xff]  ;;  %v4996_v10 = vld [vmem:[%s8095_s20 + $0x338] sm:$0xff]  ;;  %v6529_v27 = vmul.f32 %v6017_v15, %v6017_v15  ;;  %v2957_v15 = vadd.s32 912, %v9133_v3 }
 0x550   : > { %v5507_v14 = vsub.f32 %v4483_v63, %v4995_v0  ;;  %v6018_v23 = vsel %vm3970_vm5, %v5506_v6, 0.0  ;;  %v3467_v0 = vadd.s32 %v9137_v5, %v2953_v45  ;;  %vm3978_vm13 = vcmp.lt.s32.totalorder %v3466_v56, 5120 }
 0x551   : > { %v7031_v26 = vadd.f32 %v7030_v18, %v6519_v9  ;;  %v4484_v9 = vld [vmem:[%s8089_s18 + $0x338] sm:$0xff]  ;;  %v4997_v18 = vld [vmem:[%s8095_s20 + $0x340] sm:$0xff]  ;;  %v6530_v35 = vmul.f32 %v6018_v23, %v6018_v23  ;;  %v2958_v23 = vadd.s32 920, %v9133_v3 }
 0x552   : > { %v5508_v22 = vsub.f32 %v4484_v9, %v4996_v10  ;;  %v6019_v31 = vsel %vm3971_vm6, %v5507_v14, 0.0  ;;  %v3468_v10 = vadd.s32 %v9137_v5, %v2954_v53  ;;  %vm3979_vm14 = vcmp.lt.s32.totalorder %v3467_v0, 5120 }
 0x553   : > { %v7032_v34 = vadd.f32 %v7031_v26, %v6520_v17  ;;  %v4485_v17 = vld [vmem:[%s8089_s18 + $0x340] sm:$0xff]  ;;  %v4998_v26 = vld [vmem:[%s8095_s20 + $0x348] sm:$0xff]  ;;  %v6531_v43 = vmul.f32 %v6019_v31, %v6019_v31  ;;  %v2959_v31 = vadd.s32 928, %v9133_v3 }
 0x554   : > { %v5509_v30 = vsub.f32 %v4485_v17, %v4997_v18  ;;  %v6020_v39 = vsel %vm3972_vm7, %v5508_v22, 0.0  ;;  %v3469_v18 = vadd.s32 %v9137_v5, %v2955_v61  ;;  %vm3980_vm15 = vcmp.lt.s32.totalorder %v3468_v10, 5120 }
 0x555   : > { %v7033_v42 = vadd.f32 %v7032_v34, %v6521_v25  ;;  %v4486_v25 = vld [vmem:[%s8089_s18 + $0x348] sm:$0xff]  ;;  %v4999_v34 = vld [vmem:[%s8095_s20 + $0x350] sm:$0xff]  ;;  %v6532_v51 = vmul.f32 %v6020_v39, %v6020_v39  ;;  %v2960_v39 = vadd.s32 936, %v9133_v3 }
 0x556   : > { %v5510_v38 = vsub.f32 %v4486_v25, %v4998_v26  ;;  %v6021_v47 = vsel %vm3973_vm8, %v5509_v30, 0.0  ;;  %v3470_v26 = vadd.s32 %v9137_v5, %v2956_v7  ;;  %vm3981_vm0 = vcmp.lt.s32.totalorder %v3469_v18, 5120 }
 0x557   : > { %v7034_v50 = vadd.f32 %v7033_v42, %v6522_v33  ;;  %v4487_v33 = vld [vmem:[%s8089_s18 + $0x350] sm:$0xff]  ;;  %v5000_v42 = vld [vmem:[%s8095_s20 + $0x358] sm:$0xff]  ;;  %v6533_v59 = vmul.f32 %v6021_v47, %v6021_v47  ;;  %v2961_v47 = vadd.s32 944, %v9133_v3 }
 0x558   : > { %v5511_v46 = vsub.f32 %v4487_v33, %v4999_v34  ;;  %v6022_v55 = vsel %vm3974_vm9, %v5510_v38, 0.0  ;;  %v3471_v34 = vadd.s32 %v9137_v5, %v2957_v15  ;;  %vm3982_vm1 = vcmp.lt.s32.totalorder %v3470_v26, 5120 }
 0x559   : > { %v7035_v58 = vadd.f32 %v7034_v50, %v6523_v41  ;;  %v4488_v41 = vld [vmem:[%s8089_s18 + $0x358] sm:$0xff]  ;;  %v5001_v50 = vld [vmem:[%s8095_s20 + $0x360] sm:$0xff]  ;;  %v6534_v4 = vmul.f32 %v6022_v55, %v6022_v55  ;;  %v2962_v55 = vadd.s32 952, %v9133_v3 }
 0x55a   : > { %v5512_v54 = vsub.f32 %v4488_v41, %v5000_v42  ;;  %v6023_v63 = vsel %vm3975_vm10, %v5511_v46, 0.0  ;;  %v3472_v42 = vadd.s32 %v9137_v5, %v2958_v23  ;;  %vm3983_vm2 = vcmp.lt.s32.totalorder %v3471_v34, 5120 }
 0x55b   : > { %v7036_v2 = vadd.f32 %v7035_v58, %v6524_v49  ;;  %v4489_v49 = vld [vmem:[%s8089_s18 + $0x360] sm:$0xff]  ;;  %v5002_v58 = vld [vmem:[%s8095_s20 + $0x368] sm:$0xff]  ;;  %v6535_v13 = vmul.f32 %v6023_v63, %v6023_v63  ;;  %v2963_v63 = vadd.s32 960, %v9133_v3 }
 0x55c   : > { %v5513_v62 = vsub.f32 %v4489_v49, %v5001_v50  ;;  %v6024_v9 = vsel %vm3976_vm11, %v5512_v54, 0.0  ;;  %v3473_v50 = vadd.s32 %v9137_v5, %v2959_v31  ;;  %vm3984_vm3 = vcmp.lt.s32.totalorder %v3472_v42, 5120 }
 0x55d   : > { %v7037_v12 = vadd.f32 %v7036_v2, %v6525_v57  ;;  %v4490_v57 = vld [vmem:[%s8089_s18 + $0x368] sm:$0xff]  ;;  %v5003_v2 = vld [vmem:[%s8095_s20 + $0x370] sm:$0xff]  ;;  %v6536_v21 = vmul.f32 %v6024_v9, %v6024_v9  ;;  %v2964_v9 = vadd.s32 968, %v9133_v3 }
 0x55e   : > { %v5514_v8 = vsub.f32 %v4490_v57, %v5002_v58  ;;  %v6025_v17 = vsel %vm3977_vm12, %v5513_v62, 0.0  ;;  %v3474_v58 = vadd.s32 %v9137_v5, %v2960_v39  ;;  %vm3985_vm4 = vcmp.lt.s32.totalorder %v3473_v50, 5120 }
 0x55f   : > { %v7038_v20 = vadd.f32 %v7037_v12, %v6526_v1  ;;  %v4491_v1 = vld [vmem:[%s8089_s18 + $0x370] sm:$0xff]  ;;  %v5004_v12 = vld [vmem:[%s8095_s20 + $0x378] sm:$0xff]  ;;  %v6537_v29 = vmul.f32 %v6025_v17, %v6025_v17  ;;  %v2965_v17 = vadd.s32 976, %v9133_v3 }
 0x560   : > { %v5515_v16 = vsub.f32 %v4491_v1, %v5003_v2  ;;  %v6026_v25 = vsel %vm3978_vm13, %v5514_v8, 0.0  ;;  %v3475_v2 = vadd.s32 %v9137_v5, %v2961_v47  ;;  %vm3986_vm5 = vcmp.lt.s32.totalorder %v3474_v58, 5120 }
 0x561   : > { %v7039_v28 = vadd.f32 %v7038_v20, %v6527_v11  ;;  %v4492_v11 = vld [vmem:[%s8089_s18 + $0x378] sm:$0xff]  ;;  %v5005_v20 = vld [vmem:[%s8095_s20 + $0x380] sm:$0xff]  ;;  %v6538_v37 = vmul.f32 %v6026_v25, %v6026_v25  ;;  %v2966_v25 = vadd.s32 984, %v9133_v3 }
 0x562   : > { %v5516_v24 = vsub.f32 %v4492_v11, %v5004_v12  ;;  %v6027_v33 = vsel %vm3979_vm14, %v5515_v16, 0.0  ;;  %v3476_v12 = vadd.s32 %v9137_v5, %v2962_v55  ;;  %vm3987_vm6 = vcmp.lt.s32.totalorder %v3475_v2, 5120 }
 0x563   : > { %v7040_v36 = vadd.f32 %v7039_v28, %v6528_v19  ;;  %v4493_v19 = vld [vmem:[%s8089_s18 + $0x380] sm:$0xff]  ;;  %v5006_v28 = vld [vmem:[%s8095_s20 + $0x388] sm:$0xff]  ;;  %v6539_v45 = vmul.f32 %v6027_v33, %v6027_v33  ;;  %v2967_v33 = vadd.s32 992, %v9133_v3 }
 0x564   : > { %v5517_v32 = vsub.f32 %v4493_v19, %v5005_v20  ;;  %v6028_v41 = vsel %vm3980_vm15, %v5516_v24, 0.0  ;;  %v3477_v20 = vadd.s32 %v9137_v5, %v2963_v63  ;;  %vm3988_vm7 = vcmp.lt.s32.totalorder %v3476_v12, 5120 }
 0x565   : > { %v7041_v44 = vadd.f32 %v7040_v36, %v6529_v27  ;;  %v4494_v27 = vld [vmem:[%s8089_s18 + $0x388] sm:$0xff]  ;;  %v5007_v36 = vld [vmem:[%s8095_s20 + $0x390] sm:$0xff]  ;;  %v6540_v53 = vmul.f32 %v6028_v41, %v6028_v41  ;;  %v2968_v41 = vadd.s32 1000, %v9133_v3 }
 0x566   : > { %v5518_v40 = vsub.f32 %v4494_v27, %v5006_v28  ;;  %v6029_v49 = vsel %vm3981_vm0, %v5517_v32, 0.0  ;;  %v3478_v28 = vadd.s32 %v9137_v5, %v2964_v9  ;;  %vm3989_vm8 = vcmp.lt.s32.totalorder %v3477_v20, 5120 }
 0x567   : > { %v7042_v52 = vadd.f32 %v7041_v44, %v6530_v35  ;;  %v4495_v35 = vld [vmem:[%s8089_s18 + $0x390] sm:$0xff]  ;;  %v5008_v44 = vld [vmem:[%s8095_s20 + $0x398] sm:$0xff]  ;;  %v6541_v61 = vmul.f32 %v6029_v49, %v6029_v49  ;;  %v2969_v49 = vadd.s32 1008, %v9133_v3 }
 0x568   : > { %v5519_v48 = vsub.f32 %v4495_v35, %v5007_v36  ;;  %v6030_v57 = vsel %vm3982_vm1, %v5518_v40, 0.0  ;;  %v3479_v36 = vadd.s32 %v9137_v5, %v2965_v17  ;;  %vm3990_vm9 = vcmp.lt.s32.totalorder %v3478_v28, 5120 }
 0x569   : > { %v7043_v60 = vadd.f32 %v7042_v52, %v6531_v43  ;;  %v4496_v43 = vld [vmem:[%s8089_s18 + $0x398] sm:$0xff]  ;;  %v5009_v52 = vld [vmem:[%s8095_s20 + $0x3a0] sm:$0xff]  ;;  %v6542_v7 = vmul.f32 %v6030_v57, %v6030_v57  ;;  %v2970_v57 = vadd.s32 1016, %v9133_v3 }
 0x56a   : > { %v5520_v56 = vsub.f32 %v4496_v43, %v5008_v44  ;;  %v6031_v1 = vsel %vm3983_vm2, %v5519_v48, 0.0  ;;  %v3480_v44 = vadd.s32 %v9137_v5, %v2966_v25  ;;  %vm3991_vm10 = vcmp.lt.s32.totalorder %v3479_v36, 5120 }
 0x56b   : > { %v7044_v6 = vadd.f32 %v7043_v60, %v6532_v51  ;;  %v4497_v51 = vld [vmem:[%s8089_s18 + $0x3a0] sm:$0xff]  ;;  %v5010_v60 = vld [vmem:[%s8095_s20 + $0x3a8] sm:$0xff]  ;;  %v6543_v15 = vmul.f32 %v6031_v1, %v6031_v1  ;;  %v2971_v1 = vadd.s32 1024, %v9133_v3 }
 0x56c   : > { %v5521_v0 = vsub.f32 %v4497_v51, %v5009_v52  ;;  %v6032_v11 = vsel %vm3984_vm3, %v5520_v56, 0.0  ;;  %v3481_v52 = vadd.s32 %v9137_v5, %v2967_v33  ;;  %vm3992_vm11 = vcmp.lt.s32.totalorder %v3480_v44, 5120 }
 0x56d   : > { %v7045_v14 = vadd.f32 %v7044_v6, %v6533_v59  ;;  %v4498_v59 = vld [vmem:[%s8089_s18 + $0x3a8] sm:$0xff]  ;;  %v5011_v6 = vld [vmem:[%s8095_s20 + $0x3b0] sm:$0xff]  ;;  %v6544_v23 = vmul.f32 %v6032_v11, %v6032_v11  ;;  %v2972_v11 = vadd.s32 1032, %v9133_v3 }
 0x56e   : > { %v5522_v10 = vsub.f32 %v4498_v59, %v5010_v60  ;;  %v6033_v19 = vsel %vm3985_vm4, %v5521_v0, 0.0  ;;  %v3482_v60 = vadd.s32 %v9137_v5, %v2968_v41  ;;  %vm3993_vm12 = vcmp.lt.s32.totalorder %v3481_v52, 5120 }
 0x56f   : > { %v7046_v22 = vadd.f32 %v7045_v14, %v6534_v4  ;;  %v4499_v4 = vld [vmem:[%s8089_s18 + $0x3b0] sm:$0xff]  ;;  %v5012_v14 = vld [vmem:[%s8095_s20 + $0x3b8] sm:$0xff]  ;;  %v6545_v31 = vmul.f32 %v6033_v19, %v6033_v19  ;;  %v2973_v19 = vadd.s32 1040, %v9133_v3 }
 0x570   : > { %v5523_v18 = vsub.f32 %v4499_v4, %v5011_v6  ;;  %v6034_v27 = vsel %vm3986_vm5, %v5522_v10, 0.0  ;;  %v3483_v6 = vadd.s32 %v9137_v5, %v2969_v49  ;;  %vm3994_vm13 = vcmp.lt.s32.totalorder %v3482_v60, 5120 }
 0x571   : > { %v7047_v30 = vadd.f32 %v7046_v22, %v6535_v13  ;;  %v4500_v13 = vld [vmem:[%s8089_s18 + $0x3b8] sm:$0xff]  ;;  %v5013_v22 = vld [vmem:[%s8095_s20 + $0x3c0] sm:$0xff]  ;;  %v6546_v39 = vmul.f32 %v6034_v27, %v6034_v27  ;;  %v2974_v27 = vadd.s32 1048, %v9133_v3 }
 0x572   : > { %v5524_v26 = vsub.f32 %v4500_v13, %v5012_v14  ;;  %v6035_v35 = vsel %vm3987_vm6, %v5523_v18, 0.0  ;;  %v3484_v14 = vadd.s32 %v9137_v5, %v2970_v57  ;;  %vm3995_vm14 = vcmp.lt.s32.totalorder %v3483_v6, 5120 }
 0x573   : > { %v7048_v38 = vadd.f32 %v7047_v30, %v6536_v21  ;;  %v4501_v21 = vld [vmem:[%s8089_s18 + $0x3c0] sm:$0xff]  ;;  %v5014_v30 = vld [vmem:[%s8095_s20 + $0x3c8] sm:$0xff]  ;;  %v6547_v47 = vmul.f32 %v6035_v35, %v6035_v35  ;;  %v2975_v35 = vadd.s32 1056, %v9133_v3 }
 0x574   : > { %v5525_v34 = vsub.f32 %v4501_v21, %v5013_v22  ;;  %v6036_v43 = vsel %vm3988_vm7, %v5524_v26, 0.0  ;;  %v3485_v22 = vadd.s32 %v9137_v5, %v2971_v1  ;;  %vm3996_vm15 = vcmp.lt.s32.totalorder %v3484_v14, 5120 }
 0x575   : > { %v7049_v46 = vadd.f32 %v7048_v38, %v6537_v29  ;;  %v4502_v29 = vld [vmem:[%s8089_s18 + $0x3c8] sm:$0xff]  ;;  %v5015_v38 = vld [vmem:[%s8095_s20 + $0x3d0] sm:$0xff]  ;;  %v6548_v55 = vmul.f32 %v6036_v43, %v6036_v43  ;;  %v2976_v43 = vadd.s32 1064, %v9133_v3 }
 0x576   : > { %v5526_v42 = vsub.f32 %v4502_v29, %v5014_v30  ;;  %v6037_v51 = vsel %vm3989_vm8, %v5525_v34, 0.0  ;;  %v3486_v30 = vadd.s32 %v9137_v5, %v2972_v11  ;;  %vm3997_vm0 = vcmp.lt.s32.totalorder %v3485_v22, 5120 }
 0x577   : > { %v7050_v54 = vadd.f32 %v7049_v46, %v6538_v37  ;;  %v4503_v37 = vld [vmem:[%s8089_s18 + $0x3d0] sm:$0xff]  ;;  %v5016_v46 = vld [vmem:[%s8095_s20 + $0x3d8] sm:$0xff]  ;;  %v6549_v63 = vmul.f32 %v6037_v51, %v6037_v51  ;;  %v2977_v51 = vadd.s32 1072, %v9133_v3 }
 0x578   : > { %v5527_v50 = vsub.f32 %v4503_v37, %v5015_v38  ;;  %v6038_v59 = vsel %vm3990_vm9, %v5526_v42, 0.0  ;;  %v3487_v38 = vadd.s32 %v9137_v5, %v2973_v19  ;;  %vm3998_vm1 = vcmp.lt.s32.totalorder %v3486_v30, 5120 }
 0x579   : > { %v7051_v62 = vadd.f32 %v7050_v54, %v6539_v45  ;;  %v4504_v45 = vld [vmem:[%s8089_s18 + $0x3d8] sm:$0xff]  ;;  %v5017_v54 = vld [vmem:[%s8095_s20 + $0x3e0] sm:$0xff]  ;;  %v6550_v9 = vmul.f32 %v6038_v59, %v6038_v59  ;;  %v2978_v59 = vadd.s32 1080, %v9133_v3 }
 0x57a   : > { %v5528_v58 = vsub.f32 %v4504_v45, %v5016_v46  ;;  %v6039_v4 = vsel %vm3991_vm10, %v5527_v50, 0.0  ;;  %v3488_v46 = vadd.s32 %v9137_v5, %v2974_v27  ;;  %vm3999_vm2 = vcmp.lt.s32.totalorder %v3487_v38, 5120 }
 0x57b   : > { %v7052_v8 = vadd.f32 %v7051_v62, %v6540_v53  ;;  %v4505_v53 = vld [vmem:[%s8089_s18 + $0x3e0] sm:$0xff]  ;;  %v5018_v62 = vld [vmem:[%s8095_s20 + $0x3e8] sm:$0xff]  ;;  %v6551_v17 = vmul.f32 %v6039_v4, %v6039_v4  ;;  %v2979_v4 = vadd.s32 1088, %v9133_v3 }
 0x57c   : > { %v5529_v2 = vsub.f32 %v4505_v53, %v5017_v54  ;;  %v6040_v13 = vsel %vm3992_vm11, %v5528_v58, 0.0  ;;  %v3489_v54 = vadd.s32 %v9137_v5, %v2975_v35  ;;  %vm4000_vm3 = vcmp.lt.s32.totalorder %v3488_v46, 5120 }
 0x57d   : > { %v7053_v16 = vadd.f32 %v7052_v8, %v6541_v61  ;;  %v4506_v61 = vld [vmem:[%s8089_s18 + $0x3e8] sm:$0xff]  ;;  %v5019_v8 = vld [vmem:[%s8095_s20 + $0x3f0] sm:$0xff]  ;;  %v6552_v25 = vmul.f32 %v6040_v13, %v6040_v13  ;;  %v2980_v13 = vadd.s32 1096, %v9133_v3 }
 0x57e   : > { %v5530_v12 = vsub.f32 %v4506_v61, %v5018_v62  ;;  %v6041_v21 = vsel %vm3993_vm12, %v5529_v2, 0.0  ;;  %v3490_v62 = vadd.s32 %v9137_v5, %v2976_v43  ;;  %vm4001_vm4 = vcmp.lt.s32.totalorder %v3489_v54, 5120 }
 0x57f   : > { %v7054_v24 = vadd.f32 %v7053_v16, %v6542_v7  ;;  %v4507_v7 = vld [vmem:[%s8089_s18 + $0x3f0] sm:$0xff]  ;;  %v5020_v16 = vld [vmem:[%s8095_s20 + $0x3f8] sm:$0xff]  ;;  %v6553_v33 = vmul.f32 %v6041_v21, %v6041_v21  ;;  %v2981_v21 = vadd.s32 1104, %v9133_v3 }
 0x580   : > { %v5531_v20 = vsub.f32 %v4507_v7, %v5019_v8  ;;  %v6042_v29 = vsel %vm3994_vm13, %v5530_v12, 0.0  ;;  %v3491_v8 = vadd.s32 %v9137_v5, %v2977_v51  ;;  %vm4002_vm5 = vcmp.lt.s32.totalorder %v3490_v62, 5120 }
 0x581   : > { %v7055_v32 = vadd.f32 %v7054_v24, %v6543_v15  ;;  %v4508_v15 = vld [vmem:[%s8089_s18 + $0x3f8] sm:$0xff]  ;;  %v5021_v24 = vld [vmem:[%s8095_s20 + $0x400] sm:$0xff]  ;;  %v6554_v41 = vmul.f32 %v6042_v29, %v6042_v29  ;;  %v2982_v29 = vadd.s32 1112, %v9133_v3 }
 0x582   : > { %v5532_v28 = vsub.f32 %v4508_v15, %v5020_v16  ;;  %v6043_v37 = vsel %vm3995_vm14, %v5531_v20, 0.0  ;;  %v3492_v16 = vadd.s32 %v9137_v5, %v2978_v59  ;;  %vm4003_vm6 = vcmp.lt.s32.totalorder %v3491_v8, 5120 }
 0x583   : > { %v7056_v40 = vadd.f32 %v7055_v32, %v6544_v23  ;;  %v4509_v23 = vld [vmem:[%s8089_s18 + $0x400] sm:$0xff]  ;;  %v5022_v32 = vld [vmem:[%s8095_s20 + $0x408] sm:$0xff]  ;;  %v6555_v49 = vmul.f32 %v6043_v37, %v6043_v37  ;;  %v2983_v37 = vadd.s32 1120, %v9133_v3 }
 0x584   : > { %v5533_v36 = vsub.f32 %v4509_v23, %v5021_v24  ;;  %v6044_v45 = vsel %vm3996_vm15, %v5532_v28, 0.0  ;;  %v3493_v24 = vadd.s32 %v9137_v5, %v2979_v4  ;;  %vm4004_vm7 = vcmp.lt.s32.totalorder %v3492_v16, 5120 }
 0x585   : > { %v7057_v48 = vadd.f32 %v7056_v40, %v6545_v31  ;;  %v4510_v31 = vld [vmem:[%s8089_s18 + $0x408] sm:$0xff]  ;;  %v5023_v40 = vld [vmem:[%s8095_s20 + $0x410] sm:$0xff]  ;;  %v6556_v57 = vmul.f32 %v6044_v45, %v6044_v45  ;;  %v2984_v45 = vadd.s32 1128, %v9133_v3 }
 0x586   : > { %v5534_v44 = vsub.f32 %v4510_v31, %v5022_v32  ;;  %v6045_v53 = vsel %vm3997_vm0, %v5533_v36, 0.0  ;;  %v3494_v32 = vadd.s32 %v9137_v5, %v2980_v13  ;;  %vm4005_vm8 = vcmp.lt.s32.totalorder %v3493_v24, 5120 }
 0x587   : > { %v7058_v56 = vadd.f32 %v7057_v48, %v6546_v39  ;;  %v4511_v39 = vld [vmem:[%s8089_s18 + $0x410] sm:$0xff]  ;;  %v5024_v48 = vld [vmem:[%s8095_s20 + $0x418] sm:$0xff]  ;;  %v6557_v1 = vmul.f32 %v6045_v53, %v6045_v53  ;;  %v2985_v53 = vadd.s32 1136, %v9133_v3 }
 0x588   : > { %v5535_v52 = vsub.f32 %v4511_v39, %v5023_v40  ;;  %v6046_v61 = vsel %vm3998_vm1, %v5534_v44, 0.0  ;;  %v3495_v40 = vadd.s32 %v9137_v5, %v2981_v21  ;;  %vm4006_vm9 = vcmp.lt.s32.totalorder %v3494_v32, 5120 }
 0x589   : > { %v7059_v0 = vadd.f32 %v7058_v56, %v6547_v47  ;;  %v4512_v47 = vld [vmem:[%s8089_s18 + $0x418] sm:$0xff]  ;;  %v5025_v56 = vld [vmem:[%s8095_s20 + $0x420] sm:$0xff]  ;;  %v6558_v11 = vmul.f32 %v6046_v61, %v6046_v61  ;;  %v2986_v61 = vadd.s32 1144, %v9133_v3 }
 0x58a   : > { %v5536_v60 = vsub.f32 %v4512_v47, %v5024_v48  ;;  %v6047_v7 = vsel %vm3999_vm2, %v5535_v52, 0.0  ;;  %v3496_v48 = vadd.s32 %v9137_v5, %v2982_v29  ;;  %vm4007_vm10 = vcmp.lt.s32.totalorder %v3495_v40, 5120 }
 0x58b   : > { %v7060_v10 = vadd.f32 %v7059_v0, %v6548_v55  ;;  %v4513_v55 = vld [vmem:[%s8089_s18 + $0x420] sm:$0xff]  ;;  %v5026_v0 = vld [vmem:[%s8095_s20 + $0x428] sm:$0xff]  ;;  %v6559_v19 = vmul.f32 %v6047_v7, %v6047_v7  ;;  %v2987_v7 = vadd.s32 1152, %v9133_v3 }
 0x58c   : > { %v5537_v6 = vsub.f32 %v4513_v55, %v5025_v56  ;;  %v6048_v15 = vsel %vm4000_vm3, %v5536_v60, 0.0  ;;  %v3497_v56 = vadd.s32 %v9137_v5, %v2983_v37  ;;  %vm4008_vm11 = vcmp.lt.s32.totalorder %v3496_v48, 5120 }
 0x58d   : > { %v7061_v18 = vadd.f32 %v7060_v10, %v6549_v63  ;;  %v4514_v63 = vld [vmem:[%s8089_s18 + $0x428] sm:$0xff]  ;;  %v5027_v10 = vld [vmem:[%s8095_s20 + $0x430] sm:$0xff]  ;;  %v6560_v27 = vmul.f32 %v6048_v15, %v6048_v15  ;;  %v2988_v15 = vadd.s32 1160, %v9133_v3 }
 0x58e   : > { %v5538_v14 = vsub.f32 %v4514_v63, %v5026_v0  ;;  %v6049_v23 = vsel %vm4001_vm4, %v5537_v6, 0.0  ;;  %v3498_v0 = vadd.s32 %v9137_v5, %v2984_v45  ;;  %vm4009_vm12 = vcmp.lt.s32.totalorder %v3497_v56, 5120 }
 0x58f   : > { %v7062_v26 = vadd.f32 %v7061_v18, %v6550_v9  ;;  %v4515_v9 = vld [vmem:[%s8089_s18 + $0x430] sm:$0xff]  ;;  %v5028_v18 = vld [vmem:[%s8095_s20 + $0x438] sm:$0xff]  ;;  %v6561_v35 = vmul.f32 %v6049_v23, %v6049_v23  ;;  %v2989_v23 = vadd.s32 1168, %v9133_v3 }
 0x590   : > { %v5539_v22 = vsub.f32 %v4515_v9, %v5027_v10  ;;  %v6050_v31 = vsel %vm4002_vm5, %v5538_v14, 0.0  ;;  %v3499_v10 = vadd.s32 %v9137_v5, %v2985_v53  ;;  %vm4010_vm13 = vcmp.lt.s32.totalorder %v3498_v0, 5120 }
 0x591   : > { %v7063_v34 = vadd.f32 %v7062_v26, %v6551_v17  ;;  %v4516_v17 = vld [vmem:[%s8089_s18 + $0x438] sm:$0xff]  ;;  %v5029_v26 = vld [vmem:[%s8095_s20 + $0x440] sm:$0xff]  ;;  %v6562_v43 = vmul.f32 %v6050_v31, %v6050_v31  ;;  %v2990_v31 = vadd.s32 1176, %v9133_v3 }
 0x592   : > { %v5540_v30 = vsub.f32 %v4516_v17, %v5028_v18  ;;  %v6051_v39 = vsel %vm4003_vm6, %v5539_v22, 0.0  ;;  %v3500_v18 = vadd.s32 %v9137_v5, %v2986_v61  ;;  %vm4011_vm14 = vcmp.lt.s32.totalorder %v3499_v10, 5120 }
 0x593   : > { %v7064_v42 = vadd.f32 %v7063_v34, %v6552_v25  ;;  %v4517_v25 = vld [vmem:[%s8089_s18 + $0x440] sm:$0xff]  ;;  %v5030_v34 = vld [vmem:[%s8095_s20 + $0x448] sm:$0xff]  ;;  %v6563_v51 = vmul.f32 %v6051_v39, %v6051_v39  ;;  %v2991_v39 = vadd.s32 1184, %v9133_v3 }
 0x594   : > { %v5541_v38 = vsub.f32 %v4517_v25, %v5029_v26  ;;  %v6052_v47 = vsel %vm4004_vm7, %v5540_v30, 0.0  ;;  %v3501_v26 = vadd.s32 %v9137_v5, %v2987_v7  ;;  %vm4012_vm15 = vcmp.lt.s32.totalorder %v3500_v18, 5120 }
 0x595   : > { %v7065_v50 = vadd.f32 %v7064_v42, %v6553_v33  ;;  %v4518_v33 = vld [vmem:[%s8089_s18 + $0x448] sm:$0xff]  ;;  %v5031_v42 = vld [vmem:[%s8095_s20 + $0x450] sm:$0xff]  ;;  %v6564_v59 = vmul.f32 %v6052_v47, %v6052_v47  ;;  %v2992_v47 = vadd.s32 1192, %v9133_v3 }
 0x596   : > { %v5542_v46 = vsub.f32 %v4518_v33, %v5030_v34  ;;  %v6053_v55 = vsel %vm4005_vm8, %v5541_v38, 0.0  ;;  %v3502_v34 = vadd.s32 %v9137_v5, %v2988_v15  ;;  %vm4013_vm0 = vcmp.lt.s32.totalorder %v3501_v26, 5120 }
 0x597   : > { %v7066_v58 = vadd.f32 %v7065_v50, %v6554_v41  ;;  %v4519_v41 = vld [vmem:[%s8089_s18 + $0x450] sm:$0xff]  ;;  %v5032_v50 = vld [vmem:[%s8095_s20 + $0x458] sm:$0xff]  ;;  %v6565_v4 = vmul.f32 %v6053_v55, %v6053_v55  ;;  %v2993_v55 = vadd.s32 1200, %v9133_v3 }
 0x598   : > { %v5543_v54 = vsub.f32 %v4519_v41, %v5031_v42  ;;  %v6054_v63 = vsel %vm4006_vm9, %v5542_v46, 0.0  ;;  %v3503_v42 = vadd.s32 %v9137_v5, %v2989_v23  ;;  %vm4014_vm1 = vcmp.lt.s32.totalorder %v3502_v34, 5120 }
 0x599   : > { %v7067_v2 = vadd.f32 %v7066_v58, %v6555_v49  ;;  %v4520_v49 = vld [vmem:[%s8089_s18 + $0x458] sm:$0xff]  ;;  %v5033_v58 = vld [vmem:[%s8095_s20 + $0x460] sm:$0xff]  ;;  %v6566_v13 = vmul.f32 %v6054_v63, %v6054_v63  ;;  %v2994_v63 = vadd.s32 1208, %v9133_v3 }
 0x59a   : > { %v5544_v62 = vsub.f32 %v4520_v49, %v5032_v50  ;;  %v6055_v9 = vsel %vm4007_vm10, %v5543_v54, 0.0  ;;  %v3504_v50 = vadd.s32 %v9137_v5, %v2990_v31  ;;  %vm4015_vm2 = vcmp.lt.s32.totalorder %v3503_v42, 5120 }
 0x59b   : > { %v7068_v12 = vadd.f32 %v7067_v2, %v6556_v57  ;;  %v4521_v57 = vld [vmem:[%s8089_s18 + $0x460] sm:$0xff]  ;;  %v5034_v2 = vld [vmem:[%s8095_s20 + $0x468] sm:$0xff]  ;;  %v6567_v21 = vmul.f32 %v6055_v9, %v6055_v9  ;;  %v2995_v9 = vadd.s32 1216, %v9133_v3 }
 0x59c   : > { %v5545_v8 = vsub.f32 %v4521_v57, %v5033_v58  ;;  %v6056_v17 = vsel %vm4008_vm11, %v5544_v62, 0.0  ;;  %v3505_v58 = vadd.s32 %v9137_v5, %v2991_v39  ;;  %vm4016_vm3 = vcmp.lt.s32.totalorder %v3504_v50, 5120 }
 0x59d   : > { %v7069_v20 = vadd.f32 %v7068_v12, %v6557_v1  ;;  %v4522_v1 = vld [vmem:[%s8089_s18 + $0x468] sm:$0xff]  ;;  %v5035_v12 = vld [vmem:[%s8095_s20 + $0x470] sm:$0xff]  ;;  %v6568_v29 = vmul.f32 %v6056_v17, %v6056_v17  ;;  %v2996_v17 = vadd.s32 1224, %v9133_v3 }
 0x59e   : > { %v5546_v16 = vsub.f32 %v4522_v1, %v5034_v2  ;;  %v6057_v25 = vsel %vm4009_vm12, %v5545_v8, 0.0  ;;  %v3506_v2 = vadd.s32 %v9137_v5, %v2992_v47  ;;  %vm4017_vm4 = vcmp.lt.s32.totalorder %v3505_v58, 5120 }
 0x59f   : > { %v7070_v28 = vadd.f32 %v7069_v20, %v6558_v11  ;;  %v4523_v11 = vld [vmem:[%s8089_s18 + $0x470] sm:$0xff]  ;;  %v5036_v20 = vld [vmem:[%s8095_s20 + $0x478] sm:$0xff]  ;;  %v6569_v37 = vmul.f32 %v6057_v25, %v6057_v25  ;;  %v2997_v25 = vadd.s32 1232, %v9133_v3 }
 0x5a0   : > { %v5547_v24 = vsub.f32 %v4523_v11, %v5035_v12  ;;  %v6058_v33 = vsel %vm4010_vm13, %v5546_v16, 0.0  ;;  %v3507_v12 = vadd.s32 %v9137_v5, %v2993_v55  ;;  %vm4018_vm5 = vcmp.lt.s32.totalorder %v3506_v2, 5120 }
 0x5a1   : > { %v7071_v36 = vadd.f32 %v7070_v28, %v6559_v19  ;;  %v4524_v19 = vld [vmem:[%s8089_s18 + $0x478] sm:$0xff]  ;;  %v5037_v28 = vld [vmem:[%s8095_s20 + $0x480] sm:$0xff]  ;;  %v6570_v45 = vmul.f32 %v6058_v33, %v6058_v33  ;;  %v2998_v33 = vadd.s32 1240, %v9133_v3 }
 0x5a2   : > { %v5548_v32 = vsub.f32 %v4524_v19, %v5036_v20  ;;  %v6059_v41 = vsel %vm4011_vm14, %v5547_v24, 0.0  ;;  %v3508_v20 = vadd.s32 %v9137_v5, %v2994_v63  ;;  %vm4019_vm6 = vcmp.lt.s32.totalorder %v3507_v12, 5120 }
 0x5a3   : > { %v7072_v44 = vadd.f32 %v7071_v36, %v6560_v27  ;;  %v4525_v27 = vld [vmem:[%s8089_s18 + $0x480] sm:$0xff]  ;;  %v5038_v36 = vld [vmem:[%s8095_s20 + $0x488] sm:$0xff]  ;;  %v6571_v53 = vmul.f32 %v6059_v41, %v6059_v41  ;;  %v2999_v41 = vadd.s32 1248, %v9133_v3 }
 0x5a4   : > { %v5549_v40 = vsub.f32 %v4525_v27, %v5037_v28  ;;  %v6060_v49 = vsel %vm4012_vm15, %v5548_v32, 0.0  ;;  %v3509_v28 = vadd.s32 %v9137_v5, %v2995_v9  ;;  %vm4020_vm7 = vcmp.lt.s32.totalorder %v3508_v20, 5120 }
 0x5a5   : > { %v7073_v52 = vadd.f32 %v7072_v44, %v6561_v35  ;;  %v4526_v35 = vld [vmem:[%s8089_s18 + $0x488] sm:$0xff]  ;;  %v5039_v44 = vld [vmem:[%s8095_s20 + $0x490] sm:$0xff]  ;;  %v6572_v61 = vmul.f32 %v6060_v49, %v6060_v49  ;;  %v3000_v49 = vadd.s32 1256, %v9133_v3 }
 0x5a6   : > { %v5550_v48 = vsub.f32 %v4526_v35, %v5038_v36  ;;  %v6061_v57 = vsel %vm4013_vm0, %v5549_v40, 0.0  ;;  %v3510_v36 = vadd.s32 %v9137_v5, %v2996_v17  ;;  %vm4021_vm8 = vcmp.lt.s32.totalorder %v3509_v28, 5120 }
 0x5a7   : > { %v7074_v60 = vadd.f32 %v7073_v52, %v6562_v43  ;;  %v4527_v43 = vld [vmem:[%s8089_s18 + $0x490] sm:$0xff]  ;;  %v5040_v52 = vld [vmem:[%s8095_s20 + $0x498] sm:$0xff]  ;;  %v6573_v7 = vmul.f32 %v6061_v57, %v6061_v57  ;;  %v3001_v57 = vadd.s32 1264, %v9133_v3 }
 0x5a8   : > { %v5551_v56 = vsub.f32 %v4527_v43, %v5039_v44  ;;  %v6062_v1 = vsel %vm4014_vm1, %v5550_v48, 0.0  ;;  %v3511_v44 = vadd.s32 %v9137_v5, %v2997_v25  ;;  %vm4022_vm9 = vcmp.lt.s32.totalorder %v3510_v36, 5120 }
 0x5a9   : > { %v7075_v6 = vadd.f32 %v7074_v60, %v6563_v51  ;;  %v4528_v51 = vld [vmem:[%s8089_s18 + $0x498] sm:$0xff]  ;;  %v5041_v60 = vld [vmem:[%s8095_s20 + $0x4a0] sm:$0xff]  ;;  %v6574_v15 = vmul.f32 %v6062_v1, %v6062_v1  ;;  %v3002_v1 = vadd.s32 1272, %v9133_v3 }
 0x5aa   : > { %v5552_v0 = vsub.f32 %v4528_v51, %v5040_v52  ;;  %v6063_v11 = vsel %vm4015_vm2, %v5551_v56, 0.0  ;;  %v3512_v52 = vadd.s32 %v9137_v5, %v2998_v33  ;;  %vm4023_vm10 = vcmp.lt.s32.totalorder %v3511_v44, 5120 }
 0x5ab   : > { %v7076_v14 = vadd.f32 %v7075_v6, %v6564_v59  ;;  %v4529_v59 = vld [vmem:[%s8089_s18 + $0x4a0] sm:$0xff]  ;;  %v5042_v6 = vld [vmem:[%s8095_s20 + $0x4a8] sm:$0xff]  ;;  %v6575_v23 = vmul.f32 %v6063_v11, %v6063_v11  ;;  %v3003_v11 = vadd.s32 1280, %v9133_v3 }
 0x5ac   : > { %v5553_v10 = vsub.f32 %v4529_v59, %v5041_v60  ;;  %v6064_v19 = vsel %vm4016_vm3, %v5552_v0, 0.0  ;;  %v3513_v60 = vadd.s32 %v9137_v5, %v2999_v41  ;;  %vm4024_vm11 = vcmp.lt.s32.totalorder %v3512_v52, 5120 }
 0x5ad   : > { %v7077_v22 = vadd.f32 %v7076_v14, %v6565_v4  ;;  %v4530_v4 = vld [vmem:[%s8089_s18 + $0x4a8] sm:$0xff]  ;;  %v5043_v14 = vld [vmem:[%s8095_s20 + $0x4b0] sm:$0xff]  ;;  %v6576_v31 = vmul.f32 %v6064_v19, %v6064_v19  ;;  %v3004_v19 = vadd.s32 1288, %v9133_v3 }
 0x5ae   : > { %v5554_v18 = vsub.f32 %v4530_v4, %v5042_v6  ;;  %v6065_v27 = vsel %vm4017_vm4, %v5553_v10, 0.0  ;;  %v3514_v6 = vadd.s32 %v9137_v5, %v3000_v49  ;;  %vm4025_vm12 = vcmp.lt.s32.totalorder %v3513_v60, 5120 }
 0x5af   : > { %v7078_v30 = vadd.f32 %v7077_v22, %v6566_v13  ;;  %v4531_v13 = vld [vmem:[%s8089_s18 + $0x4b0] sm:$0xff]  ;;  %v5044_v22 = vld [vmem:[%s8095_s20 + $0x4b8] sm:$0xff]  ;;  %v6577_v39 = vmul.f32 %v6065_v27, %v6065_v27  ;;  %v3005_v27 = vadd.s32 1296, %v9133_v3 }
 0x5b0   : > { %v5555_v26 = vsub.f32 %v4531_v13, %v5043_v14  ;;  %v6066_v35 = vsel %vm4018_vm5, %v5554_v18, 0.0  ;;  %v3515_v14 = vadd.s32 %v9137_v5, %v3001_v57  ;;  %vm4026_vm13 = vcmp.lt.s32.totalorder %v3514_v6, 5120 }
 0x5b1   : > { %v7079_v38 = vadd.f32 %v7078_v30, %v6567_v21  ;;  %v4532_v21 = vld [vmem:[%s8089_s18 + $0x4b8] sm:$0xff]  ;;  %v5045_v30 = vld [vmem:[%s8095_s20 + $0x4c0] sm:$0xff]  ;;  %v6578_v47 = vmul.f32 %v6066_v35, %v6066_v35  ;;  %v3006_v35 = vadd.s32 1304, %v9133_v3 }
 0x5b2   : > { %v5556_v34 = vsub.f32 %v4532_v21, %v5044_v22  ;;  %v6067_v43 = vsel %vm4019_vm6, %v5555_v26, 0.0  ;;  %v3516_v22 = vadd.s32 %v9137_v5, %v3002_v1  ;;  %vm4027_vm14 = vcmp.lt.s32.totalorder %v3515_v14, 5120 }
 0x5b3   : > { %v7080_v46 = vadd.f32 %v7079_v38, %v6568_v29  ;;  %v4533_v29 = vld [vmem:[%s8089_s18 + $0x4c0] sm:$0xff]  ;;  %v5046_v38 = vld [vmem:[%s8095_s20 + $0x4c8] sm:$0xff]  ;;  %v6579_v55 = vmul.f32 %v6067_v43, %v6067_v43  ;;  %v3007_v43 = vadd.s32 1312, %v9133_v3 }
 0x5b4   : > { %v5557_v42 = vsub.f32 %v4533_v29, %v5045_v30  ;;  %v6068_v51 = vsel %vm4020_vm7, %v5556_v34, 0.0  ;;  %v3517_v30 = vadd.s32 %v9137_v5, %v3003_v11  ;;  %vm4028_vm15 = vcmp.lt.s32.totalorder %v3516_v22, 5120 }
 0x5b5   : > { %v7081_v54 = vadd.f32 %v7080_v46, %v6569_v37  ;;  %v4534_v37 = vld [vmem:[%s8089_s18 + $0x4c8] sm:$0xff]  ;;  %v5047_v46 = vld [vmem:[%s8095_s20 + $0x4d0] sm:$0xff]  ;;  %v6580_v63 = vmul.f32 %v6068_v51, %v6068_v51  ;;  %v3008_v51 = vadd.s32 1320, %v9133_v3 }
 0x5b6   : > { %v5558_v50 = vsub.f32 %v4534_v37, %v5046_v38  ;;  %v6069_v59 = vsel %vm4021_vm8, %v5557_v42, 0.0  ;;  %v3518_v38 = vadd.s32 %v9137_v5, %v3004_v19  ;;  %vm4029_vm0 = vcmp.lt.s32.totalorder %v3517_v30, 5120 }
 0x5b7   : > { %v7082_v62 = vadd.f32 %v7081_v54, %v6570_v45  ;;  %v4535_v45 = vld [vmem:[%s8089_s18 + $0x4d0] sm:$0xff]  ;;  %v5048_v54 = vld [vmem:[%s8095_s20 + $0x4d8] sm:$0xff]  ;;  %v6581_v9 = vmul.f32 %v6069_v59, %v6069_v59  ;;  %v3009_v59 = vadd.s32 1328, %v9133_v3 }
 0x5b8   : > { %v5559_v58 = vsub.f32 %v4535_v45, %v5047_v46  ;;  %v6070_v4 = vsel %vm4022_vm9, %v5558_v50, 0.0  ;;  %v3519_v46 = vadd.s32 %v9137_v5, %v3005_v27  ;;  %vm4030_vm1 = vcmp.lt.s32.totalorder %v3518_v38, 5120 }
 0x5b9   : > { %v7083_v8 = vadd.f32 %v7082_v62, %v6571_v53  ;;  %v4536_v53 = vld [vmem:[%s8089_s18 + $0x4d8] sm:$0xff]  ;;  %v5049_v62 = vld [vmem:[%s8095_s20 + $0x4e0] sm:$0xff]  ;;  %v6582_v17 = vmul.f32 %v6070_v4, %v6070_v4  ;;  %v3010_v4 = vadd.s32 1336, %v9133_v3 }
 0x5ba   : > { %v5560_v2 = vsub.f32 %v4536_v53, %v5048_v54  ;;  %v6071_v13 = vsel %vm4023_vm10, %v5559_v58, 0.0  ;;  %v3520_v54 = vadd.s32 %v9137_v5, %v3006_v35  ;;  %vm4031_vm2 = vcmp.lt.s32.totalorder %v3519_v46, 5120 }
 0x5bb   : > { %v7084_v16 = vadd.f32 %v7083_v8, %v6572_v61  ;;  %v4537_v61 = vld [vmem:[%s8089_s18 + $0x4e0] sm:$0xff]  ;;  %v5050_v8 = vld [vmem:[%s8095_s20 + $0x4e8] sm:$0xff]  ;;  %v6583_v25 = vmul.f32 %v6071_v13, %v6071_v13  ;;  %v3011_v13 = vadd.s32 1344, %v9133_v3 }
 0x5bc   : > { %v5561_v12 = vsub.f32 %v4537_v61, %v5049_v62  ;;  %v6072_v21 = vsel %vm4024_vm11, %v5560_v2, 0.0  ;;  %v3521_v62 = vadd.s32 %v9137_v5, %v3007_v43  ;;  %vm4032_vm3 = vcmp.lt.s32.totalorder %v3520_v54, 5120 }
 0x5bd   : > { %v7085_v24 = vadd.f32 %v7084_v16, %v6573_v7  ;;  %v4538_v7 = vld [vmem:[%s8089_s18 + $0x4e8] sm:$0xff]  ;;  %v5051_v16 = vld [vmem:[%s8095_s20 + $0x4f0] sm:$0xff]  ;;  %v6584_v33 = vmul.f32 %v6072_v21, %v6072_v21  ;;  %v3012_v21 = vadd.s32 1352, %v9133_v3 }
 0x5be   : > { %v5562_v20 = vsub.f32 %v4538_v7, %v5050_v8  ;;  %v6073_v29 = vsel %vm4025_vm12, %v5561_v12, 0.0  ;;  %v3522_v8 = vadd.s32 %v9137_v5, %v3008_v51  ;;  %vm4033_vm4 = vcmp.lt.s32.totalorder %v3521_v62, 5120 }
 0x5bf   : > { %v7086_v32 = vadd.f32 %v7085_v24, %v6574_v15  ;;  %v4539_v15 = vld [vmem:[%s8089_s18 + $0x4f0] sm:$0xff]  ;;  %v5052_v24 = vld [vmem:[%s8095_s20 + $0x4f8] sm:$0xff]  ;;  %v6585_v41 = vmul.f32 %v6073_v29, %v6073_v29  ;;  %v3013_v29 = vadd.s32 1360, %v9133_v3 }
 0x5c0   : > { %v5563_v28 = vsub.f32 %v4539_v15, %v5051_v16  ;;  %v6074_v37 = vsel %vm4026_vm13, %v5562_v20, 0.0  ;;  %v3523_v16 = vadd.s32 %v9137_v5, %v3009_v59  ;;  %vm4034_vm5 = vcmp.lt.s32.totalorder %v3522_v8, 5120 }
 0x5c1   : > { %v7087_v40 = vadd.f32 %v7086_v32, %v6575_v23  ;;  %v4540_v23 = vld [vmem:[%s8089_s18 + $0x4f8] sm:$0xff]  ;;  %v5053_v32 = vld [vmem:[%s8095_s20 + $0x500] sm:$0xff]  ;;  %v6586_v49 = vmul.f32 %v6074_v37, %v6074_v37  ;;  %v3014_v37 = vadd.s32 1368, %v9133_v3 }
 0x5c2   : > { %v5564_v36 = vsub.f32 %v4540_v23, %v5052_v24  ;;  %v6075_v45 = vsel %vm4027_vm14, %v5563_v28, 0.0  ;;  %v3524_v24 = vadd.s32 %v9137_v5, %v3010_v4  ;;  %vm4035_vm6 = vcmp.lt.s32.totalorder %v3523_v16, 5120 }
 0x5c3   : > { %v7088_v48 = vadd.f32 %v7087_v40, %v6576_v31  ;;  %v4541_v31 = vld [vmem:[%s8089_s18 + $0x500] sm:$0xff]  ;;  %v5054_v40 = vld [vmem:[%s8095_s20 + $0x508] sm:$0xff]  ;;  %v6587_v57 = vmul.f32 %v6075_v45, %v6075_v45  ;;  %v3015_v45 = vadd.s32 1376, %v9133_v3 }
 0x5c4   : > { %v5565_v44 = vsub.f32 %v4541_v31, %v5053_v32  ;;  %v6076_v53 = vsel %vm4028_vm15, %v5564_v36, 0.0  ;;  %v3525_v32 = vadd.s32 %v9137_v5, %v3011_v13  ;;  %vm4036_vm7 = vcmp.lt.s32.totalorder %v3524_v24, 5120 }
 0x5c5   : > { %v7089_v56 = vadd.f32 %v7088_v48, %v6577_v39  ;;  %v4542_v39 = vld [vmem:[%s8089_s18 + $0x508] sm:$0xff]  ;;  %v5055_v48 = vld [vmem:[%s8095_s20 + $0x510] sm:$0xff]  ;;  %v6588_v1 = vmul.f32 %v6076_v53, %v6076_v53  ;;  %v3016_v53 = vadd.s32 1384, %v9133_v3 }
 0x5c6   : > { %v5566_v52 = vsub.f32 %v4542_v39, %v5054_v40  ;;  %v6077_v61 = vsel %vm4029_vm0, %v5565_v44, 0.0  ;;  %v3526_v40 = vadd.s32 %v9137_v5, %v3012_v21  ;;  %vm4037_vm8 = vcmp.lt.s32.totalorder %v3525_v32, 5120 }
 0x5c7   : > { %v7090_v0 = vadd.f32 %v7089_v56, %v6578_v47  ;;  %v4543_v47 = vld [vmem:[%s8089_s18 + $0x510] sm:$0xff]  ;;  %v5056_v56 = vld [vmem:[%s8095_s20 + $0x518] sm:$0xff]  ;;  %v6589_v11 = vmul.f32 %v6077_v61, %v6077_v61  ;;  %v3017_v61 = vadd.s32 1392, %v9133_v3 }
 0x5c8   : > { %v5567_v60 = vsub.f32 %v4543_v47, %v5055_v48  ;;  %v6078_v7 = vsel %vm4030_vm1, %v5566_v52, 0.0  ;;  %v3527_v48 = vadd.s32 %v9137_v5, %v3013_v29  ;;  %vm4038_vm9 = vcmp.lt.s32.totalorder %v3526_v40, 5120 }
 0x5c9   : > { %v7091_v10 = vadd.f32 %v7090_v0, %v6579_v55  ;;  %v4544_v55 = vld [vmem:[%s8089_s18 + $0x518] sm:$0xff]  ;;  %v5057_v0 = vld [vmem:[%s8095_s20 + $0x520] sm:$0xff]  ;;  %v6590_v19 = vmul.f32 %v6078_v7, %v6078_v7  ;;  %v3018_v7 = vadd.s32 1400, %v9133_v3 }
 0x5ca   : > { %v5568_v6 = vsub.f32 %v4544_v55, %v5056_v56  ;;  %v6079_v15 = vsel %vm4031_vm2, %v5567_v60, 0.0  ;;  %v3528_v56 = vadd.s32 %v9137_v5, %v3014_v37  ;;  %vm4039_vm10 = vcmp.lt.s32.totalorder %v3527_v48, 5120 }
 0x5cb   : > { %v7092_v18 = vadd.f32 %v7091_v10, %v6580_v63  ;;  %v4545_v63 = vld [vmem:[%s8089_s18 + $0x520] sm:$0xff]  ;;  %v5058_v10 = vld [vmem:[%s8095_s20 + $0x528] sm:$0xff]  ;;  %v6591_v27 = vmul.f32 %v6079_v15, %v6079_v15  ;;  %v3019_v15 = vadd.s32 1408, %v9133_v3 }
 0x5cc   : > { %v5569_v14 = vsub.f32 %v4545_v63, %v5057_v0  ;;  %v6080_v23 = vsel %vm4032_vm3, %v5568_v6, 0.0  ;;  %v3529_v0 = vadd.s32 %v9137_v5, %v3015_v45  ;;  %vm4040_vm11 = vcmp.lt.s32.totalorder %v3528_v56, 5120 }
 0x5cd   : > { %v7093_v26 = vadd.f32 %v7092_v18, %v6581_v9  ;;  %v4546_v9 = vld [vmem:[%s8089_s18 + $0x528] sm:$0xff]  ;;  %v5059_v18 = vld [vmem:[%s8095_s20 + $0x530] sm:$0xff]  ;;  %v6592_v35 = vmul.f32 %v6080_v23, %v6080_v23  ;;  %v3020_v23 = vadd.s32 1416, %v9133_v3 }
 0x5ce   : > { %v5570_v22 = vsub.f32 %v4546_v9, %v5058_v10  ;;  %v6081_v31 = vsel %vm4033_vm4, %v5569_v14, 0.0  ;;  %v3530_v10 = vadd.s32 %v9137_v5, %v3016_v53  ;;  %vm4041_vm12 = vcmp.lt.s32.totalorder %v3529_v0, 5120 }
 0x5cf   : > { %v7094_v34 = vadd.f32 %v7093_v26, %v6582_v17  ;;  %v4547_v17 = vld [vmem:[%s8089_s18 + $0x530] sm:$0xff]  ;;  %v5060_v26 = vld [vmem:[%s8095_s20 + $0x538] sm:$0xff]  ;;  %v6593_v43 = vmul.f32 %v6081_v31, %v6081_v31  ;;  %v3021_v31 = vadd.s32 1424, %v9133_v3 }
 0x5d0   : > { %v5571_v30 = vsub.f32 %v4547_v17, %v5059_v18  ;;  %v6082_v39 = vsel %vm4034_vm5, %v5570_v22, 0.0  ;;  %v3531_v18 = vadd.s32 %v9137_v5, %v3017_v61  ;;  %vm4042_vm13 = vcmp.lt.s32.totalorder %v3530_v10, 5120 }
 0x5d1   : > { %v7095_v42 = vadd.f32 %v7094_v34, %v6583_v25  ;;  %v4548_v25 = vld [vmem:[%s8089_s18 + $0x538] sm:$0xff]  ;;  %v5061_v34 = vld [vmem:[%s8095_s20 + $0x540] sm:$0xff]  ;;  %v6594_v51 = vmul.f32 %v6082_v39, %v6082_v39  ;;  %v3022_v39 = vadd.s32 1432, %v9133_v3 }
 0x5d2   : > { %v5572_v38 = vsub.f32 %v4548_v25, %v5060_v26  ;;  %v6083_v47 = vsel %vm4035_vm6, %v5571_v30, 0.0  ;;  %v3532_v26 = vadd.s32 %v9137_v5, %v3018_v7  ;;  %vm4043_vm14 = vcmp.lt.s32.totalorder %v3531_v18, 5120 }
 0x5d3   : > { %v7096_v50 = vadd.f32 %v7095_v42, %v6584_v33  ;;  %v4549_v33 = vld [vmem:[%s8089_s18 + $0x540] sm:$0xff]  ;;  %v5062_v42 = vld [vmem:[%s8095_s20 + $0x548] sm:$0xff]  ;;  %v6595_v59 = vmul.f32 %v6083_v47, %v6083_v47  ;;  %v3023_v47 = vadd.s32 1440, %v9133_v3 }
 0x5d4   : > { %v5573_v46 = vsub.f32 %v4549_v33, %v5061_v34  ;;  %v6084_v55 = vsel %vm4036_vm7, %v5572_v38, 0.0  ;;  %v3533_v34 = vadd.s32 %v9137_v5, %v3019_v15  ;;  %vm4044_vm15 = vcmp.lt.s32.totalorder %v3532_v26, 5120 }
 0x5d5   : > { %v7097_v58 = vadd.f32 %v7096_v50, %v6585_v41  ;;  %v4550_v41 = vld [vmem:[%s8089_s18 + $0x548] sm:$0xff]  ;;  %v5063_v50 = vld [vmem:[%s8095_s20 + $0x550] sm:$0xff]  ;;  %v6596_v4 = vmul.f32 %v6084_v55, %v6084_v55  ;;  %v3024_v55 = vadd.s32 1448, %v9133_v3 }
 0x5d6   : > { %v5574_v54 = vsub.f32 %v4550_v41, %v5062_v42  ;;  %v6085_v63 = vsel %vm4037_vm8, %v5573_v46, 0.0  ;;  %v3534_v42 = vadd.s32 %v9137_v5, %v3020_v23  ;;  %vm4045_vm0 = vcmp.lt.s32.totalorder %v3533_v34, 5120 }
 0x5d7   : > { %v7098_v2 = vadd.f32 %v7097_v58, %v6586_v49  ;;  %v4551_v49 = vld [vmem:[%s8089_s18 + $0x550] sm:$0xff]  ;;  %v5064_v58 = vld [vmem:[%s8095_s20 + $0x558] sm:$0xff]  ;;  %v6597_v13 = vmul.f32 %v6085_v63, %v6085_v63  ;;  %v3025_v63 = vadd.s32 1456, %v9133_v3 }
 0x5d8   : > { %v5575_v62 = vsub.f32 %v4551_v49, %v5063_v50  ;;  %v6086_v9 = vsel %vm4038_vm9, %v5574_v54, 0.0  ;;  %v3535_v50 = vadd.s32 %v9137_v5, %v3021_v31  ;;  %vm4046_vm1 = vcmp.lt.s32.totalorder %v3534_v42, 5120 }
 0x5d9   : > { %v7099_v12 = vadd.f32 %v7098_v2, %v6587_v57  ;;  %v4552_v57 = vld [vmem:[%s8089_s18 + $0x558] sm:$0xff]  ;;  %v5065_v2 = vld [vmem:[%s8095_s20 + $0x560] sm:$0xff]  ;;  %v6598_v21 = vmul.f32 %v6086_v9, %v6086_v9  ;;  %v3026_v9 = vadd.s32 1464, %v9133_v3 }
 0x5da   : > { %v5576_v8 = vsub.f32 %v4552_v57, %v5064_v58  ;;  %v6087_v17 = vsel %vm4039_vm10, %v5575_v62, 0.0  ;;  %v3536_v58 = vadd.s32 %v9137_v5, %v3022_v39  ;;  %vm4047_vm2 = vcmp.lt.s32.totalorder %v3535_v50, 5120 }
 0x5db   : > { %v7100_v20 = vadd.f32 %v7099_v12, %v6588_v1  ;;  %v4553_v1 = vld [vmem:[%s8089_s18 + $0x560] sm:$0xff]  ;;  %v5066_v12 = vld [vmem:[%s8095_s20 + $0x568] sm:$0xff]  ;;  %v6599_v29 = vmul.f32 %v6087_v17, %v6087_v17  ;;  %v3027_v17 = vadd.s32 1472, %v9133_v3 }
 0x5dc   : > { %v5577_v16 = vsub.f32 %v4553_v1, %v5065_v2  ;;  %v6088_v25 = vsel %vm4040_vm11, %v5576_v8, 0.0  ;;  %v3537_v2 = vadd.s32 %v9137_v5, %v3023_v47  ;;  %vm4048_vm3 = vcmp.lt.s32.totalorder %v3536_v58, 5120 }
 0x5dd   : > { %v7101_v28 = vadd.f32 %v7100_v20, %v6589_v11  ;;  %v4554_v11 = vld [vmem:[%s8089_s18 + $0x568] sm:$0xff]  ;;  %v5067_v20 = vld [vmem:[%s8095_s20 + $0x570] sm:$0xff]  ;;  %v6600_v37 = vmul.f32 %v6088_v25, %v6088_v25  ;;  %v3028_v25 = vadd.s32 1480, %v9133_v3 }
 0x5de   : > { %v5578_v24 = vsub.f32 %v4554_v11, %v5066_v12  ;;  %v6089_v33 = vsel %vm4041_vm12, %v5577_v16, 0.0  ;;  %v3538_v12 = vadd.s32 %v9137_v5, %v3024_v55  ;;  %vm4049_vm4 = vcmp.lt.s32.totalorder %v3537_v2, 5120 }
 0x5df   : > { %v7102_v36 = vadd.f32 %v7101_v28, %v6590_v19  ;;  %v4555_v19 = vld [vmem:[%s8089_s18 + $0x570] sm:$0xff]  ;;  %v5068_v28 = vld [vmem:[%s8095_s20 + $0x578] sm:$0xff]  ;;  %v6601_v45 = vmul.f32 %v6089_v33, %v6089_v33  ;;  %v3029_v33 = vadd.s32 1488, %v9133_v3 }
 0x5e0   : > { %v5579_v32 = vsub.f32 %v4555_v19, %v5067_v20  ;;  %v6090_v41 = vsel %vm4042_vm13, %v5578_v24, 0.0  ;;  %v3539_v20 = vadd.s32 %v9137_v5, %v3025_v63  ;;  %vm4050_vm5 = vcmp.lt.s32.totalorder %v3538_v12, 5120 }
 0x5e1   : > { %v7103_v44 = vadd.f32 %v7102_v36, %v6591_v27  ;;  %v4556_v27 = vld [vmem:[%s8089_s18 + $0x578] sm:$0xff]  ;;  %v5069_v36 = vld [vmem:[%s8095_s20 + $0x580] sm:$0xff]  ;;  %v6602_v53 = vmul.f32 %v6090_v41, %v6090_v41  ;;  %v3030_v41 = vadd.s32 1496, %v9133_v3 }
 0x5e2   : > { %v5580_v40 = vsub.f32 %v4556_v27, %v5068_v28  ;;  %v6091_v49 = vsel %vm4043_vm14, %v5579_v32, 0.0  ;;  %v3540_v28 = vadd.s32 %v9137_v5, %v3026_v9  ;;  %vm4051_vm6 = vcmp.lt.s32.totalorder %v3539_v20, 5120 }
 0x5e3   : > { %v7104_v52 = vadd.f32 %v7103_v44, %v6592_v35  ;;  %v4557_v35 = vld [vmem:[%s8089_s18 + $0x580] sm:$0xff]  ;;  %v5070_v44 = vld [vmem:[%s8095_s20 + $0x588] sm:$0xff]  ;;  %v6603_v61 = vmul.f32 %v6091_v49, %v6091_v49  ;;  %v3031_v49 = vadd.s32 1504, %v9133_v3 }
 0x5e4   : > { %v5581_v48 = vsub.f32 %v4557_v35, %v5069_v36  ;;  %v6092_v57 = vsel %vm4044_vm15, %v5580_v40, 0.0  ;;  %v3541_v36 = vadd.s32 %v9137_v5, %v3027_v17  ;;  %vm4052_vm7 = vcmp.lt.s32.totalorder %v3540_v28, 5120 }
 0x5e5   : > { %v7105_v60 = vadd.f32 %v7104_v52, %v6593_v43  ;;  %v4558_v43 = vld [vmem:[%s8089_s18 + $0x588] sm:$0xff]  ;;  %v5071_v52 = vld [vmem:[%s8095_s20 + $0x590] sm:$0xff]  ;;  %v6604_v7 = vmul.f32 %v6092_v57, %v6092_v57  ;;  %v3032_v57 = vadd.s32 1512, %v9133_v3 }
 0x5e6   : > { %v5582_v56 = vsub.f32 %v4558_v43, %v5070_v44  ;;  %v6093_v1 = vsel %vm4045_vm0, %v5581_v48, 0.0  ;;  %v3542_v44 = vadd.s32 %v9137_v5, %v3028_v25  ;;  %vm4053_vm8 = vcmp.lt.s32.totalorder %v3541_v36, 5120 }
 0x5e7   : > { %v7106_v6 = vadd.f32 %v7105_v60, %v6594_v51  ;;  %v4559_v51 = vld [vmem:[%s8089_s18 + $0x590] sm:$0xff]  ;;  %v5072_v60 = vld [vmem:[%s8095_s20 + $0x598] sm:$0xff]  ;;  %v6605_v15 = vmul.f32 %v6093_v1, %v6093_v1  ;;  %v3033_v1 = vadd.s32 1520, %v9133_v3 }
 0x5e8   : > { %v5583_v0 = vsub.f32 %v4559_v51, %v5071_v52  ;;  %v6094_v11 = vsel %vm4046_vm1, %v5582_v56, 0.0  ;;  %v3543_v52 = vadd.s32 %v9137_v5, %v3029_v33  ;;  %vm4054_vm9 = vcmp.lt.s32.totalorder %v3542_v44, 5120 }
 0x5e9   : > { %v7107_v14 = vadd.f32 %v7106_v6, %v6595_v59  ;;  %v4560_v59 = vld [vmem:[%s8089_s18 + $0x598] sm:$0xff]  ;;  %v5073_v6 = vld [vmem:[%s8095_s20 + $0x5a0] sm:$0xff]  ;;  %v6606_v23 = vmul.f32 %v6094_v11, %v6094_v11  ;;  %v3034_v11 = vadd.s32 1528, %v9133_v3 }
 0x5ea   : > { %v5584_v10 = vsub.f32 %v4560_v59, %v5072_v60  ;;  %v6095_v19 = vsel %vm4047_vm2, %v5583_v0, 0.0  ;;  %v3544_v60 = vadd.s32 %v9137_v5, %v3030_v41  ;;  %vm4055_vm10 = vcmp.lt.s32.totalorder %v3543_v52, 5120 }
 0x5eb   : > { %v7108_v22 = vadd.f32 %v7107_v14, %v6596_v4  ;;  %v4561_v4 = vld [vmem:[%s8089_s18 + $0x5a0] sm:$0xff]  ;;  %v5074_v14 = vld [vmem:[%s8095_s20 + $0x5a8] sm:$0xff]  ;;  %v6607_v31 = vmul.f32 %v6095_v19, %v6095_v19  ;;  %v3035_v19 = vadd.s32 1536, %v9133_v3 }
 0x5ec   : > { %v5585_v18 = vsub.f32 %v4561_v4, %v5073_v6  ;;  %v6096_v27 = vsel %vm4048_vm3, %v5584_v10, 0.0  ;;  %v3545_v6 = vadd.s32 %v9137_v5, %v3031_v49  ;;  %vm4056_vm11 = vcmp.lt.s32.totalorder %v3544_v60, 5120 }
 0x5ed   : > { %v7109_v30 = vadd.f32 %v7108_v22, %v6597_v13  ;;  %v4562_v13 = vld [vmem:[%s8089_s18 + $0x5a8] sm:$0xff]  ;;  %v5075_v22 = vld [vmem:[%s8095_s20 + $0x5b0] sm:$0xff]  ;;  %v6608_v39 = vmul.f32 %v6096_v27, %v6096_v27  ;;  %v3036_v27 = vadd.s32 1544, %v9133_v3 }
 0x5ee   : > { %v5586_v26 = vsub.f32 %v4562_v13, %v5074_v14  ;;  %v6097_v35 = vsel %vm4049_vm4, %v5585_v18, 0.0  ;;  %v3546_v14 = vadd.s32 %v9137_v5, %v3032_v57  ;;  %vm4057_vm12 = vcmp.lt.s32.totalorder %v3545_v6, 5120 }
 0x5ef   : > { %v7110_v38 = vadd.f32 %v7109_v30, %v6598_v21  ;;  %v4563_v21 = vld [vmem:[%s8089_s18 + $0x5b0] sm:$0xff]  ;;  %v5076_v30 = vld [vmem:[%s8095_s20 + $0x5b8] sm:$0xff]  ;;  %v6609_v47 = vmul.f32 %v6097_v35, %v6097_v35  ;;  %v3037_v35 = vadd.s32 1552, %v9133_v3 }
 0x5f0   : > { %v5587_v34 = vsub.f32 %v4563_v21, %v5075_v22  ;;  %v6098_v43 = vsel %vm4050_vm5, %v5586_v26, 0.0  ;;  %v3547_v22 = vadd.s32 %v9137_v5, %v3033_v1  ;;  %vm4058_vm13 = vcmp.lt.s32.totalorder %v3546_v14, 5120 }
 0x5f1   : > { %v7111_v46 = vadd.f32 %v7110_v38, %v6599_v29  ;;  %v4564_v29 = vld [vmem:[%s8089_s18 + $0x5b8] sm:$0xff]  ;;  %v5077_v38 = vld [vmem:[%s8095_s20 + $0x5c0] sm:$0xff]  ;;  %v6610_v55 = vmul.f32 %v6098_v43, %v6098_v43  ;;  %v3038_v43 = vadd.s32 1560, %v9133_v3 }
 0x5f2   : > { %v5588_v42 = vsub.f32 %v4564_v29, %v5076_v30  ;;  %v6099_v51 = vsel %vm4051_vm6, %v5587_v34, 0.0  ;;  %v3548_v30 = vadd.s32 %v9137_v5, %v3034_v11  ;;  %vm4059_vm14 = vcmp.lt.s32.totalorder %v3547_v22, 5120 }
 0x5f3   : > { %v7112_v54 = vadd.f32 %v7111_v46, %v6600_v37  ;;  %v4565_v37 = vld [vmem:[%s8089_s18 + $0x5c0] sm:$0xff]  ;;  %v5078_v46 = vld [vmem:[%s8095_s20 + $0x5c8] sm:$0xff]  ;;  %v6611_v63 = vmul.f32 %v6099_v51, %v6099_v51  ;;  %v3039_v51 = vadd.s32 1568, %v9133_v3 }
 0x5f4   : > { %v5589_v50 = vsub.f32 %v4565_v37, %v5077_v38  ;;  %v6100_v59 = vsel %vm4052_vm7, %v5588_v42, 0.0  ;;  %v3549_v38 = vadd.s32 %v9137_v5, %v3035_v19  ;;  %vm4060_vm15 = vcmp.lt.s32.totalorder %v3548_v30, 5120 }
 0x5f5   : > { %v7113_v62 = vadd.f32 %v7112_v54, %v6601_v45  ;;  %v4566_v45 = vld [vmem:[%s8089_s18 + $0x5c8] sm:$0xff]  ;;  %v5079_v54 = vld [vmem:[%s8095_s20 + $0x5d0] sm:$0xff]  ;;  %v6612_v9 = vmul.f32 %v6100_v59, %v6100_v59  ;;  %v3040_v59 = vadd.s32 1576, %v9133_v3 }
 0x5f6   : > { %v5590_v58 = vsub.f32 %v4566_v45, %v5078_v46  ;;  %v6101_v4 = vsel %vm4053_vm8, %v5589_v50, 0.0  ;;  %v3550_v46 = vadd.s32 %v9137_v5, %v3036_v27  ;;  %vm4061_vm0 = vcmp.lt.s32.totalorder %v3549_v38, 5120 }
 0x5f7   : > { %v7114_v8 = vadd.f32 %v7113_v62, %v6602_v53  ;;  %v4567_v53 = vld [vmem:[%s8089_s18 + $0x5d0] sm:$0xff]  ;;  %v5080_v62 = vld [vmem:[%s8095_s20 + $0x5d8] sm:$0xff]  ;;  %v6613_v17 = vmul.f32 %v6101_v4, %v6101_v4  ;;  %v3041_v4 = vadd.s32 1584, %v9133_v3 }
 0x5f8   : > { %v5591_v2 = vsub.f32 %v4567_v53, %v5079_v54  ;;  %v6102_v13 = vsel %vm4054_vm9, %v5590_v58, 0.0  ;;  %v3551_v54 = vadd.s32 %v9137_v5, %v3037_v35  ;;  %vm4062_vm1 = vcmp.lt.s32.totalorder %v3550_v46, 5120 }
 0x5f9   : > { %v7115_v16 = vadd.f32 %v7114_v8, %v6603_v61  ;;  %v4568_v61 = vld [vmem:[%s8089_s18 + $0x5d8] sm:$0xff]  ;;  %v5081_v8 = vld [vmem:[%s8095_s20 + $0x5e0] sm:$0xff]  ;;  %v6614_v25 = vmul.f32 %v6102_v13, %v6102_v13  ;;  %v3042_v13 = vadd.s32 1592, %v9133_v3 }
 0x5fa   : > { %v5592_v12 = vsub.f32 %v4568_v61, %v5080_v62  ;;  %v6103_v21 = vsel %vm4055_vm10, %v5591_v2, 0.0  ;;  %v3552_v62 = vadd.s32 %v9137_v5, %v3038_v43  ;;  %vm4063_vm2 = vcmp.lt.s32.totalorder %v3551_v54, 5120 }
 0x5fb   : > { %v7116_v24 = vadd.f32 %v7115_v16, %v6604_v7  ;;  %v4569_v7 = vld [vmem:[%s8089_s18 + $0x5e0] sm:$0xff]  ;;  %v5082_v16 = vld [vmem:[%s8095_s20 + $0x5e8] sm:$0xff]  ;;  %v6615_v33 = vmul.f32 %v6103_v21, %v6103_v21  ;;  %v3043_v21 = vadd.s32 1600, %v9133_v3 }
 0x5fc   : > { %v5593_v20 = vsub.f32 %v4569_v7, %v5081_v8  ;;  %v6104_v29 = vsel %vm4056_vm11, %v5592_v12, 0.0  ;;  %v3553_v8 = vadd.s32 %v9137_v5, %v3039_v51  ;;  %vm4064_vm3 = vcmp.lt.s32.totalorder %v3552_v62, 5120 }
 0x5fd   : > { %v7117_v32 = vadd.f32 %v7116_v24, %v6605_v15  ;;  %v4570_v15 = vld [vmem:[%s8089_s18 + $0x5e8] sm:$0xff]  ;;  %v5083_v24 = vld [vmem:[%s8095_s20 + $0x5f0] sm:$0xff]  ;;  %v6616_v41 = vmul.f32 %v6104_v29, %v6104_v29  ;;  %v3044_v29 = vadd.s32 1608, %v9133_v3 }
 0x5fe   : > { %v5594_v28 = vsub.f32 %v4570_v15, %v5082_v16  ;;  %v6105_v37 = vsel %vm4057_vm12, %v5593_v20, 0.0  ;;  %v3554_v16 = vadd.s32 %v9137_v5, %v3040_v59  ;;  %vm4065_vm4 = vcmp.lt.s32.totalorder %v3553_v8, 5120 }
 0x5ff   : > { %v7118_v40 = vadd.f32 %v7117_v32, %v6606_v23  ;;  %v4571_v23 = vld [vmem:[%s8089_s18 + $0x5f0] sm:$0xff]  ;;  %v5084_v32 = vld [vmem:[%s8095_s20 + $0x5f8] sm:$0xff]  ;;  %v6617_v49 = vmul.f32 %v6105_v37, %v6105_v37  ;;  %v3045_v37 = vadd.s32 1616, %v9133_v3 }
 0x600   : > { %v5595_v36 = vsub.f32 %v4571_v23, %v5083_v24  ;;  %v6106_v45 = vsel %vm4058_vm13, %v5594_v28, 0.0  ;;  %v3555_v24 = vadd.s32 %v9137_v5, %v3041_v4  ;;  %vm4066_vm5 = vcmp.lt.s32.totalorder %v3554_v16, 5120 }
 0x601   : > { %v7119_v48 = vadd.f32 %v7118_v40, %v6607_v31  ;;  %v4572_v31 = vld [vmem:[%s8089_s18 + $0x5f8] sm:$0xff]  ;;  %v5085_v40 = vld [vmem:[%s8095_s20 + $0x600] sm:$0xff]  ;;  %v6618_v57 = vmul.f32 %v6106_v45, %v6106_v45  ;;  %v3046_v45 = vadd.s32 1624, %v9133_v3 }
 0x602   : > { %v5596_v44 = vsub.f32 %v4572_v31, %v5084_v32  ;;  %v6107_v53 = vsel %vm4059_vm14, %v5595_v36, 0.0  ;;  %v3556_v32 = vadd.s32 %v9137_v5, %v3042_v13  ;;  %vm4067_vm6 = vcmp.lt.s32.totalorder %v3555_v24, 5120 }
 0x603   : > { %v7120_v56 = vadd.f32 %v7119_v48, %v6608_v39  ;;  %v4573_v39 = vld [vmem:[%s8089_s18 + $0x600] sm:$0xff]  ;;  %v5086_v48 = vld [vmem:[%s8095_s20 + $0x608] sm:$0xff]  ;;  %v6619_v1 = vmul.f32 %v6107_v53, %v6107_v53  ;;  %v3047_v53 = vadd.s32 1632, %v9133_v3 }
 0x604   : > { %v5597_v52 = vsub.f32 %v4573_v39, %v5085_v40  ;;  %v6108_v61 = vsel %vm4060_vm15, %v5596_v44, 0.0  ;;  %v3557_v40 = vadd.s32 %v9137_v5, %v3043_v21  ;;  %vm4068_vm7 = vcmp.lt.s32.totalorder %v3556_v32, 5120 }
 0x605   : > { %v7121_v0 = vadd.f32 %v7120_v56, %v6609_v47  ;;  %v4574_v47 = vld [vmem:[%s8089_s18 + $0x608] sm:$0xff]  ;;  %v5087_v56 = vld [vmem:[%s8095_s20 + $0x610] sm:$0xff]  ;;  %v6620_v11 = vmul.f32 %v6108_v61, %v6108_v61  ;;  %v3048_v61 = vadd.s32 1640, %v9133_v3 }
 0x606   : > { %v5598_v60 = vsub.f32 %v4574_v47, %v5086_v48  ;;  %v6109_v7 = vsel %vm4061_vm0, %v5597_v52, 0.0  ;;  %v3558_v48 = vadd.s32 %v9137_v5, %v3044_v29  ;;  %vm4069_vm8 = vcmp.lt.s32.totalorder %v3557_v40, 5120 }
 0x607   : > { %v7122_v10 = vadd.f32 %v7121_v0, %v6610_v55  ;;  %v4575_v55 = vld [vmem:[%s8089_s18 + $0x610] sm:$0xff]  ;;  %v5088_v0 = vld [vmem:[%s8095_s20 + $0x618] sm:$0xff]  ;;  %v6621_v19 = vmul.f32 %v6109_v7, %v6109_v7  ;;  %v3049_v7 = vadd.s32 1648, %v9133_v3 }
 0x608   : > { %v5599_v6 = vsub.f32 %v4575_v55, %v5087_v56  ;;  %v6110_v15 = vsel %vm4062_vm1, %v5598_v60, 0.0  ;;  %v3559_v56 = vadd.s32 %v9137_v5, %v3045_v37  ;;  %vm4070_vm9 = vcmp.lt.s32.totalorder %v3558_v48, 5120 }
 0x609   : > { %v7123_v18 = vadd.f32 %v7122_v10, %v6611_v63  ;;  %v4576_v63 = vld [vmem:[%s8089_s18 + $0x618] sm:$0xff]  ;;  %v5089_v10 = vld [vmem:[%s8095_s20 + $0x620] sm:$0xff]  ;;  %v6622_v27 = vmul.f32 %v6110_v15, %v6110_v15  ;;  %v3050_v15 = vadd.s32 1656, %v9133_v3 }
 0x60a   : > { %v5600_v14 = vsub.f32 %v4576_v63, %v5088_v0  ;;  %v6111_v23 = vsel %vm4063_vm2, %v5599_v6, 0.0  ;;  %v3560_v0 = vadd.s32 %v9137_v5, %v3046_v45  ;;  %vm4071_vm10 = vcmp.lt.s32.totalorder %v3559_v56, 5120 }
 0x60b   : > { %v7124_v26 = vadd.f32 %v7123_v18, %v6612_v9  ;;  %v4577_v9 = vld [vmem:[%s8089_s18 + $0x620] sm:$0xff]  ;;  %v5090_v18 = vld [vmem:[%s8095_s20 + $0x628] sm:$0xff]  ;;  %v6623_v35 = vmul.f32 %v6111_v23, %v6111_v23  ;;  %v3051_v23 = vadd.s32 1664, %v9133_v3 }
 0x60c   : > { %v5601_v22 = vsub.f32 %v4577_v9, %v5089_v10  ;;  %v6112_v31 = vsel %vm4064_vm3, %v5600_v14, 0.0  ;;  %v3561_v10 = vadd.s32 %v9137_v5, %v3047_v53  ;;  %vm4072_vm11 = vcmp.lt.s32.totalorder %v3560_v0, 5120 }
 0x60d   : > { %v7125_v34 = vadd.f32 %v7124_v26, %v6613_v17  ;;  %v4578_v17 = vld [vmem:[%s8089_s18 + $0x628] sm:$0xff]  ;;  %v5091_v26 = vld [vmem:[%s8095_s20 + $0x630] sm:$0xff]  ;;  %v6624_v43 = vmul.f32 %v6112_v31, %v6112_v31  ;;  %v3052_v31 = vadd.s32 1672, %v9133_v3 }
 0x60e   : > { %v5602_v30 = vsub.f32 %v4578_v17, %v5090_v18  ;;  %v6113_v39 = vsel %vm4065_vm4, %v5601_v22, 0.0  ;;  %v3562_v18 = vadd.s32 %v9137_v5, %v3048_v61  ;;  %vm4073_vm12 = vcmp.lt.s32.totalorder %v3561_v10, 5120 }
 0x60f   : > { %v7126_v42 = vadd.f32 %v7125_v34, %v6614_v25  ;;  %v4579_v25 = vld [vmem:[%s8089_s18 + $0x630] sm:$0xff]  ;;  %v5092_v34 = vld [vmem:[%s8095_s20 + $0x638] sm:$0xff]  ;;  %v6625_v51 = vmul.f32 %v6113_v39, %v6113_v39  ;;  %v3053_v39 = vadd.s32 1680, %v9133_v3 }
 0x610   : > { %v5603_v38 = vsub.f32 %v4579_v25, %v5091_v26  ;;  %v6114_v47 = vsel %vm4066_vm5, %v5602_v30, 0.0  ;;  %v3563_v26 = vadd.s32 %v9137_v5, %v3049_v7  ;;  %vm4074_vm13 = vcmp.lt.s32.totalorder %v3562_v18, 5120 }
 0x611   : > { %v7127_v50 = vadd.f32 %v7126_v42, %v6615_v33  ;;  %v4580_v33 = vld [vmem:[%s8089_s18 + $0x638] sm:$0xff]  ;;  %v5093_v42 = vld [vmem:[%s8095_s20 + $0x640] sm:$0xff]  ;;  %v6626_v59 = vmul.f32 %v6114_v47, %v6114_v47  ;;  %v3054_v47 = vadd.s32 1688, %v9133_v3 }
 0x612   : > { %v5604_v46 = vsub.f32 %v4580_v33, %v5092_v34  ;;  %v6115_v55 = vsel %vm4067_vm6, %v5603_v38, 0.0  ;;  %v3564_v34 = vadd.s32 %v9137_v5, %v3050_v15  ;;  %vm4075_vm14 = vcmp.lt.s32.totalorder %v3563_v26, 5120 }
 0x613   : > { %v7128_v58 = vadd.f32 %v7127_v50, %v6616_v41  ;;  %v4581_v41 = vld [vmem:[%s8089_s18 + $0x640] sm:$0xff]  ;;  %v5094_v50 = vld [vmem:[%s8095_s20 + $0x648] sm:$0xff]  ;;  %v6627_v4 = vmul.f32 %v6115_v55, %v6115_v55  ;;  %v3055_v55 = vadd.s32 1696, %v9133_v3 }
 0x614   : > { %v5605_v54 = vsub.f32 %v4581_v41, %v5093_v42  ;;  %v6116_v63 = vsel %vm4068_vm7, %v5604_v46, 0.0  ;;  %v3565_v42 = vadd.s32 %v9137_v5, %v3051_v23  ;;  %vm4076_vm15 = vcmp.lt.s32.totalorder %v3564_v34, 5120 }
 0x615   : > { %v7129_v2 = vadd.f32 %v7128_v58, %v6617_v49  ;;  %v4582_v49 = vld [vmem:[%s8089_s18 + $0x648] sm:$0xff]  ;;  %v5095_v58 = vld [vmem:[%s8095_s20 + $0x650] sm:$0xff]  ;;  %v6628_v13 = vmul.f32 %v6116_v63, %v6116_v63  ;;  %v3056_v63 = vadd.s32 1704, %v9133_v3 }
 0x616   : > { %v5606_v62 = vsub.f32 %v4582_v49, %v5094_v50  ;;  %v6117_v9 = vsel %vm4069_vm8, %v5605_v54, 0.0  ;;  %v3566_v50 = vadd.s32 %v9137_v5, %v3052_v31  ;;  %vm4077_vm0 = vcmp.lt.s32.totalorder %v3565_v42, 5120 }
 0x617   : > { %v7130_v12 = vadd.f32 %v7129_v2, %v6618_v57  ;;  %v4583_v57 = vld [vmem:[%s8089_s18 + $0x650] sm:$0xff]  ;;  %v5096_v2 = vld [vmem:[%s8095_s20 + $0x658] sm:$0xff]  ;;  %v6629_v21 = vmul.f32 %v6117_v9, %v6117_v9  ;;  %v3057_v9 = vadd.s32 1712, %v9133_v3 }
 0x618   : > { %v5607_v8 = vsub.f32 %v4583_v57, %v5095_v58  ;;  %v6118_v17 = vsel %vm4070_vm9, %v5606_v62, 0.0  ;;  %v3567_v58 = vadd.s32 %v9137_v5, %v3053_v39  ;;  %vm4078_vm1 = vcmp.lt.s32.totalorder %v3566_v50, 5120 }
 0x619   : > { %v7131_v20 = vadd.f32 %v7130_v12, %v6619_v1  ;;  %v4584_v1 = vld [vmem:[%s8089_s18 + $0x658] sm:$0xff]  ;;  %v5097_v12 = vld [vmem:[%s8095_s20 + $0x660] sm:$0xff]  ;;  %v6630_v29 = vmul.f32 %v6118_v17, %v6118_v17  ;;  %v3058_v17 = vadd.s32 1720, %v9133_v3 }
 0x61a   : > { %v5608_v16 = vsub.f32 %v4584_v1, %v5096_v2  ;;  %v6119_v25 = vsel %vm4071_vm10, %v5607_v8, 0.0  ;;  %v3568_v2 = vadd.s32 %v9137_v5, %v3054_v47  ;;  %vm4079_vm2 = vcmp.lt.s32.totalorder %v3567_v58, 5120 }
 0x61b   : > { %v7132_v28 = vadd.f32 %v7131_v20, %v6620_v11  ;;  %v4585_v11 = vld [vmem:[%s8089_s18 + $0x660] sm:$0xff]  ;;  %v5098_v20 = vld [vmem:[%s8095_s20 + $0x668] sm:$0xff]  ;;  %v6631_v37 = vmul.f32 %v6119_v25, %v6119_v25  ;;  %v3059_v25 = vadd.s32 1728, %v9133_v3 }
 0x61c   : > { %v5609_v24 = vsub.f32 %v4585_v11, %v5097_v12  ;;  %v6120_v33 = vsel %vm4072_vm11, %v5608_v16, 0.0  ;;  %v3569_v12 = vadd.s32 %v9137_v5, %v3055_v55  ;;  %vm4080_vm3 = vcmp.lt.s32.totalorder %v3568_v2, 5120 }
 0x61d   : > { %v7133_v36 = vadd.f32 %v7132_v28, %v6621_v19  ;;  %v4586_v19 = vld [vmem:[%s8089_s18 + $0x668] sm:$0xff]  ;;  %v5099_v28 = vld [vmem:[%s8095_s20 + $0x670] sm:$0xff]  ;;  %v6632_v45 = vmul.f32 %v6120_v33, %v6120_v33  ;;  %v3060_v33 = vadd.s32 1736, %v9133_v3 }
 0x61e   : > { %v5610_v32 = vsub.f32 %v4586_v19, %v5098_v20  ;;  %v6121_v41 = vsel %vm4073_vm12, %v5609_v24, 0.0  ;;  %v3570_v20 = vadd.s32 %v9137_v5, %v3056_v63  ;;  %vm4081_vm4 = vcmp.lt.s32.totalorder %v3569_v12, 5120 }
 0x61f   : > { %v7134_v44 = vadd.f32 %v7133_v36, %v6622_v27  ;;  %v4587_v27 = vld [vmem:[%s8089_s18 + $0x670] sm:$0xff]  ;;  %v5100_v36 = vld [vmem:[%s8095_s20 + $0x678] sm:$0xff]  ;;  %v6633_v53 = vmul.f32 %v6121_v41, %v6121_v41  ;;  %v3061_v41 = vadd.s32 1744, %v9133_v3 }
 0x620   : > { %v5611_v40 = vsub.f32 %v4587_v27, %v5099_v28  ;;  %v6122_v49 = vsel %vm4074_vm13, %v5610_v32, 0.0  ;;  %v3571_v28 = vadd.s32 %v9137_v5, %v3057_v9  ;;  %vm4082_vm5 = vcmp.lt.s32.totalorder %v3570_v20, 5120 }
 0x621   : > { %v7135_v52 = vadd.f32 %v7134_v44, %v6623_v35  ;;  %v4588_v35 = vld [vmem:[%s8089_s18 + $0x678] sm:$0xff]  ;;  %v5101_v44 = vld [vmem:[%s8095_s20 + $0x680] sm:$0xff]  ;;  %v6634_v61 = vmul.f32 %v6122_v49, %v6122_v49  ;;  %v3062_v49 = vadd.s32 1752, %v9133_v3 }
 0x622   : > { %v5612_v48 = vsub.f32 %v4588_v35, %v5100_v36  ;;  %v6123_v57 = vsel %vm4075_vm14, %v5611_v40, 0.0  ;;  %v3572_v36 = vadd.s32 %v9137_v5, %v3058_v17  ;;  %vm4083_vm6 = vcmp.lt.s32.totalorder %v3571_v28, 5120 }
 0x623   : > { %v7136_v60 = vadd.f32 %v7135_v52, %v6624_v43  ;;  %v4589_v43 = vld [vmem:[%s8089_s18 + $0x680] sm:$0xff]  ;;  %v5102_v52 = vld [vmem:[%s8095_s20 + $0x688] sm:$0xff]  ;;  %v6635_v7 = vmul.f32 %v6123_v57, %v6123_v57  ;;  %v3063_v57 = vadd.s32 1760, %v9133_v3 }
 0x624   : > { %v5613_v56 = vsub.f32 %v4589_v43, %v5101_v44  ;;  %v6124_v1 = vsel %vm4076_vm15, %v5612_v48, 0.0  ;;  %v3573_v44 = vadd.s32 %v9137_v5, %v3059_v25  ;;  %vm4084_vm7 = vcmp.lt.s32.totalorder %v3572_v36, 5120 }
 0x625   : > { %v7137_v6 = vadd.f32 %v7136_v60, %v6625_v51  ;;  %v4590_v51 = vld [vmem:[%s8089_s18 + $0x688] sm:$0xff]  ;;  %v5103_v60 = vld [vmem:[%s8095_s20 + $0x690] sm:$0xff]  ;;  %v6636_v15 = vmul.f32 %v6124_v1, %v6124_v1  ;;  %v3064_v1 = vadd.s32 1768, %v9133_v3 }
 0x626   : > { %v5614_v0 = vsub.f32 %v4590_v51, %v5102_v52  ;;  %v6125_v11 = vsel %vm4077_vm0, %v5613_v56, 0.0  ;;  %v3574_v52 = vadd.s32 %v9137_v5, %v3060_v33  ;;  %vm4085_vm8 = vcmp.lt.s32.totalorder %v3573_v44, 5120 }
 0x627   : > { %v7138_v14 = vadd.f32 %v7137_v6, %v6626_v59  ;;  %v4591_v59 = vld [vmem:[%s8089_s18 + $0x690] sm:$0xff]  ;;  %v5104_v6 = vld [vmem:[%s8095_s20 + $0x698] sm:$0xff]  ;;  %v6637_v23 = vmul.f32 %v6125_v11, %v6125_v11  ;;  %v3065_v11 = vadd.s32 1776, %v9133_v3 }
 0x628   : > { %v5615_v10 = vsub.f32 %v4591_v59, %v5103_v60  ;;  %v6126_v19 = vsel %vm4078_vm1, %v5614_v0, 0.0  ;;  %v3575_v60 = vadd.s32 %v9137_v5, %v3061_v41  ;;  %vm4086_vm9 = vcmp.lt.s32.totalorder %v3574_v52, 5120 }
 0x629   : > { %v7139_v22 = vadd.f32 %v7138_v14, %v6627_v4  ;;  %v4592_v4 = vld [vmem:[%s8089_s18 + $0x698] sm:$0xff]  ;;  %v5105_v14 = vld [vmem:[%s8095_s20 + $0x6a0] sm:$0xff]  ;;  %v6638_v31 = vmul.f32 %v6126_v19, %v6126_v19  ;;  %v3066_v19 = vadd.s32 1784, %v9133_v3 }
 0x62a   : > { %v5616_v18 = vsub.f32 %v4592_v4, %v5104_v6  ;;  %v6127_v27 = vsel %vm4079_vm2, %v5615_v10, 0.0  ;;  %v3576_v6 = vadd.s32 %v9137_v5, %v3062_v49  ;;  %vm4087_vm10 = vcmp.lt.s32.totalorder %v3575_v60, 5120 }
 0x62b   : > { %v7140_v30 = vadd.f32 %v7139_v22, %v6628_v13  ;;  %v4593_v13 = vld [vmem:[%s8089_s18 + $0x6a0] sm:$0xff]  ;;  %v5106_v22 = vld [vmem:[%s8095_s20 + $0x6a8] sm:$0xff]  ;;  %v6639_v39 = vmul.f32 %v6127_v27, %v6127_v27  ;;  %v3067_v27 = vadd.s32 1792, %v9133_v3 }
 0x62c   : > { %v5617_v26 = vsub.f32 %v4593_v13, %v5105_v14  ;;  %v6128_v35 = vsel %vm4080_vm3, %v5616_v18, 0.0  ;;  %v3577_v14 = vadd.s32 %v9137_v5, %v3063_v57  ;;  %vm4088_vm11 = vcmp.lt.s32.totalorder %v3576_v6, 5120 }
 0x62d   : > { %v7141_v38 = vadd.f32 %v7140_v30, %v6629_v21  ;;  %v4594_v21 = vld [vmem:[%s8089_s18 + $0x6a8] sm:$0xff]  ;;  %v5107_v30 = vld [vmem:[%s8095_s20 + $0x6b0] sm:$0xff]  ;;  %v6640_v47 = vmul.f32 %v6128_v35, %v6128_v35  ;;  %v3068_v35 = vadd.s32 1800, %v9133_v3 }
 0x62e   : > { %v5618_v34 = vsub.f32 %v4594_v21, %v5106_v22  ;;  %v6129_v43 = vsel %vm4081_vm4, %v5617_v26, 0.0  ;;  %v3578_v22 = vadd.s32 %v9137_v5, %v3064_v1  ;;  %vm4089_vm12 = vcmp.lt.s32.totalorder %v3577_v14, 5120 }
 0x62f   : > { %v7142_v46 = vadd.f32 %v7141_v38, %v6630_v29  ;;  %v4595_v29 = vld [vmem:[%s8089_s18 + $0x6b0] sm:$0xff]  ;;  %v5108_v38 = vld [vmem:[%s8095_s20 + $0x6b8] sm:$0xff]  ;;  %v6641_v55 = vmul.f32 %v6129_v43, %v6129_v43  ;;  %v3069_v43 = vadd.s32 1808, %v9133_v3 }
 0x630   : > { %v5619_v42 = vsub.f32 %v4595_v29, %v5107_v30  ;;  %v6130_v51 = vsel %vm4082_vm5, %v5618_v34, 0.0  ;;  %v3579_v30 = vadd.s32 %v9137_v5, %v3065_v11  ;;  %vm4090_vm13 = vcmp.lt.s32.totalorder %v3578_v22, 5120 }
 0x631   : > { %v7143_v54 = vadd.f32 %v7142_v46, %v6631_v37  ;;  %v4596_v37 = vld [vmem:[%s8089_s18 + $0x6b8] sm:$0xff]  ;;  %v5109_v46 = vld [vmem:[%s8095_s20 + $0x6c0] sm:$0xff]  ;;  %v6642_v63 = vmul.f32 %v6130_v51, %v6130_v51  ;;  %v3070_v51 = vadd.s32 1816, %v9133_v3 }
 0x632   : > { %v5620_v50 = vsub.f32 %v4596_v37, %v5108_v38  ;;  %v6131_v59 = vsel %vm4083_vm6, %v5619_v42, 0.0  ;;  %v3580_v38 = vadd.s32 %v9137_v5, %v3066_v19  ;;  %vm4091_vm14 = vcmp.lt.s32.totalorder %v3579_v30, 5120 }
 0x633   : > { %v7144_v62 = vadd.f32 %v7143_v54, %v6632_v45  ;;  %v4597_v45 = vld [vmem:[%s8089_s18 + $0x6c0] sm:$0xff]  ;;  %v5110_v54 = vld [vmem:[%s8095_s20 + $0x6c8] sm:$0xff]  ;;  %v6643_v9 = vmul.f32 %v6131_v59, %v6131_v59  ;;  %v3071_v59 = vadd.s32 1824, %v9133_v3 }
 0x634   : > { %v5621_v58 = vsub.f32 %v4597_v45, %v5109_v46  ;;  %v6132_v4 = vsel %vm4084_vm7, %v5620_v50, 0.0  ;;  %v3581_v46 = vadd.s32 %v9137_v5, %v3067_v27  ;;  %vm4092_vm15 = vcmp.lt.s32.totalorder %v3580_v38, 5120 }
 0x635   : > { %v7145_v8 = vadd.f32 %v7144_v62, %v6633_v53  ;;  %v4598_v53 = vld [vmem:[%s8089_s18 + $0x6c8] sm:$0xff]  ;;  %v5111_v62 = vld [vmem:[%s8095_s20 + $0x6d0] sm:$0xff]  ;;  %v6644_v17 = vmul.f32 %v6132_v4, %v6132_v4  ;;  %v3072_v4 = vadd.s32 1832, %v9133_v3 }
 0x636   : > { %v5622_v2 = vsub.f32 %v4598_v53, %v5110_v54  ;;  %v6133_v13 = vsel %vm4085_vm8, %v5621_v58, 0.0  ;;  %v3582_v54 = vadd.s32 %v9137_v5, %v3068_v35  ;;  %vm4093_vm0 = vcmp.lt.s32.totalorder %v3581_v46, 5120 }
 0x637   : > { %v7146_v16 = vadd.f32 %v7145_v8, %v6634_v61  ;;  %v4599_v61 = vld [vmem:[%s8089_s18 + $0x6d0] sm:$0xff]  ;;  %v5112_v8 = vld [vmem:[%s8095_s20 + $0x6d8] sm:$0xff]  ;;  %v6645_v25 = vmul.f32 %v6133_v13, %v6133_v13  ;;  %v3073_v13 = vadd.s32 1840, %v9133_v3 }
 0x638   : > { %v5623_v12 = vsub.f32 %v4599_v61, %v5111_v62  ;;  %v6134_v21 = vsel %vm4086_vm9, %v5622_v2, 0.0  ;;  %v3583_v62 = vadd.s32 %v9137_v5, %v3069_v43  ;;  %vm4094_vm1 = vcmp.lt.s32.totalorder %v3582_v54, 5120 }
 0x639   : > { %v7147_v24 = vadd.f32 %v7146_v16, %v6635_v7  ;;  %v4600_v7 = vld [vmem:[%s8089_s18 + $0x6d8] sm:$0xff]  ;;  %v5113_v16 = vld [vmem:[%s8095_s20 + $0x6e0] sm:$0xff]  ;;  %v6646_v33 = vmul.f32 %v6134_v21, %v6134_v21  ;;  %v3074_v21 = vadd.s32 1848, %v9133_v3 }
 0x63a   : > { %v5624_v20 = vsub.f32 %v4600_v7, %v5112_v8  ;;  %v6135_v29 = vsel %vm4087_vm10, %v5623_v12, 0.0  ;;  %v3584_v8 = vadd.s32 %v9137_v5, %v3070_v51  ;;  %vm4095_vm2 = vcmp.lt.s32.totalorder %v3583_v62, 5120 }
 0x63b   : > { %v7148_v32 = vadd.f32 %v7147_v24, %v6636_v15  ;;  %v4601_v15 = vld [vmem:[%s8089_s18 + $0x6e0] sm:$0xff]  ;;  %v5114_v24 = vld [vmem:[%s8095_s20 + $0x6e8] sm:$0xff]  ;;  %v6647_v41 = vmul.f32 %v6135_v29, %v6135_v29  ;;  %v3075_v29 = vadd.s32 1856, %v9133_v3 }
 0x63c   : > { %v5625_v28 = vsub.f32 %v4601_v15, %v5113_v16  ;;  %v6136_v37 = vsel %vm4088_vm11, %v5624_v20, 0.0  ;;  %v3585_v16 = vadd.s32 %v9137_v5, %v3071_v59  ;;  %vm4096_vm3 = vcmp.lt.s32.totalorder %v3584_v8, 5120 }
 0x63d   : > { %v7149_v40 = vadd.f32 %v7148_v32, %v6637_v23  ;;  %v4602_v23 = vld [vmem:[%s8089_s18 + $0x6e8] sm:$0xff]  ;;  %v5115_v32 = vld [vmem:[%s8095_s20 + $0x6f0] sm:$0xff]  ;;  %v6648_v49 = vmul.f32 %v6136_v37, %v6136_v37  ;;  %v3076_v37 = vadd.s32 1864, %v9133_v3 }
 0x63e   : > { %v5626_v36 = vsub.f32 %v4602_v23, %v5114_v24  ;;  %v6137_v45 = vsel %vm4089_vm12, %v5625_v28, 0.0  ;;  %v3586_v24 = vadd.s32 %v9137_v5, %v3072_v4  ;;  %vm4097_vm4 = vcmp.lt.s32.totalorder %v3585_v16, 5120 }
 0x63f   : > { %v7150_v48 = vadd.f32 %v7149_v40, %v6638_v31  ;;  %v4603_v31 = vld [vmem:[%s8089_s18 + $0x6f0] sm:$0xff]  ;;  %v5116_v40 = vld [vmem:[%s8095_s20 + $0x6f8] sm:$0xff]  ;;  %v6649_v57 = vmul.f32 %v6137_v45, %v6137_v45  ;;  %v3077_v45 = vadd.s32 1872, %v9133_v3 }
 0x640   : > { %v5627_v44 = vsub.f32 %v4603_v31, %v5115_v32  ;;  %v6138_v53 = vsel %vm4090_vm13, %v5626_v36, 0.0  ;;  %v3587_v32 = vadd.s32 %v9137_v5, %v3073_v13  ;;  %vm4098_vm5 = vcmp.lt.s32.totalorder %v3586_v24, 5120 }
 0x641   : > { %v7151_v56 = vadd.f32 %v7150_v48, %v6639_v39  ;;  %v4604_v39 = vld [vmem:[%s8089_s18 + $0x6f8] sm:$0xff]  ;;  %v5117_v48 = vld [vmem:[%s8095_s20 + $0x700] sm:$0xff]  ;;  %v6650_v1 = vmul.f32 %v6138_v53, %v6138_v53  ;;  %v3078_v53 = vadd.s32 1880, %v9133_v3 }
 0x642   : > { %v5628_v52 = vsub.f32 %v4604_v39, %v5116_v40  ;;  %v6139_v61 = vsel %vm4091_vm14, %v5627_v44, 0.0  ;;  %v3588_v40 = vadd.s32 %v9137_v5, %v3074_v21  ;;  %vm4099_vm6 = vcmp.lt.s32.totalorder %v3587_v32, 5120 }
 0x643   : > { %v7152_v0 = vadd.f32 %v7151_v56, %v6640_v47  ;;  %v4605_v47 = vld [vmem:[%s8089_s18 + $0x700] sm:$0xff]  ;;  %v5118_v56 = vld [vmem:[%s8095_s20 + $0x708] sm:$0xff]  ;;  %v6651_v11 = vmul.f32 %v6139_v61, %v6139_v61  ;;  %v3079_v61 = vadd.s32 1888, %v9133_v3 }
 0x644   : > { %v5629_v60 = vsub.f32 %v4605_v47, %v5117_v48  ;;  %v6140_v7 = vsel %vm4092_vm15, %v5628_v52, 0.0  ;;  %v3589_v48 = vadd.s32 %v9137_v5, %v3075_v29  ;;  %vm4100_vm7 = vcmp.lt.s32.totalorder %v3588_v40, 5120 }
 0x645   : > { %v7153_v10 = vadd.f32 %v7152_v0, %v6641_v55  ;;  %v4606_v55 = vld [vmem:[%s8089_s18 + $0x708] sm:$0xff]  ;;  %v5119_v0 = vld [vmem:[%s8095_s20 + $0x710] sm:$0xff]  ;;  %v6652_v19 = vmul.f32 %v6140_v7, %v6140_v7  ;;  %v3080_v7 = vadd.s32 1896, %v9133_v3 }
 0x646   : > { %v5630_v6 = vsub.f32 %v4606_v55, %v5118_v56  ;;  %v6141_v15 = vsel %vm4093_vm0, %v5629_v60, 0.0  ;;  %v3590_v56 = vadd.s32 %v9137_v5, %v3076_v37  ;;  %vm4101_vm8 = vcmp.lt.s32.totalorder %v3589_v48, 5120 }
 0x647   : > { %v7154_v18 = vadd.f32 %v7153_v10, %v6642_v63  ;;  %v4607_v63 = vld [vmem:[%s8089_s18 + $0x710] sm:$0xff]  ;;  %v5120_v10 = vld [vmem:[%s8095_s20 + $0x718] sm:$0xff]  ;;  %v6653_v27 = vmul.f32 %v6141_v15, %v6141_v15  ;;  %v3081_v15 = vadd.s32 1904, %v9133_v3 }
 0x648   : > { %v5631_v14 = vsub.f32 %v4607_v63, %v5119_v0  ;;  %v6142_v23 = vsel %vm4094_vm1, %v5630_v6, 0.0  ;;  %v3591_v0 = vadd.s32 %v9137_v5, %v3077_v45  ;;  %vm4102_vm9 = vcmp.lt.s32.totalorder %v3590_v56, 5120 }
 0x649   : > { %v7155_v26 = vadd.f32 %v7154_v18, %v6643_v9  ;;  %v4608_v9 = vld [vmem:[%s8089_s18 + $0x718] sm:$0xff]  ;;  %v5121_v18 = vld [vmem:[%s8095_s20 + $0x720] sm:$0xff]  ;;  %v6654_v35 = vmul.f32 %v6142_v23, %v6142_v23  ;;  %v3082_v23 = vadd.s32 1912, %v9133_v3 }
 0x64a   : > { %v5632_v22 = vsub.f32 %v4608_v9, %v5120_v10  ;;  %v6143_v31 = vsel %vm4095_vm2, %v5631_v14, 0.0  ;;  %v3592_v10 = vadd.s32 %v9137_v5, %v3078_v53  ;;  %vm4103_vm10 = vcmp.lt.s32.totalorder %v3591_v0, 5120 }
 0x64b   : > { %v7156_v34 = vadd.f32 %v7155_v26, %v6644_v17  ;;  %v4609_v17 = vld [vmem:[%s8089_s18 + $0x720] sm:$0xff]  ;;  %v5122_v26 = vld [vmem:[%s8095_s20 + $0x728] sm:$0xff]  ;;  %v6655_v43 = vmul.f32 %v6143_v31, %v6143_v31  ;;  %v3083_v31 = vadd.s32 1920, %v9133_v3 }
 0x64c   : > { %v5633_v30 = vsub.f32 %v4609_v17, %v5121_v18  ;;  %v6144_v39 = vsel %vm4096_vm3, %v5632_v22, 0.0  ;;  %v3593_v18 = vadd.s32 %v9137_v5, %v3079_v61  ;;  %vm4104_vm11 = vcmp.lt.s32.totalorder %v3592_v10, 5120 }
 0x64d   : > { %v7157_v42 = vadd.f32 %v7156_v34, %v6645_v25  ;;  %v4610_v25 = vld [vmem:[%s8089_s18 + $0x728] sm:$0xff]  ;;  %v5123_v34 = vld [vmem:[%s8095_s20 + $0x730] sm:$0xff]  ;;  %v6656_v51 = vmul.f32 %v6144_v39, %v6144_v39  ;;  %v3084_v39 = vadd.s32 1928, %v9133_v3 }
 0x64e   : > { %v5634_v38 = vsub.f32 %v4610_v25, %v5122_v26  ;;  %v6145_v47 = vsel %vm4097_vm4, %v5633_v30, 0.0  ;;  %v3594_v26 = vadd.s32 %v9137_v5, %v3080_v7  ;;  %vm4105_vm12 = vcmp.lt.s32.totalorder %v3593_v18, 5120 }
 0x64f   : > { %v7158_v50 = vadd.f32 %v7157_v42, %v6646_v33  ;;  %v4611_v33 = vld [vmem:[%s8089_s18 + $0x730] sm:$0xff]  ;;  %v5124_v42 = vld [vmem:[%s8095_s20 + $0x738] sm:$0xff]  ;;  %v6657_v59 = vmul.f32 %v6145_v47, %v6145_v47  ;;  %v3085_v47 = vadd.s32 1936, %v9133_v3 }
 0x650   : > { %v5635_v46 = vsub.f32 %v4611_v33, %v5123_v34  ;;  %v6146_v55 = vsel %vm4098_vm5, %v5634_v38, 0.0  ;;  %v3595_v34 = vadd.s32 %v9137_v5, %v3081_v15  ;;  %vm4106_vm13 = vcmp.lt.s32.totalorder %v3594_v26, 5120 }
 0x651   : > { %v7159_v58 = vadd.f32 %v7158_v50, %v6647_v41  ;;  %v4612_v41 = vld [vmem:[%s8089_s18 + $0x738] sm:$0xff]  ;;  %v5125_v50 = vld [vmem:[%s8095_s20 + $0x740] sm:$0xff]  ;;  %v6658_v4 = vmul.f32 %v6146_v55, %v6146_v55  ;;  %v3086_v55 = vadd.s32 1944, %v9133_v3 }
 0x652   : > { %v5636_v54 = vsub.f32 %v4612_v41, %v5124_v42  ;;  %v6147_v63 = vsel %vm4099_vm6, %v5635_v46, 0.0  ;;  %v3596_v42 = vadd.s32 %v9137_v5, %v3082_v23  ;;  %vm4107_vm14 = vcmp.lt.s32.totalorder %v3595_v34, 5120 }
 0x653   : > { %v7160_v2 = vadd.f32 %v7159_v58, %v6648_v49  ;;  %v4613_v49 = vld [vmem:[%s8089_s18 + $0x740] sm:$0xff]  ;;  %v5126_v58 = vld [vmem:[%s8095_s20 + $0x748] sm:$0xff]  ;;  %v6659_v13 = vmul.f32 %v6147_v63, %v6147_v63  ;;  %v3087_v63 = vadd.s32 1952, %v9133_v3 }
 0x654   : > { %v5637_v62 = vsub.f32 %v4613_v49, %v5125_v50  ;;  %v6148_v9 = vsel %vm4100_vm7, %v5636_v54, 0.0  ;;  %v3597_v50 = vadd.s32 %v9137_v5, %v3083_v31  ;;  %vm4108_vm15 = vcmp.lt.s32.totalorder %v3596_v42, 5120 }
 0x655   : > { %v7161_v12 = vadd.f32 %v7160_v2, %v6649_v57  ;;  %v4614_v57 = vld [vmem:[%s8089_s18 + $0x748] sm:$0xff]  ;;  %v5127_v2 = vld [vmem:[%s8095_s20 + $0x750] sm:$0xff]  ;;  %v6660_v21 = vmul.f32 %v6148_v9, %v6148_v9  ;;  %v3088_v9 = vadd.s32 1960, %v9133_v3 }
 0x656   : > { %v5638_v8 = vsub.f32 %v4614_v57, %v5126_v58  ;;  %v6149_v17 = vsel %vm4101_vm8, %v5637_v62, 0.0  ;;  %v3598_v58 = vadd.s32 %v9137_v5, %v3084_v39  ;;  %vm4109_vm0 = vcmp.lt.s32.totalorder %v3597_v50, 5120 }
 0x657   : > { %v7162_v20 = vadd.f32 %v7161_v12, %v6650_v1  ;;  %v4615_v1 = vld [vmem:[%s8089_s18 + $0x750] sm:$0xff]  ;;  %v5128_v12 = vld [vmem:[%s8095_s20 + $0x758] sm:$0xff]  ;;  %v6661_v29 = vmul.f32 %v6149_v17, %v6149_v17  ;;  %v3089_v17 = vadd.s32 1968, %v9133_v3 }
 0x658   : > { %v5639_v16 = vsub.f32 %v4615_v1, %v5127_v2  ;;  %v6150_v25 = vsel %vm4102_vm9, %v5638_v8, 0.0  ;;  %v3599_v2 = vadd.s32 %v9137_v5, %v3085_v47  ;;  %vm4110_vm1 = vcmp.lt.s32.totalorder %v3598_v58, 5120 }
 0x659   : > { %v7163_v28 = vadd.f32 %v7162_v20, %v6651_v11  ;;  %v4616_v11 = vld [vmem:[%s8089_s18 + $0x758] sm:$0xff]  ;;  %v5129_v20 = vld [vmem:[%s8095_s20 + $0x760] sm:$0xff]  ;;  %v6662_v37 = vmul.f32 %v6150_v25, %v6150_v25  ;;  %v3090_v25 = vadd.s32 1976, %v9133_v3 }
 0x65a   : > { %v5640_v24 = vsub.f32 %v4616_v11, %v5128_v12  ;;  %v6151_v33 = vsel %vm4103_vm10, %v5639_v16, 0.0  ;;  %v3600_v12 = vadd.s32 %v9137_v5, %v3086_v55  ;;  %vm4111_vm2 = vcmp.lt.s32.totalorder %v3599_v2, 5120 }
 0x65b   : > { %v7164_v36 = vadd.f32 %v7163_v28, %v6652_v19  ;;  %v4617_v19 = vld [vmem:[%s8089_s18 + $0x760] sm:$0xff]  ;;  %v5130_v28 = vld [vmem:[%s8095_s20 + $0x768] sm:$0xff]  ;;  %v6663_v45 = vmul.f32 %v6151_v33, %v6151_v33  ;;  %v3091_v33 = vadd.s32 1984, %v9133_v3 }
 0x65c   : > { %v5641_v32 = vsub.f32 %v4617_v19, %v5129_v20  ;;  %v6152_v41 = vsel %vm4104_vm11, %v5640_v24, 0.0  ;;  %v3601_v20 = vadd.s32 %v9137_v5, %v3087_v63  ;;  %vm4112_vm3 = vcmp.lt.s32.totalorder %v3600_v12, 5120 }
 0x65d   : > { %v7165_v44 = vadd.f32 %v7164_v36, %v6653_v27  ;;  %v4618_v27 = vld [vmem:[%s8089_s18 + $0x768] sm:$0xff]  ;;  %v5131_v36 = vld [vmem:[%s8095_s20 + $0x770] sm:$0xff]  ;;  %v6664_v53 = vmul.f32 %v6152_v41, %v6152_v41  ;;  %v3092_v41 = vadd.s32 1992, %v9133_v3 }
 0x65e   : > { %v5642_v40 = vsub.f32 %v4618_v27, %v5130_v28  ;;  %v6153_v49 = vsel %vm4105_vm12, %v5641_v32, 0.0  ;;  %v3602_v28 = vadd.s32 %v9137_v5, %v3088_v9  ;;  %vm4113_vm4 = vcmp.lt.s32.totalorder %v3601_v20, 5120 }
 0x65f   : > { %v7166_v52 = vadd.f32 %v7165_v44, %v6654_v35  ;;  %v4619_v35 = vld [vmem:[%s8089_s18 + $0x770] sm:$0xff]  ;;  %v5132_v44 = vld [vmem:[%s8095_s20 + $0x778] sm:$0xff]  ;;  %v6665_v61 = vmul.f32 %v6153_v49, %v6153_v49  ;;  %v3093_v49 = vadd.s32 2000, %v9133_v3 }
 0x660   : > { %v5643_v48 = vsub.f32 %v4619_v35, %v5131_v36  ;;  %v6154_v57 = vsel %vm4106_vm13, %v5642_v40, 0.0  ;;  %v3603_v36 = vadd.s32 %v9137_v5, %v3089_v17  ;;  %vm4114_vm5 = vcmp.lt.s32.totalorder %v3602_v28, 5120 }
 0x661   : > { %v7167_v60 = vadd.f32 %v7166_v52, %v6655_v43  ;;  %v4620_v43 = vld [vmem:[%s8089_s18 + $0x778] sm:$0xff]  ;;  %v5133_v52 = vld [vmem:[%s8095_s20 + $0x780] sm:$0xff]  ;;  %v6666_v7 = vmul.f32 %v6154_v57, %v6154_v57  ;;  %v3094_v57 = vadd.s32 2008, %v9133_v3 }
 0x662   : > { %v5644_v56 = vsub.f32 %v4620_v43, %v5132_v44  ;;  %v6155_v1 = vsel %vm4107_vm14, %v5643_v48, 0.0  ;;  %v3604_v44 = vadd.s32 %v9137_v5, %v3090_v25  ;;  %vm4115_vm6 = vcmp.lt.s32.totalorder %v3603_v36, 5120 }
 0x663   : > { %v7168_v6 = vadd.f32 %v7167_v60, %v6656_v51  ;;  %v4621_v51 = vld [vmem:[%s8089_s18 + $0x780] sm:$0xff]  ;;  %v5134_v60 = vld [vmem:[%s8095_s20 + $0x788] sm:$0xff]  ;;  %v6667_v15 = vmul.f32 %v6155_v1, %v6155_v1  ;;  %v3095_v1 = vadd.s32 2016, %v9133_v3 }
 0x664   : > { %v5645_v0 = vsub.f32 %v4621_v51, %v5133_v52  ;;  %v6156_v11 = vsel %vm4108_vm15, %v5644_v56, 0.0  ;;  %v3605_v52 = vadd.s32 %v9137_v5, %v3091_v33  ;;  %vm4116_vm7 = vcmp.lt.s32.totalorder %v3604_v44, 5120 }
 0x665   : > { %v7169_v14 = vadd.f32 %v7168_v6, %v6657_v59  ;;  %v4622_v59 = vld [vmem:[%s8089_s18 + $0x788] sm:$0xff]  ;;  %v5135_v6 = vld [vmem:[%s8095_s20 + $0x790] sm:$0xff]  ;;  %v6668_v23 = vmul.f32 %v6156_v11, %v6156_v11  ;;  %v3096_v11 = vadd.s32 2024, %v9133_v3 }
 0x666   : > { %v5646_v10 = vsub.f32 %v4622_v59, %v5134_v60  ;;  %v6157_v19 = vsel %vm4109_vm0, %v5645_v0, 0.0  ;;  %v3606_v60 = vadd.s32 %v9137_v5, %v3092_v41  ;;  %vm4117_vm8 = vcmp.lt.s32.totalorder %v3605_v52, 5120 }
 0x667   : > { %v7170_v22 = vadd.f32 %v7169_v14, %v6658_v4  ;;  %v4623_v4 = vld [vmem:[%s8089_s18 + $0x790] sm:$0xff]  ;;  %v5136_v14 = vld [vmem:[%s8095_s20 + $0x798] sm:$0xff]  ;;  %v6669_v31 = vmul.f32 %v6157_v19, %v6157_v19  ;;  %v3097_v19 = vadd.s32 2032, %v9133_v3 }
 0x668   : > { %v5647_v18 = vsub.f32 %v4623_v4, %v5135_v6  ;;  %v6158_v27 = vsel %vm4110_vm1, %v5646_v10, 0.0  ;;  %v3607_v6 = vadd.s32 %v9137_v5, %v3093_v49  ;;  %vm4118_vm9 = vcmp.lt.s32.totalorder %v3606_v60, 5120 }
 0x669   : > { %v7171_v30 = vadd.f32 %v7170_v22, %v6659_v13  ;;  %v4624_v13 = vld [vmem:[%s8089_s18 + $0x798] sm:$0xff]  ;;  %v5137_v22 = vld [vmem:[%s8095_s20 + $0x7a0] sm:$0xff]  ;;  %v6670_v39 = vmul.f32 %v6158_v27, %v6158_v27  ;;  %v3098_v27 = vadd.s32 2040, %v9133_v3 }
 0x66a   : > { %v5648_v26 = vsub.f32 %v4624_v13, %v5136_v14  ;;  %v6159_v35 = vsel %vm4111_vm2, %v5647_v18, 0.0  ;;  %v3608_v14 = vadd.s32 %v9137_v5, %v3094_v57  ;;  %vm4119_vm10 = vcmp.lt.s32.totalorder %v3607_v6, 5120 }
 0x66b   : > { %v7172_v38 = vadd.f32 %v7171_v30, %v6660_v21  ;;  %v4625_v21 = vld [vmem:[%s8089_s18 + $0x7a0] sm:$0xff]  ;;  %v5138_v30 = vld [vmem:[%s8095_s20 + $0x7a8] sm:$0xff]  ;;  %v6671_v47 = vmul.f32 %v6159_v35, %v6159_v35  ;;  %v3099_v35 = vadd.s32 2048, %v9133_v3 }
 0x66c   : > { %v5649_v34 = vsub.f32 %v4625_v21, %v5137_v22  ;;  %v6160_v43 = vsel %vm4112_vm3, %v5648_v26, 0.0  ;;  %v3609_v22 = vadd.s32 %v9137_v5, %v3095_v1  ;;  %vm4120_vm11 = vcmp.lt.s32.totalorder %v3608_v14, 5120 }
 0x66d   : > { %v7173_v46 = vadd.f32 %v7172_v38, %v6661_v29  ;;  %v4626_v29 = vld [vmem:[%s8089_s18 + $0x7a8] sm:$0xff]  ;;  %v5139_v38 = vld [vmem:[%s8095_s20 + $0x7b0] sm:$0xff]  ;;  %v6672_v55 = vmul.f32 %v6160_v43, %v6160_v43  ;;  %v3100_v43 = vadd.s32 2056, %v9133_v3 }
 0x66e   : > { %v5650_v42 = vsub.f32 %v4626_v29, %v5138_v30  ;;  %v6161_v51 = vsel %vm4113_vm4, %v5649_v34, 0.0  ;;  %v3610_v30 = vadd.s32 %v9137_v5, %v3096_v11  ;;  %vm4121_vm12 = vcmp.lt.s32.totalorder %v3609_v22, 5120 }
 0x66f   : > { %v7174_v54 = vadd.f32 %v7173_v46, %v6662_v37  ;;  %v4627_v37 = vld [vmem:[%s8089_s18 + $0x7b0] sm:$0xff]  ;;  %v5140_v46 = vld [vmem:[%s8095_s20 + $0x7b8] sm:$0xff]  ;;  %v6673_v63 = vmul.f32 %v6161_v51, %v6161_v51  ;;  %v3101_v51 = vadd.s32 2064, %v9133_v3 }
 0x670   : > { %v5651_v50 = vsub.f32 %v4627_v37, %v5139_v38  ;;  %v6162_v59 = vsel %vm4114_vm5, %v5650_v42, 0.0  ;;  %v3611_v38 = vadd.s32 %v9137_v5, %v3097_v19  ;;  %vm4122_vm13 = vcmp.lt.s32.totalorder %v3610_v30, 5120 }
 0x671   : > { %v7175_v62 = vadd.f32 %v7174_v54, %v6663_v45  ;;  %v4628_v45 = vld [vmem:[%s8089_s18 + $0x7b8] sm:$0xff]  ;;  %v5141_v54 = vld [vmem:[%s8095_s20 + $0x7c0] sm:$0xff]  ;;  %v6674_v9 = vmul.f32 %v6162_v59, %v6162_v59  ;;  %v3102_v59 = vadd.s32 2072, %v9133_v3 }
 0x672   : > { %v5652_v58 = vsub.f32 %v4628_v45, %v5140_v46  ;;  %v6163_v4 = vsel %vm4115_vm6, %v5651_v50, 0.0  ;;  %v3612_v46 = vadd.s32 %v9137_v5, %v3098_v27  ;;  %vm4123_vm14 = vcmp.lt.s32.totalorder %v3611_v38, 5120 }
 0x673   : > { %v7176_v8 = vadd.f32 %v7175_v62, %v6664_v53  ;;  %v4629_v53 = vld [vmem:[%s8089_s18 + $0x7c0] sm:$0xff]  ;;  %v5142_v62 = vld [vmem:[%s8095_s20 + $0x7c8] sm:$0xff]  ;;  %v6675_v17 = vmul.f32 %v6163_v4, %v6163_v4  ;;  %v3103_v4 = vadd.s32 2080, %v9133_v3 }
 0x674   : > { %v5653_v2 = vsub.f32 %v4629_v53, %v5141_v54  ;;  %v6164_v13 = vsel %vm4116_vm7, %v5652_v58, 0.0  ;;  %v3613_v54 = vadd.s32 %v9137_v5, %v3099_v35  ;;  %vm4124_vm15 = vcmp.lt.s32.totalorder %v3612_v46, 5120 }
 0x675   : > { %v7177_v16 = vadd.f32 %v7176_v8, %v6665_v61  ;;  %v4630_v61 = vld [vmem:[%s8089_s18 + $0x7c8] sm:$0xff]  ;;  %v5143_v8 = vld [vmem:[%s8095_s20 + $0x7d0] sm:$0xff]  ;;  %v6676_v25 = vmul.f32 %v6164_v13, %v6164_v13  ;;  %v3104_v13 = vadd.s32 2088, %v9133_v3 }
 0x676   : > { %v5654_v12 = vsub.f32 %v4630_v61, %v5142_v62  ;;  %v6165_v21 = vsel %vm4117_vm8, %v5653_v2, 0.0  ;;  %v3614_v62 = vadd.s32 %v9137_v5, %v3100_v43  ;;  %vm4125_vm0 = vcmp.lt.s32.totalorder %v3613_v54, 5120 }
 0x677   : > { %v7178_v24 = vadd.f32 %v7177_v16, %v6666_v7  ;;  %v4631_v7 = vld [vmem:[%s8089_s18 + $0x7d0] sm:$0xff]  ;;  %v5144_v16 = vld [vmem:[%s8095_s20 + $0x7d8] sm:$0xff]  ;;  %v6677_v33 = vmul.f32 %v6165_v21, %v6165_v21  ;;  %v3105_v21 = vadd.s32 2096, %v9133_v3 }
 0x678   : > { %v5655_v20 = vsub.f32 %v4631_v7, %v5143_v8  ;;  %v6166_v29 = vsel %vm4118_vm9, %v5654_v12, 0.0  ;;  %v3615_v8 = vadd.s32 %v9137_v5, %v3101_v51  ;;  %vm4126_vm1 = vcmp.lt.s32.totalorder %v3614_v62, 5120 }
 0x679   : > { %v7179_v32 = vadd.f32 %v7178_v24, %v6667_v15  ;;  %v4632_v15 = vld [vmem:[%s8089_s18 + $0x7d8] sm:$0xff]  ;;  %v5145_v24 = vld [vmem:[%s8095_s20 + $0x7e0] sm:$0xff]  ;;  %v6678_v41 = vmul.f32 %v6166_v29, %v6166_v29  ;;  %v3106_v29 = vadd.s32 2104, %v9133_v3 }
 0x67a   : > { %v5656_v28 = vsub.f32 %v4632_v15, %v5144_v16  ;;  %v6167_v37 = vsel %vm4119_vm10, %v5655_v20, 0.0  ;;  %v3616_v16 = vadd.s32 %v9137_v5, %v3102_v59  ;;  %vm4127_vm2 = vcmp.lt.s32.totalorder %v3615_v8, 5120 }
 0x67b   : > { %v7180_v40 = vadd.f32 %v7179_v32, %v6668_v23  ;;  %v4633_v23 = vld [vmem:[%s8089_s18 + $0x7e0] sm:$0xff]  ;;  %v5146_v32 = vld [vmem:[%s8095_s20 + $0x7e8] sm:$0xff]  ;;  %v6679_v49 = vmul.f32 %v6167_v37, %v6167_v37  ;;  %v3107_v37 = vadd.s32 2112, %v9133_v3 }
 0x67c   : > { %v5657_v36 = vsub.f32 %v4633_v23, %v5145_v24  ;;  %v6168_v45 = vsel %vm4120_vm11, %v5656_v28, 0.0  ;;  %v3617_v24 = vadd.s32 %v9137_v5, %v3103_v4  ;;  %vm4128_vm3 = vcmp.lt.s32.totalorder %v3616_v16, 5120 }
 0x67d   : > { %v7181_v48 = vadd.f32 %v7180_v40, %v6669_v31  ;;  %v4634_v31 = vld [vmem:[%s8089_s18 + $0x7e8] sm:$0xff]  ;;  %v5147_v40 = vld [vmem:[%s8095_s20 + $0x7f0] sm:$0xff]  ;;  %v6680_v57 = vmul.f32 %v6168_v45, %v6168_v45  ;;  %v3108_v45 = vadd.s32 2120, %v9133_v3 }
 0x67e   : > { %v5658_v44 = vsub.f32 %v4634_v31, %v5146_v32  ;;  %v6169_v53 = vsel %vm4121_vm12, %v5657_v36, 0.0  ;;  %v3618_v32 = vadd.s32 %v9137_v5, %v3104_v13  ;;  %vm4129_vm4 = vcmp.lt.s32.totalorder %v3617_v24, 5120 }
 0x67f   : > { %v7182_v56 = vadd.f32 %v7181_v48, %v6670_v39  ;;  %v4635_v39 = vld [vmem:[%s8089_s18 + $0x7f0] sm:$0xff]  ;;  %v5148_v48 = vld [vmem:[%s8095_s20 + $0x7f8] sm:$0xff]  ;;  %v6681_v1 = vmul.f32 %v6169_v53, %v6169_v53  ;;  %v3109_v53 = vadd.s32 2128, %v9133_v3 }
 0x680   : > { %v5659_v52 = vsub.f32 %v4635_v39, %v5147_v40  ;;  %v6170_v61 = vsel %vm4122_vm13, %v5658_v44, 0.0  ;;  %v3619_v40 = vadd.s32 %v9137_v5, %v3105_v21  ;;  %vm4130_vm5 = vcmp.lt.s32.totalorder %v3618_v32, 5120 }
 0x681   : > { %v7183_v0 = vadd.f32 %v7182_v56, %v6671_v47  ;;  %v4636_v47 = vld [vmem:[%s8089_s18 + $0x7f8] sm:$0xff]  ;;  %v5149_v56 = vld [vmem:[%s8095_s20 + $0x800] sm:$0xff]  ;;  %v6682_v11 = vmul.f32 %v6170_v61, %v6170_v61  ;;  %v3110_v61 = vadd.s32 2136, %v9133_v3 }
 0x682   : > { %v5660_v60 = vsub.f32 %v4636_v47, %v5148_v48  ;;  %v6171_v7 = vsel %vm4123_vm14, %v5659_v52, 0.0  ;;  %v3620_v48 = vadd.s32 %v9137_v5, %v3106_v29  ;;  %vm4131_vm6 = vcmp.lt.s32.totalorder %v3619_v40, 5120 }
 0x683   : > { %v7184_v10 = vadd.f32 %v7183_v0, %v6672_v55  ;;  %v4637_v55 = vld [vmem:[%s8089_s18 + $0x800] sm:$0xff]  ;;  %v5150_v0 = vld [vmem:[%s8095_s20 + $0x808] sm:$0xff]  ;;  %v6683_v19 = vmul.f32 %v6171_v7, %v6171_v7  ;;  %v3111_v7 = vadd.s32 2144, %v9133_v3 }
 0x684   : > { %v5661_v6 = vsub.f32 %v4637_v55, %v5149_v56  ;;  %v6172_v15 = vsel %vm4124_vm15, %v5660_v60, 0.0  ;;  %v3621_v56 = vadd.s32 %v9137_v5, %v3107_v37  ;;  %vm4132_vm7 = vcmp.lt.s32.totalorder %v3620_v48, 5120 }
 0x685   : > { %v7185_v18 = vadd.f32 %v7184_v10, %v6673_v63  ;;  %v4638_v63 = vld [vmem:[%s8089_s18 + $0x808] sm:$0xff]  ;;  %v5151_v10 = vld [vmem:[%s8095_s20 + $0x810] sm:$0xff]  ;;  %v6684_v27 = vmul.f32 %v6172_v15, %v6172_v15  ;;  %v3112_v15 = vadd.s32 2152, %v9133_v3 }
 0x686   : > { %v5662_v14 = vsub.f32 %v4638_v63, %v5150_v0  ;;  %v6173_v23 = vsel %vm4125_vm0, %v5661_v6, 0.0  ;;  %v3622_v0 = vadd.s32 %v9137_v5, %v3108_v45  ;;  %vm4133_vm8 = vcmp.lt.s32.totalorder %v3621_v56, 5120 }
 0x687   : > { %v7186_v26 = vadd.f32 %v7185_v18, %v6674_v9  ;;  %v4639_v9 = vld [vmem:[%s8089_s18 + $0x810] sm:$0xff]  ;;  %v5152_v18 = vld [vmem:[%s8095_s20 + $0x818] sm:$0xff]  ;;  %v6685_v35 = vmul.f32 %v6173_v23, %v6173_v23  ;;  %v3113_v23 = vadd.s32 2160, %v9133_v3 }
 0x688   : > { %v5663_v22 = vsub.f32 %v4639_v9, %v5151_v10  ;;  %v6174_v31 = vsel %vm4126_vm1, %v5662_v14, 0.0  ;;  %v3623_v10 = vadd.s32 %v9137_v5, %v3109_v53  ;;  %vm4134_vm9 = vcmp.lt.s32.totalorder %v3622_v0, 5120 }
 0x689   : > { %v7187_v34 = vadd.f32 %v7186_v26, %v6675_v17  ;;  %v4640_v17 = vld [vmem:[%s8089_s18 + $0x818] sm:$0xff]  ;;  %v5153_v26 = vld [vmem:[%s8095_s20 + $0x820] sm:$0xff]  ;;  %v6686_v43 = vmul.f32 %v6174_v31, %v6174_v31  ;;  %v3114_v31 = vadd.s32 2168, %v9133_v3 }
 0x68a   : > { %v5664_v30 = vsub.f32 %v4640_v17, %v5152_v18  ;;  %v6175_v39 = vsel %vm4127_vm2, %v5663_v22, 0.0  ;;  %v3624_v18 = vadd.s32 %v9137_v5, %v3110_v61  ;;  %vm4135_vm10 = vcmp.lt.s32.totalorder %v3623_v10, 5120 }
 0x68b   : > { %v7188_v42 = vadd.f32 %v7187_v34, %v6676_v25  ;;  %v4641_v25 = vld [vmem:[%s8089_s18 + $0x820] sm:$0xff]  ;;  %v5154_v34 = vld [vmem:[%s8095_s20 + $0x828] sm:$0xff]  ;;  %v6687_v51 = vmul.f32 %v6175_v39, %v6175_v39  ;;  %v3115_v39 = vadd.s32 2176, %v9133_v3 }
 0x68c   : > { %v5665_v38 = vsub.f32 %v4641_v25, %v5153_v26  ;;  %v6176_v47 = vsel %vm4128_vm3, %v5664_v30, 0.0  ;;  %v3625_v26 = vadd.s32 %v9137_v5, %v3111_v7  ;;  %vm4136_vm11 = vcmp.lt.s32.totalorder %v3624_v18, 5120 }
 0x68d   : > { %v7189_v50 = vadd.f32 %v7188_v42, %v6677_v33  ;;  %v4642_v33 = vld [vmem:[%s8089_s18 + $0x828] sm:$0xff]  ;;  %v5155_v42 = vld [vmem:[%s8095_s20 + $0x830] sm:$0xff]  ;;  %v6688_v59 = vmul.f32 %v6176_v47, %v6176_v47  ;;  %v3116_v47 = vadd.s32 2184, %v9133_v3 }
 0x68e   : > { %v5666_v46 = vsub.f32 %v4642_v33, %v5154_v34  ;;  %v6177_v55 = vsel %vm4129_vm4, %v5665_v38, 0.0  ;;  %v3626_v34 = vadd.s32 %v9137_v5, %v3112_v15  ;;  %vm4137_vm12 = vcmp.lt.s32.totalorder %v3625_v26, 5120 }
 0x68f   : > { %v7190_v58 = vadd.f32 %v7189_v50, %v6678_v41  ;;  %v4643_v41 = vld [vmem:[%s8089_s18 + $0x830] sm:$0xff]  ;;  %v5156_v50 = vld [vmem:[%s8095_s20 + $0x838] sm:$0xff]  ;;  %v6689_v4 = vmul.f32 %v6177_v55, %v6177_v55  ;;  %v3117_v55 = vadd.s32 2192, %v9133_v3 }
 0x690   : > { %v5667_v54 = vsub.f32 %v4643_v41, %v5155_v42  ;;  %v6178_v63 = vsel %vm4130_vm5, %v5666_v46, 0.0  ;;  %v3627_v42 = vadd.s32 %v9137_v5, %v3113_v23  ;;  %vm4138_vm13 = vcmp.lt.s32.totalorder %v3626_v34, 5120 }
 0x691   : > { %v7191_v2 = vadd.f32 %v7190_v58, %v6679_v49  ;;  %v4644_v49 = vld [vmem:[%s8089_s18 + $0x838] sm:$0xff]  ;;  %v5157_v58 = vld [vmem:[%s8095_s20 + $0x840] sm:$0xff]  ;;  %v6690_v13 = vmul.f32 %v6178_v63, %v6178_v63  ;;  %v3118_v63 = vadd.s32 2200, %v9133_v3 }
 0x692   : > { %v5668_v62 = vsub.f32 %v4644_v49, %v5156_v50  ;;  %v6179_v9 = vsel %vm4131_vm6, %v5667_v54, 0.0  ;;  %v3628_v50 = vadd.s32 %v9137_v5, %v3114_v31  ;;  %vm4139_vm14 = vcmp.lt.s32.totalorder %v3627_v42, 5120 }
 0x693   : > { %v7192_v12 = vadd.f32 %v7191_v2, %v6680_v57  ;;  %v4645_v57 = vld [vmem:[%s8089_s18 + $0x840] sm:$0xff]  ;;  %v5158_v2 = vld [vmem:[%s8095_s20 + $0x848] sm:$0xff]  ;;  %v6691_v21 = vmul.f32 %v6179_v9, %v6179_v9  ;;  %v3119_v9 = vadd.s32 2208, %v9133_v3 }
 0x694   : > { %v5669_v8 = vsub.f32 %v4645_v57, %v5157_v58  ;;  %v6180_v17 = vsel %vm4132_vm7, %v5668_v62, 0.0  ;;  %v3629_v58 = vadd.s32 %v9137_v5, %v3115_v39  ;;  %vm4140_vm15 = vcmp.lt.s32.totalorder %v3628_v50, 5120 }
 0x695   : > { %v7193_v20 = vadd.f32 %v7192_v12, %v6681_v1  ;;  %v4646_v1 = vld [vmem:[%s8089_s18 + $0x848] sm:$0xff]  ;;  %v5159_v12 = vld [vmem:[%s8095_s20 + $0x850] sm:$0xff]  ;;  %v6692_v29 = vmul.f32 %v6180_v17, %v6180_v17  ;;  %v3120_v17 = vadd.s32 2216, %v9133_v3 }
 0x696   : > { %v5670_v16 = vsub.f32 %v4646_v1, %v5158_v2  ;;  %v6181_v25 = vsel %vm4133_vm8, %v5669_v8, 0.0  ;;  %v3630_v2 = vadd.s32 %v9137_v5, %v3116_v47  ;;  %vm4141_vm0 = vcmp.lt.s32.totalorder %v3629_v58, 5120 }
 0x697   : > { %v7194_v28 = vadd.f32 %v7193_v20, %v6682_v11  ;;  %v4647_v11 = vld [vmem:[%s8089_s18 + $0x850] sm:$0xff]  ;;  %v5160_v20 = vld [vmem:[%s8095_s20 + $0x858] sm:$0xff]  ;;  %v6693_v37 = vmul.f32 %v6181_v25, %v6181_v25  ;;  %v3121_v25 = vadd.s32 2224, %v9133_v3 }
 0x698   : > { %v5671_v24 = vsub.f32 %v4647_v11, %v5159_v12  ;;  %v6182_v33 = vsel %vm4134_vm9, %v5670_v16, 0.0  ;;  %v3631_v12 = vadd.s32 %v9137_v5, %v3117_v55  ;;  %vm4142_vm1 = vcmp.lt.s32.totalorder %v3630_v2, 5120 }
 0x699   : > { %v7195_v36 = vadd.f32 %v7194_v28, %v6683_v19  ;;  %v4648_v19 = vld [vmem:[%s8089_s18 + $0x858] sm:$0xff]  ;;  %v5161_v28 = vld [vmem:[%s8095_s20 + $0x860] sm:$0xff]  ;;  %v6694_v45 = vmul.f32 %v6182_v33, %v6182_v33  ;;  %v3122_v33 = vadd.s32 2232, %v9133_v3 }
 0x69a   : > { %v5672_v32 = vsub.f32 %v4648_v19, %v5160_v20  ;;  %v6183_v41 = vsel %vm4135_vm10, %v5671_v24, 0.0  ;;  %v3632_v20 = vadd.s32 %v9137_v5, %v3118_v63  ;;  %vm4143_vm2 = vcmp.lt.s32.totalorder %v3631_v12, 5120 }
 0x69b   : > { %v7196_v44 = vadd.f32 %v7195_v36, %v6684_v27  ;;  %v4649_v27 = vld [vmem:[%s8089_s18 + $0x860] sm:$0xff]  ;;  %v5162_v36 = vld [vmem:[%s8095_s20 + $0x868] sm:$0xff]  ;;  %v6695_v53 = vmul.f32 %v6183_v41, %v6183_v41  ;;  %v3123_v41 = vadd.s32 2240, %v9133_v3 }
 0x69c   : > { %v5673_v40 = vsub.f32 %v4649_v27, %v5161_v28  ;;  %v6184_v49 = vsel %vm4136_vm11, %v5672_v32, 0.0  ;;  %v3633_v28 = vadd.s32 %v9137_v5, %v3119_v9  ;;  %vm4144_vm3 = vcmp.lt.s32.totalorder %v3632_v20, 5120 }
 0x69d   : > { %v7197_v52 = vadd.f32 %v7196_v44, %v6685_v35  ;;  %v4650_v35 = vld [vmem:[%s8089_s18 + $0x868] sm:$0xff]  ;;  %v5163_v44 = vld [vmem:[%s8095_s20 + $0x870] sm:$0xff]  ;;  %v6696_v61 = vmul.f32 %v6184_v49, %v6184_v49  ;;  %v3124_v49 = vadd.s32 2248, %v9133_v3 }
 0x69e   : > { %v5674_v48 = vsub.f32 %v4650_v35, %v5162_v36  ;;  %v6185_v57 = vsel %vm4137_vm12, %v5673_v40, 0.0  ;;  %v3634_v36 = vadd.s32 %v9137_v5, %v3120_v17  ;;  %vm4145_vm4 = vcmp.lt.s32.totalorder %v3633_v28, 5120 }
 0x69f   : > { %v7198_v60 = vadd.f32 %v7197_v52, %v6686_v43  ;;  %v4651_v43 = vld [vmem:[%s8089_s18 + $0x870] sm:$0xff]  ;;  %v5164_v52 = vld [vmem:[%s8095_s20 + $0x878] sm:$0xff]  ;;  %v6697_v7 = vmul.f32 %v6185_v57, %v6185_v57  ;;  %v3125_v57 = vadd.s32 2256, %v9133_v3 }
 0x6a0   : > { %v5675_v56 = vsub.f32 %v4651_v43, %v5163_v44  ;;  %v6186_v1 = vsel %vm4138_vm13, %v5674_v48, 0.0  ;;  %v3635_v44 = vadd.s32 %v9137_v5, %v3121_v25  ;;  %vm4146_vm5 = vcmp.lt.s32.totalorder %v3634_v36, 5120 }
 0x6a1   : > { %v7199_v6 = vadd.f32 %v7198_v60, %v6687_v51  ;;  %v4652_v51 = vld [vmem:[%s8089_s18 + $0x878] sm:$0xff]  ;;  %v5165_v60 = vld [vmem:[%s8095_s20 + $0x880] sm:$0xff]  ;;  %v6698_v15 = vmul.f32 %v6186_v1, %v6186_v1  ;;  %v3126_v1 = vadd.s32 2264, %v9133_v3 }
 0x6a2   : > { %v5676_v0 = vsub.f32 %v4652_v51, %v5164_v52  ;;  %v6187_v11 = vsel %vm4139_vm14, %v5675_v56, 0.0  ;;  %v3636_v52 = vadd.s32 %v9137_v5, %v3122_v33  ;;  %vm4147_vm6 = vcmp.lt.s32.totalorder %v3635_v44, 5120 }
 0x6a3   : > { %v7200_v14 = vadd.f32 %v7199_v6, %v6688_v59  ;;  %v4653_v59 = vld [vmem:[%s8089_s18 + $0x880] sm:$0xff]  ;;  %v5166_v6 = vld [vmem:[%s8095_s20 + $0x888] sm:$0xff]  ;;  %v6699_v23 = vmul.f32 %v6187_v11, %v6187_v11  ;;  %v3127_v11 = vadd.s32 2272, %v9133_v3 }
 0x6a4   : > { %v5677_v10 = vsub.f32 %v4653_v59, %v5165_v60  ;;  %v6188_v19 = vsel %vm4140_vm15, %v5676_v0, 0.0  ;;  %v3637_v60 = vadd.s32 %v9137_v5, %v3123_v41  ;;  %vm4148_vm7 = vcmp.lt.s32.totalorder %v3636_v52, 5120 }
 0x6a5   : > { %v7201_v22 = vadd.f32 %v7200_v14, %v6689_v4  ;;  %v4654_v4 = vld [vmem:[%s8089_s18 + $0x888] sm:$0xff]  ;;  %v5167_v14 = vld [vmem:[%s8095_s20 + $0x890] sm:$0xff]  ;;  %v6700_v31 = vmul.f32 %v6188_v19, %v6188_v19  ;;  %v3128_v19 = vadd.s32 2280, %v9133_v3 }
 0x6a6   : > { %v5678_v18 = vsub.f32 %v4654_v4, %v5166_v6  ;;  %v6189_v27 = vsel %vm4141_vm0, %v5677_v10, 0.0  ;;  %v3638_v6 = vadd.s32 %v9137_v5, %v3124_v49  ;;  %vm4149_vm8 = vcmp.lt.s32.totalorder %v3637_v60, 5120 }
 0x6a7   : > { %v7202_v30 = vadd.f32 %v7201_v22, %v6690_v13  ;;  %v4655_v13 = vld [vmem:[%s8089_s18 + $0x890] sm:$0xff]  ;;  %v5168_v22 = vld [vmem:[%s8095_s20 + $0x898] sm:$0xff]  ;;  %v6701_v39 = vmul.f32 %v6189_v27, %v6189_v27  ;;  %v3129_v27 = vadd.s32 2288, %v9133_v3 }
 0x6a8   : > { %v5679_v26 = vsub.f32 %v4655_v13, %v5167_v14  ;;  %v6190_v35 = vsel %vm4142_vm1, %v5678_v18, 0.0  ;;  %v3639_v14 = vadd.s32 %v9137_v5, %v3125_v57  ;;  %vm4150_vm9 = vcmp.lt.s32.totalorder %v3638_v6, 5120 }
 0x6a9   : > { %v7203_v38 = vadd.f32 %v7202_v30, %v6691_v21  ;;  %v4656_v21 = vld [vmem:[%s8089_s18 + $0x898] sm:$0xff]  ;;  %v5169_v30 = vld [vmem:[%s8095_s20 + $0x8a0] sm:$0xff]  ;;  %v6702_v47 = vmul.f32 %v6190_v35, %v6190_v35  ;;  %v3130_v35 = vadd.s32 2296, %v9133_v3 }
 0x6aa   : > { %v5680_v34 = vsub.f32 %v4656_v21, %v5168_v22  ;;  %v6191_v43 = vsel %vm4143_vm2, %v5679_v26, 0.0  ;;  %v3640_v22 = vadd.s32 %v9137_v5, %v3126_v1  ;;  %vm4151_vm10 = vcmp.lt.s32.totalorder %v3639_v14, 5120 }
 0x6ab   : > { %v7204_v46 = vadd.f32 %v7203_v38, %v6692_v29  ;;  %v4657_v29 = vld [vmem:[%s8089_s18 + $0x8a0] sm:$0xff]  ;;  %v5170_v38 = vld [vmem:[%s8095_s20 + $0x8a8] sm:$0xff]  ;;  %v6703_v55 = vmul.f32 %v6191_v43, %v6191_v43  ;;  %v3131_v43 = vadd.s32 2304, %v9133_v3 }
 0x6ac   : > { %v5681_v42 = vsub.f32 %v4657_v29, %v5169_v30  ;;  %v6192_v51 = vsel %vm4144_vm3, %v5680_v34, 0.0  ;;  %v3641_v30 = vadd.s32 %v9137_v5, %v3127_v11  ;;  %vm4152_vm11 = vcmp.lt.s32.totalorder %v3640_v22, 5120 }
 0x6ad   : > { %v7205_v54 = vadd.f32 %v7204_v46, %v6693_v37  ;;  %v4658_v37 = vld [vmem:[%s8089_s18 + $0x8a8] sm:$0xff]  ;;  %v5171_v46 = vld [vmem:[%s8095_s20 + $0x8b0] sm:$0xff]  ;;  %v6704_v63 = vmul.f32 %v6192_v51, %v6192_v51  ;;  %v3132_v51 = vadd.s32 2312, %v9133_v3 }
 0x6ae   : > { %v5682_v50 = vsub.f32 %v4658_v37, %v5170_v38  ;;  %v6193_v59 = vsel %vm4145_vm4, %v5681_v42, 0.0  ;;  %v3642_v38 = vadd.s32 %v9137_v5, %v3128_v19  ;;  %vm4153_vm12 = vcmp.lt.s32.totalorder %v3641_v30, 5120 }
 0x6af   : > { %v7206_v62 = vadd.f32 %v7205_v54, %v6694_v45  ;;  %v4659_v45 = vld [vmem:[%s8089_s18 + $0x8b0] sm:$0xff]  ;;  %v5172_v54 = vld [vmem:[%s8095_s20 + $0x8b8] sm:$0xff]  ;;  %v6705_v9 = vmul.f32 %v6193_v59, %v6193_v59  ;;  %v3133_v59 = vadd.s32 2320, %v9133_v3 }
 0x6b0   : > { %v5683_v58 = vsub.f32 %v4659_v45, %v5171_v46  ;;  %v6194_v4 = vsel %vm4146_vm5, %v5682_v50, 0.0  ;;  %v3643_v46 = vadd.s32 %v9137_v5, %v3129_v27  ;;  %vm4154_vm13 = vcmp.lt.s32.totalorder %v3642_v38, 5120 }
 0x6b1   : > { %v7207_v8 = vadd.f32 %v7206_v62, %v6695_v53  ;;  %v4660_v53 = vld [vmem:[%s8089_s18 + $0x8b8] sm:$0xff]  ;;  %v5173_v62 = vld [vmem:[%s8095_s20 + $0x8c0] sm:$0xff]  ;;  %v6706_v17 = vmul.f32 %v6194_v4, %v6194_v4  ;;  %v3134_v4 = vadd.s32 2328, %v9133_v3 }
 0x6b2   : > { %v5684_v2 = vsub.f32 %v4660_v53, %v5172_v54  ;;  %v6195_v13 = vsel %vm4147_vm6, %v5683_v58, 0.0  ;;  %v3644_v54 = vadd.s32 %v9137_v5, %v3130_v35  ;;  %vm4155_vm14 = vcmp.lt.s32.totalorder %v3643_v46, 5120 }
 0x6b3   : > { %v7208_v16 = vadd.f32 %v7207_v8, %v6696_v61  ;;  %v4661_v61 = vld [vmem:[%s8089_s18 + $0x8c0] sm:$0xff]  ;;  %v5174_v8 = vld [vmem:[%s8095_s20 + $0x8c8] sm:$0xff]  ;;  %v6707_v25 = vmul.f32 %v6195_v13, %v6195_v13  ;;  %v3135_v13 = vadd.s32 2336, %v9133_v3 }
 0x6b4   : > { %v5685_v12 = vsub.f32 %v4661_v61, %v5173_v62  ;;  %v6196_v21 = vsel %vm4148_vm7, %v5684_v2, 0.0  ;;  %v3645_v62 = vadd.s32 %v9137_v5, %v3131_v43  ;;  %vm4156_vm15 = vcmp.lt.s32.totalorder %v3644_v54, 5120 }
 0x6b5   : > { %v7209_v24 = vadd.f32 %v7208_v16, %v6697_v7  ;;  %v4662_v7 = vld [vmem:[%s8089_s18 + $0x8c8] sm:$0xff]  ;;  %v5175_v16 = vld [vmem:[%s8095_s20 + $0x8d0] sm:$0xff]  ;;  %v6708_v33 = vmul.f32 %v6196_v21, %v6196_v21  ;;  %v3136_v21 = vadd.s32 2344, %v9133_v3 }
 0x6b6   : > { %v5686_v20 = vsub.f32 %v4662_v7, %v5174_v8  ;;  %v6197_v29 = vsel %vm4149_vm8, %v5685_v12, 0.0  ;;  %v3646_v8 = vadd.s32 %v9137_v5, %v3132_v51  ;;  %vm4157_vm0 = vcmp.lt.s32.totalorder %v3645_v62, 5120 }
 0x6b7   : > { %v7210_v32 = vadd.f32 %v7209_v24, %v6698_v15  ;;  %v4663_v15 = vld [vmem:[%s8089_s18 + $0x8d0] sm:$0xff]  ;;  %v5176_v24 = vld [vmem:[%s8095_s20 + $0x8d8] sm:$0xff]  ;;  %v6709_v41 = vmul.f32 %v6197_v29, %v6197_v29  ;;  %v3137_v29 = vadd.s32 2352, %v9133_v3 }
 0x6b8   : > { %v5687_v28 = vsub.f32 %v4663_v15, %v5175_v16  ;;  %v6198_v37 = vsel %vm4150_vm9, %v5686_v20, 0.0  ;;  %v3647_v16 = vadd.s32 %v9137_v5, %v3133_v59  ;;  %vm4158_vm1 = vcmp.lt.s32.totalorder %v3646_v8, 5120 }
 0x6b9   : > { %v7211_v40 = vadd.f32 %v7210_v32, %v6699_v23  ;;  %v4664_v23 = vld [vmem:[%s8089_s18 + $0x8d8] sm:$0xff]  ;;  %v5177_v32 = vld [vmem:[%s8095_s20 + $0x8e0] sm:$0xff]  ;;  %v6710_v49 = vmul.f32 %v6198_v37, %v6198_v37  ;;  %v3138_v37 = vadd.s32 2360, %v9133_v3 }
 0x6ba   : > { %v5688_v36 = vsub.f32 %v4664_v23, %v5176_v24  ;;  %v6199_v45 = vsel %vm4151_vm10, %v5687_v28, 0.0  ;;  %v3648_v24 = vadd.s32 %v9137_v5, %v3134_v4  ;;  %vm4159_vm2 = vcmp.lt.s32.totalorder %v3647_v16, 5120 }
 0x6bb   : > { %v7212_v48 = vadd.f32 %v7211_v40, %v6700_v31  ;;  %v4665_v31 = vld [vmem:[%s8089_s18 + $0x8e0] sm:$0xff]  ;;  %v5178_v40 = vld [vmem:[%s8095_s20 + $0x8e8] sm:$0xff]  ;;  %v6711_v57 = vmul.f32 %v6199_v45, %v6199_v45  ;;  %v3139_v45 = vadd.s32 2368, %v9133_v3 }
 0x6bc   : > { %v5689_v44 = vsub.f32 %v4665_v31, %v5177_v32  ;;  %v6200_v53 = vsel %vm4152_vm11, %v5688_v36, 0.0  ;;  %v3649_v32 = vadd.s32 %v9137_v5, %v3135_v13  ;;  %vm4160_vm3 = vcmp.lt.s32.totalorder %v3648_v24, 5120 }
 0x6bd   : > { %v7213_v56 = vadd.f32 %v7212_v48, %v6701_v39  ;;  %v4666_v39 = vld [vmem:[%s8089_s18 + $0x8e8] sm:$0xff]  ;;  %v5179_v48 = vld [vmem:[%s8095_s20 + $0x8f0] sm:$0xff]  ;;  %v6712_v1 = vmul.f32 %v6200_v53, %v6200_v53  ;;  %v3140_v53 = vadd.s32 2376, %v9133_v3 }
 0x6be   : > { %v5690_v52 = vsub.f32 %v4666_v39, %v5178_v40  ;;  %v6201_v61 = vsel %vm4153_vm12, %v5689_v44, 0.0  ;;  %v3650_v40 = vadd.s32 %v9137_v5, %v3136_v21  ;;  %vm4161_vm4 = vcmp.lt.s32.totalorder %v3649_v32, 5120 }
 0x6bf   : > { %v7214_v0 = vadd.f32 %v7213_v56, %v6702_v47  ;;  %v4667_v47 = vld [vmem:[%s8089_s18 + $0x8f0] sm:$0xff]  ;;  %v5180_v56 = vld [vmem:[%s8095_s20 + $0x8f8] sm:$0xff]  ;;  %v6713_v11 = vmul.f32 %v6201_v61, %v6201_v61  ;;  %v3141_v61 = vadd.s32 2384, %v9133_v3 }
 0x6c0   : > { %v5691_v60 = vsub.f32 %v4667_v47, %v5179_v48  ;;  %v6202_v7 = vsel %vm4154_vm13, %v5690_v52, 0.0  ;;  %v3651_v48 = vadd.s32 %v9137_v5, %v3137_v29  ;;  %vm4162_vm5 = vcmp.lt.s32.totalorder %v3650_v40, 5120 }
 0x6c1   : > { %v7215_v10 = vadd.f32 %v7214_v0, %v6703_v55  ;;  %v4668_v55 = vld [vmem:[%s8089_s18 + $0x8f8] sm:$0xff]  ;;  %v5181_v0 = vld [vmem:[%s8095_s20 + $0x900] sm:$0xff]  ;;  %v6714_v19 = vmul.f32 %v6202_v7, %v6202_v7  ;;  %v3142_v7 = vadd.s32 2392, %v9133_v3 }
 0x6c2   : > { %v5692_v6 = vsub.f32 %v4668_v55, %v5180_v56  ;;  %v6203_v15 = vsel %vm4155_vm14, %v5691_v60, 0.0  ;;  %v3652_v56 = vadd.s32 %v9137_v5, %v3138_v37  ;;  %vm4163_vm6 = vcmp.lt.s32.totalorder %v3651_v48, 5120 }
 0x6c3   : > { %v7216_v18 = vadd.f32 %v7215_v10, %v6704_v63  ;;  %v4669_v63 = vld [vmem:[%s8089_s18 + $0x900] sm:$0xff]  ;;  %v5182_v10 = vld [vmem:[%s8095_s20 + $0x908] sm:$0xff]  ;;  %v6715_v27 = vmul.f32 %v6203_v15, %v6203_v15  ;;  %v3143_v15 = vadd.s32 2400, %v9133_v3 }
 0x6c4   : > { %v5693_v14 = vsub.f32 %v4669_v63, %v5181_v0  ;;  %v6204_v23 = vsel %vm4156_vm15, %v5692_v6, 0.0  ;;  %v3653_v0 = vadd.s32 %v9137_v5, %v3139_v45  ;;  %vm4164_vm7 = vcmp.lt.s32.totalorder %v3652_v56, 5120 }
 0x6c5   : > { %v7217_v26 = vadd.f32 %v7216_v18, %v6705_v9  ;;  %v4670_v9 = vld [vmem:[%s8089_s18 + $0x908] sm:$0xff]  ;;  %v5183_v18 = vld [vmem:[%s8095_s20 + $0x910] sm:$0xff]  ;;  %v6716_v35 = vmul.f32 %v6204_v23, %v6204_v23  ;;  %v3144_v23 = vadd.s32 2408, %v9133_v3 }
 0x6c6   : > { %v5694_v22 = vsub.f32 %v4670_v9, %v5182_v10  ;;  %v6205_v31 = vsel %vm4157_vm0, %v5693_v14, 0.0  ;;  %v3654_v10 = vadd.s32 %v9137_v5, %v3140_v53  ;;  %vm4165_vm8 = vcmp.lt.s32.totalorder %v3653_v0, 5120 }
 0x6c7   : > { %v7218_v34 = vadd.f32 %v7217_v26, %v6706_v17  ;;  %v4671_v17 = vld [vmem:[%s8089_s18 + $0x910] sm:$0xff]  ;;  %v5184_v26 = vld [vmem:[%s8095_s20 + $0x918] sm:$0xff]  ;;  %v6717_v43 = vmul.f32 %v6205_v31, %v6205_v31  ;;  %v3145_v31 = vadd.s32 2416, %v9133_v3 }
 0x6c8   : > { %v5695_v30 = vsub.f32 %v4671_v17, %v5183_v18  ;;  %v6206_v39 = vsel %vm4158_vm1, %v5694_v22, 0.0  ;;  %v3655_v18 = vadd.s32 %v9137_v5, %v3141_v61  ;;  %vm4166_vm9 = vcmp.lt.s32.totalorder %v3654_v10, 5120 }
 0x6c9   : > { %v7219_v42 = vadd.f32 %v7218_v34, %v6707_v25  ;;  %v4672_v25 = vld [vmem:[%s8089_s18 + $0x918] sm:$0xff]  ;;  %v5185_v34 = vld [vmem:[%s8095_s20 + $0x920] sm:$0xff]  ;;  %v6718_v51 = vmul.f32 %v6206_v39, %v6206_v39  ;;  %v3146_v39 = vadd.s32 2424, %v9133_v3 }
 0x6ca   : > { %v5696_v38 = vsub.f32 %v4672_v25, %v5184_v26  ;;  %v6207_v47 = vsel %vm4159_vm2, %v5695_v30, 0.0  ;;  %v3656_v26 = vadd.s32 %v9137_v5, %v3142_v7  ;;  %vm4167_vm10 = vcmp.lt.s32.totalorder %v3655_v18, 5120 }
 0x6cb   : > { %v7220_v50 = vadd.f32 %v7219_v42, %v6708_v33  ;;  %v4673_v33 = vld [vmem:[%s8089_s18 + $0x920] sm:$0xff]  ;;  %v5186_v42 = vld [vmem:[%s8095_s20 + $0x928] sm:$0xff]  ;;  %v6719_v59 = vmul.f32 %v6207_v47, %v6207_v47  ;;  %v3147_v47 = vadd.s32 2432, %v9133_v3 }
 0x6cc   : > { %v5697_v46 = vsub.f32 %v4673_v33, %v5185_v34  ;;  %v6208_v55 = vsel %vm4160_vm3, %v5696_v38, 0.0  ;;  %v3657_v34 = vadd.s32 %v9137_v5, %v3143_v15  ;;  %vm4168_vm11 = vcmp.lt.s32.totalorder %v3656_v26, 5120 }
 0x6cd   : > { %v7221_v58 = vadd.f32 %v7220_v50, %v6709_v41  ;;  %v4674_v41 = vld [vmem:[%s8089_s18 + $0x928] sm:$0xff]  ;;  %v5187_v50 = vld [vmem:[%s8095_s20 + $0x930] sm:$0xff]  ;;  %v6720_v4 = vmul.f32 %v6208_v55, %v6208_v55  ;;  %v3148_v55 = vadd.s32 2440, %v9133_v3 }
 0x6ce   : > { %v5698_v54 = vsub.f32 %v4674_v41, %v5186_v42  ;;  %v6209_v63 = vsel %vm4161_vm4, %v5697_v46, 0.0  ;;  %v3658_v42 = vadd.s32 %v9137_v5, %v3144_v23  ;;  %vm4169_vm12 = vcmp.lt.s32.totalorder %v3657_v34, 5120 }
 0x6cf   : > { %v7222_v2 = vadd.f32 %v7221_v58, %v6710_v49  ;;  %v4675_v49 = vld [vmem:[%s8089_s18 + $0x930] sm:$0xff]  ;;  %v5188_v58 = vld [vmem:[%s8095_s20 + $0x938] sm:$0xff]  ;;  %v6721_v13 = vmul.f32 %v6209_v63, %v6209_v63  ;;  %v3149_v63 = vadd.s32 2448, %v9133_v3 }
 0x6d0   : > { %v5699_v62 = vsub.f32 %v4675_v49, %v5187_v50  ;;  %v6210_v9 = vsel %vm4162_vm5, %v5698_v54, 0.0  ;;  %v3659_v50 = vadd.s32 %v9137_v5, %v3145_v31  ;;  %vm4170_vm13 = vcmp.lt.s32.totalorder %v3658_v42, 5120 }
 0x6d1   : > { %v7223_v12 = vadd.f32 %v7222_v2, %v6711_v57  ;;  %v4676_v57 = vld [vmem:[%s8089_s18 + $0x938] sm:$0xff]  ;;  %v5189_v2 = vld [vmem:[%s8095_s20 + $0x940] sm:$0xff]  ;;  %v6722_v21 = vmul.f32 %v6210_v9, %v6210_v9  ;;  %v3150_v9 = vadd.s32 2456, %v9133_v3 }
 0x6d2   : > { %v5700_v8 = vsub.f32 %v4676_v57, %v5188_v58  ;;  %v6211_v17 = vsel %vm4163_vm6, %v5699_v62, 0.0  ;;  %v3660_v58 = vadd.s32 %v9137_v5, %v3146_v39  ;;  %vm4171_vm14 = vcmp.lt.s32.totalorder %v3659_v50, 5120 }
 0x6d3   : > { %v7224_v20 = vadd.f32 %v7223_v12, %v6712_v1  ;;  %v4677_v1 = vld [vmem:[%s8089_s18 + $0x940] sm:$0xff]  ;;  %v5190_v12 = vld [vmem:[%s8095_s20 + $0x948] sm:$0xff]  ;;  %v6723_v29 = vmul.f32 %v6211_v17, %v6211_v17  ;;  %v3151_v17 = vadd.s32 2464, %v9133_v3 }
 0x6d4   : > { %v5701_v16 = vsub.f32 %v4677_v1, %v5189_v2  ;;  %v6212_v25 = vsel %vm4164_vm7, %v5700_v8, 0.0  ;;  %v3661_v2 = vadd.s32 %v9137_v5, %v3147_v47  ;;  %vm4172_vm15 = vcmp.lt.s32.totalorder %v3660_v58, 5120 }
 0x6d5   : > { %v7225_v28 = vadd.f32 %v7224_v20, %v6713_v11  ;;  %v4678_v11 = vld [vmem:[%s8089_s18 + $0x948] sm:$0xff]  ;;  %v5191_v20 = vld [vmem:[%s8095_s20 + $0x950] sm:$0xff]  ;;  %v6724_v37 = vmul.f32 %v6212_v25, %v6212_v25  ;;  %v3152_v25 = vadd.s32 2472, %v9133_v3 }
 0x6d6   : > { %v5702_v24 = vsub.f32 %v4678_v11, %v5190_v12  ;;  %v6213_v33 = vsel %vm4165_vm8, %v5701_v16, 0.0  ;;  %v3662_v12 = vadd.s32 %v9137_v5, %v3148_v55  ;;  %vm4173_vm0 = vcmp.lt.s32.totalorder %v3661_v2, 5120 }
 0x6d7   : > { %v7226_v36 = vadd.f32 %v7225_v28, %v6714_v19  ;;  %v4679_v19 = vld [vmem:[%s8089_s18 + $0x950] sm:$0xff]  ;;  %v5192_v28 = vld [vmem:[%s8095_s20 + $0x958] sm:$0xff]  ;;  %v6725_v45 = vmul.f32 %v6213_v33, %v6213_v33  ;;  %v3153_v33 = vadd.s32 2480, %v9133_v3 }
 0x6d8   : > { %v5703_v32 = vsub.f32 %v4679_v19, %v5191_v20  ;;  %v6214_v41 = vsel %vm4166_vm9, %v5702_v24, 0.0  ;;  %v3663_v20 = vadd.s32 %v9137_v5, %v3149_v63  ;;  %vm4174_vm1 = vcmp.lt.s32.totalorder %v3662_v12, 5120 }
 0x6d9   : > { %v7227_v44 = vadd.f32 %v7226_v36, %v6715_v27  ;;  %v4680_v27 = vld [vmem:[%s8089_s18 + $0x958] sm:$0xff]  ;;  %v5193_v36 = vld [vmem:[%s8095_s20 + $0x960] sm:$0xff]  ;;  %v6726_v53 = vmul.f32 %v6214_v41, %v6214_v41  ;;  %v3154_v41 = vadd.s32 2488, %v9133_v3 }
 0x6da   : > { %v5704_v40 = vsub.f32 %v4680_v27, %v5192_v28  ;;  %v6215_v49 = vsel %vm4167_vm10, %v5703_v32, 0.0  ;;  %v3664_v28 = vadd.s32 %v9137_v5, %v3150_v9  ;;  %vm4175_vm2 = vcmp.lt.s32.totalorder %v3663_v20, 5120 }
 0x6db   : > { %v7228_v52 = vadd.f32 %v7227_v44, %v6716_v35  ;;  %v4681_v35 = vld [vmem:[%s8089_s18 + $0x960] sm:$0xff]  ;;  %v5194_v44 = vld [vmem:[%s8095_s20 + $0x968] sm:$0xff]  ;;  %v6727_v61 = vmul.f32 %v6215_v49, %v6215_v49  ;;  %v3155_v49 = vadd.s32 2496, %v9133_v3 }
 0x6dc   : > { %v5705_v48 = vsub.f32 %v4681_v35, %v5193_v36  ;;  %v6216_v57 = vsel %vm4168_vm11, %v5704_v40, 0.0  ;;  %v3665_v36 = vadd.s32 %v9137_v5, %v3151_v17  ;;  %vm4176_vm3 = vcmp.lt.s32.totalorder %v3664_v28, 5120 }
 0x6dd   : > { %v7229_v60 = vadd.f32 %v7228_v52, %v6717_v43  ;;  %v4682_v43 = vld [vmem:[%s8089_s18 + $0x968] sm:$0xff]  ;;  %v5195_v52 = vld [vmem:[%s8095_s20 + $0x970] sm:$0xff]  ;;  %v6728_v7 = vmul.f32 %v6216_v57, %v6216_v57  ;;  %v3156_v57 = vadd.s32 2504, %v9133_v3 }
 0x6de   : > { %v5706_v56 = vsub.f32 %v4682_v43, %v5194_v44  ;;  %v6217_v1 = vsel %vm4169_vm12, %v5705_v48, 0.0  ;;  %v3666_v44 = vadd.s32 %v9137_v5, %v3152_v25  ;;  %vm4177_vm4 = vcmp.lt.s32.totalorder %v3665_v36, 5120 }
 0x6df   : > { %v7230_v6 = vadd.f32 %v7229_v60, %v6718_v51  ;;  %v4683_v51 = vld [vmem:[%s8089_s18 + $0x970] sm:$0xff]  ;;  %v5196_v60 = vld [vmem:[%s8095_s20 + $0x978] sm:$0xff]  ;;  %v6729_v15 = vmul.f32 %v6217_v1, %v6217_v1  ;;  %v3157_v1 = vadd.s32 2512, %v9133_v3 }
 0x6e0   : > { %v5707_v0 = vsub.f32 %v4683_v51, %v5195_v52  ;;  %v6218_v11 = vsel %vm4170_vm13, %v5706_v56, 0.0  ;;  %v3667_v52 = vadd.s32 %v9137_v5, %v3153_v33  ;;  %vm4178_vm5 = vcmp.lt.s32.totalorder %v3666_v44, 5120 }
 0x6e1   : > { %v7231_v14 = vadd.f32 %v7230_v6, %v6719_v59  ;;  %v4684_v59 = vld [vmem:[%s8089_s18 + $0x978] sm:$0xff]  ;;  %v5197_v6 = vld [vmem:[%s8095_s20 + $0x980] sm:$0xff]  ;;  %v6730_v23 = vmul.f32 %v6218_v11, %v6218_v11  ;;  %v3158_v11 = vadd.s32 2520, %v9133_v3 }
 0x6e2   : > { %v5708_v10 = vsub.f32 %v4684_v59, %v5196_v60  ;;  %v6219_v19 = vsel %vm4171_vm14, %v5707_v0, 0.0  ;;  %v3668_v60 = vadd.s32 %v9137_v5, %v3154_v41  ;;  %vm4179_vm6 = vcmp.lt.s32.totalorder %v3667_v52, 5120 }
 0x6e3   : > { %v7232_v22 = vadd.f32 %v7231_v14, %v6720_v4  ;;  %v4685_v4 = vld [vmem:[%s8089_s18 + $0x980] sm:$0xff]  ;;  %v5198_v14 = vld [vmem:[%s8095_s20 + $0x988] sm:$0xff]  ;;  %v6731_v31 = vmul.f32 %v6219_v19, %v6219_v19  ;;  %v3159_v19 = vadd.s32 2528, %v9133_v3 }
 0x6e4   : > { %v5709_v18 = vsub.f32 %v4685_v4, %v5197_v6  ;;  %v6220_v27 = vsel %vm4172_vm15, %v5708_v10, 0.0  ;;  %v3669_v6 = vadd.s32 %v9137_v5, %v3155_v49  ;;  %vm4180_vm7 = vcmp.lt.s32.totalorder %v3668_v60, 5120 }
 0x6e5   : > { %v7233_v30 = vadd.f32 %v7232_v22, %v6721_v13  ;;  %v4686_v13 = vld [vmem:[%s8089_s18 + $0x988] sm:$0xff]  ;;  %v5199_v22 = vld [vmem:[%s8095_s20 + $0x990] sm:$0xff]  ;;  %v6732_v39 = vmul.f32 %v6220_v27, %v6220_v27  ;;  %v3160_v27 = vadd.s32 2536, %v9133_v3 }
 0x6e6   : > { %v5710_v26 = vsub.f32 %v4686_v13, %v5198_v14  ;;  %v6221_v35 = vsel %vm4173_vm0, %v5709_v18, 0.0  ;;  %v3670_v14 = vadd.s32 %v9137_v5, %v3156_v57  ;;  %vm4181_vm8 = vcmp.lt.s32.totalorder %v3669_v6, 5120 }
 0x6e7   : > { %v7234_v38 = vadd.f32 %v7233_v30, %v6722_v21  ;;  %v4687_v21 = vld [vmem:[%s8089_s18 + $0x990] sm:$0xff]  ;;  %v5200_v30 = vld [vmem:[%s8095_s20 + $0x998] sm:$0xff]  ;;  %v6733_v47 = vmul.f32 %v6221_v35, %v6221_v35  ;;  %v3161_v35 = vadd.s32 2544, %v9133_v3 }
 0x6e8   : > { %v5711_v34 = vsub.f32 %v4687_v21, %v5199_v22  ;;  %v6222_v43 = vsel %vm4174_vm1, %v5710_v26, 0.0  ;;  %v3671_v22 = vadd.s32 %v9137_v5, %v3157_v1  ;;  %vm4182_vm9 = vcmp.lt.s32.totalorder %v3670_v14, 5120 }
 0x6e9   : > { %v7235_v46 = vadd.f32 %v7234_v38, %v6723_v29  ;;  %v4688_v29 = vld [vmem:[%s8089_s18 + $0x998] sm:$0xff]  ;;  %v5201_v38 = vld [vmem:[%s8095_s20 + $0x9a0] sm:$0xff]  ;;  %v6734_v55 = vmul.f32 %v6222_v43, %v6222_v43  ;;  %v3162_v43 = vadd.s32 2552, %v9133_v3 }
 0x6ea   : > { %v5712_v42 = vsub.f32 %v4688_v29, %v5200_v30  ;;  %v6223_v51 = vsel %vm4175_vm2, %v5711_v34, 0.0  ;;  %v3672_v30 = vadd.s32 %v9137_v5, %v3158_v11  ;;  %vm4183_vm10 = vcmp.lt.s32.totalorder %v3671_v22, 5120 }
 0x6eb   : > { %v7236_v54 = vadd.f32 %v7235_v46, %v6724_v37  ;;  %v4689_v37 = vld [vmem:[%s8089_s18 + $0x9a0] sm:$0xff]  ;;  %v5202_v46 = vld [vmem:[%s8095_s20 + $0x9a8] sm:$0xff]  ;;  %v6735_v63 = vmul.f32 %v6223_v51, %v6223_v51  ;;  %v3163_v51 = vadd.s32 2560, %v9133_v3 }
 0x6ec   : > { %v5713_v50 = vsub.f32 %v4689_v37, %v5201_v38  ;;  %v6224_v59 = vsel %vm4176_vm3, %v5712_v42, 0.0  ;;  %v3673_v38 = vadd.s32 %v9137_v5, %v3159_v19  ;;  %vm4184_vm11 = vcmp.lt.s32.totalorder %v3672_v30, 5120 }
 0x6ed   : > { %v7237_v62 = vadd.f32 %v7236_v54, %v6725_v45  ;;  %v4690_v45 = vld [vmem:[%s8089_s18 + $0x9a8] sm:$0xff]  ;;  %v5203_v54 = vld [vmem:[%s8095_s20 + $0x9b0] sm:$0xff]  ;;  %v6736_v9 = vmul.f32 %v6224_v59, %v6224_v59  ;;  %v3164_v59 = vadd.s32 2568, %v9133_v3 }
 0x6ee   : > { %v5714_v58 = vsub.f32 %v4690_v45, %v5202_v46  ;;  %v6225_v4 = vsel %vm4177_vm4, %v5713_v50, 0.0  ;;  %v3674_v46 = vadd.s32 %v9137_v5, %v3160_v27  ;;  %vm4185_vm12 = vcmp.lt.s32.totalorder %v3673_v38, 5120 }
 0x6ef   : > { %v7238_v8 = vadd.f32 %v7237_v62, %v6726_v53  ;;  %v4691_v53 = vld [vmem:[%s8089_s18 + $0x9b0] sm:$0xff]  ;;  %v5204_v62 = vld [vmem:[%s8095_s20 + $0x9b8] sm:$0xff]  ;;  %v6737_v17 = vmul.f32 %v6225_v4, %v6225_v4  ;;  %v3165_v4 = vadd.s32 2576, %v9133_v3 }
 0x6f0   : > { %v5715_v2 = vsub.f32 %v4691_v53, %v5203_v54  ;;  %v6226_v13 = vsel %vm4178_vm5, %v5714_v58, 0.0  ;;  %v3675_v54 = vadd.s32 %v9137_v5, %v3161_v35  ;;  %vm4186_vm13 = vcmp.lt.s32.totalorder %v3674_v46, 5120 }
 0x6f1   : > { %v7239_v16 = vadd.f32 %v7238_v8, %v6727_v61  ;;  %v4692_v61 = vld [vmem:[%s8089_s18 + $0x9b8] sm:$0xff]  ;;  %v5205_v8 = vld [vmem:[%s8095_s20 + $0x9c0] sm:$0xff]  ;;  %v6738_v25 = vmul.f32 %v6226_v13, %v6226_v13  ;;  %v3166_v13 = vadd.s32 2584, %v9133_v3 }
 0x6f2   : > { %v5716_v12 = vsub.f32 %v4692_v61, %v5204_v62  ;;  %v6227_v21 = vsel %vm4179_vm6, %v5715_v2, 0.0  ;;  %v3676_v62 = vadd.s32 %v9137_v5, %v3162_v43  ;;  %vm4187_vm14 = vcmp.lt.s32.totalorder %v3675_v54, 5120 }
 0x6f3   : > { %v7240_v24 = vadd.f32 %v7239_v16, %v6728_v7  ;;  %v4693_v7 = vld [vmem:[%s8089_s18 + $0x9c0] sm:$0xff]  ;;  %v5206_v16 = vld [vmem:[%s8095_s20 + $0x9c8] sm:$0xff]  ;;  %v6739_v33 = vmul.f32 %v6227_v21, %v6227_v21  ;;  %v3167_v21 = vadd.s32 2592, %v9133_v3 }
 0x6f4   : > { %v5717_v20 = vsub.f32 %v4693_v7, %v5205_v8  ;;  %v6228_v29 = vsel %vm4180_vm7, %v5716_v12, 0.0  ;;  %v3677_v8 = vadd.s32 %v9137_v5, %v3163_v51  ;;  %vm4188_vm15 = vcmp.lt.s32.totalorder %v3676_v62, 5120 }
 0x6f5   : > { %v7241_v32 = vadd.f32 %v7240_v24, %v6729_v15  ;;  %v4694_v15 = vld [vmem:[%s8089_s18 + $0x9c8] sm:$0xff]  ;;  %v5207_v24 = vld [vmem:[%s8095_s20 + $0x9d0] sm:$0xff]  ;;  %v6740_v41 = vmul.f32 %v6228_v29, %v6228_v29  ;;  %v3168_v29 = vadd.s32 2600, %v9133_v3 }
 0x6f6   : > { %v5718_v28 = vsub.f32 %v4694_v15, %v5206_v16  ;;  %v6229_v37 = vsel %vm4181_vm8, %v5717_v20, 0.0  ;;  %v3678_v16 = vadd.s32 %v9137_v5, %v3164_v59  ;;  %vm4189_vm0 = vcmp.lt.s32.totalorder %v3677_v8, 5120 }
 0x6f7   : > { %v7242_v40 = vadd.f32 %v7241_v32, %v6730_v23  ;;  %v4695_v23 = vld [vmem:[%s8089_s18 + $0x9d0] sm:$0xff]  ;;  %v5208_v32 = vld [vmem:[%s8095_s20 + $0x9d8] sm:$0xff]  ;;  %v6741_v49 = vmul.f32 %v6229_v37, %v6229_v37  ;;  %v3169_v37 = vadd.s32 2608, %v9133_v3 }
 0x6f8   : > { %v5719_v36 = vsub.f32 %v4695_v23, %v5207_v24  ;;  %v6230_v45 = vsel %vm4182_vm9, %v5718_v28, 0.0  ;;  %v3679_v24 = vadd.s32 %v9137_v5, %v3165_v4  ;;  %vm4190_vm1 = vcmp.lt.s32.totalorder %v3678_v16, 5120 }
 0x6f9   : > { %v7243_v48 = vadd.f32 %v7242_v40, %v6731_v31  ;;  %v4696_v31 = vld [vmem:[%s8089_s18 + $0x9d8] sm:$0xff]  ;;  %v5209_v40 = vld [vmem:[%s8095_s20 + $0x9e0] sm:$0xff]  ;;  %v6742_v57 = vmul.f32 %v6230_v45, %v6230_v45  ;;  %v3170_v45 = vadd.s32 2616, %v9133_v3 }
 0x6fa   : > { %v5720_v44 = vsub.f32 %v4696_v31, %v5208_v32  ;;  %v6231_v53 = vsel %vm4183_vm10, %v5719_v36, 0.0  ;;  %v3680_v32 = vadd.s32 %v9137_v5, %v3166_v13  ;;  %vm4191_vm2 = vcmp.lt.s32.totalorder %v3679_v24, 5120 }
 0x6fb   : > { %v7244_v56 = vadd.f32 %v7243_v48, %v6732_v39  ;;  %v4697_v39 = vld [vmem:[%s8089_s18 + $0x9e0] sm:$0xff]  ;;  %v5210_v48 = vld [vmem:[%s8095_s20 + $0x9e8] sm:$0xff]  ;;  %v6743_v1 = vmul.f32 %v6231_v53, %v6231_v53  ;;  %v3171_v53 = vadd.s32 2624, %v9133_v3 }
 0x6fc   : > { %v5721_v52 = vsub.f32 %v4697_v39, %v5209_v40  ;;  %v6232_v61 = vsel %vm4184_vm11, %v5720_v44, 0.0  ;;  %v3681_v40 = vadd.s32 %v9137_v5, %v3167_v21  ;;  %vm4192_vm3 = vcmp.lt.s32.totalorder %v3680_v32, 5120 }
 0x6fd   : > { %v7245_v0 = vadd.f32 %v7244_v56, %v6733_v47  ;;  %v4698_v47 = vld [vmem:[%s8089_s18 + $0x9e8] sm:$0xff]  ;;  %v5211_v56 = vld [vmem:[%s8095_s20 + $0x9f0] sm:$0xff]  ;;  %v6744_v11 = vmul.f32 %v6232_v61, %v6232_v61  ;;  %v3172_v61 = vadd.s32 2632, %v9133_v3 }
 0x6fe   : > { %v5722_v60 = vsub.f32 %v4698_v47, %v5210_v48  ;;  %v6233_v7 = vsel %vm4185_vm12, %v5721_v52, 0.0  ;;  %v3682_v48 = vadd.s32 %v9137_v5, %v3168_v29  ;;  %vm4193_vm4 = vcmp.lt.s32.totalorder %v3681_v40, 5120 }
 0x6ff   : > { %v7246_v10 = vadd.f32 %v7245_v0, %v6734_v55  ;;  %v4699_v55 = vld [vmem:[%s8089_s18 + $0x9f0] sm:$0xff]  ;;  %v5212_v0 = vld [vmem:[%s8095_s20 + $0x9f8] sm:$0xff]  ;;  %v6745_v19 = vmul.f32 %v6233_v7, %v6233_v7  ;;  %v3173_v7 = vadd.s32 2640, %v9133_v3 }
 0x700   : > { %v5723_v6 = vsub.f32 %v4699_v55, %v5211_v56  ;;  %v6234_v15 = vsel %vm4186_vm13, %v5722_v60, 0.0  ;;  %v3683_v56 = vadd.s32 %v9137_v5, %v3169_v37  ;;  %vm4194_vm5 = vcmp.lt.s32.totalorder %v3682_v48, 5120 }
 0x701   : > { %v7247_v18 = vadd.f32 %v7246_v10, %v6735_v63  ;;  %v4700_v63 = vld [vmem:[%s8089_s18 + $0x9f8] sm:$0xff]  ;;  %v5213_v10 = vld [vmem:[%s8095_s20 + $0xa00] sm:$0xff]  ;;  %v6746_v27 = vmul.f32 %v6234_v15, %v6234_v15  ;;  %v3174_v15 = vadd.s32 2648, %v9133_v3 }
 0x702   : > { %v5724_v14 = vsub.f32 %v4700_v63, %v5212_v0  ;;  %v6235_v23 = vsel %vm4187_vm14, %v5723_v6, 0.0  ;;  %v3684_v0 = vadd.s32 %v9137_v5, %v3170_v45  ;;  %vm4195_vm6 = vcmp.lt.s32.totalorder %v3683_v56, 5120 }
 0x703   : > { %v7248_v26 = vadd.f32 %v7247_v18, %v6736_v9  ;;  %v4701_v9 = vld [vmem:[%s8089_s18 + $0xa00] sm:$0xff]  ;;  %v5214_v18 = vld [vmem:[%s8095_s20 + $0xa08] sm:$0xff]  ;;  %v6747_v35 = vmul.f32 %v6235_v23, %v6235_v23  ;;  %v3175_v23 = vadd.s32 2656, %v9133_v3 }
 0x704   : > { %v5725_v22 = vsub.f32 %v4701_v9, %v5213_v10  ;;  %v6236_v31 = vsel %vm4188_vm15, %v5724_v14, 0.0  ;;  %v3685_v10 = vadd.s32 %v9137_v5, %v3171_v53  ;;  %vm4196_vm7 = vcmp.lt.s32.totalorder %v3684_v0, 5120 }
 0x705   : > { %v7249_v34 = vadd.f32 %v7248_v26, %v6737_v17  ;;  %v4702_v17 = vld [vmem:[%s8089_s18 + $0xa08] sm:$0xff]  ;;  %v5215_v26 = vld [vmem:[%s8095_s20 + $0xa10] sm:$0xff]  ;;  %v6748_v43 = vmul.f32 %v6236_v31, %v6236_v31  ;;  %v3176_v31 = vadd.s32 2664, %v9133_v3 }
 0x706   : > { %v5726_v30 = vsub.f32 %v4702_v17, %v5214_v18  ;;  %v6237_v39 = vsel %vm4189_vm0, %v5725_v22, 0.0  ;;  %v3686_v18 = vadd.s32 %v9137_v5, %v3172_v61  ;;  %vm4197_vm8 = vcmp.lt.s32.totalorder %v3685_v10, 5120 }
 0x707   : > { %v7250_v42 = vadd.f32 %v7249_v34, %v6738_v25  ;;  %v4703_v25 = vld [vmem:[%s8089_s18 + $0xa10] sm:$0xff]  ;;  %v5216_v34 = vld [vmem:[%s8095_s20 + $0xa18] sm:$0xff]  ;;  %v6749_v51 = vmul.f32 %v6237_v39, %v6237_v39  ;;  %v3177_v39 = vadd.s32 2672, %v9133_v3 }
 0x708   : > { %v5727_v38 = vsub.f32 %v4703_v25, %v5215_v26  ;;  %v6238_v47 = vsel %vm4190_vm1, %v5726_v30, 0.0  ;;  %v3687_v26 = vadd.s32 %v9137_v5, %v3173_v7  ;;  %vm4198_vm9 = vcmp.lt.s32.totalorder %v3686_v18, 5120 }
 0x709   : > { %v7251_v50 = vadd.f32 %v7250_v42, %v6739_v33  ;;  %v4704_v33 = vld [vmem:[%s8089_s18 + $0xa18] sm:$0xff]  ;;  %v5217_v42 = vld [vmem:[%s8095_s20 + $0xa20] sm:$0xff]  ;;  %v6750_v59 = vmul.f32 %v6238_v47, %v6238_v47  ;;  %v3178_v47 = vadd.s32 2680, %v9133_v3 }
 0x70a   : > { %v5728_v46 = vsub.f32 %v4704_v33, %v5216_v34  ;;  %v6239_v55 = vsel %vm4191_vm2, %v5727_v38, 0.0  ;;  %v3688_v34 = vadd.s32 %v9137_v5, %v3174_v15  ;;  %vm4199_vm10 = vcmp.lt.s32.totalorder %v3687_v26, 5120 }
 0x70b   : > { %v7252_v58 = vadd.f32 %v7251_v50, %v6740_v41  ;;  %v4705_v41 = vld [vmem:[%s8089_s18 + $0xa20] sm:$0xff]  ;;  %v5218_v50 = vld [vmem:[%s8095_s20 + $0xa28] sm:$0xff]  ;;  %v6751_v4 = vmul.f32 %v6239_v55, %v6239_v55  ;;  %v3179_v55 = vadd.s32 2688, %v9133_v3 }
 0x70c   : > { %v5729_v54 = vsub.f32 %v4705_v41, %v5217_v42  ;;  %v6240_v63 = vsel %vm4192_vm3, %v5728_v46, 0.0  ;;  %v3689_v42 = vadd.s32 %v9137_v5, %v3175_v23  ;;  %vm4200_vm11 = vcmp.lt.s32.totalorder %v3688_v34, 5120 }
 0x70d   : > { %v7253_v2 = vadd.f32 %v7252_v58, %v6741_v49  ;;  %v4706_v49 = vld [vmem:[%s8089_s18 + $0xa28] sm:$0xff]  ;;  %v5219_v58 = vld [vmem:[%s8095_s20 + $0xa30] sm:$0xff]  ;;  %v6752_v13 = vmul.f32 %v6240_v63, %v6240_v63  ;;  %v3180_v63 = vadd.s32 2696, %v9133_v3 }
 0x70e   : > { %v5730_v62 = vsub.f32 %v4706_v49, %v5218_v50  ;;  %v6241_v9 = vsel %vm4193_vm4, %v5729_v54, 0.0  ;;  %v3690_v50 = vadd.s32 %v9137_v5, %v3176_v31  ;;  %vm4201_vm12 = vcmp.lt.s32.totalorder %v3689_v42, 5120 }
 0x70f   : > { %v7254_v12 = vadd.f32 %v7253_v2, %v6742_v57  ;;  %v4707_v57 = vld [vmem:[%s8089_s18 + $0xa30] sm:$0xff]  ;;  %v5220_v2 = vld [vmem:[%s8095_s20 + $0xa38] sm:$0xff]  ;;  %v6753_v21 = vmul.f32 %v6241_v9, %v6241_v9  ;;  %v3181_v9 = vadd.s32 2704, %v9133_v3 }
 0x710   : > { %v5731_v8 = vsub.f32 %v4707_v57, %v5219_v58  ;;  %v6242_v17 = vsel %vm4194_vm5, %v5730_v62, 0.0  ;;  %v3691_v58 = vadd.s32 %v9137_v5, %v3177_v39  ;;  %vm4202_vm13 = vcmp.lt.s32.totalorder %v3690_v50, 5120 }
 0x711   : > { %v7255_v20 = vadd.f32 %v7254_v12, %v6743_v1  ;;  %v4708_v1 = vld [vmem:[%s8089_s18 + $0xa38] sm:$0xff]  ;;  %v5221_v12 = vld [vmem:[%s8095_s20 + $0xa40] sm:$0xff]  ;;  %v6754_v29 = vmul.f32 %v6242_v17, %v6242_v17  ;;  %v3182_v17 = vadd.s32 2712, %v9133_v3 }
 0x712   : > { %v5732_v16 = vsub.f32 %v4708_v1, %v5220_v2  ;;  %v6243_v25 = vsel %vm4195_vm6, %v5731_v8, 0.0  ;;  %v3692_v2 = vadd.s32 %v9137_v5, %v3178_v47  ;;  %vm4203_vm14 = vcmp.lt.s32.totalorder %v3691_v58, 5120 }
 0x713   : > { %v7256_v28 = vadd.f32 %v7255_v20, %v6744_v11  ;;  %v4709_v11 = vld [vmem:[%s8089_s18 + $0xa40] sm:$0xff]  ;;  %v5222_v20 = vld [vmem:[%s8095_s20 + $0xa48] sm:$0xff]  ;;  %v6755_v37 = vmul.f32 %v6243_v25, %v6243_v25  ;;  %v3183_v25 = vadd.s32 2720, %v9133_v3 }
 0x714   : > { %v5733_v24 = vsub.f32 %v4709_v11, %v5221_v12  ;;  %v6244_v33 = vsel %vm4196_vm7, %v5732_v16, 0.0  ;;  %v3693_v12 = vadd.s32 %v9137_v5, %v3179_v55  ;;  %vm4204_vm15 = vcmp.lt.s32.totalorder %v3692_v2, 5120 }
 0x715   : > { %v7257_v36 = vadd.f32 %v7256_v28, %v6745_v19  ;;  %v4710_v19 = vld [vmem:[%s8089_s18 + $0xa48] sm:$0xff]  ;;  %v5223_v28 = vld [vmem:[%s8095_s20 + $0xa50] sm:$0xff]  ;;  %v6756_v45 = vmul.f32 %v6244_v33, %v6244_v33  ;;  %v3184_v33 = vadd.s32 2728, %v9133_v3 }
 0x716   : > { %v5734_v32 = vsub.f32 %v4710_v19, %v5222_v20  ;;  %v6245_v41 = vsel %vm4197_vm8, %v5733_v24, 0.0  ;;  %v3694_v20 = vadd.s32 %v9137_v5, %v3180_v63  ;;  %vm4205_vm0 = vcmp.lt.s32.totalorder %v3693_v12, 5120 }
 0x717   : > { %v7258_v44 = vadd.f32 %v7257_v36, %v6746_v27  ;;  %v4711_v27 = vld [vmem:[%s8089_s18 + $0xa50] sm:$0xff]  ;;  %v5224_v36 = vld [vmem:[%s8095_s20 + $0xa58] sm:$0xff]  ;;  %v6757_v53 = vmul.f32 %v6245_v41, %v6245_v41  ;;  %v3185_v41 = vadd.s32 2736, %v9133_v3 }
 0x718   : > { %v5735_v40 = vsub.f32 %v4711_v27, %v5223_v28  ;;  %v6246_v49 = vsel %vm4198_vm9, %v5734_v32, 0.0  ;;  %v3695_v28 = vadd.s32 %v9137_v5, %v3181_v9  ;;  %vm4206_vm1 = vcmp.lt.s32.totalorder %v3694_v20, 5120 }
 0x719   : > { %v7259_v52 = vadd.f32 %v7258_v44, %v6747_v35  ;;  %v4712_v35 = vld [vmem:[%s8089_s18 + $0xa58] sm:$0xff]  ;;  %v5225_v44 = vld [vmem:[%s8095_s20 + $0xa60] sm:$0xff]  ;;  %v6758_v61 = vmul.f32 %v6246_v49, %v6246_v49  ;;  %v3186_v49 = vadd.s32 2744, %v9133_v3 }
 0x71a   : > { %v5736_v48 = vsub.f32 %v4712_v35, %v5224_v36  ;;  %v6247_v57 = vsel %vm4199_vm10, %v5735_v40, 0.0  ;;  %v3696_v36 = vadd.s32 %v9137_v5, %v3182_v17  ;;  %vm4207_vm2 = vcmp.lt.s32.totalorder %v3695_v28, 5120 }
 0x71b   : > { %v7260_v60 = vadd.f32 %v7259_v52, %v6748_v43  ;;  %v4713_v43 = vld [vmem:[%s8089_s18 + $0xa60] sm:$0xff]  ;;  %v5226_v52 = vld [vmem:[%s8095_s20 + $0xa68] sm:$0xff]  ;;  %v6759_v7 = vmul.f32 %v6247_v57, %v6247_v57  ;;  %v3187_v57 = vadd.s32 2752, %v9133_v3 }
 0x71c   : > { %v5737_v56 = vsub.f32 %v4713_v43, %v5225_v44  ;;  %v6248_v1 = vsel %vm4200_vm11, %v5736_v48, 0.0  ;;  %v3697_v44 = vadd.s32 %v9137_v5, %v3183_v25  ;;  %vm4208_vm3 = vcmp.lt.s32.totalorder %v3696_v36, 5120 }
 0x71d   : > { %v7261_v6 = vadd.f32 %v7260_v60, %v6749_v51  ;;  %v4714_v51 = vld [vmem:[%s8089_s18 + $0xa68] sm:$0xff]  ;;  %v5227_v60 = vld [vmem:[%s8095_s20 + $0xa70] sm:$0xff]  ;;  %v6760_v15 = vmul.f32 %v6248_v1, %v6248_v1  ;;  %v3188_v1 = vadd.s32 2760, %v9133_v3 }
 0x71e   : > { %v5738_v0 = vsub.f32 %v4714_v51, %v5226_v52  ;;  %v6249_v11 = vsel %vm4201_vm12, %v5737_v56, 0.0  ;;  %v3698_v52 = vadd.s32 %v9137_v5, %v3184_v33  ;;  %vm4209_vm4 = vcmp.lt.s32.totalorder %v3697_v44, 5120 }
 0x71f   : > { %v7262_v14 = vadd.f32 %v7261_v6, %v6750_v59  ;;  %v4715_v59 = vld [vmem:[%s8089_s18 + $0xa70] sm:$0xff]  ;;  %v5228_v6 = vld [vmem:[%s8095_s20 + $0xa78] sm:$0xff]  ;;  %v6761_v23 = vmul.f32 %v6249_v11, %v6249_v11  ;;  %v3189_v11 = vadd.s32 2768, %v9133_v3 }
 0x720   : > { %v5739_v10 = vsub.f32 %v4715_v59, %v5227_v60  ;;  %v6250_v19 = vsel %vm4202_vm13, %v5738_v0, 0.0  ;;  %v3699_v60 = vadd.s32 %v9137_v5, %v3185_v41  ;;  %vm4210_vm5 = vcmp.lt.s32.totalorder %v3698_v52, 5120 }
 0x721   : > { %v7263_v22 = vadd.f32 %v7262_v14, %v6751_v4  ;;  %v4716_v4 = vld [vmem:[%s8089_s18 + $0xa78] sm:$0xff]  ;;  %v5229_v14 = vld [vmem:[%s8095_s20 + $0xa80] sm:$0xff]  ;;  %v6762_v31 = vmul.f32 %v6250_v19, %v6250_v19  ;;  %v3190_v19 = vadd.s32 2776, %v9133_v3 }
 0x722   : > { %v5740_v18 = vsub.f32 %v4716_v4, %v5228_v6  ;;  %v6251_v27 = vsel %vm4203_vm14, %v5739_v10, 0.0  ;;  %v3700_v6 = vadd.s32 %v9137_v5, %v3186_v49  ;;  %vm4211_vm6 = vcmp.lt.s32.totalorder %v3699_v60, 5120 }
 0x723   : > { %v7264_v30 = vadd.f32 %v7263_v22, %v6752_v13  ;;  %v4717_v13 = vld [vmem:[%s8089_s18 + $0xa80] sm:$0xff]  ;;  %v5230_v22 = vld [vmem:[%s8095_s20 + $0xa88] sm:$0xff]  ;;  %v6763_v39 = vmul.f32 %v6251_v27, %v6251_v27  ;;  %v3191_v27 = vadd.s32 2784, %v9133_v3 }
 0x724   : > { %v5741_v26 = vsub.f32 %v4717_v13, %v5229_v14  ;;  %v6252_v35 = vsel %vm4204_vm15, %v5740_v18, 0.0  ;;  %v3701_v14 = vadd.s32 %v9137_v5, %v3187_v57  ;;  %vm4212_vm7 = vcmp.lt.s32.totalorder %v3700_v6, 5120 }
 0x725   : > { %v7265_v38 = vadd.f32 %v7264_v30, %v6753_v21  ;;  %v4718_v21 = vld [vmem:[%s8089_s18 + $0xa88] sm:$0xff]  ;;  %v5231_v30 = vld [vmem:[%s8095_s20 + $0xa90] sm:$0xff]  ;;  %v6764_v47 = vmul.f32 %v6252_v35, %v6252_v35  ;;  %v3192_v35 = vadd.s32 2792, %v9133_v3 }
 0x726   : > { %v5742_v34 = vsub.f32 %v4718_v21, %v5230_v22  ;;  %v6253_v43 = vsel %vm4205_vm0, %v5741_v26, 0.0  ;;  %v3702_v22 = vadd.s32 %v9137_v5, %v3188_v1  ;;  %vm4213_vm8 = vcmp.lt.s32.totalorder %v3701_v14, 5120 }
 0x727   : > { %v7266_v46 = vadd.f32 %v7265_v38, %v6754_v29  ;;  %v4719_v29 = vld [vmem:[%s8089_s18 + $0xa90] sm:$0xff]  ;;  %v5232_v38 = vld [vmem:[%s8095_s20 + $0xa98] sm:$0xff]  ;;  %v6765_v55 = vmul.f32 %v6253_v43, %v6253_v43  ;;  %v3193_v43 = vadd.s32 2800, %v9133_v3 }
 0x728   : > { %v5743_v42 = vsub.f32 %v4719_v29, %v5231_v30  ;;  %v6254_v51 = vsel %vm4206_vm1, %v5742_v34, 0.0  ;;  %v3703_v30 = vadd.s32 %v9137_v5, %v3189_v11  ;;  %vm4214_vm9 = vcmp.lt.s32.totalorder %v3702_v22, 5120 }
 0x729   : > { %v7267_v54 = vadd.f32 %v7266_v46, %v6755_v37  ;;  %v4720_v37 = vld [vmem:[%s8089_s18 + $0xa98] sm:$0xff]  ;;  %v5233_v46 = vld [vmem:[%s8095_s20 + $0xaa0] sm:$0xff]  ;;  %v6766_v63 = vmul.f32 %v6254_v51, %v6254_v51  ;;  %v3194_v51 = vadd.s32 2808, %v9133_v3 }
 0x72a   : > { %v5744_v50 = vsub.f32 %v4720_v37, %v5232_v38  ;;  %v6255_v59 = vsel %vm4207_vm2, %v5743_v42, 0.0  ;;  %v3704_v38 = vadd.s32 %v9137_v5, %v3190_v19  ;;  %vm4215_vm10 = vcmp.lt.s32.totalorder %v3703_v30, 5120 }
 0x72b   : > { %v7268_v62 = vadd.f32 %v7267_v54, %v6756_v45  ;;  %v4721_v45 = vld [vmem:[%s8089_s18 + $0xaa0] sm:$0xff]  ;;  %v5234_v54 = vld [vmem:[%s8095_s20 + $0xaa8] sm:$0xff]  ;;  %v6767_v9 = vmul.f32 %v6255_v59, %v6255_v59  ;;  %v3195_v59 = vadd.s32 2816, %v9133_v3 }
 0x72c   : > { %v5745_v58 = vsub.f32 %v4721_v45, %v5233_v46  ;;  %v6256_v4 = vsel %vm4208_vm3, %v5744_v50, 0.0  ;;  %v3705_v46 = vadd.s32 %v9137_v5, %v3191_v27  ;;  %vm4216_vm11 = vcmp.lt.s32.totalorder %v3704_v38, 5120 }
 0x72d   : > { %v7269_v8 = vadd.f32 %v7268_v62, %v6757_v53  ;;  %v4722_v53 = vld [vmem:[%s8089_s18 + $0xaa8] sm:$0xff]  ;;  %v5235_v62 = vld [vmem:[%s8095_s20 + $0xab0] sm:$0xff]  ;;  %v6768_v17 = vmul.f32 %v6256_v4, %v6256_v4  ;;  %v3196_v4 = vadd.s32 2824, %v9133_v3 }
 0x72e   : > { %v5746_v2 = vsub.f32 %v4722_v53, %v5234_v54  ;;  %v6257_v13 = vsel %vm4209_vm4, %v5745_v58, 0.0  ;;  %v3706_v54 = vadd.s32 %v9137_v5, %v3192_v35  ;;  %vm4217_vm12 = vcmp.lt.s32.totalorder %v3705_v46, 5120 }
 0x72f   : > { %v7270_v16 = vadd.f32 %v7269_v8, %v6758_v61  ;;  %v4723_v61 = vld [vmem:[%s8089_s18 + $0xab0] sm:$0xff]  ;;  %v5236_v8 = vld [vmem:[%s8095_s20 + $0xab8] sm:$0xff]  ;;  %v6769_v25 = vmul.f32 %v6257_v13, %v6257_v13  ;;  %v3197_v13 = vadd.s32 2832, %v9133_v3 }
 0x730   : > { %v5747_v12 = vsub.f32 %v4723_v61, %v5235_v62  ;;  %v6258_v21 = vsel %vm4210_vm5, %v5746_v2, 0.0  ;;  %v3707_v62 = vadd.s32 %v9137_v5, %v3193_v43  ;;  %vm4218_vm13 = vcmp.lt.s32.totalorder %v3706_v54, 5120 }
 0x731   : > { %v7271_v24 = vadd.f32 %v7270_v16, %v6759_v7  ;;  %v4724_v7 = vld [vmem:[%s8089_s18 + $0xab8] sm:$0xff]  ;;  %v5237_v16 = vld [vmem:[%s8095_s20 + $0xac0] sm:$0xff]  ;;  %v6770_v33 = vmul.f32 %v6258_v21, %v6258_v21  ;;  %v3198_v21 = vadd.s32 2840, %v9133_v3 }
 0x732   : > { %v5748_v20 = vsub.f32 %v4724_v7, %v5236_v8  ;;  %v6259_v29 = vsel %vm4211_vm6, %v5747_v12, 0.0  ;;  %v3708_v8 = vadd.s32 %v9137_v5, %v3194_v51  ;;  %vm4219_vm14 = vcmp.lt.s32.totalorder %v3707_v62, 5120 }
 0x733   : > { %v7272_v32 = vadd.f32 %v7271_v24, %v6760_v15  ;;  %v4725_v15 = vld [vmem:[%s8089_s18 + $0xac0] sm:$0xff]  ;;  %v5238_v24 = vld [vmem:[%s8095_s20 + $0xac8] sm:$0xff]  ;;  %v6771_v41 = vmul.f32 %v6259_v29, %v6259_v29  ;;  %v3199_v29 = vadd.s32 2848, %v9133_v3 }
 0x734   : > { %v5749_v28 = vsub.f32 %v4725_v15, %v5237_v16  ;;  %v6260_v37 = vsel %vm4212_vm7, %v5748_v20, 0.0  ;;  %v3709_v16 = vadd.s32 %v9137_v5, %v3195_v59  ;;  %vm4220_vm15 = vcmp.lt.s32.totalorder %v3708_v8, 5120 }
 0x735   : > { %v7273_v40 = vadd.f32 %v7272_v32, %v6761_v23  ;;  %v4726_v23 = vld [vmem:[%s8089_s18 + $0xac8] sm:$0xff]  ;;  %v5239_v32 = vld [vmem:[%s8095_s20 + $0xad0] sm:$0xff]  ;;  %v6772_v49 = vmul.f32 %v6260_v37, %v6260_v37  ;;  %v3200_v37 = vadd.s32 2856, %v9133_v3 }
 0x736   : > { %v5750_v36 = vsub.f32 %v4726_v23, %v5238_v24  ;;  %v6261_v45 = vsel %vm4213_vm8, %v5749_v28, 0.0  ;;  %v3710_v24 = vadd.s32 %v9137_v5, %v3196_v4  ;;  %vm4221_vm0 = vcmp.lt.s32.totalorder %v3709_v16, 5120 }
 0x737   : > { %v7274_v48 = vadd.f32 %v7273_v40, %v6762_v31  ;;  %v4727_v31 = vld [vmem:[%s8089_s18 + $0xad0] sm:$0xff]  ;;  %v5240_v40 = vld [vmem:[%s8095_s20 + $0xad8] sm:$0xff]  ;;  %v6773_v57 = vmul.f32 %v6261_v45, %v6261_v45  ;;  %v3201_v45 = vadd.s32 2864, %v9133_v3 }
 0x738   : > { %v5751_v44 = vsub.f32 %v4727_v31, %v5239_v32  ;;  %v6262_v53 = vsel %vm4214_vm9, %v5750_v36, 0.0  ;;  %v3711_v32 = vadd.s32 %v9137_v5, %v3197_v13  ;;  %vm4222_vm1 = vcmp.lt.s32.totalorder %v3710_v24, 5120 }
 0x739   : > { %v7275_v56 = vadd.f32 %v7274_v48, %v6763_v39  ;;  %v4728_v39 = vld [vmem:[%s8089_s18 + $0xad8] sm:$0xff]  ;;  %v5241_v48 = vld [vmem:[%s8095_s20 + $0xae0] sm:$0xff]  ;;  %v6774_v1 = vmul.f32 %v6262_v53, %v6262_v53  ;;  %v3202_v53 = vadd.s32 2872, %v9133_v3 }
 0x73a   : > { %v5752_v52 = vsub.f32 %v4728_v39, %v5240_v40  ;;  %v6263_v61 = vsel %vm4215_vm10, %v5751_v44, 0.0  ;;  %v3712_v40 = vadd.s32 %v9137_v5, %v3198_v21  ;;  %vm4223_vm2 = vcmp.lt.s32.totalorder %v3711_v32, 5120 }
 0x73b   : > { %v7276_v0 = vadd.f32 %v7275_v56, %v6764_v47  ;;  %v4729_v47 = vld [vmem:[%s8089_s18 + $0xae0] sm:$0xff]  ;;  %v5242_v56 = vld [vmem:[%s8095_s20 + $0xae8] sm:$0xff]  ;;  %v6775_v11 = vmul.f32 %v6263_v61, %v6263_v61  ;;  %v3203_v61 = vadd.s32 2880, %v9133_v3 }
 0x73c   : > { %v5753_v60 = vsub.f32 %v4729_v47, %v5241_v48  ;;  %v6264_v7 = vsel %vm4216_vm11, %v5752_v52, 0.0  ;;  %v3713_v48 = vadd.s32 %v9137_v5, %v3199_v29  ;;  %vm4224_vm3 = vcmp.lt.s32.totalorder %v3712_v40, 5120 }
 0x73d   : > { %v7277_v10 = vadd.f32 %v7276_v0, %v6765_v55  ;;  %v4730_v55 = vld [vmem:[%s8089_s18 + $0xae8] sm:$0xff]  ;;  %v5243_v0 = vld [vmem:[%s8095_s20 + $0xaf0] sm:$0xff]  ;;  %v6776_v19 = vmul.f32 %v6264_v7, %v6264_v7  ;;  %v3204_v7 = vadd.s32 2888, %v9133_v3 }
 0x73e   : > { %v5754_v6 = vsub.f32 %v4730_v55, %v5242_v56  ;;  %v6265_v15 = vsel %vm4217_vm12, %v5753_v60, 0.0  ;;  %v3714_v56 = vadd.s32 %v9137_v5, %v3200_v37  ;;  %vm4225_vm4 = vcmp.lt.s32.totalorder %v3713_v48, 5120 }
 0x73f   : > { %v7278_v18 = vadd.f32 %v7277_v10, %v6766_v63  ;;  %v4731_v63 = vld [vmem:[%s8089_s18 + $0xaf0] sm:$0xff]  ;;  %v5244_v10 = vld [vmem:[%s8095_s20 + $0xaf8] sm:$0xff]  ;;  %v6777_v27 = vmul.f32 %v6265_v15, %v6265_v15  ;;  %v3205_v15 = vadd.s32 2896, %v9133_v3 }
 0x740   : > { %v5755_v14 = vsub.f32 %v4731_v63, %v5243_v0  ;;  %v6266_v23 = vsel %vm4218_vm13, %v5754_v6, 0.0  ;;  %v3715_v0 = vadd.s32 %v9137_v5, %v3201_v45  ;;  %vm4226_vm5 = vcmp.lt.s32.totalorder %v3714_v56, 5120 }
 0x741   : > { %v7279_v26 = vadd.f32 %v7278_v18, %v6767_v9  ;;  %v4732_v9 = vld [vmem:[%s8089_s18 + $0xaf8] sm:$0xff]  ;;  %v5245_v18 = vld [vmem:[%s8095_s20 + $0xb00] sm:$0xff]  ;;  %v6778_v35 = vmul.f32 %v6266_v23, %v6266_v23  ;;  %v3206_v23 = vadd.s32 2904, %v9133_v3 }
 0x742   : > { %v5756_v22 = vsub.f32 %v4732_v9, %v5244_v10  ;;  %v6267_v31 = vsel %vm4219_vm14, %v5755_v14, 0.0  ;;  %v3716_v10 = vadd.s32 %v9137_v5, %v3202_v53  ;;  %vm4227_vm6 = vcmp.lt.s32.totalorder %v3715_v0, 5120 }
 0x743   : > { %v7280_v34 = vadd.f32 %v7279_v26, %v6768_v17  ;;  %v4733_v17 = vld [vmem:[%s8089_s18 + $0xb00] sm:$0xff]  ;;  %v5246_v26 = vld [vmem:[%s8095_s20 + $0xb08] sm:$0xff]  ;;  %v6779_v43 = vmul.f32 %v6267_v31, %v6267_v31  ;;  %v3207_v31 = vadd.s32 2912, %v9133_v3 }
 0x744   : > { %v5757_v30 = vsub.f32 %v4733_v17, %v5245_v18  ;;  %v6268_v39 = vsel %vm4220_vm15, %v5756_v22, 0.0  ;;  %v3717_v18 = vadd.s32 %v9137_v5, %v3203_v61  ;;  %vm4228_vm7 = vcmp.lt.s32.totalorder %v3716_v10, 5120 }
 0x745   : > { %v7281_v42 = vadd.f32 %v7280_v34, %v6769_v25  ;;  %v4734_v25 = vld [vmem:[%s8089_s18 + $0xb08] sm:$0xff]  ;;  %v5247_v34 = vld [vmem:[%s8095_s20 + $0xb10] sm:$0xff]  ;;  %v6780_v51 = vmul.f32 %v6268_v39, %v6268_v39  ;;  %v3208_v39 = vadd.s32 2920, %v9133_v3 }
 0x746   : > { %v5758_v38 = vsub.f32 %v4734_v25, %v5246_v26  ;;  %v6269_v47 = vsel %vm4221_vm0, %v5757_v30, 0.0  ;;  %v3718_v26 = vadd.s32 %v9137_v5, %v3204_v7  ;;  %vm4229_vm8 = vcmp.lt.s32.totalorder %v3717_v18, 5120 }
 0x747   : > { %v7282_v50 = vadd.f32 %v7281_v42, %v6770_v33  ;;  %v4735_v33 = vld [vmem:[%s8089_s18 + $0xb10] sm:$0xff]  ;;  %v5248_v42 = vld [vmem:[%s8095_s20 + $0xb18] sm:$0xff]  ;;  %v6781_v59 = vmul.f32 %v6269_v47, %v6269_v47  ;;  %v3209_v47 = vadd.s32 2928, %v9133_v3 }
 0x748   : > { %v5759_v46 = vsub.f32 %v4735_v33, %v5247_v34  ;;  %v6270_v55 = vsel %vm4222_vm1, %v5758_v38, 0.0  ;;  %v3719_v34 = vadd.s32 %v9137_v5, %v3205_v15  ;;  %vm4230_vm9 = vcmp.lt.s32.totalorder %v3718_v26, 5120 }
 0x749   : > { %v7283_v58 = vadd.f32 %v7282_v50, %v6771_v41  ;;  %v4736_v41 = vld [vmem:[%s8089_s18 + $0xb18] sm:$0xff]  ;;  %v5249_v50 = vld [vmem:[%s8095_s20 + $0xb20] sm:$0xff]  ;;  %v6782_v4 = vmul.f32 %v6270_v55, %v6270_v55  ;;  %v3210_v55 = vadd.s32 2936, %v9133_v3 }
 0x74a   : > { %v5760_v54 = vsub.f32 %v4736_v41, %v5248_v42  ;;  %v6271_v63 = vsel %vm4223_vm2, %v5759_v46, 0.0  ;;  %v3720_v42 = vadd.s32 %v9137_v5, %v3206_v23  ;;  %vm4231_vm10 = vcmp.lt.s32.totalorder %v3719_v34, 5120 }
 0x74b   : > { %v7284_v2 = vadd.f32 %v7283_v58, %v6772_v49  ;;  %v4737_v49 = vld [vmem:[%s8089_s18 + $0xb20] sm:$0xff]  ;;  %v5250_v58 = vld [vmem:[%s8095_s20 + $0xb28] sm:$0xff]  ;;  %v6783_v13 = vmul.f32 %v6271_v63, %v6271_v63  ;;  %v3211_v63 = vadd.s32 2944, %v9133_v3 }
 0x74c   : > { %v5761_v62 = vsub.f32 %v4737_v49, %v5249_v50  ;;  %v6272_v9 = vsel %vm4224_vm3, %v5760_v54, 0.0  ;;  %v3721_v50 = vadd.s32 %v9137_v5, %v3207_v31  ;;  %vm4232_vm11 = vcmp.lt.s32.totalorder %v3720_v42, 5120 }
 0x74d   : > { %v7285_v12 = vadd.f32 %v7284_v2, %v6773_v57  ;;  %v4738_v57 = vld [vmem:[%s8089_s18 + $0xb28] sm:$0xff]  ;;  %v5251_v2 = vld [vmem:[%s8095_s20 + $0xb30] sm:$0xff]  ;;  %v6784_v21 = vmul.f32 %v6272_v9, %v6272_v9  ;;  %v3212_v9 = vadd.s32 2952, %v9133_v3 }
 0x74e   : > { %v5762_v8 = vsub.f32 %v4738_v57, %v5250_v58  ;;  %v6273_v17 = vsel %vm4225_vm4, %v5761_v62, 0.0  ;;  %v3722_v58 = vadd.s32 %v9137_v5, %v3208_v39  ;;  %vm4233_vm12 = vcmp.lt.s32.totalorder %v3721_v50, 5120 }
 0x74f   : > { %v7286_v20 = vadd.f32 %v7285_v12, %v6774_v1  ;;  %v4739_v1 = vld [vmem:[%s8089_s18 + $0xb30] sm:$0xff]  ;;  %v5252_v12 = vld [vmem:[%s8095_s20 + $0xb38] sm:$0xff]  ;;  %v6785_v29 = vmul.f32 %v6273_v17, %v6273_v17  ;;  %v3213_v17 = vadd.s32 2960, %v9133_v3 }
 0x750   : > { %v5763_v16 = vsub.f32 %v4739_v1, %v5251_v2  ;;  %v6274_v25 = vsel %vm4226_vm5, %v5762_v8, 0.0  ;;  %v3723_v2 = vadd.s32 %v9137_v5, %v3209_v47  ;;  %vm4234_vm13 = vcmp.lt.s32.totalorder %v3722_v58, 5120 }
 0x751   : > { %v7287_v28 = vadd.f32 %v7286_v20, %v6775_v11  ;;  %v4740_v11 = vld [vmem:[%s8089_s18 + $0xb38] sm:$0xff]  ;;  %v5253_v20 = vld [vmem:[%s8095_s20 + $0xb40] sm:$0xff]  ;;  %v6786_v37 = vmul.f32 %v6274_v25, %v6274_v25  ;;  %v3214_v25 = vadd.s32 2968, %v9133_v3 }
 0x752   : > { %v5764_v24 = vsub.f32 %v4740_v11, %v5252_v12  ;;  %v6275_v33 = vsel %vm4227_vm6, %v5763_v16, 0.0  ;;  %v3724_v12 = vadd.s32 %v9137_v5, %v3210_v55  ;;  %vm4235_vm14 = vcmp.lt.s32.totalorder %v3723_v2, 5120 }
 0x753   : > { %v7288_v36 = vadd.f32 %v7287_v28, %v6776_v19  ;;  %v4741_v19 = vld [vmem:[%s8089_s18 + $0xb40] sm:$0xff]  ;;  %v5254_v28 = vld [vmem:[%s8095_s20 + $0xb48] sm:$0xff]  ;;  %v6787_v45 = vmul.f32 %v6275_v33, %v6275_v33  ;;  %v3215_v33 = vadd.s32 2976, %v9133_v3 }
 0x754   : > { %v5765_v32 = vsub.f32 %v4741_v19, %v5253_v20  ;;  %v6276_v41 = vsel %vm4228_vm7, %v5764_v24, 0.0  ;;  %v3725_v20 = vadd.s32 %v9137_v5, %v3211_v63  ;;  %vm4236_vm15 = vcmp.lt.s32.totalorder %v3724_v12, 5120 }
 0x755   : > { %v7289_v44 = vadd.f32 %v7288_v36, %v6777_v27  ;;  %v4742_v27 = vld [vmem:[%s8089_s18 + $0xb48] sm:$0xff]  ;;  %v5255_v36 = vld [vmem:[%s8095_s20 + $0xb50] sm:$0xff]  ;;  %v6788_v53 = vmul.f32 %v6276_v41, %v6276_v41  ;;  %v3216_v41 = vadd.s32 2984, %v9133_v3 }
 0x756   : > { %v5766_v40 = vsub.f32 %v4742_v27, %v5254_v28  ;;  %v6277_v49 = vsel %vm4229_vm8, %v5765_v32, 0.0  ;;  %v3726_v28 = vadd.s32 %v9137_v5, %v3212_v9  ;;  %vm4237_vm0 = vcmp.lt.s32.totalorder %v3725_v20, 5120 }
 0x757   : > { %v7290_v52 = vadd.f32 %v7289_v44, %v6778_v35  ;;  %v4743_v35 = vld [vmem:[%s8089_s18 + $0xb50] sm:$0xff]  ;;  %v5256_v44 = vld [vmem:[%s8095_s20 + $0xb58] sm:$0xff]  ;;  %v6789_v61 = vmul.f32 %v6277_v49, %v6277_v49  ;;  %v3217_v49 = vadd.s32 2992, %v9133_v3 }
 0x758   : > { %v5767_v48 = vsub.f32 %v4743_v35, %v5255_v36  ;;  %v6278_v57 = vsel %vm4230_vm9, %v5766_v40, 0.0  ;;  %v3727_v36 = vadd.s32 %v9137_v5, %v3213_v17  ;;  %vm4238_vm1 = vcmp.lt.s32.totalorder %v3726_v28, 5120 }
 0x759   : > { %v7291_v60 = vadd.f32 %v7290_v52, %v6779_v43  ;;  %v4744_v43 = vld [vmem:[%s8089_s18 + $0xb58] sm:$0xff]  ;;  %v5257_v52 = vld [vmem:[%s8095_s20 + $0xb60] sm:$0xff]  ;;  %v6790_v7 = vmul.f32 %v6278_v57, %v6278_v57  ;;  %v3218_v57 = vadd.s32 3000, %v9133_v3 }
 0x75a   : > { %v5768_v56 = vsub.f32 %v4744_v43, %v5256_v44  ;;  %v6279_v1 = vsel %vm4231_vm10, %v5767_v48, 0.0  ;;  %v3728_v44 = vadd.s32 %v9137_v5, %v3214_v25  ;;  %vm4239_vm2 = vcmp.lt.s32.totalorder %v3727_v36, 5120 }
 0x75b   : > { %v7292_v6 = vadd.f32 %v7291_v60, %v6780_v51  ;;  %v4745_v51 = vld [vmem:[%s8089_s18 + $0xb60] sm:$0xff]  ;;  %v5258_v60 = vld [vmem:[%s8095_s20 + $0xb68] sm:$0xff]  ;;  %v6791_v15 = vmul.f32 %v6279_v1, %v6279_v1  ;;  %v3219_v1 = vadd.s32 3008, %v9133_v3 }
 0x75c   : > { %v5769_v0 = vsub.f32 %v4745_v51, %v5257_v52  ;;  %v6280_v11 = vsel %vm4232_vm11, %v5768_v56, 0.0  ;;  %v3729_v52 = vadd.s32 %v9137_v5, %v3215_v33  ;;  %vm4240_vm3 = vcmp.lt.s32.totalorder %v3728_v44, 5120 }
 0x75d   : > { %v7293_v14 = vadd.f32 %v7292_v6, %v6781_v59  ;;  %v4746_v59 = vld [vmem:[%s8089_s18 + $0xb68] sm:$0xff]  ;;  %v5259_v6 = vld [vmem:[%s8095_s20 + $0xb70] sm:$0xff]  ;;  %v6792_v23 = vmul.f32 %v6280_v11, %v6280_v11  ;;  %v3220_v11 = vadd.s32 3016, %v9133_v3 }
 0x75e   : > { %v5770_v10 = vsub.f32 %v4746_v59, %v5258_v60  ;;  %v6281_v19 = vsel %vm4233_vm12, %v5769_v0, 0.0  ;;  %v3730_v60 = vadd.s32 %v9137_v5, %v3216_v41  ;;  %vm4241_vm4 = vcmp.lt.s32.totalorder %v3729_v52, 5120 }
 0x75f   : > { %v7294_v22 = vadd.f32 %v7293_v14, %v6782_v4  ;;  %v4747_v4 = vld [vmem:[%s8089_s18 + $0xb70] sm:$0xff]  ;;  %v5260_v14 = vld [vmem:[%s8095_s20 + $0xb78] sm:$0xff]  ;;  %v6793_v31 = vmul.f32 %v6281_v19, %v6281_v19  ;;  %v3221_v19 = vadd.s32 3024, %v9133_v3 }
 0x760   : > { %v5771_v18 = vsub.f32 %v4747_v4, %v5259_v6  ;;  %v6282_v27 = vsel %vm4234_vm13, %v5770_v10, 0.0  ;;  %v3731_v6 = vadd.s32 %v9137_v5, %v3217_v49  ;;  %vm4242_vm5 = vcmp.lt.s32.totalorder %v3730_v60, 5120 }
 0x761   : > { %v7295_v30 = vadd.f32 %v7294_v22, %v6783_v13  ;;  %v4748_v13 = vld [vmem:[%s8089_s18 + $0xb78] sm:$0xff]  ;;  %v5261_v22 = vld [vmem:[%s8095_s20 + $0xb80] sm:$0xff]  ;;  %v6794_v39 = vmul.f32 %v6282_v27, %v6282_v27  ;;  %v3222_v27 = vadd.s32 3032, %v9133_v3 }
 0x762   : > { %v5772_v26 = vsub.f32 %v4748_v13, %v5260_v14  ;;  %v6283_v35 = vsel %vm4235_vm14, %v5771_v18, 0.0  ;;  %v3732_v14 = vadd.s32 %v9137_v5, %v3218_v57  ;;  %vm4243_vm6 = vcmp.lt.s32.totalorder %v3731_v6, 5120 }
 0x763   : > { %v7296_v38 = vadd.f32 %v7295_v30, %v6784_v21  ;;  %v4749_v21 = vld [vmem:[%s8089_s18 + $0xb80] sm:$0xff]  ;;  %v5262_v30 = vld [vmem:[%s8095_s20 + $0xb88] sm:$0xff]  ;;  %v6795_v47 = vmul.f32 %v6283_v35, %v6283_v35  ;;  %v3223_v35 = vadd.s32 3040, %v9133_v3 }
 0x764   : > { %v5773_v34 = vsub.f32 %v4749_v21, %v5261_v22  ;;  %v6284_v43 = vsel %vm4236_vm15, %v5772_v26, 0.0  ;;  %v3733_v22 = vadd.s32 %v9137_v5, %v3219_v1  ;;  %vm4244_vm7 = vcmp.lt.s32.totalorder %v3732_v14, 5120 }
 0x765   : > { %v7297_v46 = vadd.f32 %v7296_v38, %v6785_v29  ;;  %v4750_v29 = vld [vmem:[%s8089_s18 + $0xb88] sm:$0xff]  ;;  %v5263_v38 = vld [vmem:[%s8095_s20 + $0xb90] sm:$0xff]  ;;  %v6796_v55 = vmul.f32 %v6284_v43, %v6284_v43  ;;  %v3224_v43 = vadd.s32 3048, %v9133_v3 }
 0x766   : > { %v5774_v42 = vsub.f32 %v4750_v29, %v5262_v30  ;;  %v6285_v51 = vsel %vm4237_vm0, %v5773_v34, 0.0  ;;  %v3734_v30 = vadd.s32 %v9137_v5, %v3220_v11  ;;  %vm4245_vm8 = vcmp.lt.s32.totalorder %v3733_v22, 5120 }
 0x767   : > { %v7298_v54 = vadd.f32 %v7297_v46, %v6786_v37  ;;  %v4751_v37 = vld [vmem:[%s8089_s18 + $0xb90] sm:$0xff]  ;;  %v5264_v46 = vld [vmem:[%s8095_s20 + $0xb98] sm:$0xff]  ;;  %v6797_v63 = vmul.f32 %v6285_v51, %v6285_v51  ;;  %v3225_v51 = vadd.s32 3056, %v9133_v3 }
 0x768   : > { %v5775_v50 = vsub.f32 %v4751_v37, %v5263_v38  ;;  %v6286_v59 = vsel %vm4238_vm1, %v5774_v42, 0.0  ;;  %v3735_v38 = vadd.s32 %v9137_v5, %v3221_v19  ;;  %vm4246_vm9 = vcmp.lt.s32.totalorder %v3734_v30, 5120 }
 0x769   : > { %v7299_v62 = vadd.f32 %v7298_v54, %v6787_v45  ;;  %v4752_v45 = vld [vmem:[%s8089_s18 + $0xb98] sm:$0xff]  ;;  %v5265_v54 = vld [vmem:[%s8095_s20 + $0xba0] sm:$0xff]  ;;  %v6798_v9 = vmul.f32 %v6286_v59, %v6286_v59  ;;  %v3226_v59 = vadd.s32 3064, %v9133_v3 }
 0x76a   : > { %v5776_v58 = vsub.f32 %v4752_v45, %v5264_v46  ;;  %v6287_v4 = vsel %vm4239_vm2, %v5775_v50, 0.0  ;;  %v3736_v46 = vadd.s32 %v9137_v5, %v3222_v27  ;;  %vm4247_vm10 = vcmp.lt.s32.totalorder %v3735_v38, 5120 }
 0x76b   : > { %v7300_v8 = vadd.f32 %v7299_v62, %v6788_v53  ;;  %v4753_v53 = vld [vmem:[%s8089_s18 + $0xba0] sm:$0xff]  ;;  %v5266_v62 = vld [vmem:[%s8095_s20 + $0xba8] sm:$0xff]  ;;  %v6799_v17 = vmul.f32 %v6287_v4, %v6287_v4  ;;  %v3227_v4 = vadd.s32 3072, %v9133_v3 }
 0x76c   : > { %v5777_v2 = vsub.f32 %v4753_v53, %v5265_v54  ;;  %v6288_v13 = vsel %vm4240_vm3, %v5776_v58, 0.0  ;;  %v3737_v54 = vadd.s32 %v9137_v5, %v3223_v35  ;;  %vm4248_vm11 = vcmp.lt.s32.totalorder %v3736_v46, 5120 }
 0x76d   : > { %v7301_v16 = vadd.f32 %v7300_v8, %v6789_v61  ;;  %v4754_v61 = vld [vmem:[%s8089_s18 + $0xba8] sm:$0xff]  ;;  %v5267_v8 = vld [vmem:[%s8095_s20 + $0xbb0] sm:$0xff]  ;;  %v6800_v25 = vmul.f32 %v6288_v13, %v6288_v13  ;;  %v3228_v13 = vadd.s32 3080, %v9133_v3 }
 0x76e   : > { %v5778_v12 = vsub.f32 %v4754_v61, %v5266_v62  ;;  %v6289_v21 = vsel %vm4241_vm4, %v5777_v2, 0.0  ;;  %v3738_v62 = vadd.s32 %v9137_v5, %v3224_v43  ;;  %vm4249_vm12 = vcmp.lt.s32.totalorder %v3737_v54, 5120 }
 0x76f   : > { %v7302_v24 = vadd.f32 %v7301_v16, %v6790_v7  ;;  %v4755_v7 = vld [vmem:[%s8089_s18 + $0xbb0] sm:$0xff]  ;;  %v5268_v16 = vld [vmem:[%s8095_s20 + $0xbb8] sm:$0xff]  ;;  %v6801_v33 = vmul.f32 %v6289_v21, %v6289_v21  ;;  %v3229_v21 = vadd.s32 3088, %v9133_v3 }
 0x770   : > { %v5779_v20 = vsub.f32 %v4755_v7, %v5267_v8  ;;  %v6290_v29 = vsel %vm4242_vm5, %v5778_v12, 0.0  ;;  %v3739_v8 = vadd.s32 %v9137_v5, %v3225_v51  ;;  %vm4250_vm13 = vcmp.lt.s32.totalorder %v3738_v62, 5120 }
 0x771   : > { %v7303_v32 = vadd.f32 %v7302_v24, %v6791_v15  ;;  %v4756_v15 = vld [vmem:[%s8089_s18 + $0xbb8] sm:$0xff]  ;;  %v5269_v24 = vld [vmem:[%s8095_s20 + $0xbc0] sm:$0xff]  ;;  %v6802_v41 = vmul.f32 %v6290_v29, %v6290_v29  ;;  %v3230_v29 = vadd.s32 3096, %v9133_v3 }
 0x772   : > { %v5780_v28 = vsub.f32 %v4756_v15, %v5268_v16  ;;  %v6291_v37 = vsel %vm4243_vm6, %v5779_v20, 0.0  ;;  %v3740_v16 = vadd.s32 %v9137_v5, %v3226_v59  ;;  %vm4251_vm14 = vcmp.lt.s32.totalorder %v3739_v8, 5120 }
 0x773   : > { %v7304_v40 = vadd.f32 %v7303_v32, %v6792_v23  ;;  %v4757_v23 = vld [vmem:[%s8089_s18 + $0xbc0] sm:$0xff]  ;;  %v5270_v32 = vld [vmem:[%s8095_s20 + $0xbc8] sm:$0xff]  ;;  %v6803_v49 = vmul.f32 %v6291_v37, %v6291_v37  ;;  %v3231_v37 = vadd.s32 3104, %v9133_v3 }
 0x774   : > { %v5781_v36 = vsub.f32 %v4757_v23, %v5269_v24  ;;  %v6292_v45 = vsel %vm4244_vm7, %v5780_v28, 0.0  ;;  %v3741_v24 = vadd.s32 %v9137_v5, %v3227_v4  ;;  %vm4252_vm15 = vcmp.lt.s32.totalorder %v3740_v16, 5120 }
 0x775   : > { %v7305_v48 = vadd.f32 %v7304_v40, %v6793_v31  ;;  %v4758_v31 = vld [vmem:[%s8089_s18 + $0xbc8] sm:$0xff]  ;;  %v5271_v40 = vld [vmem:[%s8095_s20 + $0xbd0] sm:$0xff]  ;;  %v6804_v57 = vmul.f32 %v6292_v45, %v6292_v45  ;;  %v3232_v45 = vadd.s32 3112, %v9133_v3 }
 0x776   : > { %v5782_v44 = vsub.f32 %v4758_v31, %v5270_v32  ;;  %v6293_v53 = vsel %vm4245_vm8, %v5781_v36, 0.0  ;;  %v3742_v32 = vadd.s32 %v9137_v5, %v3228_v13  ;;  %vm4253_vm0 = vcmp.lt.s32.totalorder %v3741_v24, 5120 }
 0x777   : > { %v7306_v56 = vadd.f32 %v7305_v48, %v6794_v39  ;;  %v4759_v39 = vld [vmem:[%s8089_s18 + $0xbd0] sm:$0xff]  ;;  %v5272_v48 = vld [vmem:[%s8095_s20 + $0xbd8] sm:$0xff]  ;;  %v6805_v1 = vmul.f32 %v6293_v53, %v6293_v53  ;;  %v3233_v53 = vadd.s32 3120, %v9133_v3 }
 0x778   : > { %v5783_v52 = vsub.f32 %v4759_v39, %v5271_v40  ;;  %v6294_v61 = vsel %vm4246_vm9, %v5782_v44, 0.0  ;;  %v3743_v40 = vadd.s32 %v9137_v5, %v3229_v21  ;;  %vm4254_vm1 = vcmp.lt.s32.totalorder %v3742_v32, 5120 }
 0x779   : > { %v7307_v0 = vadd.f32 %v7306_v56, %v6795_v47  ;;  %v4760_v47 = vld [vmem:[%s8089_s18 + $0xbd8] sm:$0xff]  ;;  %v5273_v56 = vld [vmem:[%s8095_s20 + $0xbe0] sm:$0xff]  ;;  %v6806_v11 = vmul.f32 %v6294_v61, %v6294_v61  ;;  %v3234_v61 = vadd.s32 3128, %v9133_v3 }
 0x77a   : > { %v5784_v60 = vsub.f32 %v4760_v47, %v5272_v48  ;;  %v6295_v7 = vsel %vm4247_vm10, %v5783_v52, 0.0  ;;  %v3744_v48 = vadd.s32 %v9137_v5, %v3230_v29  ;;  %vm4255_vm2 = vcmp.lt.s32.totalorder %v3743_v40, 5120 }
 0x77b   : > { %v7308_v10 = vadd.f32 %v7307_v0, %v6796_v55  ;;  %v4761_v55 = vld [vmem:[%s8089_s18 + $0xbe0] sm:$0xff]  ;;  %v5274_v0 = vld [vmem:[%s8095_s20 + $0xbe8] sm:$0xff]  ;;  %v6807_v19 = vmul.f32 %v6295_v7, %v6295_v7  ;;  %v3235_v7 = vadd.s32 3136, %v9133_v3 }
 0x77c   : > { %v5785_v6 = vsub.f32 %v4761_v55, %v5273_v56  ;;  %v6296_v15 = vsel %vm4248_vm11, %v5784_v60, 0.0  ;;  %v3745_v56 = vadd.s32 %v9137_v5, %v3231_v37  ;;  %vm4256_vm3 = vcmp.lt.s32.totalorder %v3744_v48, 5120 }
 0x77d   : > { %v7309_v18 = vadd.f32 %v7308_v10, %v6797_v63  ;;  %v4762_v63 = vld [vmem:[%s8089_s18 + $0xbe8] sm:$0xff]  ;;  %v5275_v10 = vld [vmem:[%s8095_s20 + $0xbf0] sm:$0xff]  ;;  %v6808_v27 = vmul.f32 %v6296_v15, %v6296_v15  ;;  %v3236_v15 = vadd.s32 3144, %v9133_v3 }
 0x77e   : > { %v5786_v14 = vsub.f32 %v4762_v63, %v5274_v0  ;;  %v6297_v23 = vsel %vm4249_vm12, %v5785_v6, 0.0  ;;  %v3746_v0 = vadd.s32 %v9137_v5, %v3232_v45  ;;  %vm4257_vm4 = vcmp.lt.s32.totalorder %v3745_v56, 5120 }
 0x77f   : > { %v7310_v26 = vadd.f32 %v7309_v18, %v6798_v9  ;;  %v4763_v9 = vld [vmem:[%s8089_s18 + $0xbf0] sm:$0xff]  ;;  %v5276_v18 = vld [vmem:[%s8095_s20 + $0xbf8] sm:$0xff]  ;;  %v6809_v35 = vmul.f32 %v6297_v23, %v6297_v23  ;;  %v3237_v23 = vadd.s32 3152, %v9133_v3 }
 0x780   : > { %v5787_v22 = vsub.f32 %v4763_v9, %v5275_v10  ;;  %v6298_v31 = vsel %vm4250_vm13, %v5786_v14, 0.0  ;;  %v3747_v10 = vadd.s32 %v9137_v5, %v3233_v53  ;;  %vm4258_vm5 = vcmp.lt.s32.totalorder %v3746_v0, 5120 }
 0x781   : > { %v7311_v34 = vadd.f32 %v7310_v26, %v6799_v17  ;;  %v4764_v17 = vld [vmem:[%s8089_s18 + $0xbf8] sm:$0xff]  ;;  %v5277_v26 = vld [vmem:[%s8095_s20 + $0xc00] sm:$0xff]  ;;  %v6810_v43 = vmul.f32 %v6298_v31, %v6298_v31  ;;  %v3238_v31 = vadd.s32 3160, %v9133_v3 }
 0x782   : > { %v5788_v30 = vsub.f32 %v4764_v17, %v5276_v18  ;;  %v6299_v39 = vsel %vm4251_vm14, %v5787_v22, 0.0  ;;  %v3748_v18 = vadd.s32 %v9137_v5, %v3234_v61  ;;  %vm4259_vm6 = vcmp.lt.s32.totalorder %v3747_v10, 5120 }
 0x783   : > { %v7312_v42 = vadd.f32 %v7311_v34, %v6800_v25  ;;  %v4765_v25 = vld [vmem:[%s8089_s18 + $0xc00] sm:$0xff]  ;;  %v5278_v34 = vld [vmem:[%s8095_s20 + $0xc08] sm:$0xff]  ;;  %v6811_v51 = vmul.f32 %v6299_v39, %v6299_v39  ;;  %v3239_v39 = vadd.s32 3168, %v9133_v3 }
 0x784   : > { %v5789_v38 = vsub.f32 %v4765_v25, %v5277_v26  ;;  %v6300_v47 = vsel %vm4252_vm15, %v5788_v30, 0.0  ;;  %v3749_v26 = vadd.s32 %v9137_v5, %v3235_v7  ;;  %vm4260_vm7 = vcmp.lt.s32.totalorder %v3748_v18, 5120 }
 0x785   : > { %v7313_v50 = vadd.f32 %v7312_v42, %v6801_v33  ;;  %v4766_v33 = vld [vmem:[%s8089_s18 + $0xc08] sm:$0xff]  ;;  %v5279_v42 = vld [vmem:[%s8095_s20 + $0xc10] sm:$0xff]  ;;  %v6812_v59 = vmul.f32 %v6300_v47, %v6300_v47  ;;  %v3240_v47 = vadd.s32 3176, %v9133_v3 }
 0x786   : > { %v5790_v46 = vsub.f32 %v4766_v33, %v5278_v34  ;;  %v6301_v55 = vsel %vm4253_vm0, %v5789_v38, 0.0  ;;  %v3750_v34 = vadd.s32 %v9137_v5, %v3236_v15  ;;  %vm4261_vm8 = vcmp.lt.s32.totalorder %v3749_v26, 5120 }
 0x787   : > { %v7314_v58 = vadd.f32 %v7313_v50, %v6802_v41  ;;  %v4767_v41 = vld [vmem:[%s8089_s18 + $0xc10] sm:$0xff]  ;;  %v5280_v50 = vld [vmem:[%s8095_s20 + $0xc18] sm:$0xff]  ;;  %v6813_v4 = vmul.f32 %v6301_v55, %v6301_v55  ;;  %v3241_v55 = vadd.s32 3184, %v9133_v3 }
 0x788   : > { %v5791_v54 = vsub.f32 %v4767_v41, %v5279_v42  ;;  %v6302_v63 = vsel %vm4254_vm1, %v5790_v46, 0.0  ;;  %v3751_v42 = vadd.s32 %v9137_v5, %v3237_v23  ;;  %vm4262_vm9 = vcmp.lt.s32.totalorder %v3750_v34, 5120 }
 0x789   : > { %v7315_v2 = vadd.f32 %v7314_v58, %v6803_v49  ;;  %v4768_v49 = vld [vmem:[%s8089_s18 + $0xc18] sm:$0xff]  ;;  %v5281_v58 = vld [vmem:[%s8095_s20 + $0xc20] sm:$0xff]  ;;  %v6814_v13 = vmul.f32 %v6302_v63, %v6302_v63  ;;  %v3242_v63 = vadd.s32 3192, %v9133_v3 }
 0x78a   : > { %v5792_v62 = vsub.f32 %v4768_v49, %v5280_v50  ;;  %v6303_v9 = vsel %vm4255_vm2, %v5791_v54, 0.0  ;;  %v3752_v50 = vadd.s32 %v9137_v5, %v3238_v31  ;;  %vm4263_vm10 = vcmp.lt.s32.totalorder %v3751_v42, 5120 }
 0x78b   : > { %v7316_v12 = vadd.f32 %v7315_v2, %v6804_v57  ;;  %v4769_v57 = vld [vmem:[%s8089_s18 + $0xc20] sm:$0xff]  ;;  %v5282_v2 = vld [vmem:[%s8095_s20 + $0xc28] sm:$0xff]  ;;  %v6815_v21 = vmul.f32 %v6303_v9, %v6303_v9  ;;  %v3243_v9 = vadd.s32 3200, %v9133_v3 }
 0x78c   : > { %v5793_v8 = vsub.f32 %v4769_v57, %v5281_v58  ;;  %v6304_v17 = vsel %vm4256_vm3, %v5792_v62, 0.0  ;;  %v3753_v58 = vadd.s32 %v9137_v5, %v3239_v39  ;;  %vm4264_vm11 = vcmp.lt.s32.totalorder %v3752_v50, 5120 }
 0x78d   : > { %v7317_v20 = vadd.f32 %v7316_v12, %v6805_v1  ;;  %v4770_v1 = vld [vmem:[%s8089_s18 + $0xc28] sm:$0xff]  ;;  %v5283_v12 = vld [vmem:[%s8095_s20 + $0xc30] sm:$0xff]  ;;  %v6816_v29 = vmul.f32 %v6304_v17, %v6304_v17  ;;  %v3244_v17 = vadd.s32 3208, %v9133_v3 }
 0x78e   : > { %v5794_v16 = vsub.f32 %v4770_v1, %v5282_v2  ;;  %v6305_v25 = vsel %vm4257_vm4, %v5793_v8, 0.0  ;;  %v3754_v2 = vadd.s32 %v9137_v5, %v3240_v47  ;;  %vm4265_vm12 = vcmp.lt.s32.totalorder %v3753_v58, 5120 }
 0x78f   : > { %v7318_v28 = vadd.f32 %v7317_v20, %v6806_v11  ;;  %v4771_v11 = vld [vmem:[%s8089_s18 + $0xc30] sm:$0xff]  ;;  %v5284_v20 = vld [vmem:[%s8095_s20 + $0xc38] sm:$0xff]  ;;  %v6817_v37 = vmul.f32 %v6305_v25, %v6305_v25  ;;  %v3245_v25 = vadd.s32 3216, %v9133_v3 }
 0x790   : > { %v5795_v24 = vsub.f32 %v4771_v11, %v5283_v12  ;;  %v6306_v33 = vsel %vm4258_vm5, %v5794_v16, 0.0  ;;  %v3755_v12 = vadd.s32 %v9137_v5, %v3241_v55  ;;  %vm4266_vm13 = vcmp.lt.s32.totalorder %v3754_v2, 5120 }
 0x791   : > { %v7319_v36 = vadd.f32 %v7318_v28, %v6807_v19  ;;  %v4772_v19 = vld [vmem:[%s8089_s18 + $0xc38] sm:$0xff]  ;;  %v5285_v28 = vld [vmem:[%s8095_s20 + $0xc40] sm:$0xff]  ;;  %v6818_v45 = vmul.f32 %v6306_v33, %v6306_v33  ;;  %v3246_v33 = vadd.s32 3224, %v9133_v3 }
 0x792   : > { %v5796_v32 = vsub.f32 %v4772_v19, %v5284_v20  ;;  %v6307_v41 = vsel %vm4259_vm6, %v5795_v24, 0.0  ;;  %v3756_v20 = vadd.s32 %v9137_v5, %v3242_v63  ;;  %vm4267_vm14 = vcmp.lt.s32.totalorder %v3755_v12, 5120 }
 0x793   : > { %v7320_v44 = vadd.f32 %v7319_v36, %v6808_v27  ;;  %v4773_v27 = vld [vmem:[%s8089_s18 + $0xc40] sm:$0xff]  ;;  %v5286_v36 = vld [vmem:[%s8095_s20 + $0xc48] sm:$0xff]  ;;  %v6819_v53 = vmul.f32 %v6307_v41, %v6307_v41  ;;  %v3247_v41 = vadd.s32 3232, %v9133_v3 }
 0x794   : > { %v5797_v40 = vsub.f32 %v4773_v27, %v5285_v28  ;;  %v6308_v49 = vsel %vm4260_vm7, %v5796_v32, 0.0  ;;  %v3757_v28 = vadd.s32 %v9137_v5, %v3243_v9  ;;  %vm4268_vm15 = vcmp.lt.s32.totalorder %v3756_v20, 5120 }
 0x795   : > { %v7321_v52 = vadd.f32 %v7320_v44, %v6809_v35  ;;  %v4774_v35 = vld [vmem:[%s8089_s18 + $0xc48] sm:$0xff]  ;;  %v5287_v44 = vld [vmem:[%s8095_s20 + $0xc50] sm:$0xff]  ;;  %v6820_v61 = vmul.f32 %v6308_v49, %v6308_v49  ;;  %v3248_v49 = vadd.s32 3240, %v9133_v3 }
 0x796   : > { %v5798_v48 = vsub.f32 %v4774_v35, %v5286_v36  ;;  %v6309_v57 = vsel %vm4261_vm8, %v5797_v40, 0.0  ;;  %v3758_v36 = vadd.s32 %v9137_v5, %v3244_v17  ;;  %vm4269_vm0 = vcmp.lt.s32.totalorder %v3757_v28, 5120 }
 0x797   : > { %v7322_v60 = vadd.f32 %v7321_v52, %v6810_v43  ;;  %v4775_v43 = vld [vmem:[%s8089_s18 + $0xc50] sm:$0xff]  ;;  %v5288_v52 = vld [vmem:[%s8095_s20 + $0xc58] sm:$0xff]  ;;  %v6821_v7 = vmul.f32 %v6309_v57, %v6309_v57  ;;  %v3249_v57 = vadd.s32 3248, %v9133_v3 }
 0x798   : > { %v5799_v56 = vsub.f32 %v4775_v43, %v5287_v44  ;;  %v6310_v1 = vsel %vm4262_vm9, %v5798_v48, 0.0  ;;  %v3759_v44 = vadd.s32 %v9137_v5, %v3245_v25  ;;  %vm4270_vm1 = vcmp.lt.s32.totalorder %v3758_v36, 5120 }
 0x799   : > { %v7323_v6 = vadd.f32 %v7322_v60, %v6811_v51  ;;  %v4776_v51 = vld [vmem:[%s8089_s18 + $0xc58] sm:$0xff]  ;;  %v5289_v60 = vld [vmem:[%s8095_s20 + $0xc60] sm:$0xff]  ;;  %v6822_v15 = vmul.f32 %v6310_v1, %v6310_v1  ;;  %v3250_v1 = vadd.s32 3256, %v9133_v3 }
 0x79a   : > { %v5800_v0 = vsub.f32 %v4776_v51, %v5288_v52  ;;  %v6311_v11 = vsel %vm4263_vm10, %v5799_v56, 0.0  ;;  %v3760_v52 = vadd.s32 %v9137_v5, %v3246_v33  ;;  %vm4271_vm2 = vcmp.lt.s32.totalorder %v3759_v44, 5120 }
 0x79b   : > { %v7324_v14 = vadd.f32 %v7323_v6, %v6812_v59  ;;  %v4777_v59 = vld [vmem:[%s8089_s18 + $0xc60] sm:$0xff]  ;;  %v5290_v6 = vld [vmem:[%s8095_s20 + $0xc68] sm:$0xff]  ;;  %v6823_v23 = vmul.f32 %v6311_v11, %v6311_v11  ;;  %v3251_v11 = vadd.s32 3264, %v9133_v3 }
 0x79c   : > { %v5801_v10 = vsub.f32 %v4777_v59, %v5289_v60  ;;  %v6312_v19 = vsel %vm4264_vm11, %v5800_v0, 0.0  ;;  %v3761_v60 = vadd.s32 %v9137_v5, %v3247_v41  ;;  %vm4272_vm3 = vcmp.lt.s32.totalorder %v3760_v52, 5120 }
 0x79d   : > { %v7325_v22 = vadd.f32 %v7324_v14, %v6813_v4  ;;  %v4778_v4 = vld [vmem:[%s8089_s18 + $0xc68] sm:$0xff]  ;;  %v5291_v14 = vld [vmem:[%s8095_s20 + $0xc70] sm:$0xff]  ;;  %v6824_v31 = vmul.f32 %v6312_v19, %v6312_v19  ;;  %v3252_v19 = vadd.s32 3272, %v9133_v3 }
 0x79e   : > { %v5802_v18 = vsub.f32 %v4778_v4, %v5290_v6  ;;  %v6313_v27 = vsel %vm4265_vm12, %v5801_v10, 0.0  ;;  %v3762_v6 = vadd.s32 %v9137_v5, %v3248_v49  ;;  %vm4273_vm4 = vcmp.lt.s32.totalorder %v3761_v60, 5120 }
 0x79f   : > { %v7326_v30 = vadd.f32 %v7325_v22, %v6814_v13  ;;  %v4779_v13 = vld [vmem:[%s8089_s18 + $0xc70] sm:$0xff]  ;;  %v5292_v22 = vld [vmem:[%s8095_s20 + $0xc78] sm:$0xff]  ;;  %v6825_v39 = vmul.f32 %v6313_v27, %v6313_v27  ;;  %v3253_v27 = vadd.s32 3280, %v9133_v3 }
 0x7a0   : > { %v5803_v26 = vsub.f32 %v4779_v13, %v5291_v14  ;;  %v6314_v35 = vsel %vm4266_vm13, %v5802_v18, 0.0  ;;  %v3763_v14 = vadd.s32 %v9137_v5, %v3249_v57  ;;  %vm4274_vm5 = vcmp.lt.s32.totalorder %v3762_v6, 5120 }
 0x7a1   : > { %v7327_v38 = vadd.f32 %v7326_v30, %v6815_v21  ;;  %v4780_v21 = vld [vmem:[%s8089_s18 + $0xc78] sm:$0xff]  ;;  %v5293_v30 = vld [vmem:[%s8095_s20 + $0xc80] sm:$0xff]  ;;  %v6826_v47 = vmul.f32 %v6314_v35, %v6314_v35  ;;  %v3254_v35 = vadd.s32 3288, %v9133_v3 }
 0x7a2   : > { %v5804_v34 = vsub.f32 %v4780_v21, %v5292_v22  ;;  %v6315_v43 = vsel %vm4267_vm14, %v5803_v26, 0.0  ;;  %v3764_v22 = vadd.s32 %v9137_v5, %v3250_v1  ;;  %vm4275_vm6 = vcmp.lt.s32.totalorder %v3763_v14, 5120 }
 0x7a3   : > { %v7328_v46 = vadd.f32 %v7327_v38, %v6816_v29  ;;  %v4781_v29 = vld [vmem:[%s8089_s18 + $0xc80] sm:$0xff]  ;;  %v5294_v38 = vld [vmem:[%s8095_s20 + $0xc88] sm:$0xff]  ;;  %v6827_v55 = vmul.f32 %v6315_v43, %v6315_v43  ;;  %v3255_v43 = vadd.s32 3296, %v9133_v3 }
 0x7a4   : > { %v5805_v42 = vsub.f32 %v4781_v29, %v5293_v30  ;;  %v6316_v51 = vsel %vm4268_vm15, %v5804_v34, 0.0  ;;  %v3765_v30 = vadd.s32 %v9137_v5, %v3251_v11  ;;  %vm4276_vm7 = vcmp.lt.s32.totalorder %v3764_v22, 5120 }
 0x7a5   : > { %v7329_v54 = vadd.f32 %v7328_v46, %v6817_v37  ;;  %v4782_v37 = vld [vmem:[%s8089_s18 + $0xc88] sm:$0xff]  ;;  %v5295_v46 = vld [vmem:[%s8095_s20 + $0xc90] sm:$0xff]  ;;  %v6828_v63 = vmul.f32 %v6316_v51, %v6316_v51  ;;  %v3256_v51 = vadd.s32 3304, %v9133_v3 }
 0x7a6   : > { %v5806_v50 = vsub.f32 %v4782_v37, %v5294_v38  ;;  %v6317_v59 = vsel %vm4269_vm0, %v5805_v42, 0.0  ;;  %v3766_v38 = vadd.s32 %v9137_v5, %v3252_v19  ;;  %vm4277_vm8 = vcmp.lt.s32.totalorder %v3765_v30, 5120 }
 0x7a7   : > { %v7330_v62 = vadd.f32 %v7329_v54, %v6818_v45  ;;  %v4783_v45 = vld [vmem:[%s8089_s18 + $0xc90] sm:$0xff]  ;;  %v5296_v54 = vld [vmem:[%s8095_s20 + $0xc98] sm:$0xff]  ;;  %v6829_v9 = vmul.f32 %v6317_v59, %v6317_v59  ;;  %v3257_v59 = vadd.s32 3312, %v9133_v3 }
 0x7a8   : > { %v5807_v58 = vsub.f32 %v4783_v45, %v5295_v46  ;;  %v6318_v4 = vsel %vm4270_vm1, %v5806_v50, 0.0  ;;  %v3767_v46 = vadd.s32 %v9137_v5, %v3253_v27  ;;  %vm4278_vm9 = vcmp.lt.s32.totalorder %v3766_v38, 5120 }
 0x7a9   : > { %v7331_v8 = vadd.f32 %v7330_v62, %v6819_v53  ;;  %v4784_v53 = vld [vmem:[%s8089_s18 + $0xc98] sm:$0xff]  ;;  %v5297_v62 = vld [vmem:[%s8095_s20 + $0xca0] sm:$0xff]  ;;  %v6830_v17 = vmul.f32 %v6318_v4, %v6318_v4  ;;  %v3258_v4 = vadd.s32 3320, %v9133_v3 }
 0x7aa   : > { %v5808_v2 = vsub.f32 %v4784_v53, %v5296_v54  ;;  %v6319_v13 = vsel %vm4271_vm2, %v5807_v58, 0.0  ;;  %v3768_v54 = vadd.s32 %v9137_v5, %v3254_v35  ;;  %vm4279_vm10 = vcmp.lt.s32.totalorder %v3767_v46, 5120 }
 0x7ab   : > { %v7332_v16 = vadd.f32 %v7331_v8, %v6820_v61  ;;  %v4785_v61 = vld [vmem:[%s8089_s18 + $0xca0] sm:$0xff]  ;;  %v5298_v8 = vld [vmem:[%s8095_s20 + $0xca8] sm:$0xff]  ;;  %v6831_v25 = vmul.f32 %v6319_v13, %v6319_v13  ;;  %v3259_v13 = vadd.s32 3328, %v9133_v3 }
 0x7ac   : > { %v5809_v12 = vsub.f32 %v4785_v61, %v5297_v62  ;;  %v6320_v21 = vsel %vm4272_vm3, %v5808_v2, 0.0  ;;  %v3769_v62 = vadd.s32 %v9137_v5, %v3255_v43  ;;  %vm4280_vm11 = vcmp.lt.s32.totalorder %v3768_v54, 5120 }
 0x7ad   : > { %v7333_v24 = vadd.f32 %v7332_v16, %v6821_v7  ;;  %v4786_v7 = vld [vmem:[%s8089_s18 + $0xca8] sm:$0xff]  ;;  %v5299_v16 = vld [vmem:[%s8095_s20 + $0xcb0] sm:$0xff]  ;;  %v6832_v33 = vmul.f32 %v6320_v21, %v6320_v21  ;;  %v3260_v21 = vadd.s32 3336, %v9133_v3 }
 0x7ae   : > { %v5810_v20 = vsub.f32 %v4786_v7, %v5298_v8  ;;  %v6321_v29 = vsel %vm4273_vm4, %v5809_v12, 0.0  ;;  %v3770_v8 = vadd.s32 %v9137_v5, %v3256_v51  ;;  %vm4281_vm12 = vcmp.lt.s32.totalorder %v3769_v62, 5120 }
 0x7af   : > { %v7334_v32 = vadd.f32 %v7333_v24, %v6822_v15  ;;  %v4787_v15 = vld [vmem:[%s8089_s18 + $0xcb0] sm:$0xff]  ;;  %v5300_v24 = vld [vmem:[%s8095_s20 + $0xcb8] sm:$0xff]  ;;  %v6833_v41 = vmul.f32 %v6321_v29, %v6321_v29  ;;  %v3261_v29 = vadd.s32 3344, %v9133_v3 }
 0x7b0   : > { %v5811_v28 = vsub.f32 %v4787_v15, %v5299_v16  ;;  %v6322_v37 = vsel %vm4274_vm5, %v5810_v20, 0.0  ;;  %v3771_v16 = vadd.s32 %v9137_v5, %v3257_v59  ;;  %vm4282_vm13 = vcmp.lt.s32.totalorder %v3770_v8, 5120 }
 0x7b1   : > { %v7335_v40 = vadd.f32 %v7334_v32, %v6823_v23  ;;  %v4788_v23 = vld [vmem:[%s8089_s18 + $0xcb8] sm:$0xff]  ;;  %v5301_v32 = vld [vmem:[%s8095_s20 + $0xcc0] sm:$0xff]  ;;  %v6834_v49 = vmul.f32 %v6322_v37, %v6322_v37  ;;  %v3262_v37 = vadd.s32 3352, %v9133_v3 }
 0x7b2   : > { %v5812_v36 = vsub.f32 %v4788_v23, %v5300_v24  ;;  %v6323_v45 = vsel %vm4275_vm6, %v5811_v28, 0.0  ;;  %v3772_v24 = vadd.s32 %v9137_v5, %v3258_v4  ;;  %vm4283_vm14 = vcmp.lt.s32.totalorder %v3771_v16, 5120 }
 0x7b3   : > { %v7336_v48 = vadd.f32 %v7335_v40, %v6824_v31  ;;  %v4789_v31 = vld [vmem:[%s8089_s18 + $0xcc0] sm:$0xff]  ;;  %v5302_v40 = vld [vmem:[%s8095_s20 + $0xcc8] sm:$0xff]  ;;  %v6835_v57 = vmul.f32 %v6323_v45, %v6323_v45  ;;  %v3263_v45 = vadd.s32 3360, %v9133_v3 }
 0x7b4   : > { %v5813_v44 = vsub.f32 %v4789_v31, %v5301_v32  ;;  %v6324_v53 = vsel %vm4276_vm7, %v5812_v36, 0.0  ;;  %v3773_v32 = vadd.s32 %v9137_v5, %v3259_v13  ;;  %vm4284_vm15 = vcmp.lt.s32.totalorder %v3772_v24, 5120 }
 0x7b5   : > { %v7337_v56 = vadd.f32 %v7336_v48, %v6825_v39  ;;  %v4790_v39 = vld [vmem:[%s8089_s18 + $0xcc8] sm:$0xff]  ;;  %v5303_v48 = vld [vmem:[%s8095_s20 + $0xcd0] sm:$0xff]  ;;  %v6836_v1 = vmul.f32 %v6324_v53, %v6324_v53  ;;  %v3264_v53 = vadd.s32 3368, %v9133_v3 }
 0x7b6   : > { %v5814_v52 = vsub.f32 %v4790_v39, %v5302_v40  ;;  %v6325_v61 = vsel %vm4277_vm8, %v5813_v44, 0.0  ;;  %v3774_v40 = vadd.s32 %v9137_v5, %v3260_v21  ;;  %vm4285_vm0 = vcmp.lt.s32.totalorder %v3773_v32, 5120 }
 0x7b7   : > { %v7338_v0 = vadd.f32 %v7337_v56, %v6826_v47  ;;  %v4791_v47 = vld [vmem:[%s8089_s18 + $0xcd0] sm:$0xff]  ;;  %v5304_v56 = vld [vmem:[%s8095_s20 + $0xcd8] sm:$0xff]  ;;  %v6837_v11 = vmul.f32 %v6325_v61, %v6325_v61  ;;  %v3265_v61 = vadd.s32 3376, %v9133_v3 }
 0x7b8   : > { %v5815_v60 = vsub.f32 %v4791_v47, %v5303_v48  ;;  %v6326_v7 = vsel %vm4278_vm9, %v5814_v52, 0.0  ;;  %v3775_v48 = vadd.s32 %v9137_v5, %v3261_v29  ;;  %vm4286_vm1 = vcmp.lt.s32.totalorder %v3774_v40, 5120 }
 0x7b9   : > { %v7339_v10 = vadd.f32 %v7338_v0, %v6827_v55  ;;  %v4792_v55 = vld [vmem:[%s8089_s18 + $0xcd8] sm:$0xff]  ;;  %v5305_v0 = vld [vmem:[%s8095_s20 + $0xce0] sm:$0xff]  ;;  %v6838_v19 = vmul.f32 %v6326_v7, %v6326_v7  ;;  %v3266_v7 = vadd.s32 3384, %v9133_v3 }
 0x7ba   : > { %v5816_v6 = vsub.f32 %v4792_v55, %v5304_v56  ;;  %v6327_v15 = vsel %vm4279_vm10, %v5815_v60, 0.0  ;;  %v3776_v56 = vadd.s32 %v9137_v5, %v3262_v37  ;;  %vm4287_vm2 = vcmp.lt.s32.totalorder %v3775_v48, 5120 }
 0x7bb   : > { %v7340_v18 = vadd.f32 %v7339_v10, %v6828_v63  ;;  %v4793_v63 = vld [vmem:[%s8089_s18 + $0xce0] sm:$0xff]  ;;  %v5306_v10 = vld [vmem:[%s8095_s20 + $0xce8] sm:$0xff]  ;;  %v6839_v27 = vmul.f32 %v6327_v15, %v6327_v15  ;;  %v3267_v15 = vadd.s32 3392, %v9133_v3 }
 0x7bc   : > { %v5817_v14 = vsub.f32 %v4793_v63, %v5305_v0  ;;  %v6328_v23 = vsel %vm4280_vm11, %v5816_v6, 0.0  ;;  %v3777_v0 = vadd.s32 %v9137_v5, %v3263_v45  ;;  %vm4288_vm3 = vcmp.lt.s32.totalorder %v3776_v56, 5120 }
 0x7bd   : > { %v7341_v26 = vadd.f32 %v7340_v18, %v6829_v9  ;;  %v4794_v9 = vld [vmem:[%s8089_s18 + $0xce8] sm:$0xff]  ;;  %v5307_v18 = vld [vmem:[%s8095_s20 + $0xcf0] sm:$0xff]  ;;  %v6840_v35 = vmul.f32 %v6328_v23, %v6328_v23  ;;  %v3268_v23 = vadd.s32 3400, %v9133_v3 }
 0x7be   : > { %v5818_v22 = vsub.f32 %v4794_v9, %v5306_v10  ;;  %v6329_v31 = vsel %vm4281_vm12, %v5817_v14, 0.0  ;;  %v3778_v10 = vadd.s32 %v9137_v5, %v3264_v53  ;;  %vm4289_vm4 = vcmp.lt.s32.totalorder %v3777_v0, 5120 }
 0x7bf   : > { %v7342_v34 = vadd.f32 %v7341_v26, %v6830_v17  ;;  %v4795_v17 = vld [vmem:[%s8089_s18 + $0xcf0] sm:$0xff]  ;;  %v5308_v26 = vld [vmem:[%s8095_s20 + $0xcf8] sm:$0xff]  ;;  %v6841_v43 = vmul.f32 %v6329_v31, %v6329_v31  ;;  %v3269_v31 = vadd.s32 3408, %v9133_v3 }
 0x7c0   : > { %v5819_v30 = vsub.f32 %v4795_v17, %v5307_v18  ;;  %v6330_v39 = vsel %vm4282_vm13, %v5818_v22, 0.0  ;;  %v3779_v18 = vadd.s32 %v9137_v5, %v3265_v61  ;;  %vm4290_vm5 = vcmp.lt.s32.totalorder %v3778_v10, 5120 }
 0x7c1   : > { %v7343_v42 = vadd.f32 %v7342_v34, %v6831_v25  ;;  %v4796_v25 = vld [vmem:[%s8089_s18 + $0xcf8] sm:$0xff]  ;;  %v5309_v34 = vld [vmem:[%s8095_s20 + $0xd00] sm:$0xff]  ;;  %v6842_v51 = vmul.f32 %v6330_v39, %v6330_v39  ;;  %v3270_v39 = vadd.s32 3416, %v9133_v3 }
 0x7c2   : > { %v5820_v38 = vsub.f32 %v4796_v25, %v5308_v26  ;;  %v6331_v47 = vsel %vm4283_vm14, %v5819_v30, 0.0  ;;  %v3780_v26 = vadd.s32 %v9137_v5, %v3266_v7  ;;  %vm4291_vm6 = vcmp.lt.s32.totalorder %v3779_v18, 5120 }
 0x7c3   : > { %v7344_v50 = vadd.f32 %v7343_v42, %v6832_v33  ;;  %v4797_v33 = vld [vmem:[%s8089_s18 + $0xd00] sm:$0xff]  ;;  %v5310_v42 = vld [vmem:[%s8095_s20 + $0xd08] sm:$0xff]  ;;  %v6843_v59 = vmul.f32 %v6331_v47, %v6331_v47  ;;  %v3271_v47 = vadd.s32 3424, %v9133_v3 }
 0x7c4   : > { %v5821_v46 = vsub.f32 %v4797_v33, %v5309_v34  ;;  %v6332_v55 = vsel %vm4284_vm15, %v5820_v38, 0.0  ;;  %v3781_v34 = vadd.s32 %v9137_v5, %v3267_v15  ;;  %vm4292_vm7 = vcmp.lt.s32.totalorder %v3780_v26, 5120 }
 0x7c5   : > { %v7345_v58 = vadd.f32 %v7344_v50, %v6833_v41  ;;  %v4798_v41 = vld [vmem:[%s8089_s18 + $0xd08] sm:$0xff]  ;;  %v5311_v50 = vld [vmem:[%s8095_s20 + $0xd10] sm:$0xff]  ;;  %v6844_v4 = vmul.f32 %v6332_v55, %v6332_v55  ;;  %v3272_v55 = vadd.s32 3432, %v9133_v3 }
 0x7c6   : > { %v5822_v54 = vsub.f32 %v4798_v41, %v5310_v42  ;;  %v6333_v63 = vsel %vm4285_vm0, %v5821_v46, 0.0  ;;  %v3782_v42 = vadd.s32 %v9137_v5, %v3268_v23  ;;  %vm4293_vm8 = vcmp.lt.s32.totalorder %v3781_v34, 5120 }
 0x7c7   : > { %v7346_v2 = vadd.f32 %v7345_v58, %v6834_v49  ;;  %v4799_v49 = vld [vmem:[%s8089_s18 + $0xd10] sm:$0xff]  ;;  %v5312_v58 = vld [vmem:[%s8095_s20 + $0xd18] sm:$0xff]  ;;  %v6845_v13 = vmul.f32 %v6333_v63, %v6333_v63  ;;  %v3273_v63 = vadd.s32 3440, %v9133_v3 }
 0x7c8   : > { %v5823_v62 = vsub.f32 %v4799_v49, %v5311_v50  ;;  %v6334_v9 = vsel %vm4286_vm1, %v5822_v54, 0.0  ;;  %v3783_v50 = vadd.s32 %v9137_v5, %v3269_v31  ;;  %vm4294_vm9 = vcmp.lt.s32.totalorder %v3782_v42, 5120 }
 0x7c9   : > { %v7347_v12 = vadd.f32 %v7346_v2, %v6835_v57  ;;  %v4800_v57 = vld [vmem:[%s8089_s18 + $0xd18] sm:$0xff]  ;;  %v5313_v2 = vld [vmem:[%s8095_s20 + $0xd20] sm:$0xff]  ;;  %v6846_v21 = vmul.f32 %v6334_v9, %v6334_v9  ;;  %v3274_v9 = vadd.s32 3448, %v9133_v3 }
 0x7ca   : > { %v5824_v8 = vsub.f32 %v4800_v57, %v5312_v58  ;;  %v6335_v17 = vsel %vm4287_vm2, %v5823_v62, 0.0  ;;  %v3784_v58 = vadd.s32 %v9137_v5, %v3270_v39  ;;  %vm4295_vm10 = vcmp.lt.s32.totalorder %v3783_v50, 5120 }
 0x7cb   : > { %v7348_v20 = vadd.f32 %v7347_v12, %v6836_v1  ;;  %v4801_v1 = vld [vmem:[%s8089_s18 + $0xd20] sm:$0xff]  ;;  %v5314_v12 = vld [vmem:[%s8095_s20 + $0xd28] sm:$0xff]  ;;  %v6847_v29 = vmul.f32 %v6335_v17, %v6335_v17  ;;  %v3275_v17 = vadd.s32 3456, %v9133_v3 }
 0x7cc   : > { %v5825_v16 = vsub.f32 %v4801_v1, %v5313_v2  ;;  %v6336_v25 = vsel %vm4288_vm3, %v5824_v8, 0.0  ;;  %v3785_v2 = vadd.s32 %v9137_v5, %v3271_v47  ;;  %vm4296_vm11 = vcmp.lt.s32.totalorder %v3784_v58, 5120 }
 0x7cd   : > { %v7349_v28 = vadd.f32 %v7348_v20, %v6837_v11  ;;  %v4802_v11 = vld [vmem:[%s8089_s18 + $0xd28] sm:$0xff]  ;;  %v5315_v20 = vld [vmem:[%s8095_s20 + $0xd30] sm:$0xff]  ;;  %v6848_v37 = vmul.f32 %v6336_v25, %v6336_v25  ;;  %v3276_v25 = vadd.s32 3464, %v9133_v3 }
 0x7ce   : > { %v5826_v24 = vsub.f32 %v4802_v11, %v5314_v12  ;;  %v6337_v33 = vsel %vm4289_vm4, %v5825_v16, 0.0  ;;  %v3786_v12 = vadd.s32 %v9137_v5, %v3272_v55  ;;  %vm4297_vm12 = vcmp.lt.s32.totalorder %v3785_v2, 5120 }
 0x7cf   : > { %v7350_v36 = vadd.f32 %v7349_v28, %v6838_v19  ;;  %v4803_v19 = vld [vmem:[%s8089_s18 + $0xd30] sm:$0xff]  ;;  %v5316_v28 = vld [vmem:[%s8095_s20 + $0xd38] sm:$0xff]  ;;  %v6849_v45 = vmul.f32 %v6337_v33, %v6337_v33  ;;  %v3277_v33 = vadd.s32 3472, %v9133_v3 }
 0x7d0   : > { %v5827_v32 = vsub.f32 %v4803_v19, %v5315_v20  ;;  %v6338_v41 = vsel %vm4290_vm5, %v5826_v24, 0.0  ;;  %v3787_v20 = vadd.s32 %v9137_v5, %v3273_v63  ;;  %vm4298_vm13 = vcmp.lt.s32.totalorder %v3786_v12, 5120 }
 0x7d1   : > { %v7351_v44 = vadd.f32 %v7350_v36, %v6839_v27  ;;  %v4804_v27 = vld [vmem:[%s8089_s18 + $0xd38] sm:$0xff]  ;;  %v5317_v36 = vld [vmem:[%s8095_s20 + $0xd40] sm:$0xff]  ;;  %v6850_v53 = vmul.f32 %v6338_v41, %v6338_v41  ;;  %v3278_v41 = vadd.s32 3480, %v9133_v3 }
 0x7d2   : > { %v5828_v40 = vsub.f32 %v4804_v27, %v5316_v28  ;;  %v6339_v49 = vsel %vm4291_vm6, %v5827_v32, 0.0  ;;  %v3788_v28 = vadd.s32 %v9137_v5, %v3274_v9  ;;  %vm4299_vm14 = vcmp.lt.s32.totalorder %v3787_v20, 5120 }
 0x7d3   : > { %v7352_v52 = vadd.f32 %v7351_v44, %v6840_v35  ;;  %v4805_v35 = vld [vmem:[%s8089_s18 + $0xd40] sm:$0xff]  ;;  %v5318_v44 = vld [vmem:[%s8095_s20 + $0xd48] sm:$0xff]  ;;  %v6851_v61 = vmul.f32 %v6339_v49, %v6339_v49  ;;  %v3279_v49 = vadd.s32 3488, %v9133_v3 }
 0x7d4   : > { %v5829_v48 = vsub.f32 %v4805_v35, %v5317_v36  ;;  %v6340_v57 = vsel %vm4292_vm7, %v5828_v40, 0.0  ;;  %v3789_v36 = vadd.s32 %v9137_v5, %v3275_v17  ;;  %vm4300_vm15 = vcmp.lt.s32.totalorder %v3788_v28, 5120 }
 0x7d5   : > { %v7353_v60 = vadd.f32 %v7352_v52, %v6841_v43  ;;  %v4806_v43 = vld [vmem:[%s8089_s18 + $0xd48] sm:$0xff]  ;;  %v5319_v52 = vld [vmem:[%s8095_s20 + $0xd50] sm:$0xff]  ;;  %v6852_v7 = vmul.f32 %v6340_v57, %v6340_v57  ;;  %v3280_v57 = vadd.s32 3496, %v9133_v3 }
 0x7d6   : > { %v5830_v56 = vsub.f32 %v4806_v43, %v5318_v44  ;;  %v6341_v1 = vsel %vm4293_vm8, %v5829_v48, 0.0  ;;  %v3790_v44 = vadd.s32 %v9137_v5, %v3276_v25  ;;  %vm4301_vm0 = vcmp.lt.s32.totalorder %v3789_v36, 5120 }
 0x7d7   : > { %v7354_v6 = vadd.f32 %v7353_v60, %v6842_v51  ;;  %v4807_v51 = vld [vmem:[%s8089_s18 + $0xd50] sm:$0xff]  ;;  %v5320_v60 = vld [vmem:[%s8095_s20 + $0xd58] sm:$0xff]  ;;  %v6853_v15 = vmul.f32 %v6341_v1, %v6341_v1  ;;  %v3281_v1 = vadd.s32 3504, %v9133_v3 }
 0x7d8   : > { %v5831_v0 = vsub.f32 %v4807_v51, %v5319_v52  ;;  %v6342_v11 = vsel %vm4294_vm9, %v5830_v56, 0.0  ;;  %v3791_v52 = vadd.s32 %v9137_v5, %v3277_v33  ;;  %vm4302_vm1 = vcmp.lt.s32.totalorder %v3790_v44, 5120 }
 0x7d9   : > { %v7355_v14 = vadd.f32 %v7354_v6, %v6843_v59  ;;  %v4808_v59 = vld [vmem:[%s8089_s18 + $0xd58] sm:$0xff]  ;;  %v5321_v6 = vld [vmem:[%s8095_s20 + $0xd60] sm:$0xff]  ;;  %v6854_v23 = vmul.f32 %v6342_v11, %v6342_v11  ;;  %v3282_v11 = vadd.s32 3512, %v9133_v3 }
 0x7da   : > { %v5832_v10 = vsub.f32 %v4808_v59, %v5320_v60  ;;  %v6343_v19 = vsel %vm4295_vm10, %v5831_v0, 0.0  ;;  %v3792_v60 = vadd.s32 %v9137_v5, %v3278_v41  ;;  %vm4303_vm2 = vcmp.lt.s32.totalorder %v3791_v52, 5120 }
 0x7db   : > { %v7356_v22 = vadd.f32 %v7355_v14, %v6844_v4  ;;  %v4809_v4 = vld [vmem:[%s8089_s18 + $0xd60] sm:$0xff]  ;;  %v5322_v14 = vld [vmem:[%s8095_s20 + $0xd68] sm:$0xff]  ;;  %v6855_v31 = vmul.f32 %v6343_v19, %v6343_v19  ;;  %v3283_v19 = vadd.s32 3520, %v9133_v3 }
 0x7dc   : > { %v5833_v18 = vsub.f32 %v4809_v4, %v5321_v6  ;;  %v6344_v27 = vsel %vm4296_vm11, %v5832_v10, 0.0  ;;  %v3793_v6 = vadd.s32 %v9137_v5, %v3279_v49  ;;  %vm4304_vm3 = vcmp.lt.s32.totalorder %v3792_v60, 5120 }
 0x7dd   : > { %v7357_v30 = vadd.f32 %v7356_v22, %v6845_v13  ;;  %v4810_v13 = vld [vmem:[%s8089_s18 + $0xd68] sm:$0xff]  ;;  %v5323_v22 = vld [vmem:[%s8095_s20 + $0xd70] sm:$0xff]  ;;  %v6856_v39 = vmul.f32 %v6344_v27, %v6344_v27  ;;  %v3284_v27 = vadd.s32 3528, %v9133_v3 }
 0x7de   : > { %v5834_v26 = vsub.f32 %v4810_v13, %v5322_v14  ;;  %v6345_v35 = vsel %vm4297_vm12, %v5833_v18, 0.0  ;;  %v3794_v14 = vadd.s32 %v9137_v5, %v3280_v57  ;;  %vm4305_vm4 = vcmp.lt.s32.totalorder %v3793_v6, 5120 }
 0x7df   : > { %v7358_v38 = vadd.f32 %v7357_v30, %v6846_v21  ;;  %v4811_v21 = vld [vmem:[%s8089_s18 + $0xd70] sm:$0xff]  ;;  %v5324_v30 = vld [vmem:[%s8095_s20 + $0xd78] sm:$0xff]  ;;  %v6857_v47 = vmul.f32 %v6345_v35, %v6345_v35  ;;  %v3285_v35 = vadd.s32 3536, %v9133_v3 }
 0x7e0   : > { %v5835_v34 = vsub.f32 %v4811_v21, %v5323_v22  ;;  %v6346_v43 = vsel %vm4298_vm13, %v5834_v26, 0.0  ;;  %v3795_v22 = vadd.s32 %v9137_v5, %v3281_v1  ;;  %vm4306_vm5 = vcmp.lt.s32.totalorder %v3794_v14, 5120 }
 0x7e1   : > { %v7359_v46 = vadd.f32 %v7358_v38, %v6847_v29  ;;  %v4812_v29 = vld [vmem:[%s8089_s18 + $0xd78] sm:$0xff]  ;;  %v5325_v38 = vld [vmem:[%s8095_s20 + $0xd80] sm:$0xff]  ;;  %v6858_v55 = vmul.f32 %v6346_v43, %v6346_v43  ;;  %v3286_v43 = vadd.s32 3544, %v9133_v3 }
 0x7e2   : > { %v5836_v42 = vsub.f32 %v4812_v29, %v5324_v30  ;;  %v6347_v51 = vsel %vm4299_vm14, %v5835_v34, 0.0  ;;  %v3796_v30 = vadd.s32 %v9137_v5, %v3282_v11  ;;  %vm4307_vm6 = vcmp.lt.s32.totalorder %v3795_v22, 5120 }
 0x7e3   : > { %v7360_v54 = vadd.f32 %v7359_v46, %v6848_v37  ;;  %v4813_v37 = vld [vmem:[%s8089_s18 + $0xd80] sm:$0xff]  ;;  %v5326_v46 = vld [vmem:[%s8095_s20 + $0xd88] sm:$0xff]  ;;  %v6859_v63 = vmul.f32 %v6347_v51, %v6347_v51  ;;  %v3287_v51 = vadd.s32 3552, %v9133_v3 }
 0x7e4   : > { %v5837_v50 = vsub.f32 %v4813_v37, %v5325_v38  ;;  %v6348_v59 = vsel %vm4300_vm15, %v5836_v42, 0.0  ;;  %v3797_v38 = vadd.s32 %v9137_v5, %v3283_v19  ;;  %vm4308_vm7 = vcmp.lt.s32.totalorder %v3796_v30, 5120 }
 0x7e5   : > { %v7361_v62 = vadd.f32 %v7360_v54, %v6849_v45  ;;  %v4814_v45 = vld [vmem:[%s8089_s18 + $0xd88] sm:$0xff]  ;;  %v5327_v54 = vld [vmem:[%s8095_s20 + $0xd90] sm:$0xff]  ;;  %v6860_v9 = vmul.f32 %v6348_v59, %v6348_v59  ;;  %v3288_v59 = vadd.s32 3560, %v9133_v3 }
 0x7e6   : > { %v5838_v58 = vsub.f32 %v4814_v45, %v5326_v46  ;;  %v6349_v4 = vsel %vm4301_vm0, %v5837_v50, 0.0  ;;  %v3798_v46 = vadd.s32 %v9137_v5, %v3284_v27  ;;  %vm4309_vm8 = vcmp.lt.s32.totalorder %v3797_v38, 5120 }
 0x7e7   : > { %v7362_v8 = vadd.f32 %v7361_v62, %v6850_v53  ;;  %v4815_v53 = vld [vmem:[%s8089_s18 + $0xd90] sm:$0xff]  ;;  %v5328_v62 = vld [vmem:[%s8095_s20 + $0xd98] sm:$0xff]  ;;  %v6861_v17 = vmul.f32 %v6349_v4, %v6349_v4  ;;  %v3289_v4 = vadd.s32 3568, %v9133_v3 }
 0x7e8   : > { %v5839_v2 = vsub.f32 %v4815_v53, %v5327_v54  ;;  %v6350_v13 = vsel %vm4302_vm1, %v5838_v58, 0.0  ;;  %v3799_v54 = vadd.s32 %v9137_v5, %v3285_v35  ;;  %vm4310_vm9 = vcmp.lt.s32.totalorder %v3798_v46, 5120 }
 0x7e9   : > { %v7363_v16 = vadd.f32 %v7362_v8, %v6851_v61  ;;  %v4816_v61 = vld [vmem:[%s8089_s18 + $0xd98] sm:$0xff]  ;;  %v5329_v8 = vld [vmem:[%s8095_s20 + $0xda0] sm:$0xff]  ;;  %v6862_v25 = vmul.f32 %v6350_v13, %v6350_v13  ;;  %v3290_v13 = vadd.s32 3576, %v9133_v3 }
 0x7ea   : > { %v5840_v12 = vsub.f32 %v4816_v61, %v5328_v62  ;;  %v6351_v21 = vsel %vm4303_vm2, %v5839_v2, 0.0  ;;  %v3800_v62 = vadd.s32 %v9137_v5, %v3286_v43  ;;  %vm4311_vm10 = vcmp.lt.s32.totalorder %v3799_v54, 5120 }
 0x7eb   : > { %v7364_v24 = vadd.f32 %v7363_v16, %v6852_v7  ;;  %v4817_v7 = vld [vmem:[%s8089_s18 + $0xda0] sm:$0xff]  ;;  %v5330_v16 = vld [vmem:[%s8095_s20 + $0xda8] sm:$0xff]  ;;  %v6863_v33 = vmul.f32 %v6351_v21, %v6351_v21  ;;  %v3291_v21 = vadd.s32 3584, %v9133_v3 }
 0x7ec   : > { %v5841_v20 = vsub.f32 %v4817_v7, %v5329_v8  ;;  %v6352_v29 = vsel %vm4304_vm3, %v5840_v12, 0.0  ;;  %v3801_v8 = vadd.s32 %v9137_v5, %v3287_v51  ;;  %vm4312_vm11 = vcmp.lt.s32.totalorder %v3800_v62, 5120 }
 0x7ed   : > { %v7365_v32 = vadd.f32 %v7364_v24, %v6853_v15  ;;  %v4818_v15 = vld [vmem:[%s8089_s18 + $0xda8] sm:$0xff]  ;;  %v5331_v24 = vld [vmem:[%s8095_s20 + $0xdb0] sm:$0xff]  ;;  %v6864_v41 = vmul.f32 %v6352_v29, %v6352_v29  ;;  %v3292_v29 = vadd.s32 3592, %v9133_v3 }
 0x7ee   : > { %v5842_v28 = vsub.f32 %v4818_v15, %v5330_v16  ;;  %v6353_v37 = vsel %vm4305_vm4, %v5841_v20, 0.0  ;;  %v3802_v16 = vadd.s32 %v9137_v5, %v3288_v59  ;;  %vm4313_vm12 = vcmp.lt.s32.totalorder %v3801_v8, 5120 }
 0x7ef   : > { %v7366_v40 = vadd.f32 %v7365_v32, %v6854_v23  ;;  %v4819_v23 = vld [vmem:[%s8089_s18 + $0xdb0] sm:$0xff]  ;;  %v5332_v32 = vld [vmem:[%s8095_s20 + $0xdb8] sm:$0xff]  ;;  %v6865_v49 = vmul.f32 %v6353_v37, %v6353_v37  ;;  %v3293_v37 = vadd.s32 3600, %v9133_v3 }
 0x7f0   : > { %v5843_v36 = vsub.f32 %v4819_v23, %v5331_v24  ;;  %v6354_v45 = vsel %vm4306_vm5, %v5842_v28, 0.0  ;;  %v3803_v24 = vadd.s32 %v9137_v5, %v3289_v4  ;;  %vm4314_vm13 = vcmp.lt.s32.totalorder %v3802_v16, 5120 }
 0x7f1   : > { %v7367_v48 = vadd.f32 %v7366_v40, %v6855_v31  ;;  %v4820_v31 = vld [vmem:[%s8089_s18 + $0xdb8] sm:$0xff]  ;;  %v5333_v40 = vld [vmem:[%s8095_s20 + $0xdc0] sm:$0xff]  ;;  %v6866_v57 = vmul.f32 %v6354_v45, %v6354_v45  ;;  %v3294_v45 = vadd.s32 3608, %v9133_v3 }
 0x7f2   : > { %v5844_v44 = vsub.f32 %v4820_v31, %v5332_v32  ;;  %v6355_v53 = vsel %vm4307_vm6, %v5843_v36, 0.0  ;;  %v3804_v32 = vadd.s32 %v9137_v5, %v3290_v13  ;;  %vm4315_vm14 = vcmp.lt.s32.totalorder %v3803_v24, 5120 }
 0x7f3   : > { %v7368_v56 = vadd.f32 %v7367_v48, %v6856_v39  ;;  %v4821_v39 = vld [vmem:[%s8089_s18 + $0xdc0] sm:$0xff]  ;;  %v5334_v48 = vld [vmem:[%s8095_s20 + $0xdc8] sm:$0xff]  ;;  %v6867_v1 = vmul.f32 %v6355_v53, %v6355_v53  ;;  %v3295_v53 = vadd.s32 3616, %v9133_v3 }
 0x7f4   : > { %v5845_v52 = vsub.f32 %v4821_v39, %v5333_v40  ;;  %v6356_v61 = vsel %vm4308_vm7, %v5844_v44, 0.0  ;;  %v3805_v40 = vadd.s32 %v9137_v5, %v3291_v21  ;;  %vm4316_vm15 = vcmp.lt.s32.totalorder %v3804_v32, 5120 }
 0x7f5   : > { %v7369_v0 = vadd.f32 %v7368_v56, %v6857_v47  ;;  %v4822_v47 = vld [vmem:[%s8089_s18 + $0xdc8] sm:$0xff]  ;;  %v5335_v56 = vld [vmem:[%s8095_s20 + $0xdd0] sm:$0xff]  ;;  %v6868_v11 = vmul.f32 %v6356_v61, %v6356_v61  ;;  %v3296_v61 = vadd.s32 3624, %v9133_v3 }
 0x7f6   : > { %v5846_v60 = vsub.f32 %v4822_v47, %v5334_v48  ;;  %v6357_v7 = vsel %vm4309_vm8, %v5845_v52, 0.0  ;;  %v3806_v48 = vadd.s32 %v9137_v5, %v3292_v29  ;;  %vm4317_vm0 = vcmp.lt.s32.totalorder %v3805_v40, 5120 }
 0x7f7   : > { %v7370_v10 = vadd.f32 %v7369_v0, %v6858_v55  ;;  %v4823_v55 = vld [vmem:[%s8089_s18 + $0xdd0] sm:$0xff]  ;;  %v5336_v0 = vld [vmem:[%s8095_s20 + $0xdd8] sm:$0xff]  ;;  %v6869_v19 = vmul.f32 %v6357_v7, %v6357_v7  ;;  %v3297_v7 = vadd.s32 3632, %v9133_v3 }
 0x7f8   : > { %v5847_v6 = vsub.f32 %v4823_v55, %v5335_v56  ;;  %v6358_v15 = vsel %vm4310_vm9, %v5846_v60, 0.0  ;;  %v3807_v56 = vadd.s32 %v9137_v5, %v3293_v37  ;;  %vm4318_vm1 = vcmp.lt.s32.totalorder %v3806_v48, 5120 }
 0x7f9   : > { %v7371_v18 = vadd.f32 %v7370_v10, %v6859_v63  ;;  %v4824_v63 = vld [vmem:[%s8089_s18 + $0xdd8] sm:$0xff]  ;;  %v5337_v10 = vld [vmem:[%s8095_s20 + $0xde0] sm:$0xff]  ;;  %v6870_v27 = vmul.f32 %v6358_v15, %v6358_v15  ;;  %v3298_v15 = vadd.s32 3640, %v9133_v3 }
 0x7fa   : > { %v5848_v14 = vsub.f32 %v4824_v63, %v5336_v0  ;;  %v6359_v23 = vsel %vm4311_vm10, %v5847_v6, 0.0  ;;  %v3808_v0 = vadd.s32 %v9137_v5, %v3294_v45  ;;  %vm4319_vm2 = vcmp.lt.s32.totalorder %v3807_v56, 5120 }
 0x7fb   : > { %v7372_v26 = vadd.f32 %v7371_v18, %v6860_v9  ;;  %v4825_v9 = vld [vmem:[%s8089_s18 + $0xde0] sm:$0xff]  ;;  %v5338_v18 = vld [vmem:[%s8095_s20 + $0xde8] sm:$0xff]  ;;  %v6871_v35 = vmul.f32 %v6359_v23, %v6359_v23  ;;  %v3299_v23 = vadd.s32 3648, %v9133_v3 }
 0x7fc   : > { %v5849_v22 = vsub.f32 %v4825_v9, %v5337_v10  ;;  %v6360_v31 = vsel %vm4312_vm11, %v5848_v14, 0.0  ;;  %v3809_v10 = vadd.s32 %v9137_v5, %v3295_v53  ;;  %vm4320_vm3 = vcmp.lt.s32.totalorder %v3808_v0, 5120 }
 0x7fd   : > { %v7373_v34 = vadd.f32 %v7372_v26, %v6861_v17  ;;  %v4826_v17 = vld [vmem:[%s8089_s18 + $0xde8] sm:$0xff]  ;;  %v5339_v26 = vld [vmem:[%s8095_s20 + $0xdf0] sm:$0xff]  ;;  %v6872_v43 = vmul.f32 %v6360_v31, %v6360_v31  ;;  %v3300_v31 = vadd.s32 3656, %v9133_v3 }
 0x7fe   : > { %v5850_v30 = vsub.f32 %v4826_v17, %v5338_v18  ;;  %v6361_v39 = vsel %vm4313_vm12, %v5849_v22, 0.0  ;;  %v3810_v18 = vadd.s32 %v9137_v5, %v3296_v61  ;;  %vm4321_vm4 = vcmp.lt.s32.totalorder %v3809_v10, 5120 }
 0x7ff   : > { %v7374_v42 = vadd.f32 %v7373_v34, %v6862_v25  ;;  %v4827_v25 = vld [vmem:[%s8089_s18 + $0xdf0] sm:$0xff]  ;;  %v5340_v34 = vld [vmem:[%s8095_s20 + $0xdf8] sm:$0xff]  ;;  %v6873_v51 = vmul.f32 %v6361_v39, %v6361_v39  ;;  %v3301_v39 = vadd.s32 3664, %v9133_v3 }
 0x800   : > { %v5851_v38 = vsub.f32 %v4827_v25, %v5339_v26  ;;  %v6362_v47 = vsel %vm4314_vm13, %v5850_v30, 0.0  ;;  %v3811_v26 = vadd.s32 %v9137_v5, %v3297_v7  ;;  %vm4322_vm5 = vcmp.lt.s32.totalorder %v3810_v18, 5120 }
 0x801   : > { %v7375_v50 = vadd.f32 %v7374_v42, %v6863_v33  ;;  %v4828_v33 = vld [vmem:[%s8089_s18 + $0xdf8] sm:$0xff]  ;;  %v5341_v42 = vld [vmem:[%s8095_s20 + $0xe00] sm:$0xff]  ;;  %v6874_v59 = vmul.f32 %v6362_v47, %v6362_v47  ;;  %v3302_v47 = vadd.s32 3672, %v9133_v3 }
 0x802   : > { %v5852_v46 = vsub.f32 %v4828_v33, %v5340_v34  ;;  %v6363_v55 = vsel %vm4315_vm14, %v5851_v38, 0.0  ;;  %v3812_v34 = vadd.s32 %v9137_v5, %v3298_v15  ;;  %vm4323_vm6 = vcmp.lt.s32.totalorder %v3811_v26, 5120 }
 0x803   : > { %v7376_v58 = vadd.f32 %v7375_v50, %v6864_v41  ;;  %v4829_v41 = vld [vmem:[%s8089_s18 + $0xe00] sm:$0xff]  ;;  %v5342_v50 = vld [vmem:[%s8095_s20 + $0xe08] sm:$0xff]  ;;  %v6875_v4 = vmul.f32 %v6363_v55, %v6363_v55  ;;  %v3303_v55 = vadd.s32 3680, %v9133_v3 }
 0x804   : > { %v5853_v54 = vsub.f32 %v4829_v41, %v5341_v42  ;;  %v6364_v63 = vsel %vm4316_vm15, %v5852_v46, 0.0  ;;  %v3813_v42 = vadd.s32 %v9137_v5, %v3299_v23  ;;  %vm4324_vm7 = vcmp.lt.s32.totalorder %v3812_v34, 5120 }
 0x805   : > { %v7377_v2 = vadd.f32 %v7376_v58, %v6865_v49  ;;  %v4830_v49 = vld [vmem:[%s8089_s18 + $0xe08] sm:$0xff]  ;;  %v5343_v58 = vld [vmem:[%s8095_s20 + $0xe10] sm:$0xff]  ;;  %v6876_v13 = vmul.f32 %v6364_v63, %v6364_v63  ;;  %v3304_v63 = vadd.s32 3688, %v9133_v3 }
 0x806   : > { %v5854_v62 = vsub.f32 %v4830_v49, %v5342_v50  ;;  %v6365_v9 = vsel %vm4317_vm0, %v5853_v54, 0.0  ;;  %v3814_v50 = vadd.s32 %v9137_v5, %v3300_v31  ;;  %vm4325_vm8 = vcmp.lt.s32.totalorder %v3813_v42, 5120 }
 0x807   : > { %v7378_v12 = vadd.f32 %v7377_v2, %v6866_v57  ;;  %v4831_v57 = vld [vmem:[%s8089_s18 + $0xe10] sm:$0xff]  ;;  %v5344_v2 = vld [vmem:[%s8095_s20 + $0xe18] sm:$0xff]  ;;  %v6877_v21 = vmul.f32 %v6365_v9, %v6365_v9  ;;  %v3305_v9 = vadd.s32 3696, %v9133_v3 }
 0x808   : > { %v5855_v8 = vsub.f32 %v4831_v57, %v5343_v58  ;;  %v6366_v17 = vsel %vm4318_vm1, %v5854_v62, 0.0  ;;  %v3815_v58 = vadd.s32 %v9137_v5, %v3301_v39  ;;  %vm4326_vm9 = vcmp.lt.s32.totalorder %v3814_v50, 5120 }
 0x809   : > { %v7379_v20 = vadd.f32 %v7378_v12, %v6867_v1  ;;  %v4832_v1 = vld [vmem:[%s8089_s18 + $0xe18] sm:$0xff]  ;;  %v5345_v12 = vld [vmem:[%s8095_s20 + $0xe20] sm:$0xff]  ;;  %v6878_v29 = vmul.f32 %v6366_v17, %v6366_v17  ;;  %v3306_v17 = vadd.s32 3704, %v9133_v3 }
 0x80a   : > { %v5856_v16 = vsub.f32 %v4832_v1, %v5344_v2  ;;  %v6367_v25 = vsel %vm4319_vm2, %v5855_v8, 0.0  ;;  %v3816_v2 = vadd.s32 %v9137_v5, %v3302_v47  ;;  %vm4327_vm10 = vcmp.lt.s32.totalorder %v3815_v58, 5120 }
 0x80b   : > { %v7380_v28 = vadd.f32 %v7379_v20, %v6868_v11  ;;  %v4833_v11 = vld [vmem:[%s8089_s18 + $0xe20] sm:$0xff]  ;;  %v5346_v20 = vld [vmem:[%s8095_s20 + $0xe28] sm:$0xff]  ;;  %v6879_v37 = vmul.f32 %v6367_v25, %v6367_v25  ;;  %v3307_v25 = vadd.s32 3712, %v9133_v3 }
 0x80c   : > { %v5857_v24 = vsub.f32 %v4833_v11, %v5345_v12  ;;  %v6368_v33 = vsel %vm4320_vm3, %v5856_v16, 0.0  ;;  %v3817_v12 = vadd.s32 %v9137_v5, %v3303_v55  ;;  %vm4328_vm11 = vcmp.lt.s32.totalorder %v3816_v2, 5120 }
 0x80d   : > { %v7381_v36 = vadd.f32 %v7380_v28, %v6869_v19  ;;  %v4834_v19 = vld [vmem:[%s8089_s18 + $0xe28] sm:$0xff]  ;;  %v5347_v28 = vld [vmem:[%s8095_s20 + $0xe30] sm:$0xff]  ;;  %v6880_v45 = vmul.f32 %v6368_v33, %v6368_v33  ;;  %v3308_v33 = vadd.s32 3720, %v9133_v3 }
 0x80e   : > { %v5858_v32 = vsub.f32 %v4834_v19, %v5346_v20  ;;  %v6369_v41 = vsel %vm4321_vm4, %v5857_v24, 0.0  ;;  %v3818_v20 = vadd.s32 %v9137_v5, %v3304_v63  ;;  %vm4329_vm12 = vcmp.lt.s32.totalorder %v3817_v12, 5120 }
 0x80f   : > { %v7382_v44 = vadd.f32 %v7381_v36, %v6870_v27  ;;  %v4835_v27 = vld [vmem:[%s8089_s18 + $0xe30] sm:$0xff]  ;;  %v5348_v36 = vld [vmem:[%s8095_s20 + $0xe38] sm:$0xff]  ;;  %v6881_v53 = vmul.f32 %v6369_v41, %v6369_v41  ;;  %v3309_v41 = vadd.s32 3728, %v9133_v3 }
 0x810   : > { %v5859_v40 = vsub.f32 %v4835_v27, %v5347_v28  ;;  %v6370_v49 = vsel %vm4322_vm5, %v5858_v32, 0.0  ;;  %v3819_v28 = vadd.s32 %v9137_v5, %v3305_v9  ;;  %vm4330_vm13 = vcmp.lt.s32.totalorder %v3818_v20, 5120 }
 0x811   : > { %v7383_v52 = vadd.f32 %v7382_v44, %v6871_v35  ;;  %v4836_v35 = vld [vmem:[%s8089_s18 + $0xe38] sm:$0xff]  ;;  %v5349_v44 = vld [vmem:[%s8095_s20 + $0xe40] sm:$0xff]  ;;  %v6882_v61 = vmul.f32 %v6370_v49, %v6370_v49  ;;  %v3310_v49 = vadd.s32 3736, %v9133_v3 }
 0x812   : > { %v5860_v48 = vsub.f32 %v4836_v35, %v5348_v36  ;;  %v6371_v57 = vsel %vm4323_vm6, %v5859_v40, 0.0  ;;  %v3820_v36 = vadd.s32 %v9137_v5, %v3306_v17  ;;  %vm4331_vm14 = vcmp.lt.s32.totalorder %v3819_v28, 5120 }
 0x813   : > { %v7384_v60 = vadd.f32 %v7383_v52, %v6872_v43  ;;  %v4837_v43 = vld [vmem:[%s8089_s18 + $0xe40] sm:$0xff]  ;;  %v5350_v52 = vld [vmem:[%s8095_s20 + $0xe48] sm:$0xff]  ;;  %v6883_v7 = vmul.f32 %v6371_v57, %v6371_v57  ;;  %v3311_v57 = vadd.s32 3744, %v9133_v3 }
 0x814   : > { %v5861_v56 = vsub.f32 %v4837_v43, %v5349_v44  ;;  %v6372_v1 = vsel %vm4324_vm7, %v5860_v48, 0.0  ;;  %v3821_v44 = vadd.s32 %v9137_v5, %v3307_v25  ;;  %vm4332_vm15 = vcmp.lt.s32.totalorder %v3820_v36, 5120 }
 0x815   : > { %v7385_v6 = vadd.f32 %v7384_v60, %v6873_v51  ;;  %v4838_v51 = vld [vmem:[%s8089_s18 + $0xe48] sm:$0xff]  ;;  %v5351_v60 = vld [vmem:[%s8095_s20 + $0xe50] sm:$0xff]  ;;  %v6884_v15 = vmul.f32 %v6372_v1, %v6372_v1  ;;  %v3312_v1 = vadd.s32 3752, %v9133_v3 }
 0x816   : > { %v5862_v0 = vsub.f32 %v4838_v51, %v5350_v52  ;;  %v6373_v11 = vsel %vm4325_vm8, %v5861_v56, 0.0  ;;  %v3822_v52 = vadd.s32 %v9137_v5, %v3308_v33  ;;  %vm4333_vm0 = vcmp.lt.s32.totalorder %v3821_v44, 5120 }
 0x817   : > { %v7386_v14 = vadd.f32 %v7385_v6, %v6874_v59  ;;  %v4839_v59 = vld [vmem:[%s8089_s18 + $0xe50] sm:$0xff]  ;;  %v5352_v6 = vld [vmem:[%s8095_s20 + $0xe58] sm:$0xff]  ;;  %v6885_v23 = vmul.f32 %v6373_v11, %v6373_v11  ;;  %v3313_v11 = vadd.s32 3760, %v9133_v3 }
 0x818   : > { %v5863_v10 = vsub.f32 %v4839_v59, %v5351_v60  ;;  %v6374_v19 = vsel %vm4326_vm9, %v5862_v0, 0.0  ;;  %v3823_v60 = vadd.s32 %v9137_v5, %v3309_v41  ;;  %vm4334_vm1 = vcmp.lt.s32.totalorder %v3822_v52, 5120 }
 0x819   : > { %v7387_v22 = vadd.f32 %v7386_v14, %v6875_v4  ;;  %v4840_v4 = vld [vmem:[%s8089_s18 + $0xe58] sm:$0xff]  ;;  %v5353_v14 = vld [vmem:[%s8095_s20 + $0xe60] sm:$0xff]  ;;  %v6886_v31 = vmul.f32 %v6374_v19, %v6374_v19  ;;  %v3314_v19 = vadd.s32 3768, %v9133_v3 }
 0x81a   : > { %v5864_v18 = vsub.f32 %v4840_v4, %v5352_v6  ;;  %v6375_v27 = vsel %vm4327_vm10, %v5863_v10, 0.0  ;;  %v3824_v6 = vadd.s32 %v9137_v5, %v3310_v49  ;;  %vm4335_vm2 = vcmp.lt.s32.totalorder %v3823_v60, 5120 }
 0x81b   : > { %v7388_v30 = vadd.f32 %v7387_v22, %v6876_v13  ;;  %v4841_v13 = vld [vmem:[%s8089_s18 + $0xe60] sm:$0xff]  ;;  %v5354_v22 = vld [vmem:[%s8095_s20 + $0xe68] sm:$0xff]  ;;  %v6887_v39 = vmul.f32 %v6375_v27, %v6375_v27  ;;  %v3315_v27 = vadd.s32 3776, %v9133_v3 }
 0x81c   : > { %v5865_v26 = vsub.f32 %v4841_v13, %v5353_v14  ;;  %v6376_v35 = vsel %vm4328_vm11, %v5864_v18, 0.0  ;;  %v3825_v14 = vadd.s32 %v9137_v5, %v3311_v57  ;;  %vm4336_vm3 = vcmp.lt.s32.totalorder %v3824_v6, 5120 }
 0x81d   : > { %v7389_v38 = vadd.f32 %v7388_v30, %v6877_v21  ;;  %v4842_v21 = vld [vmem:[%s8089_s18 + $0xe68] sm:$0xff]  ;;  %v5355_v30 = vld [vmem:[%s8095_s20 + $0xe70] sm:$0xff]  ;;  %v6888_v47 = vmul.f32 %v6376_v35, %v6376_v35  ;;  %v3316_v35 = vadd.s32 3784, %v9133_v3 }
 0x81e   : > { %v5866_v34 = vsub.f32 %v4842_v21, %v5354_v22  ;;  %v6377_v43 = vsel %vm4329_vm12, %v5865_v26, 0.0  ;;  %v3826_v22 = vadd.s32 %v9137_v5, %v3312_v1  ;;  %vm4337_vm4 = vcmp.lt.s32.totalorder %v3825_v14, 5120 }
 0x81f   : > { %v7390_v46 = vadd.f32 %v7389_v38, %v6878_v29  ;;  %v4843_v29 = vld [vmem:[%s8089_s18 + $0xe70] sm:$0xff]  ;;  %v5356_v38 = vld [vmem:[%s8095_s20 + $0xe78] sm:$0xff]  ;;  %v6889_v55 = vmul.f32 %v6377_v43, %v6377_v43  ;;  %v3317_v43 = vadd.s32 3792, %v9133_v3 }
 0x820   : > { %v5867_v42 = vsub.f32 %v4843_v29, %v5355_v30  ;;  %v6378_v51 = vsel %vm4330_vm13, %v5866_v34, 0.0  ;;  %v3827_v30 = vadd.s32 %v9137_v5, %v3313_v11  ;;  %vm4338_vm5 = vcmp.lt.s32.totalorder %v3826_v22, 5120 }
 0x821   : > { %v7391_v54 = vadd.f32 %v7390_v46, %v6879_v37  ;;  %v4844_v37 = vld [vmem:[%s8089_s18 + $0xe78] sm:$0xff]  ;;  %v5357_v46 = vld [vmem:[%s8095_s20 + $0xe80] sm:$0xff]  ;;  %v6890_v63 = vmul.f32 %v6378_v51, %v6378_v51  ;;  %v3318_v51 = vadd.s32 3800, %v9133_v3 }
 0x822   : > { %v5868_v50 = vsub.f32 %v4844_v37, %v5356_v38  ;;  %v6379_v59 = vsel %vm4331_vm14, %v5867_v42, 0.0  ;;  %v3828_v38 = vadd.s32 %v9137_v5, %v3314_v19  ;;  %vm4339_vm6 = vcmp.lt.s32.totalorder %v3827_v30, 5120 }
 0x823   : > { %v7392_v62 = vadd.f32 %v7391_v54, %v6880_v45  ;;  %v4845_v45 = vld [vmem:[%s8089_s18 + $0xe80] sm:$0xff]  ;;  %v5358_v54 = vld [vmem:[%s8095_s20 + $0xe88] sm:$0xff]  ;;  %v6891_v9 = vmul.f32 %v6379_v59, %v6379_v59  ;;  %v3319_v59 = vadd.s32 3808, %v9133_v3 }
 0x824   : > { %v5869_v58 = vsub.f32 %v4845_v45, %v5357_v46  ;;  %v6380_v4 = vsel %vm4332_vm15, %v5868_v50, 0.0  ;;  %v3829_v46 = vadd.s32 %v9137_v5, %v3315_v27  ;;  %vm4340_vm7 = vcmp.lt.s32.totalorder %v3828_v38, 5120 }
 0x825   : > { %v7393_v8 = vadd.f32 %v7392_v62, %v6881_v53  ;;  %v4846_v53 = vld [vmem:[%s8089_s18 + $0xe88] sm:$0xff]  ;;  %v5359_v62 = vld [vmem:[%s8095_s20 + $0xe90] sm:$0xff]  ;;  %v6892_v17 = vmul.f32 %v6380_v4, %v6380_v4  ;;  %v3320_v4 = vadd.s32 3816, %v9133_v3 }
 0x826   : > { %v5870_v2 = vsub.f32 %v4846_v53, %v5358_v54  ;;  %v6381_v13 = vsel %vm4333_vm0, %v5869_v58, 0.0  ;;  %v3830_v54 = vadd.s32 %v9137_v5, %v3316_v35  ;;  %vm4341_vm8 = vcmp.lt.s32.totalorder %v3829_v46, 5120 }
 0x827   : > { %v7394_v16 = vadd.f32 %v7393_v8, %v6882_v61  ;;  %v4847_v61 = vld [vmem:[%s8089_s18 + $0xe90] sm:$0xff]  ;;  %v5360_v8 = vld [vmem:[%s8095_s20 + $0xe98] sm:$0xff]  ;;  %v6893_v25 = vmul.f32 %v6381_v13, %v6381_v13  ;;  %v3321_v13 = vadd.s32 3824, %v9133_v3 }
 0x828   : > { %v5871_v12 = vsub.f32 %v4847_v61, %v5359_v62  ;;  %v6382_v21 = vsel %vm4334_vm1, %v5870_v2, 0.0  ;;  %v3831_v62 = vadd.s32 %v9137_v5, %v3317_v43  ;;  %vm4342_vm9 = vcmp.lt.s32.totalorder %v3830_v54, 5120 }
 0x829   : > { %v7395_v24 = vadd.f32 %v7394_v16, %v6883_v7  ;;  %v4848_v7 = vld [vmem:[%s8089_s18 + $0xe98] sm:$0xff]  ;;  %v5361_v16 = vld [vmem:[%s8095_s20 + $0xea0] sm:$0xff]  ;;  %v6894_v33 = vmul.f32 %v6382_v21, %v6382_v21  ;;  %v3322_v21 = vadd.s32 3832, %v9133_v3 }
 0x82a   : > { %v5872_v20 = vsub.f32 %v4848_v7, %v5360_v8  ;;  %v6383_v29 = vsel %vm4335_vm2, %v5871_v12, 0.0  ;;  %v3832_v8 = vadd.s32 %v9137_v5, %v3318_v51  ;;  %vm4343_vm10 = vcmp.lt.s32.totalorder %v3831_v62, 5120 }
 0x82b   : > { %v7396_v32 = vadd.f32 %v7395_v24, %v6884_v15  ;;  %v4849_v15 = vld [vmem:[%s8089_s18 + $0xea0] sm:$0xff]  ;;  %v5362_v24 = vld [vmem:[%s8095_s20 + $0xea8] sm:$0xff]  ;;  %v6895_v41 = vmul.f32 %v6383_v29, %v6383_v29  ;;  %v3323_v29 = vadd.s32 3840, %v9133_v3 }
 0x82c   : > { %v5873_v28 = vsub.f32 %v4849_v15, %v5361_v16  ;;  %v6384_v37 = vsel %vm4336_vm3, %v5872_v20, 0.0  ;;  %v3833_v16 = vadd.s32 %v9137_v5, %v3319_v59  ;;  %vm4344_vm11 = vcmp.lt.s32.totalorder %v3832_v8, 5120 }
 0x82d   : > { %v7397_v40 = vadd.f32 %v7396_v32, %v6885_v23  ;;  %v4850_v23 = vld [vmem:[%s8089_s18 + $0xea8] sm:$0xff]  ;;  %v5363_v32 = vld [vmem:[%s8095_s20 + $0xeb0] sm:$0xff]  ;;  %v6896_v49 = vmul.f32 %v6384_v37, %v6384_v37  ;;  %v3324_v37 = vadd.s32 3848, %v9133_v3 }
 0x82e   : > { %v5874_v36 = vsub.f32 %v4850_v23, %v5362_v24  ;;  %v6385_v45 = vsel %vm4337_vm4, %v5873_v28, 0.0  ;;  %v3834_v24 = vadd.s32 %v9137_v5, %v3320_v4  ;;  %vm4345_vm12 = vcmp.lt.s32.totalorder %v3833_v16, 5120 }
 0x82f   : > { %v7398_v48 = vadd.f32 %v7397_v40, %v6886_v31  ;;  %v4851_v31 = vld [vmem:[%s8089_s18 + $0xeb0] sm:$0xff]  ;;  %v5364_v40 = vld [vmem:[%s8095_s20 + $0xeb8] sm:$0xff]  ;;  %v6897_v57 = vmul.f32 %v6385_v45, %v6385_v45  ;;  %v3325_v45 = vadd.s32 3856, %v9133_v3 }
 0x830   : > { %v5875_v44 = vsub.f32 %v4851_v31, %v5363_v32  ;;  %v6386_v53 = vsel %vm4338_vm5, %v5874_v36, 0.0  ;;  %v3835_v32 = vadd.s32 %v9137_v5, %v3321_v13  ;;  %vm4346_vm13 = vcmp.lt.s32.totalorder %v3834_v24, 5120 }
 0x831   : > { %v7399_v56 = vadd.f32 %v7398_v48, %v6887_v39  ;;  %v4852_v39 = vld [vmem:[%s8089_s18 + $0xeb8] sm:$0xff]  ;;  %v5365_v48 = vld [vmem:[%s8095_s20 + $0xec0] sm:$0xff]  ;;  %v6898_v1 = vmul.f32 %v6386_v53, %v6386_v53  ;;  %v3326_v53 = vadd.s32 3864, %v9133_v3 }
 0x832   : > { %v5876_v52 = vsub.f32 %v4852_v39, %v5364_v40  ;;  %v6387_v61 = vsel %vm4339_vm6, %v5875_v44, 0.0  ;;  %v3836_v40 = vadd.s32 %v9137_v5, %v3322_v21  ;;  %vm4347_vm14 = vcmp.lt.s32.totalorder %v3835_v32, 5120 }
 0x833   : > { %v7400_v0 = vadd.f32 %v7399_v56, %v6888_v47  ;;  %v4853_v47 = vld [vmem:[%s8089_s18 + $0xec0] sm:$0xff]  ;;  %v5366_v56 = vld [vmem:[%s8095_s20 + $0xec8] sm:$0xff]  ;;  %v6899_v11 = vmul.f32 %v6387_v61, %v6387_v61  ;;  %v3327_v61 = vadd.s32 3872, %v9133_v3 }
 0x834   : > { %v5877_v60 = vsub.f32 %v4853_v47, %v5365_v48  ;;  %v6388_v7 = vsel %vm4340_vm7, %v5876_v52, 0.0  ;;  %v3837_v48 = vadd.s32 %v9137_v5, %v3323_v29  ;;  %vm4348_vm15 = vcmp.lt.s32.totalorder %v3836_v40, 5120 }
 0x835   : > { %v7401_v10 = vadd.f32 %v7400_v0, %v6889_v55  ;;  %v4854_v55 = vld [vmem:[%s8089_s18 + $0xec8] sm:$0xff]  ;;  %v5367_v0 = vld [vmem:[%s8095_s20 + $0xed0] sm:$0xff]  ;;  %v6900_v19 = vmul.f32 %v6388_v7, %v6388_v7  ;;  %v3328_v7 = vadd.s32 3880, %v9133_v3 }
 0x836   : > { %v5878_v6 = vsub.f32 %v4854_v55, %v5366_v56  ;;  %v6389_v15 = vsel %vm4341_vm8, %v5877_v60, 0.0  ;;  %v3838_v56 = vadd.s32 %v9137_v5, %v3324_v37  ;;  %vm4349_vm0 = vcmp.lt.s32.totalorder %v3837_v48, 5120 }
 0x837   : > { %v7402_v18 = vadd.f32 %v7401_v10, %v6890_v63  ;;  %v4855_v63 = vld [vmem:[%s8089_s18 + $0xed0] sm:$0xff]  ;;  %v5368_v10 = vld [vmem:[%s8095_s20 + $0xed8] sm:$0xff]  ;;  %v6901_v27 = vmul.f32 %v6389_v15, %v6389_v15  ;;  %v3329_v15 = vadd.s32 3888, %v9133_v3 }
 0x838   : > { %v5879_v14 = vsub.f32 %v4855_v63, %v5367_v0  ;;  %v6390_v23 = vsel %vm4342_vm9, %v5878_v6, 0.0  ;;  %v3839_v0 = vadd.s32 %v9137_v5, %v3325_v45  ;;  %vm4350_vm1 = vcmp.lt.s32.totalorder %v3838_v56, 5120 }
 0x839   : > { %v7403_v26 = vadd.f32 %v7402_v18, %v6891_v9  ;;  %v4856_v9 = vld [vmem:[%s8089_s18 + $0xed8] sm:$0xff]  ;;  %v5369_v18 = vld [vmem:[%s8095_s20 + $0xee0] sm:$0xff]  ;;  %v6902_v35 = vmul.f32 %v6390_v23, %v6390_v23  ;;  %v3330_v23 = vadd.s32 3896, %v9133_v3 }
 0x83a   : > { %v5880_v22 = vsub.f32 %v4856_v9, %v5368_v10  ;;  %v6391_v31 = vsel %vm4343_vm10, %v5879_v14, 0.0  ;;  %v3840_v10 = vadd.s32 %v9137_v5, %v3326_v53  ;;  %vm4351_vm2 = vcmp.lt.s32.totalorder %v3839_v0, 5120 }
 0x83b   : > { %v7404_v34 = vadd.f32 %v7403_v26, %v6892_v17  ;;  %v4857_v17 = vld [vmem:[%s8089_s18 + $0xee0] sm:$0xff]  ;;  %v5370_v26 = vld [vmem:[%s8095_s20 + $0xee8] sm:$0xff]  ;;  %v6903_v43 = vmul.f32 %v6391_v31, %v6391_v31  ;;  %v3331_v31 = vadd.s32 3904, %v9133_v3 }
 0x83c   : > { %v5881_v30 = vsub.f32 %v4857_v17, %v5369_v18  ;;  %v6392_v39 = vsel %vm4344_vm11, %v5880_v22, 0.0  ;;  %v3841_v18 = vadd.s32 %v9137_v5, %v3327_v61  ;;  %vm4352_vm3 = vcmp.lt.s32.totalorder %v3840_v10, 5120 }
 0x83d   : > { %v7405_v42 = vadd.f32 %v7404_v34, %v6893_v25  ;;  %v4858_v25 = vld [vmem:[%s8089_s18 + $0xee8] sm:$0xff]  ;;  %v5371_v34 = vld [vmem:[%s8095_s20 + $0xef0] sm:$0xff]  ;;  %v6904_v51 = vmul.f32 %v6392_v39, %v6392_v39  ;;  %v3332_v39 = vadd.s32 3912, %v9133_v3 }
 0x83e   : > { %v5882_v38 = vsub.f32 %v4858_v25, %v5370_v26  ;;  %v6393_v47 = vsel %vm4345_vm12, %v5881_v30, 0.0  ;;  %v3842_v26 = vadd.s32 %v9137_v5, %v3328_v7  ;;  %vm4353_vm4 = vcmp.lt.s32.totalorder %v3841_v18, 5120 }
 0x83f   : > { %v7406_v50 = vadd.f32 %v7405_v42, %v6894_v33  ;;  %v4859_v33 = vld [vmem:[%s8089_s18 + $0xef0] sm:$0xff]  ;;  %v5372_v42 = vld [vmem:[%s8095_s20 + $0xef8] sm:$0xff]  ;;  %v6905_v59 = vmul.f32 %v6393_v47, %v6393_v47  ;;  %v3333_v47 = vadd.s32 3920, %v9133_v3 }
 0x840   : > { %v5883_v46 = vsub.f32 %v4859_v33, %v5371_v34  ;;  %v6394_v55 = vsel %vm4346_vm13, %v5882_v38, 0.0  ;;  %v3843_v34 = vadd.s32 %v9137_v5, %v3329_v15  ;;  %vm4354_vm5 = vcmp.lt.s32.totalorder %v3842_v26, 5120 }
 0x841   : > { %v7407_v58 = vadd.f32 %v7406_v50, %v6895_v41  ;;  %v4860_v41 = vld [vmem:[%s8089_s18 + $0xef8] sm:$0xff]  ;;  %v5373_v50 = vld [vmem:[%s8095_s20 + $0xf00] sm:$0xff]  ;;  %v6906_v4 = vmul.f32 %v6394_v55, %v6394_v55  ;;  %v3334_v55 = vadd.s32 3928, %v9133_v3 }
 0x842   : > { %v5884_v54 = vsub.f32 %v4860_v41, %v5372_v42  ;;  %v6395_v63 = vsel %vm4347_vm14, %v5883_v46, 0.0  ;;  %v3844_v42 = vadd.s32 %v9137_v5, %v3330_v23  ;;  %vm4355_vm6 = vcmp.lt.s32.totalorder %v3843_v34, 5120 }
 0x843   : > { %v7408_v2 = vadd.f32 %v7407_v58, %v6896_v49  ;;  %v4861_v49 = vld [vmem:[%s8089_s18 + $0xf00] sm:$0xff]  ;;  %v5374_v58 = vld [vmem:[%s8095_s20 + $0xf08] sm:$0xff]  ;;  %v6907_v13 = vmul.f32 %v6395_v63, %v6395_v63  ;;  %v3335_v63 = vadd.s32 3936, %v9133_v3 }
 0x844   : > { %v5885_v62 = vsub.f32 %v4861_v49, %v5373_v50  ;;  %v6396_v9 = vsel %vm4348_vm15, %v5884_v54, 0.0  ;;  %v3845_v50 = vadd.s32 %v9137_v5, %v3331_v31  ;;  %vm4356_vm7 = vcmp.lt.s32.totalorder %v3844_v42, 5120 }
 0x845   : > { %v7409_v12 = vadd.f32 %v7408_v2, %v6897_v57  ;;  %v4862_v57 = vld [vmem:[%s8089_s18 + $0xf08] sm:$0xff]  ;;  %v5375_v2 = vld [vmem:[%s8095_s20 + $0xf10] sm:$0xff]  ;;  %v6908_v21 = vmul.f32 %v6396_v9, %v6396_v9  ;;  %v3336_v9 = vadd.s32 3944, %v9133_v3 }
 0x846   : > { %v5886_v8 = vsub.f32 %v4862_v57, %v5374_v58  ;;  %v6397_v17 = vsel %vm4349_vm0, %v5885_v62, 0.0  ;;  %v3846_v58 = vadd.s32 %v9137_v5, %v3332_v39  ;;  %vm4357_vm8 = vcmp.lt.s32.totalorder %v3845_v50, 5120 }
 0x847   : > { %v7410_v20 = vadd.f32 %v7409_v12, %v6898_v1  ;;  %v4863_v1 = vld [vmem:[%s8089_s18 + $0xf10] sm:$0xff]  ;;  %v5376_v12 = vld [vmem:[%s8095_s20 + $0xf18] sm:$0xff]  ;;  %v6909_v29 = vmul.f32 %v6397_v17, %v6397_v17  ;;  %v3337_v17 = vadd.s32 3952, %v9133_v3 }
 0x848   : > { %v5887_v16 = vsub.f32 %v4863_v1, %v5375_v2  ;;  %v6398_v25 = vsel %vm4350_vm1, %v5886_v8, 0.0  ;;  %v3847_v2 = vadd.s32 %v9137_v5, %v3333_v47  ;;  %vm4358_vm9 = vcmp.lt.s32.totalorder %v3846_v58, 5120 }
 0x849   : > { %v7411_v28 = vadd.f32 %v7410_v20, %v6899_v11  ;;  %v4864_v11 = vld [vmem:[%s8089_s18 + $0xf18] sm:$0xff]  ;;  %v5377_v20 = vld [vmem:[%s8095_s20 + $0xf20] sm:$0xff]  ;;  %v6910_v37 = vmul.f32 %v6398_v25, %v6398_v25  ;;  %v3338_v25 = vadd.s32 3960, %v9133_v3 }
 0x84a   : > { %v5888_v24 = vsub.f32 %v4864_v11, %v5376_v12  ;;  %v6399_v33 = vsel %vm4351_vm2, %v5887_v16, 0.0  ;;  %v3848_v12 = vadd.s32 %v9137_v5, %v3334_v55  ;;  %vm4359_vm10 = vcmp.lt.s32.totalorder %v3847_v2, 5120 }
 0x84b   : > { %v7412_v36 = vadd.f32 %v7411_v28, %v6900_v19  ;;  %v4865_v19 = vld [vmem:[%s8089_s18 + $0xf20] sm:$0xff]  ;;  %v5378_v28 = vld [vmem:[%s8095_s20 + $0xf28] sm:$0xff]  ;;  %v6911_v45 = vmul.f32 %v6399_v33, %v6399_v33  ;;  %v3339_v33 = vadd.s32 3968, %v9133_v3 }
 0x84c   : > { %v5889_v32 = vsub.f32 %v4865_v19, %v5377_v20  ;;  %v6400_v41 = vsel %vm4352_vm3, %v5888_v24, 0.0  ;;  %v3849_v20 = vadd.s32 %v9137_v5, %v3335_v63  ;;  %vm4360_vm11 = vcmp.lt.s32.totalorder %v3848_v12, 5120 }
 0x84d   : > { %v7413_v44 = vadd.f32 %v7412_v36, %v6901_v27  ;;  %v4866_v27 = vld [vmem:[%s8089_s18 + $0xf28] sm:$0xff]  ;;  %v5379_v36 = vld [vmem:[%s8095_s20 + $0xf30] sm:$0xff]  ;;  %v6912_v53 = vmul.f32 %v6400_v41, %v6400_v41  ;;  %v3340_v41 = vadd.s32 3976, %v9133_v3 }
 0x84e   : > { %v5890_v40 = vsub.f32 %v4866_v27, %v5378_v28  ;;  %v6401_v49 = vsel %vm4353_vm4, %v5889_v32, 0.0  ;;  %v3850_v28 = vadd.s32 %v9137_v5, %v3336_v9  ;;  %vm4361_vm12 = vcmp.lt.s32.totalorder %v3849_v20, 5120 }
 0x84f   : > { %v7414_v52 = vadd.f32 %v7413_v44, %v6902_v35  ;;  %v4867_v35 = vld [vmem:[%s8089_s18 + $0xf30] sm:$0xff]  ;;  %v5380_v44 = vld [vmem:[%s8095_s20 + $0xf38] sm:$0xff]  ;;  %v6913_v61 = vmul.f32 %v6401_v49, %v6401_v49  ;;  %v3341_v49 = vadd.s32 3984, %v9133_v3 }
 0x850   : > { %v5891_v48 = vsub.f32 %v4867_v35, %v5379_v36  ;;  %v6402_v57 = vsel %vm4354_vm5, %v5890_v40, 0.0  ;;  %v3851_v36 = vadd.s32 %v9137_v5, %v3337_v17  ;;  %vm4362_vm13 = vcmp.lt.s32.totalorder %v3850_v28, 5120 }
 0x851   : > { %v7415_v60 = vadd.f32 %v7414_v52, %v6903_v43  ;;  %v4868_v43 = vld [vmem:[%s8089_s18 + $0xf38] sm:$0xff]  ;;  %v5381_v52 = vld [vmem:[%s8095_s20 + $0xf40] sm:$0xff]  ;;  %v6914_v7 = vmul.f32 %v6402_v57, %v6402_v57  ;;  %v3342_v57 = vadd.s32 3992, %v9133_v3 }
 0x852   : > { %v5892_v56 = vsub.f32 %v4868_v43, %v5380_v44  ;;  %v6403_v1 = vsel %vm4355_vm6, %v5891_v48, 0.0  ;;  %v3852_v44 = vadd.s32 %v9137_v5, %v3338_v25  ;;  %vm4363_vm14 = vcmp.lt.s32.totalorder %v3851_v36, 5120 }
 0x853   : > { %v7416_v6 = vadd.f32 %v7415_v60, %v6904_v51  ;;  %v4869_v51 = vld [vmem:[%s8089_s18 + $0xf40] sm:$0xff]  ;;  %v5382_v60 = vld [vmem:[%s8095_s20 + $0xf48] sm:$0xff]  ;;  %v6915_v15 = vmul.f32 %v6403_v1, %v6403_v1  ;;  %v3343_v1 = vadd.s32 4000, %v9133_v3 }
 0x854   : > { %v5893_v0 = vsub.f32 %v4869_v51, %v5381_v52  ;;  %v6404_v11 = vsel %vm4356_vm7, %v5892_v56, 0.0  ;;  %v3853_v52 = vadd.s32 %v9137_v5, %v3339_v33  ;;  %vm4364_vm15 = vcmp.lt.s32.totalorder %v3852_v44, 5120 }
 0x855   : > { %v7417_v14 = vadd.f32 %v7416_v6, %v6905_v59  ;;  %v4870_v59 = vld [vmem:[%s8089_s18 + $0xf48] sm:$0xff]  ;;  %v5383_v6 = vld [vmem:[%s8095_s20 + $0xf50] sm:$0xff]  ;;  %v6916_v23 = vmul.f32 %v6404_v11, %v6404_v11  ;;  %v3344_v11 = vadd.s32 4008, %v9133_v3 }
 0x856   : > { %v5894_v10 = vsub.f32 %v4870_v59, %v5382_v60  ;;  %v6405_v19 = vsel %vm4357_vm8, %v5893_v0, 0.0  ;;  %v3854_v60 = vadd.s32 %v9137_v5, %v3340_v41  ;;  %vm4365_vm0 = vcmp.lt.s32.totalorder %v3853_v52, 5120 }
 0x857   : > { %v7418_v22 = vadd.f32 %v7417_v14, %v6906_v4  ;;  %v4871_v4 = vld [vmem:[%s8089_s18 + $0xf50] sm:$0xff]  ;;  %v5384_v14 = vld [vmem:[%s8095_s20 + $0xf58] sm:$0xff]  ;;  %v6917_v31 = vmul.f32 %v6405_v19, %v6405_v19  ;;  %v3345_v19 = vadd.s32 4016, %v9133_v3 }
 0x858   : > { %v5895_v18 = vsub.f32 %v4871_v4, %v5383_v6  ;;  %v6406_v27 = vsel %vm4358_vm9, %v5894_v10, 0.0  ;;  %v3855_v6 = vadd.s32 %v9137_v5, %v3341_v49  ;;  %vm4366_vm1 = vcmp.lt.s32.totalorder %v3854_v60, 5120 }
 0x859   : > { %v7419_v30 = vadd.f32 %v7418_v22, %v6907_v13  ;;  %v4872_v13 = vld [vmem:[%s8089_s18 + $0xf58] sm:$0xff]  ;;  %v5385_v22 = vld [vmem:[%s8095_s20 + $0xf60] sm:$0xff]  ;;  %v6918_v39 = vmul.f32 %v6406_v27, %v6406_v27  ;;  %v3346_v27 = vadd.s32 4024, %v9133_v3 }
 0x85a   : > { %v5896_v26 = vsub.f32 %v4872_v13, %v5384_v14  ;;  %v6407_v35 = vsel %vm4359_vm10, %v5895_v18, 0.0  ;;  %v3856_v14 = vadd.s32 %v9137_v5, %v3342_v57  ;;  %vm4367_vm2 = vcmp.lt.s32.totalorder %v3855_v6, 5120 }
 0x85b   : > { %v7420_v38 = vadd.f32 %v7419_v30, %v6908_v21  ;;  %v4873_v21 = vld [vmem:[%s8089_s18 + $0xf60] sm:$0xff]  ;;  %v5386_v30 = vld [vmem:[%s8095_s20 + $0xf68] sm:$0xff]  ;;  %v6919_v47 = vmul.f32 %v6407_v35, %v6407_v35  ;;  %v3347_v35 = vadd.s32 4032, %v9133_v3 }
 0x85c   : > { %v5897_v34 = vsub.f32 %v4873_v21, %v5385_v22  ;;  %v6408_v43 = vsel %vm4360_vm11, %v5896_v26, 0.0  ;;  %v3857_v22 = vadd.s32 %v9137_v5, %v3343_v1  ;;  %vm4368_vm3 = vcmp.lt.s32.totalorder %v3856_v14, 5120 }
 0x85d   : > { %v7421_v46 = vadd.f32 %v7420_v38, %v6909_v29  ;;  %v4874_v29 = vld [vmem:[%s8089_s18 + $0xf68] sm:$0xff]  ;;  %v5387_v38 = vld [vmem:[%s8095_s20 + $0xf70] sm:$0xff]  ;;  %v6920_v55 = vmul.f32 %v6408_v43, %v6408_v43  ;;  %v3348_v43 = vadd.s32 4040, %v9133_v3 }
 0x85e   : > { %v5898_v42 = vsub.f32 %v4874_v29, %v5386_v30  ;;  %v6409_v51 = vsel %vm4361_vm12, %v5897_v34, 0.0  ;;  %v3858_v30 = vadd.s32 %v9137_v5, %v3344_v11  ;;  %vm4369_vm4 = vcmp.lt.s32.totalorder %v3857_v22, 5120 }
 0x85f   : > { %v7422_v54 = vadd.f32 %v7421_v46, %v6910_v37  ;;  %v4875_v37 = vld [vmem:[%s8089_s18 + $0xf70] sm:$0xff]  ;;  %v5388_v46 = vld [vmem:[%s8095_s20 + $0xf78] sm:$0xff]  ;;  %v6921_v63 = vmul.f32 %v6409_v51, %v6409_v51  ;;  %v3349_v51 = vadd.s32 4048, %v9133_v3 }
 0x860   : > { %v5899_v50 = vsub.f32 %v4875_v37, %v5387_v38  ;;  %v6410_v59 = vsel %vm4362_vm13, %v5898_v42, 0.0  ;;  %v3859_v38 = vadd.s32 %v9137_v5, %v3345_v19  ;;  %vm4370_vm5 = vcmp.lt.s32.totalorder %v3858_v30, 5120 }
 0x861   : > { %v7423_v62 = vadd.f32 %v7422_v54, %v6911_v45  ;;  %v4876_v45 = vld [vmem:[%s8089_s18 + $0xf78] sm:$0xff]  ;;  %v5389_v54 = vld [vmem:[%s8095_s20 + $0xf80] sm:$0xff]  ;;  %v6922_v9 = vmul.f32 %v6410_v59, %v6410_v59  ;;  %v3350_v59 = vadd.s32 4056, %v9133_v3 }
 0x862   : > { %v5900_v58 = vsub.f32 %v4876_v45, %v5388_v46  ;;  %v6411_v4 = vsel %vm4363_vm14, %v5899_v50, 0.0  ;;  %v3860_v46 = vadd.s32 %v9137_v5, %v3346_v27  ;;  %vm4371_vm6 = vcmp.lt.s32.totalorder %v3859_v38, 5120 }
 0x863   : > { %v7424_v8 = vadd.f32 %v7423_v62, %v6912_v53  ;;  %v4877_v53 = vld [vmem:[%s8089_s18 + $0xf80] sm:$0xff]  ;;  %v5390_v62 = vld [vmem:[%s8095_s20 + $0xf88] sm:$0xff]  ;;  %v6923_v17 = vmul.f32 %v6411_v4, %v6411_v4  ;;  %v3351_v4 = vadd.s32 4064, %v9133_v3 }
 0x864   : > { %v5901_v2 = vsub.f32 %v4877_v53, %v5389_v54  ;;  %v6412_v13 = vsel %vm4364_vm15, %v5900_v58, 0.0  ;;  %v3861_v54 = vadd.s32 %v9137_v5, %v3347_v35  ;;  %vm4372_vm7 = vcmp.lt.s32.totalorder %v3860_v46, 5120  ;;  %v4892_v46 = vld [vmem:[%s8089_s18 + $0xff8] sm:$0xff] }
 0x865   : > { %v7425_v16 = vadd.f32 %v7424_v8, %v6913_v61  ;;  %v4878_v61 = vld [vmem:[%s8089_s18 + $0xf88] sm:$0xff]  ;;  %v5391_v8 = vld [vmem:[%s8095_s20 + $0xf90] sm:$0xff]  ;;  %v6924_v25 = vmul.f32 %v6412_v13, %v6412_v13  ;;  %v3352_v13 = vadd.s32 4072, %v9133_v3 }
 0x866   : > { %v5902_v12 = vsub.f32 %v4878_v61, %v5390_v62  ;;  %v6413_v21 = vsel %vm4365_vm0, %v5901_v2, 0.0  ;;  %v3862_v62 = vadd.s32 %v9137_v5, %v3348_v43  ;;  %vm4373_vm8 = vcmp.lt.s32.totalorder %v3861_v54, 5120 }
 0x867   : > { %v7426_v24 = vadd.f32 %v7425_v16, %v6914_v7  ;;  %v4879_v7 = vld [vmem:[%s8089_s18 + $0xf90] sm:$0xff]  ;;  %v5392_v16 = vld [vmem:[%s8095_s20 + $0xf98] sm:$0xff]  ;;  %v6925_v33 = vmul.f32 %v6413_v21, %v6413_v21  ;;  %v3353_v21 = vadd.s32 4080, %v9133_v3 }
 0x868   : > { %v5903_v20 = vsub.f32 %v4879_v7, %v5391_v8  ;;  %v6414_v29 = vsel %vm4366_vm1, %v5902_v12, 0.0  ;;  %v3863_v8 = vadd.s32 %v9137_v5, %v3349_v51  ;;  %vm4374_vm9 = vcmp.lt.s32.totalorder %v3862_v62, 5120 }
 0x869   : > { %v7427_v32 = vadd.f32 %v7426_v24, %v6915_v15  ;;  %v4880_v15 = vld [vmem:[%s8089_s18 + $0xf98] sm:$0xff]  ;;  %v5393_v24 = vld [vmem:[%s8095_s20 + $0xfa0] sm:$0xff]  ;;  %v6926_v41 = vmul.f32 %v6414_v29, %v6414_v29  ;;  %v3354_v29 = vadd.s32 4088, %v9133_v3 }
 0x86a   : > { %v5904_v28 = vsub.f32 %v4880_v15, %v5392_v16  ;;  %v6415_v37 = vsel %vm4367_vm2, %v5903_v20, 0.0  ;;  %v3864_v16 = vadd.s32 %v9137_v5, %v3350_v59  ;;  %vm4375_vm10 = vcmp.lt.s32.totalorder %v3863_v8, 5120 }
 0x86b   : > { %v7428_v40 = vadd.f32 %v7427_v32, %v6916_v23  ;;  %v4881_v23 = vld [vmem:[%s8089_s18 + $0xfa0] sm:$0xff]  ;;  %v5394_v32 = vld [vmem:[%s8095_s20 + $0xfa8] sm:$0xff]  ;;  %v6927_v49 = vmul.f32 %v6415_v37, %v6415_v37 }
 0x86c   : > { %v5905_v36 = vsub.f32 %v4881_v23, %v5393_v24  ;;  %v6416_v45 = vsel %vm4368_vm3, %v5904_v28, 0.0  ;;  %v3865_v24 = vadd.s32 %v9137_v5, %v3351_v4  ;;  %vm4376_vm11 = vcmp.lt.s32.totalorder %v3864_v16, 5120 }
 0x86d   : > { %v7429_v48 = vadd.f32 %v7428_v40, %v6917_v31  ;;  %v4882_v31 = vld [vmem:[%s8089_s18 + $0xfa8] sm:$0xff]  ;;  %v5395_v40 = vld [vmem:[%s8095_s20 + $0xfb0] sm:$0xff]  ;;  %v6928_v57 = vmul.f32 %v6416_v45, %v6416_v45  ;;  %v3868_v45 = vadd.s32 %v9137_v5, %v3354_v29 }
 0x86e   : > { %v5906_v44 = vsub.f32 %v4882_v31, %v5394_v32  ;;  %v6417_v53 = vsel %vm4369_vm4, %v5905_v36, 0.0  ;;  %v3866_v32 = vadd.s32 %v9137_v5, %v3352_v13  ;;  %vm4377_vm12 = vcmp.lt.s32.totalorder %v3865_v24, 5120 }
 0x86f   : > { %v7430_v56 = vadd.f32 %v7429_v48, %v6918_v39  ;;  %v4883_v39 = vld [vmem:[%s8089_s18 + $0xfb0] sm:$0xff]  ;;  %v5396_v48 = vld [vmem:[%s8095_s20 + $0xfb8] sm:$0xff]  ;;  %v6929_v1 = vmul.f32 %v6417_v53, %v6417_v53  ;;  %vm4380_vm15 = vcmp.lt.s32.totalorder %v3868_v45, 5120 }
 0x870   : > { %v5907_v52 = vsub.f32 %v4883_v39, %v5395_v40  ;;  %v6418_v61 = vsel %vm4370_vm5, %v5906_v44, 0.0  ;;  %v3867_v39 = vadd.s32 %v9137_v5, %v3353_v21  ;;  %v4891_v40 = vld [vmem:[%s8089_s18 + $0xff0] sm:$0xff]  ;;  %vm4378_vm13 = vcmp.lt.s32.totalorder %v3866_v32, 5120 }
 0x871   : > { %v7431_v0 = vadd.f32 %v7430_v56, %v6919_v47  ;;  %v4884_v47 = vld [vmem:[%s8089_s18 + $0xfb8] sm:$0xff]  ;;  %v5397_v56 = vld [vmem:[%s8095_s20 + $0xfc0] sm:$0xff]  ;;  %v6930_v11 = vmul.f32 %v6418_v61, %v6418_v61 }
 0x872   : > { %v5908_v60 = vsub.f32 %v4884_v47, %v5396_v48  ;;  %v6419_v7 = vsel %vm4371_vm6, %v5907_v52, 0.0  ;;  %v5404_v47 = vld [vmem:[%s8095_s20 + $0xff8] sm:$0xff]  ;;  %vm4379_vm14 = vcmp.lt.s32.totalorder %v3867_v39, 5120 }
 0x873   : > { %v7432_v10 = vadd.f32 %v7431_v0, %v6920_v55  ;;  %v4885_v55 = vld [vmem:[%s8089_s18 + $0xfc0] sm:$0xff]  ;;  %v5398_v0 = vld [vmem:[%s8095_s20 + $0xfc8] sm:$0xff]  ;;  %v6931_v19 = vmul.f32 %v6419_v7, %v6419_v7  ;;  %v5916_v54 = vsub.f32 %v4892_v46, %v5404_v47 }
 0x874   : > { %v5909_v6 = vsub.f32 %v4885_v55, %v5397_v56  ;;  %v6420_v15 = vsel %vm4372_vm7, %v5908_v60, 0.0 }
 0x875   : > { %v7433_v18 = vadd.f32 %v7432_v10, %v6921_v63  ;;  %v4886_v63 = vld [vmem:[%s8089_s18 + $0xfc8] sm:$0xff]  ;;  %v5399_v10 = vld [vmem:[%s8095_s20 + $0xfd0] sm:$0xff]  ;;  %v6932_v27 = vmul.f32 %v6420_v15, %v6420_v15  ;;  %v6428_v61 = vsel %vm4380_vm15, %v5916_v54, 0.0 }
 0x876   : > { %v5910_v14 = vsub.f32 %v4886_v63, %v5398_v0  ;;  %v6421_v23 = vsel %vm4373_vm8, %v5909_v6, 0.0  ;;  %v6940_v63 = vmul.f32 %v6428_v61, %v6428_v61 }
 0x877   : > { %v7434_v26 = vadd.f32 %v7433_v18, %v6922_v9  ;;  %v4887_v9 = vld [vmem:[%s8089_s18 + $0xfd0] sm:$0xff]  ;;  %v5400_v18 = vld [vmem:[%s8095_s20 + $0xfd8] sm:$0xff]  ;;  %v6933_v35 = vmul.f32 %v6421_v23, %v6421_v23 }
 0x878   : > { %v5911_v22 = vsub.f32 %v4887_v9, %v5399_v10  ;;  %v6422_v31 = vsel %vm4374_vm9, %v5910_v14, 0.0 }
 0x879   : > { %v7435_v34 = vadd.f32 %v7434_v26, %v6923_v17  ;;  %v4888_v17 = vld [vmem:[%s8089_s18 + $0xfd8] sm:$0xff]  ;;  %v5401_v26 = vld [vmem:[%s8095_s20 + $0xfe0] sm:$0xff]  ;;  %v6934_v3 = vmul.f32 %v6422_v31, %v6422_v31 }
 0x87a   : > { %v5912_v30 = vsub.f32 %v4888_v17, %v5400_v18  ;;  %v6423_v38 = vsel %vm4375_vm10, %v5911_v22, 0.0 }
 0x87b   : > { %v7436_v42 = vadd.f32 %v7435_v34, %v6924_v25  ;;  %v4889_v25 = vld [vmem:[%s8089_s18 + $0xfe0] sm:$0xff]  ;;  %v5402_v34 = vld [vmem:[%s8095_s20 + $0xfe8] sm:$0xff]  ;;  %v6935_v48 = vmul.f32 %v6423_v38, %v6423_v38 }
 0x87c   : > { %v5913_v37 = vsub.f32 %v4889_v25, %v5401_v26  ;;  %v6424_v44 = vsel %vm4376_vm11, %v5912_v30, 0.0 }
 0x87d   : > { %v7437_v50 = vadd.f32 %v7436_v42, %v6925_v33  ;;  %v4890_v33 = vld [vmem:[%s8089_s18 + $0xfe8] sm:$0xff]  ;;  %v6936_v52 = vmul.f32 %v6424_v44, %v6424_v44 }
 0x87e   : > { %v5914_v43 = vsub.f32 %v4890_v33, %v5402_v34  ;;  %v6425_v51 = vsel %vm4377_vm12, %v5913_v37, 0.0 }
 0x87f   : > { %v7438_v58 = vadd.f32 %v7437_v50, %v6926_v41  ;;  %v5403_v41 = vld [vmem:[%s8095_s20 + $0xff0] sm:$0xff]  ;;  %v6937_v56 = vmul.f32 %v6425_v51, %v6425_v51 }
 0x880   : > { %v5915_v50 = vsub.f32 %v4891_v40, %v5403_v41  ;;  %v6426_v55 = vsel %vm4378_vm13, %v5914_v43, 0.0 }
 0x881   : > { %v7439_v2 = vadd.f32 %v7438_v58, %v6927_v49  ;;  %v6938_v59 = vmul.f32 %v6426_v55, %v6426_v55 }
 0x882   : > { %v6427_v58 = vsel %vm4379_vm14, %v5915_v50, 0.0 }
 0x883   : > { %v7440_v12 = vadd.f32 %v7439_v2, %v6928_v57  ;;  %v6939_v5 = vmul.f32 %v6427_v58, %v6427_v58  ;;  %v6941_v2 = vld [vmem:[#allocation2] sm:$0xff] }
 0x885   : > { %v7441_v20 = vadd.f32 %v7440_v12, %v6929_v1 }
 0x887   : > { %v7442_v28 = vadd.f32 %v7441_v20, %v6930_v11 }
 0x889   : > { %v7443_v36 = vadd.f32 %v7442_v28, %v6931_v19 }
 0x88b   : > { %v7444_v42 = vadd.f32 %v7443_v36, %v6932_v27 }
 0x88d   : > { %v7445_v49 = vadd.f32 %v7444_v42, %v6933_v35 }
 0x88f   : > { %v7446_v53 = vadd.f32 %v7445_v49, %v6934_v3 }
 0x891   : > { %v7447_v57 = vadd.f32 %v7446_v53, %v6935_v48 }
 0x893   : > { %v7448_v60 = vadd.f32 %v7447_v57, %v6936_v52 }
 0x895   : > { %v7449_v62 = vadd.f32 %v7448_v60, %v6937_v56 }
 0x897   : > { %v7450_v0 = vadd.f32 %v7449_v62, %v6938_v59 }
 0x899   : > { %v7451_v1 = vadd.f32 %v7450_v0, %v6939_v5 }
 0x89b   : > { %v7452_v4 = vadd.f32 %v7451_v1, %v6940_v63 }
 0x89d   : > { %v7453_v6 = vadd.f32 %v7452_v4, %v6941_v2 }
 0x89f   : > { %7454 = vst [vmem:[#allocation2] sm:$0xff] %v7453_v6 }
 0x8a0 PF: > { %s7603_s7 = sshll.u32 %s7874_s15, 3  ;;  %s7473_s21 = sshll.u32 %s249_s27, 4  ;;  %s7474_s21 = int_to_ptr.vmem [resolvable:$true] %s7473_s21 }
 0x8a1   : > { %s7471_s8 = scalar_lea.hbm %s11714_s2, %s7603_s7  ;;  %s7461_s28 = scalar_lea.sflag [#allocation5], %s247_s23 }
 0x8a2   : > { %s7475_s5 = sshll.u32 %s7471_s8, 4  ;;  %s7792_s22 = scalar_lea.hbm %s11714_s2, 16  ;;  %s7476_s5 = int_to_ptr.hbm [resolvable:$true] %s7475_s5 }
 0x8a3   : > { %s7786_s12 = sshra.s32 %s7476_s5, 4  ;;  %s7787_s12 = int_to_ptr.hbm [resolvable:$true] %s7786_s12 }
 0x8a4   : > { %s7788_s24 = scalar_lea.hbm %s7787_s12, 8  ;;  %p7793_p9 = scmp.lt.s32.totalorder %s7787_s12, %s11714_s2 }
 0x8a5   : > { %p7789_p0 = scmp.ne.s32.totalorder %s7787_s12, %s7788_s24  ;;  %p7794_p10 = scmp.lt.s32.totalorder %s7792_s22, %s7788_s24 }
 0x8a6   : > { %v7458_v7 = vld [vmem:[#allocation2] sm:$0xff] }
 0x8a7   : > { %7459 = vst [vmem:[%s249_s27] sm:$0xff] %v7458_v7  ;;  %p7790_p4 = pnand %p7789_p0, %p7987_p1  ;;  %p7795_p5 = por %p7794_p10, %p7793_p9 }
 0x8a9   : > { %p7791_p7 = pneg %p7790_p4 }
 0x8ab   : > { %p7796_p11 = pnand %p7795_p5, %p7791_p7 }
 0x8ad   : > { %7799 = shalt.err (!%p7796_p11)
}
 0x8ae   : > { %7610 = dma.vmem_to_hbm [thread:$0]  (%p7987_p1), %s7474_s21, 128, %s7476_s5, %s7461_s28  }
 0x8af PF: > { %s7487_s20 = sand.u32 1, %s7850_s9   ;;  %p7613_p12 = pnand %p7580_p3, %p7991_p2 }
 0x8b0   : > { %s7488_s23 = scalar_lea.sflag [#allocation5], %s7487_s20 }
 0x8b1   : > { %p7614_p13 = pneg %p7613_p12 }
 0x8b3   : > { %7845 = dma.done.wait (%p7614_p13), %s7488_s23, 128  }
 0x8b4   : > { %7847 = vsyncadd (%p7614_p13), %s7488_s23, 4294967168  ;;  %s21_s17 = sadd.s32 1, %s7882_s17   ;;  %s11729_s15 = sld [smem:[#allocation12_spill]] }
 0x8b5   : > { %p18_p6 = scmp.ge.s32.totalorder %s21_s17, 4   ;;  %s11730_s16 = sld [smem:[#allocation13_spill]] }
 0x8b6   : > { %s11731_s9 = smov %s7854_s10  ;;  %s11732_s10 = smov %s7858_s11 }
 0x8b7   : > { %s11733_s11 = smov %s7978_s29  ;;  %s11734_s12 = smov %s7866_s13 }
 0x8b8   : > { %s11735_s13 = smov %s7870_s14  ;;  %s11736_s14 = smov %s7981_s30 }
 0x8b9   :  { %20 = sbr.rel (!%p18_p6) target bundleno = 12 (0xc), region = 102 }
 0x8be   :  { %7494 = vsyncpa [#allocation4], 1 }
 0x8bf   :  { %7496 = vsyncpa [#allocation4 + $0x1], 1 }
 0x8c0   :  { %7497 = vsyncpa [#allocation7], 1 }
 0x8c1   :  { %7499 = vsyncpa [#allocation7 + $0x1], 1 }
 0x8c2   :  { %7500 = vsyncpa [#allocation5], 1 }
 0x8c3   :  { %7502 = vsyncpa [#allocation5 + $0x1], 1 }

</bundles_post_ra>
